<compile_context>
chip_gen: v5e
topology: v5e:2x2
jax: 0.10.0
libtpu: 0.0.40
codegen_flags: <defaults>
</compile_context>

<pallas_src>
import jax
import jax.numpy as jnp
from jax import lax
from jax.experimental import pallas as pl
from jax.experimental.pallas import tpu as pltpu


def _round_up(x, m):
    return ((x + m - 1) // m) * m


def _vmem_limit_bytes():
    try:
        info = pltpu.get_tpu_info()
        cap = int(getattr(info, "vmem_capacity_bytes", 0))
        if cap > 0:
            # Leave headroom for compiler internal scratch (v7x only has 64 MiB).
            return min(cap * 3 // 4, 100 * 1024 * 1024)
    except Exception:
        pass
    return 48 * 1024 * 1024


_VMEM_LIMIT = _vmem_limit_bytes()


# ---------------------------------------------------------------------------
# Conv 3x3 (padding=1) + bias + ReLU.  B RoIs per grid step, 9 slab matmuls
# into an f32 VMEM scratch accumulator.  Channels are lane-padded to 128.
# ---------------------------------------------------------------------------
def _conv3x3_relu_kernel(x_ref, w_ref, b_ref, o_ref, xp_ref, acc_ref):
    # x_ref : (B, H, W, Cin)     bf16, unpadded-halo block of B RoIs
    # w_ref : (9, Cin, Cout)     bf16, taps flattened along dim 0
    # b_ref : (1, Cout)          f32
    # o_ref : (B, H, W, Cout)    bf16
    # xp_ref: (B, H+2, W+2, Cin) bf16 VMEM scratch (haloed input)
    # acc_ref: (B*H*W, Cout)     f32 VMEM scratch accumulator
    B, H, W, Cin = x_ref.shape
    Cout = o_ref.shape[-1]
    M = B * H * W

    # Zero only the four 1-pixel border strips; the interior is fully
    # overwritten every step (correct under megacore "parallel" sharding).
    xp_ref[:, 0:1, :, :] = jnp.zeros((B, 1, W + 2, Cin), xp_ref.dtype)
    xp_ref[:, H + 1:H + 2, :, :] = jnp.zeros((B, 1, W + 2, Cin), xp_ref.dtype)
    xp_ref[:, :, 0:1, :] = jnp.zeros((B, H + 2, 1, Cin), xp_ref.dtype)
    xp_ref[:, :, W + 1:W + 2, :] = jnp.zeros((B, H + 2, 1, Cin), xp_ref.dtype)
    xp_ref[:, 1:H + 1, 1:W + 1, :] = x_ref[...]

    # 9 shifted-slab matmuls: (B*H*W, Cin) x (Cin, Cout) -> f32 scratch acc.
    for t in range(9):
        dh, dw = divmod(t, 3)
        tap = xp_ref[:, dh:dh + H, dw:dw + W, :].reshape(M, Cin)
        contrib = jnp.dot(tap, w_ref[t], preferred_element_type=jnp.float32)
        if t == 0:
            acc_ref[...] = contrib
        else:
            acc_ref[...] += contrib

    y = acc_ref[...] + b_ref[...]
    o_ref[...] = jnp.maximum(y, 0.0).astype(o_ref.dtype).reshape(B, H, W, Cout)


def conv3x3_relu(x_nhwc, convp, target_rows=2048):
    """x_nhwc: (N, H, W, Cin_actual) bf16; convp from prepare_head_params."""
    N, H, W, cin_act = x_nhwc.shape
    cinp, coutp = convp["cinp"], convp["coutp"]

    # Lane-pad input channels (first conv layer only; later layers already
    # arrive padded from the previous conv).
    if cin_act < cinp:
        x_nhwc = jnp.pad(x_nhwc, ((0, 0), (0, 0), (0, 0), (0, cinp - cin_act)))

    # Pack B RoIs per grid step so the matmul M-dim (~target_rows) fills the
    # MXU; pad N to a multiple of B instead of shrinking B to a divisor.
    B = max(1, min(N, target_rows // (H * W)))
    B = min(B, max(1, -(-N // 2)))          # keep >=2 grid steps (v7x: 2 TCs)
    Np = _round_up(N, B)
    if Np > N:
        x_nhwc = jnp.pad(x_nhwc, ((0, Np - N), (0, 0), (0, 0), (0, 0)))

    out = pl.pallas_call(
        _conv3x3_relu_kernel,
        out_shape=jax.ShapeDtypeStruct((Np, H, W, coutp), jnp.bfloat16),
        grid=(Np // B,),
        in_specs=[
            pl.BlockSpec((B, H, W, cinp), lambda n: (n, 0, 0, 0)),
            pl.BlockSpec((9, cinp, coutp), lambda n: (0, 0, 0)),
            pl.BlockSpec((1, coutp), lambda n: (0, 0)),
        ],
        out_specs=pl.BlockSpec((B, H, W, coutp), lambda n: (n, 0, 0, 0)),
        scratch_shapes=[
            pltpu.VMEM((B, H + 2, W + 2, cinp), jnp.bfloat16),
            pltpu.VMEM((B * H * W, coutp), jnp.float32),
        ],
        compiler_params=pltpu.CompilerParams(
            dimension_semantics=("parallel",),
            vmem_limit_bytes=_VMEM_LIMIT),
    )(x_nhwc, convp["w"], convp["b"])

    if Np > N:
        out = out[:N]
    return out


# ---------------------------------------------------------------------------
# Linear + ReLU as a tiled MXU matmul with an f32 VMEM accumulator.
# ---------------------------------------------------------------------------
def _fc_relu_kernel(x_ref, w_ref, b_ref, o_ref, acc_ref):
    k = pl.program_id(2)

    @pl.when(k == 0)
    def _():
        acc_ref[...] = jnp.zeros_like(acc_ref)

    acc_ref[...] += jnp.dot(x_ref[...], w_ref[...],
                            preferred_element_type=jnp.float32)

    @pl.when(k == pl.num_programs(2) - 1)
    def _():
        o_ref[...] = jnp.maximum(acc_ref[...] + b_ref[...], 0.0).astype(o_ref.dtype)


def _prepare_fc(w, b, dtype=jnp.bfloat16):
    """Pre-cast + pre-pad an FC layer's weights (done once, outside hot path)."""
    K, F = w.shape
    tk = min(_round_up(K, 128), 512)
    tn = min(_round_up(F, 128), 512)
    Kp, Fp = _round_up(K, tk), _round_up(F, tn)
    wp = jnp.pad(w.astype(dtype), ((0, Kp - K), (0, Fp - F)))
    bp = jnp.pad(jnp.reshape(b, (1, F)).astype(jnp.float32), ((0, 0), (0, Fp - F)))
    return dict(w=wp, b=bp, k=K, f=F, tk=tk, tn=tn)


def fc_relu(x, fcp, out_dtype=None):
    """x: (M, K) bf16; fcp from _prepare_fc."""
    M, K = x.shape
    assert K == fcp["k"], (K, fcp["k"])
    out_dtype = out_dtype if out_dtype is not None else x.dtype
    Kp, Fp = fcp["w"].shape
    tk, tn = fcp["tk"], fcp["tn"]
    tm = min(_round_up(M, 16), 1024)          # cover M in one tile when possible
    Mp = _round_up(M, tm)
    if (Mp, Kp) != (M, K):
        x = jnp.pad(x, ((0, Mp - M), (0, Kp - K)))

    out = pl.pallas_call(
        _fc_relu_kernel,
        out_shape=jax.ShapeDtypeStruct((Mp, Fp), out_dtype),
        grid=(Mp // tm, Fp // tn, Kp // tk),
        in_specs=[
            pl.BlockSpec((tm, tk), lambda i, j, k: (i, k)),
            pl.BlockSpec((tk, tn), lambda i, j, k: (k, j)),
            pl.BlockSpec((1, tn), lambda i, j, k: (0, j)),
        ],
        out_specs=pl.BlockSpec((tm, tn), lambda i, j, k: (i, j)),
        scratch_shapes=[pltpu.VMEM((tm, tn), jnp.float32)],
        compiler_params=pltpu.CompilerParams(
            dimension_semantics=("parallel", "parallel", "arbitrary"),
            vmem_limit_bytes=_VMEM_LIMIT),
    )(x, fcp["w"], fcp["b"])

    if Mp > M or Fp > fcp["f"]:
        out = out[:M, :fcp["f"]]
    return out


# ---------------------------------------------------------------------------
# One-time parameter preparation (bf16 cast, lane padding, fc1 permutation).
# ---------------------------------------------------------------------------
def prepare_head_params(conv_params, fc_params, input_shape):
    """conv_params: [(w (3,3,Ci,Co), b (Co,))]; fc_params: [(w (K,F), b (F,))];
    input_shape: (Cin, H, W)."""
    cin, H, W = input_shape
    prepared_convs = []
    c = cin
    for w, b in conv_params:
        cout = w.shape[-1]
        cinp = _round_up(c, 128)
        coutp = _round_up(cout, 128)
        wp = jnp.pad(w.astype(jnp.bfloat16),
                     ((0, 0), (0, 0), (0, cinp - c), (0, coutp - cout)))
        wp = wp.reshape(9, cinp, coutp)
        bp = jnp.pad(jnp.reshape(b, (1, cout)).astype(jnp.float32),
                     ((0, 0), (0, coutp - cout)))
        prepared_convs.append(dict(w=wp, b=bp, cin=c, cout=cout,
                                   cinp=cinp, coutp=coutp))
        c = cout

    prepared_fcs = []
    if fc_params:
        w0, b0 = fc_params[0]
        if conv_params:
            # Fold torch.flatten's NCHW ordering into the NHWC-flatten layout
            # (one-time row permutation of the first FC weight).
            F0 = w0.shape[1]
            w0 = jnp.transpose(w0.reshape(c, H, W, F0), (1, 2, 0, 3))
            w0 = w0.reshape(H * W * c, F0)
        prepared_fcs.append(_prepare_fc(w0, b0))
        for w, b in fc_params[1:]:
            prepared_fcs.append(_prepare_fc(w, b))
    return prepared_convs, prepared_fcs


# ---------------------------------------------------------------------------
# Full head (layout plumbing in plain JAX; heavy math in Pallas).
# ---------------------------------------------------------------------------
def fastrcnn_conv_fc_head(x_nchw, prepared_convs, prepared_fcs):
    x = x_nchw.astype(jnp.bfloat16)
    if prepared_convs:
        x = jnp.transpose(x, (0, 2, 3, 1))                # NCHW -> NHWC, once
        for cp in prepared_convs:
            x = conv3x3_relu(x, cp)
        x = x[..., :prepared_convs[-1]["cout"]]           # drop lane padding
        if not prepared_fcs:
            return jnp.transpose(x, (0, 3, 1, 2)).astype(jnp.float32)
        x = x.reshape(x.shape[0], -1)                     # NHWC flatten (fc1 pre-folded)
    else:
        x = x.reshape(x.shape[0], -1)                     # NCHW flatten (no fold needed)
    for i, fcp in enumerate(prepared_fcs):
        out_dtype = jnp.float32 if i == len(prepared_fcs) - 1 else None
        x = fc_relu(x, fcp, out_dtype=out_dtype)
    return x


# Pure-JAX f32 reference mirroring the PyTorch forward (NCHW conv, flatten, fc).
def reference_head(x_nchw, conv_params, fc_params):
    x = x_nchw
    for w, b in conv_params:
        w_oihw = jnp.transpose(w, (3, 2, 0, 1))
        x = lax.conv_general_dilated(
            x, w_oihw, window_strides=(1, 1), padding=((1, 1), (1, 1)),
            dimension_numbers=("NCHW", "OIHW", "NCHW"))
        x = jax.nn.relu(x + b.reshape(1, -1, 1, 1))
    if fc_params:
        x = x.reshape(x.shape[0], -1)
        for w, b in fc_params:
            x = jax.nn.relu(x @ w + b)
    return x


if __name__ == "__main__":
    # Small synthetic config: num_conv=2, conv_dim=16, num_fc=2, fc_dim=128.
    N, Cin, H, W = 16, 4, 8, 8
    conv_dim, fc_dim = 16, 128
    num_conv, num_fc = 2, 2

    key = jax.random.PRNGKey(0)
    keys = jax.random.split(key, 2 * (num_conv + num_fc) + 1)

    conv_params = []
    ci = Cin
    ki = 0
    for _ in range(num_conv):
        w = 0.1 * jax.random.normal(keys[ki], (3, 3, ci, conv_dim), jnp.float32)
        b = 0.01 * jax.random.normal(keys[ki + 1], (conv_dim,), jnp.float32)
        conv_params.append((w, b))
        ci = conv_dim
        ki += 2

    fc_params = []
    d = conv_dim * H * W
    for _ in range(num_fc):
        w = 0.05 * jax.random.normal(keys[ki], (d, fc_dim), jnp.float32)
        b = 0.01 * jax.random.normal(keys[ki + 1], (fc_dim,), jnp.float32)
        fc_params.append((w, b))
        d = fc_dim
        ki += 2

    x = jax.random.normal(keys[-1], (N, Cin, H, W), jnp.float32)

    # One-time parameter prep (bf16 cast, lane padding, fc1 fold) — off the
    # per-call hot path.
    prepared_convs, prepared_fcs = prepare_head_params(
        conv_params, fc_params, (Cin, H, W))

    out = fastrcnn_conv_fc_head(x, prepared_convs, prepared_fcs)
    out = jax.block_until_ready(out)

    ref = reference_head(x, conv_params, fc_params)
    assert out.shape == (N, fc_dim), out.shape
    # bf16 activations + bf16 MXU operands vs f32 reference -> loose tolerance.
    max_err = float(jnp.max(jnp.abs(out - ref)))
    assert jnp.allclose(out, ref, atol=5e-2, rtol=5e-2), max_err
    print("KERNEL_OK")
</pallas_src>

<mosaic_0001>
module attributes {stable_mosaic.version = 11 : i64} {
  func.func @_conv3x3_relu_kernel(%arg0: i32, %arg1: memref<8x8x8x128xbf16, #tpu.memory_space<vmem>>, %arg2: memref<9x128x128xbf16, #tpu.memory_space<vmem>>, %arg3: memref<1x128xf32, #tpu.memory_space<vmem>>, %arg4: memref<8x8x8x128xbf16, #tpu.memory_space<vmem>>, %arg5: memref<8x10x10x128xbf16, #tpu.memory_space<vmem>>, %arg6: memref<512x128xf32, #tpu.memory_space<vmem>>) attributes {dimension_semantics = [#tpu.dimension_semantics<parallel>], iteration_bounds = array<i64: 2>, scalar_prefetch = 0 : i64, scratch_operands = 2 : i64, tpu.core_type = #tpu.core_type<tc>, window_params = [{transform_indices = @transform_0, window_bounds = array<i64: 8, 8, 8, 128>}, {pipeline_mode = #tpu.pipeline_mode<synchronous>, transform_indices = @transform_1, window_bounds = array<i64: 9, 128, 128>}, {pipeline_mode = #tpu.pipeline_mode<synchronous>, transform_indices = @transform_2, window_bounds = array<i64: 1, 128>}, {transform_indices = @transform_3, window_bounds = array<i64: 8, 8, 8, 128>}]} {
    %cst = arith.constant 0.000000e+00 : bf16
    %0 = vector.broadcast %cst : bf16 to vector<8x1x10x128xbf16>
    %c0 = arith.constant 0 : index
    %c0_0 = arith.constant 0 : index
    %c0_1 = arith.constant 0 : index
    %c0_2 = arith.constant 0 : index
    %1 = vector.load %arg5[%c0, %c0_0, %c0_1, %c0_2] : memref<8x10x10x128xbf16, #tpu.memory_space<vmem>>, vector<8x1x10x128xbf16>
    tpu.vector_store %arg5[%c0, %c0_0, %c0_1, %c0_2], %0 {strides = array<i32>} : memref<8x10x10x128xbf16, #tpu.memory_space<vmem>>, vector<8x1x10x128xbf16>,
    %cst_3 = arith.constant 0.000000e+00 : bf16
    %2 = vector.broadcast %cst_3 : bf16 to vector<8x1x10x128xbf16>
    %c0_4 = arith.constant 0 : index
    %c9 = arith.constant 9 : index
    %c0_5 = arith.constant 0 : index
    %c0_6 = arith.constant 0 : index
    %3 = vector.load %arg5[%c0_4, %c9, %c0_5, %c0_6] : memref<8x10x10x128xbf16, #tpu.memory_space<vmem>>, vector<8x1x10x128xbf16>
    tpu.vector_store %arg5[%c0_4, %c9, %c0_5, %c0_6], %2 {strides = array<i32>} : memref<8x10x10x128xbf16, #tpu.memory_space<vmem>>, vector<8x1x10x128xbf16>,
    %cst_7 = arith.constant 0.000000e+00 : bf16
    %4 = vector.broadcast %cst_7 : bf16 to vector<8x10x1x128xbf16>
    %c0_8 = arith.constant 0 : index
    %c0_9 = arith.constant 0 : index
    %c0_10 = arith.constant 0 : index
    %c0_11 = arith.constant 0 : index
    %5 = vector.load %arg5[%c0_8, %c0_9, %c0_10, %c0_11] : memref<8x10x10x128xbf16, #tpu.memory_space<vmem>>, vector<8x10x1x128xbf16>
    tpu.vector_store %arg5[%c0_8, %c0_9, %c0_10, %c0_11], %4 {strides = array<i32>} : memref<8x10x10x128xbf16, #tpu.memory_space<vmem>>, vector<8x10x1x128xbf16>,
    %cst_12 = arith.constant 0.000000e+00 : bf16
    %6 = vector.broadcast %cst_12 : bf16 to vector<8x10x1x128xbf16>
    %c0_13 = arith.constant 0 : index
    %c0_14 = arith.constant 0 : index
    %c9_15 = arith.constant 9 : index
    %c0_16 = arith.constant 0 : index
    %7 = vector.load %arg5[%c0_13, %c0_14, %c9_15, %c0_16] : memref<8x10x10x128xbf16, #tpu.memory_space<vmem>>, vector<8x10x1x128xbf16>
    tpu.vector_store %arg5[%c0_13, %c0_14, %c9_15, %c0_16], %6 {strides = array<i32>} : memref<8x10x10x128xbf16, #tpu.memory_space<vmem>>, vector<8x10x1x128xbf16>,
    %c0_17 = arith.constant 0 : index
    %c0_18 = arith.constant 0 : index
    %c0_19 = arith.constant 0 : index
    %c0_20 = arith.constant 0 : index
    %8 = vector.load %arg1[%c0_17, %c0_18, %c0_19, %c0_20] : memref<8x8x8x128xbf16, #tpu.memory_space<vmem>>, vector<8x8x8x128xbf16>
    %c0_21 = arith.constant 0 : index
    %c1 = arith.constant 1 : index
    %c1_22 = arith.constant 1 : index
    %c0_23 = arith.constant 0 : index
    %9 = vector.load %arg5[%c0_21, %c1, %c1_22, %c0_23] : memref<8x10x10x128xbf16, #tpu.memory_space<vmem>>, vector<8x8x8x128xbf16>
    tpu.vector_store %arg5[%c0_21, %c1, %c1_22, %c0_23], %8 {strides = array<i32>} : memref<8x10x10x128xbf16, #tpu.memory_space<vmem>>, vector<8x8x8x128xbf16>,
    %c0_24 = arith.constant 0 : index
    %c0_25 = arith.constant 0 : index
    %c0_26 = arith.constant 0 : index
    %c0_27 = arith.constant 0 : index
    %10 = vector.load %arg5[%c0_24, %c0_25, %c0_26, %c0_27] : memref<8x10x10x128xbf16, #tpu.memory_space<vmem>>, vector<8x8x8x128xbf16>
    %11 = vector.shape_cast %10 : vector<8x8x8x128xbf16> to vector<512x128xbf16>
    %c0_28 = arith.constant 0 : index
    %c0_29 = arith.constant 0 : index
    %c0_30 = arith.constant 0 : index
    %12 = vector.load %arg2[%c0_28, %c0_29, %c0_30] : memref<9x128x128xbf16, #tpu.memory_space<vmem>>, vector<1x128x128xbf16>
    %13 = vector.shape_cast %12 : vector<1x128x128xbf16> to vector<128x128xbf16>
    %cst_31 = arith.constant dense<0.000000e+00> : vector<512x128xf32>
    %14 = tpu.matmul %11, %13, %cst_31 {dimension_numbers = #tpu.dot_dimension_numbers<[1], [0], [0], [1], [0, 0, 1, 1], [], []>} : vector<512x128xbf16>, vector<128x128xbf16>, vector<512x128xf32> -> vector<512x128xf32>
    %c0_32 = arith.constant 0 : index
    %c0_33 = arith.constant 0 : index
    %15 = vector.load %arg6[%c0_32, %c0_33] : memref<512x128xf32, #tpu.memory_space<vmem>>, vector<512x128xf32>
    tpu.vector_store %arg6[%c0_32, %c0_33], %14 {strides = array<i32>} : memref<512x128xf32, #tpu.memory_space<vmem>>, vector<512x128xf32>,
    %c0_34 = arith.constant 0 : index
    %c0_35 = arith.constant 0 : index
    %c1_36 = arith.constant 1 : index
    %c0_37 = arith.constant 0 : index
    %16 = vector.load %arg5[%c0_34, %c0_35, %c1_36, %c0_37] : memref<8x10x10x128xbf16, #tpu.memory_space<vmem>>, vector<8x8x8x128xbf16>
    %17 = vector.shape_cast %16 : vector<8x8x8x128xbf16> to vector<512x128xbf16>
    %c1_38 = arith.constant 1 : index
    %c0_39 = arith.constant 0 : index
    %c0_40 = arith.constant 0 : index
    %18 = vector.load %arg2[%c1_38, %c0_39, %c0_40] : memref<9x128x128xbf16, #tpu.memory_space<vmem>>, vector<1x128x128xbf16>
    %19 = vector.shape_cast %18 : vector<1x128x128xbf16> to vector<128x128xbf16>
    %cst_41 = arith.constant dense<0.000000e+00> : vector<512x128xf32>
    %20 = tpu.matmul %17, %19, %cst_41 {dimension_numbers = #tpu.dot_dimension_numbers<[1], [0], [0], [1], [0, 0, 1, 1], [], []>} : vector<512x128xbf16>, vector<128x128xbf16>, vector<512x128xf32> -> vector<512x128xf32>
    %c0_42 = arith.constant 0 : index
    %c0_43 = arith.constant 0 : index
    %21 = vector.load %arg6[%c0_42, %c0_43] : memref<512x128xf32, #tpu.memory_space<vmem>>, vector<512x128xf32>
    %22 = arith.addf %21, %20 : vector<512x128xf32>
    %c0_44 = arith.constant 0 : index
    %c0_45 = arith.constant 0 : index
    %23 = vector.load %arg6[%c0_44, %c0_45] : memref<512x128xf32, #tpu.memory_space<vmem>>, vector<512x128xf32>
    tpu.vector_store %arg6[%c0_44, %c0_45], %22 {strides = array<i32>} : memref<512x128xf32, #tpu.memory_space<vmem>>, vector<512x128xf32>,
    %c0_46 = arith.constant 0 : index
    %c0_47 = arith.constant 0 : index
    %c2 = arith.constant 2 : index
    %c0_48 = arith.constant 0 : index
    %24 = vector.load %arg5[%c0_46, %c0_47, %c2, %c0_48] : memref<8x10x10x128xbf16, #tpu.memory_space<vmem>>, vector<8x8x8x128xbf16>
    %25 = vector.shape_cast %24 : vector<8x8x8x128xbf16> to vector<512x128xbf16>
    %c2_49 = arith.constant 2 : index
    %c0_50 = arith.constant 0 : index
    %c0_51 = arith.constant 0 : index
    %26 = vector.load %arg2[%c2_49, %c0_50, %c0_51] : memref<9x128x128xbf16, #tpu.memory_space<vmem>>, vector<1x128x128xbf16>
    %27 = vector.shape_cast %26 : vector<1x128x128xbf16> to vector<128x128xbf16>
    %cst_52 = arith.constant dense<0.000000e+00> : vector<512x128xf32>
    %28 = tpu.matmul %25, %27, %cst_52 {dimension_numbers = #tpu.dot_dimension_numbers<[1], [0], [0], [1], [0, 0, 1, 1], [], []>} : vector<512x128xbf16>, vector<128x128xbf16>, vector<512x128xf32> -> vector<512x128xf32>
    %c0_53 = arith.constant 0 : index
    %c0_54 = arith.constant 0 : index
    %29 = vector.load %arg6[%c0_53, %c0_54] : memref<512x128xf32, #tpu.memory_space<vmem>>, vector<512x128xf32>
    %30 = arith.addf %29, %28 : vector<512x128xf32>
    %c0_55 = arith.constant 0 : index
    %c0_56 = arith.constant 0 : index
    %31 = vector.load %arg6[%c0_55, %c0_56] : memref<512x128xf32, #tpu.memory_space<vmem>>, vector<512x128xf32>
    tpu.vector_store %arg6[%c0_55, %c0_56], %30 {strides = array<i32>} : memref<512x128xf32, #tpu.memory_space<vmem>>, vector<512x128xf32>,
    %c0_57 = arith.constant 0 : index
    %c1_58 = arith.constant 1 : index
    %c0_59 = arith.constant 0 : index
    %c0_60 = arith.constant 0 : index
    %32 = vector.load %arg5[%c0_57, %c1_58, %c0_59, %c0_60] : memref<8x10x10x128xbf16, #tpu.memory_space<vmem>>, vector<8x8x8x128xbf16>
    %33 = vector.shape_cast %32 : vector<8x8x8x128xbf16> to vector<512x128xbf16>
    %c3 = arith.constant 3 : index
    %c0_61 = arith.constant 0 : index
    %c0_62 = arith.constant 0 : index
    %34 = vector.load %arg2[%c3, %c0_61, %c0_62] : memref<9x128x128xbf16, #tpu.memory_space<vmem>>, vector<1x128x128xbf16>
    %35 = vector.shape_cast %34 : vector<1x128x128xbf16> to vector<128x128xbf16>
    %cst_63 = arith.constant dense<0.000000e+00> : vector<512x128xf32>
    %36 = tpu.matmul %33, %35, %cst_63 {dimension_numbers = #tpu.dot_dimension_numbers<[1], [0], [0], [1], [0, 0, 1, 1], [], []>} : vector<512x128xbf16>, vector<128x128xbf16>, vector<512x128xf32> -> vector<512x128xf32>
    %c0_64 = arith.constant 0 : index
    %c0_65 = arith.constant 0 : index
    %37 = vector.load %arg6[%c0_64, %c0_65] : memref<512x128xf32, #tpu.memory_space<vmem>>, vector<512x128xf32>
    %38 = arith.addf %37, %36 : vector<512x128xf32>
    %c0_66 = arith.constant 0 : index
    %c0_67 = arith.constant 0 : index
    %39 = vector.load %arg6[%c0_66, %c0_67] : memref<512x128xf32, #tpu.memory_space<vmem>>, vector<512x128xf32>
    tpu.vector_store %arg6[%c0_66, %c0_67], %38 {strides = array<i32>} : memref<512x128xf32, #tpu.memory_space<vmem>>, vector<512x128xf32>,
    %c0_68 = arith.constant 0 : index
    %c1_69 = arith.constant 1 : index
    %c1_70 = arith.constant 1 : index
    %c0_71 = arith.constant 0 : index
    %40 = vector.load %arg5[%c0_68, %c1_69, %c1_70, %c0_71] : memref<8x10x10x128xbf16, #tpu.memory_space<vmem>>, vector<8x8x8x128xbf16>
    %41 = vector.shape_cast %40 : vector<8x8x8x128xbf16> to vector<512x128xbf16>
    %c4 = arith.constant 4 : index
    %c0_72 = arith.constant 0 : index
    %c0_73 = arith.constant 0 : index
    %42 = vector.load %arg2[%c4, %c0_72, %c0_73] : memref<9x128x128xbf16, #tpu.memory_space<vmem>>, vector<1x128x128xbf16>
    %43 = vector.shape_cast %42 : vector<1x128x128xbf16> to vector<128x128xbf16>
    %cst_74 = arith.constant dense<0.000000e+00> : vector<512x128xf32>
    %44 = tpu.matmul %41, %43, %cst_74 {dimension_numbers = #tpu.dot_dimension_numbers<[1], [0], [0], [1], [0, 0, 1, 1], [], []>} : vector<512x128xbf16>, vector<128x128xbf16>, vector<512x128xf32> -> vector<512x128xf32>
    %c0_75 = arith.constant 0 : index
    %c0_76 = arith.constant 0 : index
    %45 = vector.load %arg6[%c0_75, %c0_76] : memref<512x128xf32, #tpu.memory_space<vmem>>, vector<512x128xf32>
    %46 = arith.addf %45, %44 : vector<512x128xf32>
    %c0_77 = arith.constant 0 : index
    %c0_78 = arith.constant 0 : index
    %47 = vector.load %arg6[%c0_77, %c0_78] : memref<512x128xf32, #tpu.memory_space<vmem>>, vector<512x128xf32>
    tpu.vector_store %arg6[%c0_77, %c0_78], %46 {strides = array<i32>} : memref<512x128xf32, #tpu.memory_space<vmem>>, vector<512x128xf32>,
    %c0_79 = arith.constant 0 : index
    %c1_80 = arith.constant 1 : index
    %c2_81 = arith.constant 2 : index
    %c0_82 = arith.constant 0 : index
    %48 = vector.load %arg5[%c0_79, %c1_80, %c2_81, %c0_82] : memref<8x10x10x128xbf16, #tpu.memory_space<vmem>>, vector<8x8x8x128xbf16>
    %49 = vector.shape_cast %48 : vector<8x8x8x128xbf16> to vector<512x128xbf16>
    %c5 = arith.constant 5 : index
    %c0_83 = arith.constant 0 : index
    %c0_84 = arith.constant 0 : index
    %50 = vector.load %arg2[%c5, %c0_83, %c0_84] : memref<9x128x128xbf16, #tpu.memory_space<vmem>>, vector<1x128x128xbf16>
    %51 = vector.shape_cast %50 : vector<1x128x128xbf16> to vector<128x128xbf16>
    %cst_85 = arith.constant dense<0.000000e+00> : vector<512x128xf32>
    %52 = tpu.matmul %49, %51, %cst_85 {dimension_numbers = #tpu.dot_dimension_numbers<[1], [0], [0], [1], [0, 0, 1, 1], [], []>} : vector<512x128xbf16>, vector<128x128xbf16>, vector<512x128xf32> -> vector<512x128xf32>
    %c0_86 = arith.constant 0 : index
    %c0_87 = arith.constant 0 : index
    %53 = vector.load %arg6[%c0_86, %c0_87] : memref<512x128xf32, #tpu.memory_space<vmem>>, vector<512x128xf32>
    %54 = arith.addf %53, %52 : vector<512x128xf32>
    %c0_88 = arith.constant 0 : index
    %c0_89 = arith.constant 0 : index
    %55 = vector.load %arg6[%c0_88, %c0_89] : memref<512x128xf32, #tpu.memory_space<vmem>>, vector<512x128xf32>
    tpu.vector_store %arg6[%c0_88, %c0_89], %54 {strides = array<i32>} : memref<512x128xf32, #tpu.memory_space<vmem>>, vector<512x128xf32>,
    %c0_90 = arith.constant 0 : index
    %c2_91 = arith.constant 2 : index
    %c0_92 = arith.constant 0 : index
    %c0_93 = arith.constant 0 : index
    %56 = vector.load %arg5[%c0_90, %c2_91, %c0_92, %c0_93] : memref<8x10x10x128xbf16, #tpu.memory_space<vmem>>, vector<8x8x8x128xbf16>
    %57 = vector.shape_cast %56 : vector<8x8x8x128xbf16> to vector<512x128xbf16>
    %c6 = arith.constant 6 : index
    %c0_94 = arith.constant 0 : index
    %c0_95 = arith.constant 0 : index
    %58 = vector.load %arg2[%c6, %c0_94, %c0_95] : memref<9x128x128xbf16, #tpu.memory_space<vmem>>, vector<1x128x128xbf16>
    %59 = vector.shape_cast %58 : vector<1x128x128xbf16> to vector<128x128xbf16>
    %cst_96 = arith.constant dense<0.000000e+00> : vector<512x128xf32>
    %60 = tpu.matmul %57, %59, %cst_96 {dimension_numbers = #tpu.dot_dimension_numbers<[1], [0], [0], [1], [0, 0, 1, 1], [], []>} : vector<512x128xbf16>, vector<128x128xbf16>, vector<512x128xf32> -> vector<512x128xf32>
    %c0_97 = arith.constant 0 : index
    %c0_98 = arith.constant 0 : index
    %61 = vector.load %arg6[%c0_97, %c0_98] : memref<512x128xf32, #tpu.memory_space<vmem>>, vector<512x128xf32>
    %62 = arith.addf %61, %60 : vector<512x128xf32>
    %c0_99 = arith.constant 0 : index
    %c0_100 = arith.constant 0 : index
    %63 = vector.load %arg6[%c0_99, %c0_100] : memref<512x128xf32, #tpu.memory_space<vmem>>, vector<512x128xf32>
    tpu.vector_store %arg6[%c0_99, %c0_100], %62 {strides = array<i32>} : memref<512x128xf32, #tpu.memory_space<vmem>>, vector<512x128xf32>,
    %c0_101 = arith.constant 0 : index
    %c2_102 = arith.constant 2 : index
    %c1_103 = arith.constant 1 : index
    %c0_104 = arith.constant 0 : index
    %64 = vector.load %arg5[%c0_101, %c2_102, %c1_103, %c0_104] : memref<8x10x10x128xbf16, #tpu.memory_space<vmem>>, vector<8x8x8x128xbf16>
    %65 = vector.shape_cast %64 : vector<8x8x8x128xbf16> to vector<512x128xbf16>
    %c7 = arith.constant 7 : index
    %c0_105 = arith.constant 0 : index
    %c0_106 = arith.constant 0 : index
    %66 = vector.load %arg2[%c7, %c0_105, %c0_106] : memref<9x128x128xbf16, #tpu.memory_space<vmem>>, vector<1x128x128xbf16>
    %67 = vector.shape_cast %66 : vector<1x128x128xbf16> to vector<128x128xbf16>
    %cst_107 = arith.constant dense<0.000000e+00> : vector<512x128xf32>
    %68 = tpu.matmul %65, %67, %cst_107 {dimension_numbers = #tpu.dot_dimension_numbers<[1], [0], [0], [1], [0, 0, 1, 1], [], []>} : vector<512x128xbf16>, vector<128x128xbf16>, vector<512x128xf32> -> vector<512x128xf32>
    %c0_108 = arith.constant 0 : index
    %c0_109 = arith.constant 0 : index
    %69 = vector.load %arg6[%c0_108, %c0_109] : memref<512x128xf32, #tpu.memory_space<vmem>>, vector<512x128xf32>
    %70 = arith.addf %69, %68 : vector<512x128xf32>
    %c0_110 = arith.constant 0 : index
    %c0_111 = arith.constant 0 : index
    %71 = vector.load %arg6[%c0_110, %c0_111] : memref<512x128xf32, #tpu.memory_space<vmem>>, vector<512x128xf32>
    tpu.vector_store %arg6[%c0_110, %c0_111], %70 {strides = array<i32>} : memref<512x128xf32, #tpu.memory_space<vmem>>, vector<512x128xf32>,
    %c0_112 = arith.constant 0 : index
    %c2_113 = arith.constant 2 : index
    %c2_114 = arith.constant 2 : index
    %c0_115 = arith.constant 0 : index
    %72 = vector.load %arg5[%c0_112, %c2_113, %c2_114, %c0_115] : memref<8x10x10x128xbf16, #tpu.memory_space<vmem>>, vector<8x8x8x128xbf16>
    %73 = vector.shape_cast %72 : vector<8x8x8x128xbf16> to vector<512x128xbf16>
    %c8 = arith.constant 8 : index
    %c0_116 = arith.constant 0 : index
    %c0_117 = arith.constant 0 : index
    %74 = vector.load %arg2[%c8, %c0_116, %c0_117] : memref<9x128x128xbf16, #tpu.memory_space<vmem>>, vector<1x128x128xbf16>
    %75 = vector.shape_cast %74 : vector<1x128x128xbf16> to vector<128x128xbf16>
    %cst_118 = arith.constant dense<0.000000e+00> : vector<512x128xf32>
    %76 = tpu.matmul %73, %75, %cst_118 {dimension_numbers = #tpu.dot_dimension_numbers<[1], [0], [0], [1], [0, 0, 1, 1], [], []>} : vector<512x128xbf16>, vector<128x128xbf16>, vector<512x128xf32> -> vector<512x128xf32>
    %c0_119 = arith.constant 0 : index
    %c0_120 = arith.constant 0 : index
    %77 = vector.load %arg6[%c0_119, %c0_120] : memref<512x128xf32, #tpu.memory_space<vmem>>, vector<512x128xf32>
    %78 = arith.addf %77, %76 : vector<512x128xf32>
    %c0_121 = arith.constant 0 : index
    %c0_122 = arith.constant 0 : index
    %79 = vector.load %arg6[%c0_121, %c0_122] : memref<512x128xf32, #tpu.memory_space<vmem>>, vector<512x128xf32>
    tpu.vector_store %arg6[%c0_121, %c0_122], %78 {strides = array<i32>} : memref<512x128xf32, #tpu.memory_space<vmem>>, vector<512x128xf32>,
    %c0_123 = arith.constant 0 : index
    %c0_124 = arith.constant 0 : index
    %80 = vector.load %arg6[%c0_123, %c0_124] : memref<512x128xf32, #tpu.memory_space<vmem>>, vector<512x128xf32>
    %c0_125 = arith.constant 0 : index
    %c0_126 = arith.constant 0 : index
    %81 = vector.load %arg3[%c0_125, %c0_126] : memref<1x128xf32, #tpu.memory_space<vmem>>, vector<1x128xf32>
    %82 = vector.broadcast %81 : vector<1x128xf32> to vector<512x128xf32>
    %83 = arith.addf %80, %82 : vector<512x128xf32>
    %cst_127 = arith.constant 0.000000e+00 : f32
    %84 = vector.broadcast %cst_127 : f32 to vector<512x128xf32>
    %85 = arith.maximumf %83, %84 : vector<512x128xf32>
    %86 = arith.truncf %85 : vector<512x128xf32> to vector<512x128xbf16>
    %87 = vector.shape_cast %86 : vector<512x128xbf16> to vector<8x8x8x128xbf16>
    %c0_128 = arith.constant 0 : index
    %c0_129 = arith.constant 0 : index
    %c0_130 = arith.constant 0 : index
    %c0_131 = arith.constant 0 : index
    %88 = vector.load %arg4[%c0_128, %c0_129, %c0_130, %c0_131] : memref<8x8x8x128xbf16, #tpu.memory_space<vmem>>, vector<8x8x8x128xbf16>
    tpu.vector_store %arg4[%c0_128, %c0_129, %c0_130, %c0_131], %87 {strides = array<i32>} : memref<8x8x8x128xbf16, #tpu.memory_space<vmem>>, vector<8x8x8x128xbf16>,
    return
  }
  func.func @transform_0(%arg0: i32) -> (i32, i32, i32, i32) {
    %c0_i32 = arith.constant 0 : i32
    %c0_i32_0 = arith.constant 0 : i32
    %c0_i32_1 = arith.constant 0 : i32
    %c0_i32_2 = arith.constant 0 : i32
    return %arg0, %c0_i32, %c0_i32_0, %c0_i32_1 : i32, i32, i32, i32
  }
  func.func @transform_1(%arg0: i32) -> (i32, i32, i32) {
    %c0_i32 = arith.constant 0 : i32
    %c0_i32_0 = arith.constant 0 : i32
    %c0_i32_1 = arith.constant 0 : i32
    %c0_i32_2 = arith.constant 0 : i32
    return %c0_i32, %c0_i32_0, %c0_i32_1 : i32, i32, i32
  }
  func.func @transform_2(%arg0: i32) -> (i32, i32) {
    %c0_i32 = arith.constant 0 : i32
    %c0_i32_0 = arith.constant 0 : i32
    %c0_i32_1 = arith.constant 0 : i32
    return %c0_i32, %c0_i32_0 : i32, i32
  }
  func.func @transform_3(%arg0: i32) -> (i32, i32, i32, i32) {
    %c0_i32 = arith.constant 0 : i32
    %c0_i32_0 = arith.constant 0 : i32
    %c0_i32_1 = arith.constant 0 : i32
    %c0_i32_2 = arith.constant 0 : i32
    return %arg0, %c0_i32, %c0_i32_0, %c0_i32_1 : i32, i32, i32, i32
  }
}

</mosaic_0001>

<bundles_post_ra>
// kernel: tpu_custom_call.1
= control target key start
LH: loop header
LB: loop body
LE: loop exit
PB: predicated region body
PF: predicated region fallthrough
CT: control target
= control target key end

     0   :  { %8 = vsyncpa [#allocation5], 0  ;;  %s16806_s0 = inlined_call_operand.hbm [shape: bf16[16,8,8,128], index: 0, kind: input, shape index: {}]   ;;  %s16807_s1 = inlined_call_operand.hbm [shape: bf16[9,128,128], index: 1, kind: input, shape index: {}]   ;;  %s16808_s2 = inlined_call_operand.vmem [shape: f32[1,128], index: 2, kind: input, shape index: {}]   ;;  %s16809_s3 = inlined_call_operand.hbm [shape: bf16[16,8,8,128], index: 3, kind: output, shape index: {}]  }
   0x1   :  { %10 = vsyncpa [#allocation5 + $0x1], 0 }
   0x2   :  { %11 = vsyncpa [#allocation8], 0 }
   0x3   :  { %12 = vsyncpa [#allocation6], 0 }
   0x4   :  { %14 = vsyncpa [#allocation6 + $0x1], 0  ;;  %s13594_s12 = smov 0   ;;  %s13596_s13 = smov 0  }
   0x5   :  { %s13598_s14 = smov 0   ;;  %s13600_s15 = smov 0  }
   0x6 LB: > { %s13615_s16 = sadd.s32 4294967295, %s13566_s15   ;;  %s12101_s17 = sadd.s32 4294967294, %s13566_s15   ;;  %s13566_s15 = sphi %s13600_s15, %s17191_s15   ;;  %s13562_s14 = sphi %s13598_s14, %s17190_s14   ;;  %s13558_s13 = sphi %s13596_s13, %s17189_s13   ;;  %s13554_s12 = sphi %s13594_s12, %s17188_s12  }
   0x7   : > { %p40_p0 = scmp.ne.s32.totalorder %s13558_s13, %s13554_s12  ;;  %p41_p1 = scmp.eq.s32.totalorder %s13615_s16, 0 }
   0x8   : > { %p106_p2 = scmp.eq.s32.totalorder %s13615_s16, 1  ;;  %p112_p3 = scmp.eq.s32.totalorder %s12101_s17, 1 }
   0x9   : > { %p13624_p4 = por %p41_p1, %p40_p0  ;;  %p12102_p5 = scmp.ge.s32.totalorder %s13566_s15, 1 }
   0xa   : > { %p13629_p6 = por %p112_p3, %p40_p0  ;;  %p119_p7 = scmp.lt.s32.totalorder %s13566_s15, 3 }
   0xb   : > { %s130_s22 = sshll.u32 %s16807_s1, 4  ;;  %s13568_s24 = smov [#allocation7]   ;;  %s131_s22 = int_to_ptr.hbm [resolvable:$true] %s130_s22 }
   0xc   : > { %p13637_p8 = pnand %p12102_p5, %p119_p7  ;;  %s132_s25 = sshll.u32 %s13568_s24, 4  ;;  %s133_s25 = int_to_ptr.vmem [resolvable:$true] %s132_s25 }
   0xd   : > { %s13647_s26 = sadd.s32 1, %s13566_s15   ;;  %s13569_s27 = smov 64  }
   0xe   : > { %p13378_p9 = pneg %p13637_p8  ;;  %s13570_s28 = smov 4  }
   0xf   : > { %s24_s29 = ssub.s32 %s13566_s15, %s13647_s26  ;;  %s27_s30 = sadd.s32 1, %s13562_s14 }
  0x10   : > { %p13379_p10 = pnand %p13378_p9, %p41_p1  ;;  %p25_p12 = scmp.eq.s32.totalorder %s24_s29, 0 }
  0x11   : > { %p34_p13 = scmp.ne.s32.totalorder %s13562_s14, %s13558_s13  ;;  %p35_p0 = scmp.eq.s32.totalorder %s13566_s15, 0 }
  0x12   : > { %13381 = dma.hbm_to_vmem [thread:$0]  (!%p13379_p10), %s131_s22, 9216, %s133_s25, [#allocation8], %s13569_s27, %s13569_s27, %s13570_s28  }
  0x13   : > { %s13659_s4 = scalar_select %p25_p12, %s13562_s14, %s27_s30  }
  0x14   : > { %p13663_p3 = por %p106_p2, %p34_p13  ;;  %p13391_p5 = scmp.lt.s32.totalorder %s13566_s15, 2 }
  0x15   : > { %s149_s6 = sand.u32 1, %s13562_s14   ;;  %s12984_s7 = sshll.u32 %s13566_s15, 8 }
  0x16   : > { %p36_p7 = por %p35_p0, %p34_p13  ;;  %s12105_s8 = sshll.u32 %s149_s6, 8 }
  0x17   : > { %s159_s11 = scalar_lea.hbm %s16806_s0, %s12984_s7  ;;  %s153_s20 = scalar_lea.vmem [#allocation4], %s12105_s8 }
  0x18   : > { %s160_s17 = sshll.u32 %s159_s11, 4  ;;  %s162_s21 = sshll.u32 %s153_s20, 4  ;;  %s161_s17 = int_to_ptr.hbm [resolvable:$true] %s160_s17  ;;  %s163_s21 = int_to_ptr.vmem [resolvable:$true] %s162_s21 }
  0x19   : > { %p13673_p9 = pnand %p13391_p5, %p36_p7  ;;  %s150_s24 = scalar_lea.sflag [#allocation5], %s149_s6 }
  0x1a   : > { %s13466_s25 = sshra.s32 %s161_s17, 4  ;;  %s13473_s8 = scalar_lea.hbm %s16806_s0, 512  ;;  %s13467_s25 = int_to_ptr.hbm [resolvable:$true] %s13466_s25 }
  0x1b   : > { %s13468_s29 = scalar_lea.hbm %s13467_s25, 256  ;;  %p13470_p10 = pneg %p13673_p9 }
  0x1c   : > { %p13469_p2 = scmp.ne.s32.totalorder %s13467_s25, %s13468_s29  ;;  %p13474_p0 = scmp.lt.s32.totalorder %s13467_s25, %s16806_s0 }
  0x1d   : > { %p13475_p5 = scmp.lt.s32.totalorder %s13473_s8, %s13468_s29 }
  0x1e   : > { %p13471_p12 = pnand %p13470_p10, %p13469_p2 }
  0x1f   : > { %p13476_p7 = por %p13475_p5, %p13474_p0 }
  0x20   : > { %p13472_p13 = pneg %p13471_p12 }
  0x22   : > { %p13477_p11 = pnand %p13476_p7, %p13472_p13 }
  0x24   : > { %13480 = shalt.err (!%p13477_p11)
}
  0x25   : > { %13385 = dma.hbm_to_vmem [thread:$0]  (!%p13673_p9), %s161_s17, 4096, %s163_s21, %s150_s24, %s13569_s27, %s13569_s27, %s13570_s28  }
  0x26   : > { %174 = sbr.rel (%p13637_p8) target bundleno = 1478 (0x5c6), region = 32 }
  0x2b   : > { %s13693_s6 = sand.u32 1, %s13558_s13  }
  0x2c   : > { %s12110_s11 = sshll.u32 %s13693_s6, 8  ;;  %s177_s20 = scalar_lea.sflag [#allocation5], %s13693_s6 }
  0x2d   : > { %s13699_s25 = scalar_lea.vmem [#allocation4], %s12110_s11 }
  0x2e   : > { %13541 = dma.done.wait (%p13624_p4), %s177_s20, 4096  }
  0x2f   : > { %13543 = vsyncadd (%p13624_p4), %s177_s20, 4294963200 }
  0x30   : > { %13545 = dma.done.wait (%p41_p1), [#allocation8], 9216  }
  0x31   : > { %13547 = vsyncadd (%p41_p1), [#allocation8], 4294958080  ;;  %v13571_v0 = vmov 0   ;;  %vm245_vm0 = vcmask 1040384   ;;  %vm246_vm1 = vsmask.f32 256 }
  0x32   : > { %216 = vst [vmem:[#allocation2 + $0xa0] sm:$0xf] %v13571_v0  ;;  %vm488_vm2 = vsmask.f32 7938  ;;  %v13024_v2 = vld [vmem:[#allocation7 + $0x38] sm:$0xff]  ;;  %vm13721_vm4 = vmand %vm245_vm0, %vm246_vm1  ;;  %v13023_v4 = vld [vmem:[#allocation7 + $0x30] sm:$0xff] }
  0x33   : > { %212 = vst [vmem:[#allocation2] sm:$0xf] %v13571_v0  ;;  %vm13715_vm3 = vmand %vm245_vm0, %vm488_vm2  ;;  %13346 = vmatpush.bf16.msra.mxu1 %v13024_v2  ;;  %13347 = vmatpush.bf16.msra.mxu2 %v13024_v2  ;;  %v311_v7 = vld [vmem:[#allocation2 + $0xa8] sm:$0x1]  ;;  %v746_v8 = vld [vmem:[%s13699_s25 + $0x40] sm:$0xf] }
  0x34   : > { %213 = vst [vmem:[#allocation2 + $0x4] sm:$0x1] %v13571_v0  ;;  %13348 = vmatpush.bf16.msra.mxu3 %v13024_v2  ;;  %2141 = vmatpush.bf16.msra.mxu0 %v13024_v2  ;;  %v312_v9 = vsel %vm13721_vm4, 0, %v311_v7  ;;  %v923_v10 = vshrl.u32 %v746_v8, 16  ;;  %v926_v11 = vshll.u32 %v746_v8, 16  ;;  %v13022_v12 = vld [vmem:[#allocation7 + $0x28] sm:$0xff] }
  0x35   : > { %214 = vst [vmem:[#allocation2 + $0x50] sm:$0xf] %v13571_v0  ;;  %vm1435_vm5 = vcmask 1043456   ;;  %v13021_v15 = vld [vmem:[#allocation7 + $0x20] sm:$0xff]  ;;  %v13020_v19 = vld [vmem:[#allocation7 + $0x18] sm:$0xff]  ;;  %v13019_v25 = vld [vmem:[#allocation7 + $0x10] sm:$0xff] }
  0x36   : > { %215 = vst [vmem:[#allocation2 + $0x54] sm:$0x1] %v13571_v0  ;;  %v13732_v13 = vrot.slane %v923_v10, 7  ;;  %vm13740_vm6 = vmand %vm1435_vm5, %vm488_vm2  ;;  %v13748_v18 = vld [vmem:[%s13699_s25 + $0x80] sm:$0xf]  ;;  %v13018_v34 = vld [vmem:[#allocation7 + $0x8] sm:$0xff] }
  0x37   : > { %217 = vst [vmem:[#allocation2 + $0xa4] sm:$0x1] %v13571_v0  ;;  %13349 = vmatpush.bf16.msra.mxu1 %v13023_v4  ;;  %13350 = vmatpush.bf16.msra.mxu2 %v13023_v4  ;;  %v13753_v21 = vld [vmem:[#allocation2 + $0x148] sm:$0x1]  ;;  %v1051_v22 = vshrl.u32 %v13748_v18, 16  ;;  %v1054_v27 = vshll.u32 %v13748_v18, 16 }
  0x38   : > { %218 = vst [vmem:[#allocation2 + $0xf0] sm:$0xf] %v13571_v0  ;;  %13351 = vmatpush.bf16.msra.mxu3 %v13023_v4  ;;  %2142 = vmatpush.bf16.msra.mxu0 %v13023_v4  ;;  %v928_v14 = vor.u32 %v926_v11, %v13732_v13  ;;  %v13758_v23 = vld [vmem:[#allocation2 + $0x1e8] sm:$0x1]  ;;  %v13761_v24 = vld [vmem:[%s13699_s25 + $0xc0] sm:$0xf] }
  0x39   : > { %219 = vst [vmem:[#allocation2 + $0xf4] sm:$0x1] %v13571_v0  ;;  %v308_v5 = vld [vmem:[#allocation2 + $0xa0] sm:$0x1]  ;;  %v372_v26 = vsel %vm13721_vm4, 0, %v13753_v21  ;;  %v13773_v30 = vrot.slane %v1051_v22, 7 }
  0x3a   : > { %220 = vst [vmem:[#allocation2 + $0x140] sm:$0xf] %v13571_v0  ;;  %v309_v6 = vsel %vm13721_vm4, 0, %v308_v5  ;;  %v13770_v29 = vld [vmem:[%s13699_s25] sm:$0xf]  ;;  %v432_v31 = vsel %vm13721_vm4, 0, %v13758_v23 }
  0x3b   : > { %310 = vst [vmem:[#allocation2 + $0xa0] sm:$0x1] %v309_v6  ;;  %13352 = vmatpush.bf16.msra.mxu1 %v13022_v12  ;;  %13353 = vmatpush.bf16.msra.mxu2 %v13022_v12  ;;  %v1179_v32 = vshrl.u32 %v13761_v24, 16  ;;  %v1182_v33 = vshll.u32 %v13761_v24, 16  ;;  %v13781_v35 = vld [vmem:[#allocation2] sm:$0x1] }
  0x3c   : > { %313 = vst [vmem:[#allocation2 + $0xa8] sm:$0x1] %v312_v9  ;;  %13354 = vmatpush.bf16.msra.mxu3 %v13022_v12  ;;  %2143 = vmatpush.bf16.msra.mxu0 %v13022_v12  ;;  %v13783_v36 = vld [vmem:[#allocation2 + $0x8] sm:$0x1]  ;;  %v795_v38 = vshrl.u32 %v13770_v29, 16  ;;  %v249_v43 = vsel %vm13721_vm4, 0, %v13781_v35 }
  0x3d   : > { %221 = vst [vmem:[#allocation2 + $0x144] sm:$0x1] %v13571_v0  ;;  %v13789_v39 = vld [vmem:[#allocation2 + $0xb0] sm:$0x1]  ;;  %v13793_v41 = vld [vmem:[%s13699_s25 + $0x44] sm:$0xf] }
  0x3e   : > { %222 = vst [vmem:[#allocation2 + $0x190] sm:$0xf] %v13571_v0  ;;  %v13796_v42 = vrot.slane %v1179_v32, 7  ;;  %v252_v44 = vsel %vm13721_vm4, 0, %v13783_v36  ;;  %v798_v45 = vshll.u32 %v13770_v29, 16  ;;  %v13017_v46 = vld [vmem:[#allocation7] sm:$0xff] }
  0x3f   : > { %223 = vst [vmem:[#allocation2 + $0x194] sm:$0x1] %v13571_v0  ;;  %13355 = vmatpush.bf16.msra.mxu1 %v13021_v15  ;;  %13356 = vmatpush.bf16.msra.mxu2 %v13021_v15  ;;  %v13806_v48 = vld [vmem:[#allocation2 + $0xb8] sm:$0x1]  ;;  %v13809_v49 = vld [vmem:[%s13699_s25 + $0x48] sm:$0xf] }
  0x40   : > { %224 = vst [vmem:[#allocation2 + $0x1e0] sm:$0xf] %v13571_v0  ;;  %13357 = vmatpush.bf16.msra.mxu3 %v13021_v15  ;;  %2144 = vmatpush.bf16.msra.mxu0 %v13021_v15  ;;  %v13814_v51 = vrot.slane %v795_v38, 7  ;;  %v315_v52 = vsel %vm13721_vm4, 0, %v13789_v39  ;;  %v931_v53 = vshrl.u32 %v13793_v41, 16  ;;  %v318_v56 = vsel %vm13721_vm4, 0, %v13806_v48 }
  0x41   : > { %225 = vst [vmem:[#allocation2 + $0x1e4] sm:$0x1] %v13571_v0  ;;  %v368_v28 = vld [vmem:[#allocation2 + $0x140] sm:$0x1]  ;;  %v374_v55 = vld [vmem:[#allocation2 + $0x150] sm:$0x1] }
  0x42   : > { %226 = vst [vmem:[#allocation2 + $0x230] sm:$0xf] %v13571_v0  ;;  %v369_v37 = vsel %vm13721_vm4, 0, %v368_v28  ;;  %v12147_v47 = vld [vmem:[#allocation2 + $0xa0] sm:$0xf]  ;;  %v939_v57 = vshrl.u32 %v13809_v49, 16 }
  0x43   : > { %v1533_v17 = vld [vmem:[#allocation2 + $0xa8] sm:$0xf]  ;;  %227 = vst [vmem:[#allocation2 + $0x234] sm:$0x1] %v13571_v0  ;;  %13358 = vmatpush.bf16.msra.mxu1 %v13020_v19  ;;  %13359 = vmatpush.bf16.msra.mxu2 %v13020_v19  ;;  %v13827_v58 = vld [vmem:[%s13699_s25 + $0x84] sm:$0xf] }
  0x44   : > { %v1534_v20 = vsel %vm13740_vm6, %v928_v14, %v1533_v17  ;;  %229 = vst [vmem:[#allocation2 + $0x48] sm:$0xf] %v13571_v0  ;;  %13360 = vmatpush.bf16.msra.mxu3 %v13020_v19  ;;  %2145 = vmatpush.bf16.msra.mxu0 %v13020_v19  ;;  %v13040_v59 = vld [vmem:[#allocation7 + $0xb8] sm:$0xff]  ;;  %v13831_v61 = vld [vmem:[%s13699_s25 + $0x88] sm:$0xf]  ;;  %v13834_v2 = vrot.slane %v931_v53, 7  ;;  %v1056_v14 = vor.u32 %v1054_v27, %v13773_v30 }
  0x45   : > { %1535 = vst [vmem:[#allocation2 + $0xa8] sm:$0xf] %v1534_v20  ;;  %v13080_v60 = vld [vmem:[#allocation7 + $0xf8] sm:$0xff]  ;;  %v934_v4 = vshll.u32 %v13793_v41, 16  ;;  %v375_v5 = vsel %vm13721_vm4, 0, %v374_v55  ;;  %v1059_v8 = vshrl.u32 %v13827_v58, 16  ;;  %v800_v41 = vor.u32 %v798_v45, %v13814_v51 }
  0x46   : > { %230 = vst [vmem:[#allocation2 + $0x4c] sm:$0x1] %v13571_v0  ;;  %v13088_v63 = vld [vmem:[#allocation7 + $0x138] sm:$0xff]  ;;  %v1067_v9 = vshrl.u32 %v13831_v61, 16  ;;  %v434_v10 = vld [vmem:[#allocation2 + $0x1f0] sm:$0x1] }
  0x47   : > { %231 = vst [vmem:[#allocation2 + $0x98] sm:$0xf] %v13571_v0  ;;  %13361 = vmatpush.bf16.msra.mxu1 %v13019_v25  ;;  %13362 = vmatpush.bf16.msra.mxu2 %v13019_v25  ;;  %v428_v40 = vld [vmem:[#allocation2 + $0x1e0] sm:$0x1]  ;;  %v13032_v6 = vld [vmem:[#allocation7 + $0x78] sm:$0xff]  ;;  %v942_v15 = vshll.u32 %v13809_v49, 16 }
  0x48   : > { %232 = vst [vmem:[#allocation2 + $0x9c] sm:$0x1] %v13571_v0  ;;  %13363 = vmatpush.bf16.msra.mxu3 %v13019_v25  ;;  %2146 = vmatpush.bf16.msra.mxu0 %v13019_v25  ;;  %v429_v50 = vsel %vm13721_vm4, 0, %v428_v40  ;;  %v377_v7 = vld [vmem:[#allocation2 + $0x158] sm:$0x1]  ;;  %v13863_v20 = vrot.slane %v1059_v8, 7 }
  0x49   : > { %233 = vst [vmem:[#allocation2 + $0xe8] sm:$0xf] %v13571_v0  ;;  %v437_v11 = vld [vmem:[#allocation2 + $0x1f8] sm:$0x1]  ;;  %v13848_v12 = vld [vmem:[%s13699_s25 + $0xc4] sm:$0xf] }
  0x4a   : > { %234 = vst [vmem:[#allocation2 + $0xec] sm:$0x1] %v13571_v0  ;;  %v378_v17 = vsel %vm13721_vm4, 0, %v377_v7  ;;  %v13861_v19 = vld [vmem:[%s13699_s25 + $0xc8] sm:$0xf]  ;;  %v1062_v18 = vshll.u32 %v13827_v58, 16 }
  0x4b   : > { %16866 = vst [vmem:[#allocation13_spill] sm:$0xff] %v13773_v30  ;;  %13364 = vmatpush.bf16.msra.mxu1 %v13018_v34  ;;  %13365 = vmatpush.bf16.msra.mxu2 %v13018_v34  ;;  %v1070_v21 = vshll.u32 %v13831_v61, 16  ;;  %v435_v22 = vsel %vm13721_vm4, 0, %v434_v10  ;;  %v13873_v23 = vrot.slane %v1067_v9, 7  ;;  %v438_v25 = vsel %vm13721_vm4, 0, %v437_v11  ;;  %v13079_v38 = vld [vmem:[#allocation7 + $0xf0] sm:$0xff] }
  0x4c   : > { %235 = vst [vmem:[#allocation2 + $0x138] sm:$0xf] %v13571_v0  ;;  %v12993_v54 = vld [vmem:[#allocation2 + $0xa4] sm:$0xf0]  ;;  %13366 = vmatpush.bf16.msra.mxu3 %v13018_v34  ;;  %2147 = vmatpush.bf16.msra.mxu0 %v13018_v34  ;;  %v1190_v27 = vshll.u32 %v13848_v12, 16  ;;  %v1195_v28 = vshrl.u32 %v13861_v19, 16  ;;  %v1184_v34 = vor.u32 %v1182_v33, %v13796_v42 }
  0x4d   : > { %236 = vst [vmem:[#allocation2 + $0x13c] sm:$0x1] %v13571_v0  ;;  %v12148_v62 = vor.u32 %v12993_v54, %v12147_v47  ;;  %v13880_v32 = vld [vmem:[#allocation2 + $0x10] sm:$0x1]  ;;  %v13885_v35 = vld [vmem:[#allocation2 + $0x18] sm:$0x1]  ;;  %v1064_v54 = vor.u32 %v1062_v18, %v13863_v20 }
  0x4e   : > { %237 = vst [vmem:[#allocation2 + $0x188] sm:$0xf] %v13571_v0  ;;  %v13888_v36 = vld [vmem:[%s13699_s25 + $0x4] sm:$0xf]  ;;  %v13031_v39 = vld [vmem:[#allocation7 + $0x70] sm:$0xff]  ;;  %v1198_v48 = vshll.u32 %v13861_v19, 16 }
  0x4f   : > { %238 = vst [vmem:[#allocation2 + $0x18c] sm:$0x1] %v13571_v0  ;;  %13367 = vmatpush.bf16.msra.mxu1 %v13017_v46  ;;  %13368 = vmatpush.bf16.msra.mxu2 %v13017_v46  ;;  %v13898_v33 = vld [vmem:[%s13699_s25 + $0x8] sm:$0xf]  ;;  %v803_v49 = vshrl.u32 %v13888_v36, 16  ;;  %v13906_v45 = vrot.slane %v1195_v28, 7 }
  0x50   : > { %16867 = vst [vmem:[#allocation14_spill] sm:$0xff] %v13796_v42  ;;  %13369 = vmatpush.bf16.msra.mxu3 %v13017_v46  ;;  %2148 = vmatpush.bf16.msra.mxu0 %v13017_v46  ;;  %v936_v46 = vor.u32 %v934_v4, %v13834_v2  ;;  %v806_v55 = vshll.u32 %v13888_v36, 16  ;;  %v814_v4 = vshll.u32 %v13898_v33, 16  ;;  %v749_v10 = vld [vmem:[%s13699_s25 + $0x4c] sm:$0xf]  ;;  %vm4211_vm8 = vcmask 1042432  }
  0x51   : > { %239 = vst [vmem:[#allocation2 + $0x1d8] sm:$0xf] %v13571_v0  ;;  %v1200_v18 = vor.u32 %v1198_v48, %v13906_v45  ;;  %vm2502_vm7 = vsmask.f32 3328  ;;  %vm2503_vm9 = vsmask.f32 7440 }
  0x52   : > { %240 = vst [vmem:[#allocation2 + $0x1dc] sm:$0x1] %v13571_v0  ;;  %2189 = vmatmul.bf16.vlgmr.msra.gmra.mxu1 %v12148_v62  ;;  %vm4212_vm10 = vcmask 1046532   ;;  %vm14377_vm12 = vmor %vm2502_vm7, %vm2503_vm9  ;;  %s16308_s27 = scalar_lea.vmem [#allocation9], %s12110_s11  ;;  %s13154_s30 = sshll.u32 %s13615_s16, 8 }
  0x53   : > { %241 = vst [vmem:[#allocation2 + $0x228] sm:$0xf] %v13571_v0  ;;  %4663 = vmatpush.bf16.msrb.mxu2 %v13040_v59  ;;  %3594 = vmatpush.bf16.msrb.mxu1 %v13032_v6  ;;  %vm14367_vm11 = vmor %vm4211_vm8, %vm4212_vm10  ;;  %s12014_s9 = scalar_lea.hbm %s16809_s3, %s13154_s30  ;;  %s12015_s10 = sshll.u32 %s16308_s27, 4  ;;  %s12016_s10 = int_to_ptr.vmem [resolvable:$true] %s12015_s10 }
  0x54   : > { %242 = vst [vmem:[#allocation2 + $0x22c] sm:$0x1] %v13571_v0  ;;  %5345 = vmatpush.bf16.msrb.mxu3 %v13080_v60  ;;  %6923 = vmatpush.bf16.msrb.mxu0 %v13088_v63  ;;  %v1072_v60 = vor.u32 %v1070_v21, %v13873_v23  ;;  %v13922_v63 = vrot.slane %v803_v49, 7  ;;  %v750_v21 = vld [vmem:[%s13699_s25 + $0x50] sm:$0xf]  ;;  %s12017_s11 = sshll.u32 %s12014_s9, 4  ;;  %s12018_s11 = int_to_ptr.hbm [resolvable:$true] %s12017_s11 }
  0x55   : > { %243 = vst [vmem:[#allocation2 + $0x278] sm:$0xf] %v13571_v0  ;;  %v383_v49 = vld [vmem:[#allocation2 + $0x168] sm:$0x1]  ;;  %s12002_s16 = scalar_lea.sflag [#allocation6], %s13693_s6  ;;  %s13510_s20 = sshra.s32 %s12018_s11, 4  ;;  %s13511_s20 = int_to_ptr.hbm [resolvable:$true] %s13510_s20 }
  0x56   : > { %244 = vst [vmem:[#allocation2 + $0x27c] sm:$0x1] %v13571_v0  ;;  %v13844_v0 = vrot.slane %v939_v57, 7  ;;  %v808_v48 = vor.u32 %v806_v55, %v13922_v63  ;;  %s13516_s28 = scalar_lea.hbm %s16809_s3, 512  ;;  %p13517_p11 = scmp.lt.s32.totalorder %s13511_s20, %s16809_s3 }
  0x57   : > { %370 = vst [vmem:[#allocation2 + $0x140] sm:$0x1] %v369_v37  ;;  %3595 = vmatpush.bf16.msrb.mxu1 %v13031_v39 }
  0x58   : > { %373 = vst [vmem:[#allocation2 + $0x148] sm:$0x1] %v372_v26  ;;  %v1187_v26 = vshrl.u32 %v13848_v12, 16  ;;  %v944_v47 = vor.u32 %v942_v15, %v13844_v0  ;;  %5346 = vmatpush.bf16.msrb.mxu3 %v13079_v38  ;;  %v955_v38 = vshrl.u32 %v750_v21, 16 }
  0x59   : > { %430 = vst [vmem:[#allocation2 + $0x1e0] sm:$0x1] %v429_v50  ;;  %v255_v50 = vsel %vm13721_vm4, 0, %v13880_v32 }
  0x5a   : > { %433 = vst [vmem:[#allocation2 + $0x1e8] sm:$0x1] %v432_v31  ;;  %v13039_v31 = vld [vmem:[#allocation7 + $0xb0] sm:$0xff]  ;;  %v13895_v24 = vrot.slane %v1187_v26, 7 }
  0x5b   : > { %250 = vst [vmem:[#allocation2] sm:$0x1] %v249_v43  ;;  %4664 = vmatpush.bf16.msrb.mxu2 %v13039_v31  ;;  %v13087_v43 = vld [vmem:[#allocation7 + $0x130] sm:$0xff] }
  0x5c   : > { %16868 = vst [vmem:[#allocation15_spill] sm:$0xff] %v13863_v20  ;;  %6924 = vmatpush.bf16.msrb.mxu0 %v13087_v43  ;;  %v1192_v9 = vor.u32 %v1190_v27, %v13895_v24  ;;  %v947_v27 = vshrl.u32 %v749_v10, 16 }
  0x5d   : > { %253 = vst [vmem:[#allocation2 + $0x8] sm:$0x1] %v252_v44 }
  0x5e   : > { %16869 = vst [vmem:[#allocation16_spill] sm:$0xff] %v13873_v23  ;;  %v12179_v57 = vld [vmem:[#allocation2 + $0x140] sm:$0xf] }
  0x5f   : > { %316 = vst [vmem:[#allocation2 + $0xb0] sm:$0x1] %v315_v52  ;;  %v1629_v37 = vld [vmem:[#allocation2 + $0x148] sm:$0xf]  ;;  %v258_v52 = vsel %vm13721_vm4, 0, %v13885_v35 }
  0x60   : > { %319 = vst [vmem:[#allocation2 + $0xb8] sm:$0x1] %v318_v56  ;;  %v1630_v40 = vsel %vm13740_vm6, %v1056_v14, %v1629_v37  ;;  %v811_v56 = vshrl.u32 %v13898_v33, 16  ;;  %v12211_v6 = vld [vmem:[#allocation2 + $0x1e0] sm:$0xf]  ;;  %v950_v37 = vshll.u32 %v749_v10, 16 }
  0x61   : > { %376 = vst [vmem:[#allocation2 + $0x150] sm:$0x1] %v375_v5  ;;  %v1725_v44 = vld [vmem:[#allocation2 + $0x1e8] sm:$0xf]  ;;  %v320_v5 = vld [vmem:[#allocation2 + $0xc0] sm:$0x1] }
  0x62   : > { %379 = vst [vmem:[#allocation2 + $0x158] sm:$0x1] %v378_v17  ;;  %v1726_v29 = vsel %vm13740_vm6, %v1184_v34, %v1725_v44  ;;  %v323_v14 = vld [vmem:[#allocation2 + $0xc8] sm:$0x1]  ;;  %v12115_v17 = vld [vmem:[#allocation2] sm:$0xf] }
  0x63   : > { %16870 = vst [vmem:[#allocation17_spill] sm:$0xff] %v13895_v24  ;;  %v13935_v26 = vrot.slane %v811_v56, 7  ;;  %v321_v32 = vsel %vm13721_vm4, 0, %v320_v5  ;;  %v324_v34 = vsel %vm13721_vm4, 0, %v323_v14  ;;  %v13945_v44 = vrot.slane %v947_v27, 7  ;;  %v13078_v10 = vld [vmem:[#allocation7 + $0xe8] sm:$0xff] }
  0x64   : > { %1631 = vst [vmem:[#allocation2 + $0x148] sm:$0xf] %v1630_v40  ;;  %v1437_v53 = vld [vmem:[#allocation2 + $0x8] sm:$0xf]  ;;  %5347 = vmatpush.bf16.msrb.mxu3 %v13078_v10 }
  0x65   : > { %436 = vst [vmem:[#allocation2 + $0x1f0] sm:$0x1] %v435_v22  ;;  %v1438_v58 = vsel %vm13740_vm6, %v800_v41, %v1437_v53  ;;  %v380_v41 = vld [vmem:[#allocation2 + $0x160] sm:$0x1]  ;;  %v384_v53 = vsel %vm13721_vm4, 0, %v383_v49  ;;  %v816_v56 = vor.u32 %v814_v4, %v13935_v26  ;;  %v952_v55 = vor.u32 %v950_v37, %v13945_v44 }
  0x66   : > { %16871 = vst [vmem:[#allocation18_spill] sm:$0xff] %v13906_v45  ;;  %v1539_v59 = vld [vmem:[#allocation2 + $0xb0] sm:$0xf] }
  0x67   : > { %1727 = vst [vmem:[#allocation2 + $0x1e8] sm:$0xf] %v1726_v29  ;;  %v1540_v61 = vsel %vm13740_vm6, %v936_v46, %v1539_v59  ;;  %v1545_v62 = vld [vmem:[#allocation2 + $0xb8] sm:$0xf]  ;;  %v381_v46 = vsel %vm13721_vm4, 0, %v380_v41 }
  0x68   : > { %439 = vst [vmem:[#allocation2 + $0x1f8] sm:$0x1] %v438_v25  ;;  %v1546_v7 = vsel %vm13740_vm6, %v944_v47, %v1545_v62  ;;  %v1635_v8 = vld [vmem:[#allocation2 + $0x150] sm:$0xf] }
  0x69   : > { %1439 = vst [vmem:[#allocation2 + $0x8] sm:$0xf] %v1438_v58  ;;  %v1636_v11 = vsel %vm13740_vm6, %v1064_v54, %v1635_v8  ;;  %v1641_v12 = vld [vmem:[#allocation2 + $0x158] sm:$0xf]  ;;  %v13038_v54 = vld [vmem:[#allocation7 + $0xa8] sm:$0xff] }
  0x6a   : > { %1541 = vst [vmem:[#allocation2 + $0xb0] sm:$0xf] %v1540_v61  ;;  %v1642_v19 = vsel %vm13740_vm6, %v1072_v60, %v1641_v12  ;;  %v766_v59 = vld [vmem:[%s13699_s25 + $0x90] sm:$0xf]  ;;  %4665 = vmatpush.bf16.msrb.mxu2 %v13038_v54  ;;  %v260_v54 = vld [vmem:[#allocation2 + $0x20] sm:$0x1] }
  0x6b   : > { %1547 = vst [vmem:[#allocation2 + $0xb8] sm:$0xf] %v1546_v7  ;;  %v13001_v15 = vld [vmem:[#allocation2 + $0x144] sm:$0xf0]  ;;  %v1083_v7 = vshrl.u32 %v766_v59, 16 }
  0x6c   : > { %1637 = vst [vmem:[#allocation2 + $0x150] sm:$0xf] %v1636_v11  ;;  %v12180_v22 = vor.u32 %v13001_v15, %v12179_v57  ;;  %v1731_v25 = vld [vmem:[#allocation2 + $0x1f0] sm:$0xf]  ;;  %v765_v57 = vld [vmem:[%s13699_s25 + $0x8c] sm:$0xf] }
  0x6d   : > { %1643 = vst [vmem:[#allocation2 + $0x158] sm:$0xf] %v1642_v19  ;;  %v1732_v31 = vsel %vm13740_vm6, %v1192_v9, %v1731_v25  ;;  %v1075_v5 = vshrl.u32 %v765_v57, 16  ;;  %v1086_v9 = vshll.u32 %v766_v59, 16  ;;  %v440_v19 = vld [vmem:[#allocation2 + $0x200] sm:$0x1] }
  0x6e   : > { %v13009_v28 = vld [vmem:[#allocation2 + $0x1e4] sm:$0xf0]  ;;  %256 = vst [vmem:[#allocation2 + $0x10] sm:$0x1] %v255_v50  ;;  %2229 = vmatmul.bf16.vlgmr.msra.gmra.mxu2 %v12180_v22  ;;  %v13950_v50 = vrot.slane %v955_v38, 7 }
  0x6f   : > { %v12212_v35 = vor.u32 %v13009_v28, %v12211_v6  ;;  %1733 = vst [vmem:[#allocation2 + $0x1f0] sm:$0xf] %v1732_v31  ;;  %v1737_v36 = vld [vmem:[#allocation2 + $0x1f8] sm:$0xf]  ;;  %v1078_v6 = vshll.u32 %v765_v57, 16  ;;  %v13963_v15 = vrot.slane %v1075_v5, 7 }
  0x70   : > { %v12985_v39 = vld [vmem:[#allocation2 + $0x4] sm:$0xf0]  ;;  %v1738_v40 = vsel %vm13740_vm6, %v1200_v18, %v1737_v36  ;;  %259 = vst [vmem:[#allocation2 + $0x18] sm:$0x1] %v258_v52  ;;  %v958_v52 = vshll.u32 %v750_v21, 16  ;;  %v441_v21 = vsel %vm13721_vm4, 0, %v440_v19 }
  0x71   : > { %2269 = vmatmul.bf16.vlgmr.msra.gmra.mxu3 %v12212_v35  ;;  %v12116_v33 = vor.u32 %v12985_v39, %v12115_v17  ;;  %v12151_v43 = vld [vmem:[#allocation2 + $0xb0] sm:$0xf]  ;;  %1739 = vst [vmem:[#allocation2 + $0x1f8] sm:$0xf] %v1738_v40  ;;  %v13965_v17 = vrot.slane %v1083_v7, 7  ;;  %v13030_v22 = vld [vmem:[#allocation7 + $0x68] sm:$0xff]  ;;  %v1080_v28 = vor.u32 %v1078_v6, %v13963_v15 }
  0x72   : > { %v12994_v47 = vld [vmem:[#allocation2 + $0xb4] sm:$0xf0]  ;;  %322 = vst [vmem:[#allocation2 + $0xc0] sm:$0x1] %v321_v32  ;;  %v960_v4 = vor.u32 %v958_v52, %v13950_v50  ;;  %v13086_v32 = vld [vmem:[#allocation7 + $0x128] sm:$0xff]  ;;  %3596 = vmatpush.bf16.msrb.mxu1 %v13030_v22 }
  0x73   : > { %2149 = vmatmul.bf16.vlgmr.msra.gmra.mxu0 %v12116_v33  ;;  %v12152_v29 = vor.u32 %v12994_v47, %v12151_v43  ;;  %325 = vst [vmem:[#allocation2 + $0xc8] sm:$0x1] %v324_v34  ;;  %v12183_v60 = vld [vmem:[#allocation2 + $0x150] sm:$0xf]  ;;  %v1088_v31 = vor.u32 %v1086_v9, %v13965_v17  ;;  %v443_v39 = vld [vmem:[#allocation2 + $0x208] sm:$0x1] }
  0x74   : > { %382 = vst [vmem:[#allocation2 + $0x160] sm:$0x1] %v381_v46  ;;  %v13002_v61 = vld [vmem:[#allocation2 + $0x154] sm:$0xf0]  ;;  %6925 = vmatpush.bf16.msrb.mxu0 %v13086_v32  ;;  %v444_v33 = vsel %vm13721_vm4, 0, %v443_v39 }
  0x75   : > { %2194 = vmatmul.bf16.gmra.mxu1 %v12152_v29  ;;  %v1443_v58 = vld [vmem:[#allocation2 + $0x10] sm:$0xf]  ;;  %385 = vst [vmem:[#allocation2 + $0x168] sm:$0x1] %v384_v53  ;;  %v12184_v34 = vor.u32 %v13002_v61, %v12183_v60  ;;  %v781_v43 = vld [vmem:[%s13699_s25 + $0xcc] sm:$0xf] }
  0x76   : > { %v1444_v62 = vsel %vm13740_vm6, %v808_v48, %v1443_v58  ;;  %v12215_v11 = vld [vmem:[#allocation2 + $0x1f0] sm:$0xf]  ;;  %16872 = vst [vmem:[#allocation19_spill] sm:$0xff] %v13963_v15  ;;  %v1203_v48 = vshrl.u32 %v781_v43, 16  ;;  %v1206_v49 = vshll.u32 %v781_v43, 16  ;;  %v261_v60 = vsel %vm13721_vm4, 0, %v260_v54 }
  0x77   : > { %1445 = vst [vmem:[#allocation2 + $0x10] sm:$0xf] %v1444_v62  ;;  %v1449_v8 = vld [vmem:[#allocation2 + $0x18] sm:$0xf]  ;;  %v782_v47 = vld [vmem:[%s13699_s25 + $0xd0] sm:$0xf] }
  0x78   : > { %v13010_v12 = vld [vmem:[#allocation2 + $0x1f4] sm:$0xf0]  ;;  %v1450_v14 = vsel %vm13740_vm6, %v816_v56, %v1449_v8  ;;  %16873 = vst [vmem:[#allocation20_spill] sm:$0xff] %v13965_v17  ;;  %v1211_v29 = vshrl.u32 %v782_v47, 16  ;;  %v1214_v52 = vshll.u32 %v782_v47, 16  ;;  %v13983_v58 = vrot.slane %v1203_v48, 7 }
  0x79   : > { %1451 = vst [vmem:[#allocation2 + $0x18] sm:$0xf] %v1450_v14  ;;  %v1551_v18 = vld [vmem:[#allocation2 + $0xc0] sm:$0xf]  ;;  %v12216_v40 = vor.u32 %v13010_v12, %v12215_v11  ;;  %v263_v56 = vld [vmem:[#allocation2 + $0x28] sm:$0x1] }
  0x7a   : > { %v1552_v25 = vsel %vm13740_vm6, %v952_v55, %v1551_v18  ;;  %v1557_v27 = vld [vmem:[#allocation2 + $0xc8] sm:$0xf]  ;;  %442 = vst [vmem:[#allocation2 + $0x200] sm:$0x1] %v441_v21  ;;  %v13985_v55 = vrot.slane %v1211_v29, 7  ;;  %v264_v62 = vsel %vm13721_vm4, 0, %v263_v56  ;;  %v1208_v6 = vor.u32 %v1206_v49, %v13983_v58 }
  0x7b   : > { %1553 = vst [vmem:[#allocation2 + $0xc0] sm:$0xf] %v1552_v25  ;;  %v1558_v35 = vsel %vm13740_vm6, %v960_v4, %v1557_v27  ;;  %v1647_v36 = vld [vmem:[#allocation2 + $0x160] sm:$0xf]  ;;  %v733_v4 = vld [vmem:[%s13699_s25 + $0xc] sm:$0xf] }
  0x7c   : > { %1559 = vst [vmem:[#allocation2 + $0xc8] sm:$0xf] %v1558_v35  ;;  %v1648_v37 = vsel %vm13740_vm6, %v1080_v28, %v1647_v36  ;;  %v1653_v38 = vld [vmem:[#allocation2 + $0x168] sm:$0xf]  ;;  %v1216_v7 = vor.u32 %v1214_v52, %v13985_v55  ;;  %v734_v9 = vld [vmem:[%s13699_s25 + $0x10] sm:$0xf] }
  0x7d   : > { %1649 = vst [vmem:[#allocation2 + $0x160] sm:$0xf] %v1648_v37  ;;  %v1654_v41 = vsel %vm13740_vm6, %v1088_v31, %v1653_v38  ;;  %v819_v14 = vshrl.u32 %v733_v4, 16  ;;  %v822_v19 = vshll.u32 %v733_v4, 16  ;;  %v827_v18 = vshrl.u32 %v734_v9, 16 }
  0x7e   : > { %v12119_v46 = vld [vmem:[#allocation2 + $0x10] sm:$0xf]  ;;  %1655 = vst [vmem:[#allocation2 + $0x168] sm:$0xf] %v1654_v41  ;;  %2234 = vmatmul.bf16.gmra.mxu2 %v12184_v34  ;;  %v830_v22 = vshll.u32 %v734_v9, 16 }
  0x7f   : > { %445 = vst [vmem:[#allocation2 + $0x208] sm:$0x1] %v444_v33  ;;  %v13999_v27 = vrot.slane %v819_v14, 7  ;;  %v14001_v28 = vrot.slane %v827_v18, 7  ;;  %v326_v31 = vld [vmem:[#allocation2 + $0xd0] sm:$0x1] }
  0x80   : > { %v12986_v53 = vld [vmem:[#allocation2 + $0x14] sm:$0xf0]  ;;  %16874 = vst [vmem:[#allocation21_spill] sm:$0xff] %v13983_v58  ;;  %v327_v34 = vsel %vm13721_vm4, 0, %v326_v31  ;;  %v751_v36 = vld [vmem:[%s13699_s25 + $0x54] sm:$0xf] }
  0x81   : > { %2274 = vmatmul.bf16.gmra.mxu3 %v12216_v40  ;;  %v12120_v57 = vor.u32 %v12986_v53, %v12119_v46  ;;  %16875 = vst [vmem:[#allocation22_spill] sm:$0xff] %v13985_v55  ;;  %v1743_v59 = vld [vmem:[#allocation2 + $0x200] sm:$0xf]  ;;  %v329_v32 = vld [vmem:[#allocation2 + $0xd8] sm:$0x1]  ;;  %v824_v37 = vor.u32 %v822_v19, %v13999_v27  ;;  %v832_v38 = vor.u32 %v830_v22, %v14001_v28  ;;  %v963_v47 = vshrl.u32 %v751_v36, 16 }
  0x82   : > { %v12155_v61 = vld [vmem:[#allocation2 + $0xc0] sm:$0xf]  ;;  %262 = vst [vmem:[#allocation2 + $0x20] sm:$0x1] %v261_v60  ;;  %v1744_v12 = vsel %vm13740_vm6, %v1208_v6, %v1743_v59  ;;  %v330_v35 = vsel %vm13721_vm4, 0, %v329_v32  ;;  %v966_v48 = vshll.u32 %v751_v36, 16 }
  0x83   : > { %2154 = vmatmul.bf16.gmra.mxu0 %v12120_v57  ;;  %v12995_v5 = vld [vmem:[#allocation2 + $0xc4] sm:$0xf0]  ;;  %265 = vst [vmem:[#allocation2 + $0x28] sm:$0x1] %v264_v62  ;;  %v752_v33 = vld [vmem:[%s13699_s25 + $0x58] sm:$0xf] }
  0x84   : > { %v12156_v8 = vor.u32 %v12995_v5, %v12155_v61  ;;  %v12187_v10 = vld [vmem:[#allocation2 + $0x160] sm:$0xf]  ;;  %1745 = vst [vmem:[#allocation2 + $0x200] sm:$0xf] %v1744_v12  ;;  %v386_v49 = vld [vmem:[#allocation2 + $0x170] sm:$0x1] }
  0x85   : > { %v13003_v11 = vld [vmem:[#allocation2 + $0x164] sm:$0xf0]  ;;  %328 = vst [vmem:[#allocation2 + $0xd0] sm:$0x1] %v327_v34  ;;  %v389_v29 = vld [vmem:[#allocation2 + $0x178] sm:$0x1] }
  0x86   : > { %2199 = vmatmul.bf16.gmra.mxu1 %v12156_v8  ;;  %v1749_v21 = vld [vmem:[#allocation2 + $0x208] sm:$0xf]  ;;  %v12188_v40 = vor.u32 %v13003_v11, %v12187_v10  ;;  %331 = vst [vmem:[#allocation2 + $0xd8] sm:$0x1] %v330_v35  ;;  %v971_v52 = vshrl.u32 %v752_v33, 16  ;;  %v974_v53 = vshll.u32 %v752_v33, 16 }
  0x87   : > { %v1750_v25 = vsel %vm13740_vm6, %v1216_v7, %v1749_v21  ;;  %v387_v54 = vsel %vm13721_vm4, 0, %v386_v49  ;;  %v390_v56 = vsel %vm13721_vm4, 0, %v389_v29  ;;  %v14019_v59 = vrot.slane %v963_v47, 7  ;;  %v13037_v60 = vld [vmem:[#allocation7 + $0xa0] sm:$0xff]  ;;  %v767_v62 = vld [vmem:[%s13699_s25 + $0x94] sm:$0xf] }
  0x88   : > { %1751 = vst [vmem:[#allocation2 + $0x208] sm:$0xf] %v1750_v25  ;;  %v14021_v61 = vrot.slane %v971_v52, 7  ;;  %v1091_v7 = vshrl.u32 %v767_v62, 16  ;;  %v768_v10 = vld [vmem:[%s13699_s25 + $0x98] sm:$0xf]  ;;  %4666 = vmatpush.bf16.msrb.mxu2 %v13037_v60 }
  0x89   : > { %v1455_v39 = vld [vmem:[#allocation2 + $0x20] sm:$0xf]  ;;  %16876 = vst [vmem:[#allocation23_spill] sm:$0xff] %v14019_v59  ;;  %v968_v6 = vor.u32 %v966_v48, %v14019_v59  ;;  %v1094_v11 = vshll.u32 %v767_v62, 16  ;;  %v1099_v18 = vshrl.u32 %v768_v10, 16  ;;  %v1102_v21 = vshll.u32 %v768_v10, 16 }
  0x8a   : > { %v1461_v41 = vld [vmem:[#allocation2 + $0x28] sm:$0xf]  ;;  %v1456_v43 = vsel %vm13740_vm6, %v824_v37, %v1455_v39  ;;  %16877 = vst [vmem:[#allocation24_spill] sm:$0xff] %v14021_v61  ;;  %v976_v4 = vor.u32 %v974_v53, %v14021_v61  ;;  %v14029_v19 = vrot.slane %v1091_v7, 7  ;;  %v13077_v22 = vld [vmem:[#allocation7 + $0xe0] sm:$0xff] }
  0x8b   : > { %v1462_v46 = vsel %vm13740_vm6, %v832_v38, %v1461_v41  ;;  %1457 = vst [vmem:[#allocation2 + $0x20] sm:$0xf] %v1456_v43  ;;  %v12219_v57 = vld [vmem:[#allocation2 + $0x200] sm:$0xf]  ;;  %v446_v31 = vld [vmem:[#allocation2 + $0x210] sm:$0x1]  ;;  %5348 = vmatpush.bf16.msrb.mxu3 %v13077_v22 }
  0x8c   : > { %1463 = vst [vmem:[#allocation2 + $0x28] sm:$0xf] %v1462_v46  ;;  %v1563_v9 = vld [vmem:[#allocation2 + $0xd0] sm:$0xf]  ;;  %v449_v32 = vld [vmem:[#allocation2 + $0x218] sm:$0x1]  ;;  %v1096_v35 = vor.u32 %v1094_v11, %v14029_v19 }
  0x8d   : > { %388 = vst [vmem:[#allocation2 + $0x170] sm:$0x1] %v387_v54  ;;  %v1564_v12 = vsel %vm13740_vm6, %v968_v6, %v1563_v9  ;;  %v1569_v14 = vld [vmem:[#allocation2 + $0xd8] sm:$0xf]  ;;  %v14034_v36 = vrot.slane %v1099_v18, 7  ;;  %v447_v38 = vsel %vm13721_vm4, 0, %v446_v31 }
  0x8e   : > { %2239 = vmatmul.bf16.gmra.mxu2 %v12188_v40  ;;  %391 = vst [vmem:[#allocation2 + $0x178] sm:$0x1] %v390_v56  ;;  %v1570_v25 = vsel %vm13740_vm6, %v976_v4, %v1569_v14  ;;  %v450_v39 = vsel %vm13721_vm4, 0, %v449_v32  ;;  %v783_v40 = vld [vmem:[%s13699_s25 + $0xd4] sm:$0xf]  ;;  %v13029_v56 = vld [vmem:[#allocation7 + $0x60] sm:$0xff] }
  0x8f   : > { %v13011_v5 = vld [vmem:[#allocation2 + $0x204] sm:$0xf0]  ;;  %16878 = vst [vmem:[#allocation25_spill] sm:$0xff] %v14029_v19  ;;  %v1104_v33 = vor.u32 %v1102_v21, %v14034_v36  ;;  %v1219_v46 = vshrl.u32 %v783_v40, 16  ;;  %v784_v49 = vld [vmem:[%s13699_s25 + $0xd8] sm:$0xf]  ;;  %3597 = vmatpush.bf16.msrb.mxu1 %v13029_v56 }
  0x90   : > { %v12220_v8 = vor.u32 %v13011_v5, %v12219_v57  ;;  %1565 = vst [vmem:[#allocation2 + $0xd0] sm:$0xf] %v1564_v12  ;;  %v1222_v53 = vshll.u32 %v783_v40, 16  ;;  %v1227_v54 = vshrl.u32 %v784_v49, 16  ;;  %v1230_v57 = vshll.u32 %v784_v49, 16  ;;  %v13085_v62 = vld [vmem:[#allocation7 + $0x120] sm:$0xff] }
  0x91   : > { %1571 = vst [vmem:[#allocation2 + $0xd8] sm:$0xf] %v1570_v25  ;;  %v14047_v52 = vrot.slane %v1219_v46, 7  ;;  %v266_v60 = vld [vmem:[#allocation2 + $0x30] sm:$0x1]  ;;  %6926 = vmatpush.bf16.msrb.mxu0 %v13085_v62  ;;  %v13036_v46 = vld [vmem:[#allocation7 + $0x98] sm:$0xff] }
  0x92   : > { %2279 = vmatmul.bf16.gmra.mxu3 %v12220_v8  ;;  %v12123_v34 = vld [vmem:[#allocation2 + $0x20] sm:$0xf]  ;;  %16879 = vst [vmem:[#allocation26_spill] sm:$0xff] %v14034_v36  ;;  %v14050_v7 = vrot.slane %v1227_v54, 7  ;;  %v267_v8 = vsel %vm13721_vm4, 0, %v266_v60  ;;  %4667 = vmatpush.bf16.msrb.mxu2 %v13036_v46 }
  0x93   : > { %v12987_v37 = vld [vmem:[#allocation2 + $0x24] sm:$0xf0]  ;;  %448 = vst [vmem:[#allocation2 + $0x210] sm:$0x1] %v447_v38  ;;  %v1224_v6 = vor.u32 %v1222_v53, %v14047_v52  ;;  %v269_v9 = vld [vmem:[#allocation2 + $0x38] sm:$0x1] }
  0x94   : > { %v12124_v41 = vor.u32 %v12987_v37, %v12123_v34  ;;  %v1659_v43 = vld [vmem:[#allocation2 + $0x170] sm:$0xf]  ;;  %451 = vst [vmem:[#allocation2 + $0x218] sm:$0x1] %v450_v39  ;;  %v1232_v11 = vor.u32 %v1230_v57, %v14050_v7  ;;  %v270_v12 = vsel %vm13721_vm4, 0, %v269_v9 }
  0x95   : > { %v1660_v47 = vsel %vm13740_vm6, %v1096_v35, %v1659_v43  ;;  %v1665_v48 = vld [vmem:[#allocation2 + $0x178] sm:$0xf]  ;;  %16880 = vst [vmem:[#allocation27_spill] sm:$0xff] %v14047_v52  ;;  %v735_v14 = vld [vmem:[%s13699_s25 + $0x14] sm:$0xf] }
  0x96   : > { %2159 = vmatmul.bf16.gmra.mxu0 %v12124_v41  ;;  %1661 = vst [vmem:[#allocation2 + $0x170] sm:$0xf] %v1660_v47  ;;  %v1666_v29 = vsel %vm13740_vm6, %v1104_v33, %v1665_v48  ;;  %v736_v18 = vld [vmem:[%s13699_s25 + $0x18] sm:$0xf]  ;;  %v835_v22 = vshrl.u32 %v735_v14, 16  ;;  %v838_v25 = vshll.u32 %v735_v14, 16 }
  0x97   : > { %1667 = vst [vmem:[#allocation2 + $0x178] sm:$0xf] %v1666_v29  ;;  %v12159_v5 = vld [vmem:[#allocation2 + $0xd0] sm:$0xf]  ;;  %v843_v34 = vshrl.u32 %v736_v18, 16  ;;  %v846_v35 = vshll.u32 %v736_v18, 16 }
  0x98   : > { %16881 = vst [vmem:[#allocation28_spill] sm:$0xff] %v14050_v7  ;;  %v12996_v4 = vld [vmem:[#allocation2 + $0xd4] sm:$0xf0]  ;;  %v338_v37 = vld [vmem:[#allocation2 + $0xf0] sm:$0x1]  ;;  %v14063_v40 = vrot.slane %v835_v22, 7 }
  0x99   : > { %268 = vst [vmem:[#allocation2 + $0x30] sm:$0x1] %v267_v8  ;;  %v12160_v10 = vor.u32 %v12996_v4, %v12159_v5  ;;  %v339_v41 = vsel %vm13721_vm4, 0, %v338_v37  ;;  %v14067_v43 = vrot.slane %v843_v34, 7  ;;  %v341_v49 = vld [vmem:[#allocation2 + $0xf8] sm:$0x1] }
  0x9a   : > { %v1755_v21 = vld [vmem:[#allocation2 + $0x210] sm:$0xf]  ;;  %271 = vst [vmem:[#allocation2 + $0x38] sm:$0x1] %v270_v12  ;;  %v840_v48 = vor.u32 %v838_v25, %v14063_v40  ;;  %v342_v54 = vsel %vm13721_vm4, 0, %v341_v49  ;;  %v13028_v18 = vld [vmem:[#allocation7 + $0x58] sm:$0xff] }
  0x9b   : > { %2204 = vmatmul.bf16.gmra.mxu1 %v12160_v10  ;;  %v1756_v31 = vsel %vm13740_vm6, %v1224_v6, %v1755_v21  ;;  %v1761_v32 = vld [vmem:[#allocation2 + $0x218] sm:$0xf]  ;;  %340 = vst [vmem:[#allocation2 + $0xf0] sm:$0x1] %v339_v41  ;;  %v848_v29 = vor.u32 %v846_v35, %v14067_v43  ;;  %v754_v56 = vld [vmem:[%s13699_s25 + $0x60] sm:$0xf] }
  0x9c   : > { %1757 = vst [vmem:[#allocation2 + $0x210] sm:$0xf] %v1756_v31  ;;  %v1762_v39 = vsel %vm13740_vm6, %v1232_v11, %v1761_v32  ;;  %v987_v60 = vshrl.u32 %v754_v56, 16  ;;  %v990_v62 = vshll.u32 %v754_v56, 16  ;;  %v398_v5 = vld [vmem:[#allocation2 + $0x190] sm:$0x1]  ;;  %3598 = vmatpush.bf16.msrb.mxu1 %v13028_v18 }
  0x9d   : > { %v12191_v38 = vld [vmem:[#allocation2 + $0x170] sm:$0xf]  ;;  %1763 = vst [vmem:[#allocation2 + $0x218] sm:$0xf] %v1762_v39  ;;  %v399_v8 = vsel %vm13721_vm4, 0, %v398_v5  ;;  %v13076_v11 = vld [vmem:[#allocation7 + $0xd8] sm:$0xff] }
  0x9e   : > { %v13004_v33 = vld [vmem:[#allocation2 + $0x174] sm:$0xf0]  ;;  %343 = vst [vmem:[#allocation2 + $0xf8] sm:$0x1] %v342_v54  ;;  %v14080_v9 = vrot.slane %v987_v60, 7  ;;  %5349 = vmatpush.bf16.msrb.mxu3 %v13076_v11 }
  0x9f   : > { %v12192_v47 = vor.u32 %v13004_v33, %v12191_v38  ;;  %400 = vst [vmem:[#allocation2 + $0x190] sm:$0x1] %v399_v8  ;;  %v401_v10 = vld [vmem:[#allocation2 + $0x198] sm:$0x1]  ;;  %v770_v32 = vld [vmem:[%s13699_s25 + $0xa0] sm:$0xf] }
  0xa0   : > { %v1467_v53 = vld [vmem:[#allocation2 + $0x30] sm:$0xf]  ;;  %v402_v14 = vsel %vm13721_vm4, 0, %v401_v10  ;;  %v992_v22 = vor.u32 %v990_v62, %v14080_v9  ;;  %v13084_v25 = vld [vmem:[#allocation7 + $0x118] sm:$0xff]  ;;  %v1115_v35 = vshrl.u32 %v770_v32, 16  ;;  %v1118_v37 = vshll.u32 %v770_v32, 16 }
  0xa1   : > { %2244 = vmatmul.bf16.gmra.mxu2 %v12192_v47  ;;  %v1468_v57 = vsel %vm13740_vm6, %v840_v48, %v1467_v53  ;;  %v1473_v6 = vld [vmem:[#allocation2 + $0x38] sm:$0xf]  ;;  %403 = vst [vmem:[#allocation2 + $0x198] sm:$0x1] %v402_v14  ;;  %v458_v34 = vld [vmem:[#allocation2 + $0x230] sm:$0x1]  ;;  %6927 = vmatpush.bf16.msrb.mxu0 %v13084_v25 }
  0xa2   : > { %1469 = vst [vmem:[#allocation2 + $0x30] sm:$0xf] %v1468_v57  ;;  %v1474_v4 = vsel %vm13740_vm6, %v848_v29, %v1473_v6  ;;  %v459_v38 = vsel %vm13721_vm4, 0, %v458_v34  ;;  %v461_v39 = vld [vmem:[#allocation2 + $0x238] sm:$0x1]  ;;  %v14092_v48 = vrot.slane %v1115_v35, 7 }
  0xa3   : > { %v12223_v12 = vld [vmem:[#allocation2 + $0x210] sm:$0xf]  ;;  %1475 = vst [vmem:[#allocation2 + $0x38] sm:$0xf] %v1474_v4  ;;  %v462_v33 = vsel %vm13721_vm4, 0, %v461_v39 }
  0xa4   : > { %v13012_v21 = vld [vmem:[#allocation2 + $0x214] sm:$0xf0]  ;;  %460 = vst [vmem:[#allocation2 + $0x230] sm:$0x1] %v459_v38  ;;  %v786_v49 = vld [vmem:[%s13699_s25 + $0xe0] sm:$0xf]  ;;  %v1120_v53 = vor.u32 %v1118_v37, %v14092_v48 }
  0xa5   : > { %v12224_v31 = vor.u32 %v13012_v21, %v12223_v12  ;;  %v1581_v41 = vld [vmem:[#allocation2 + $0xf8] sm:$0xf]  ;;  %463 = vst [vmem:[#allocation2 + $0x238] sm:$0x1] %v462_v33  ;;  %v1243_v54 = vshrl.u32 %v786_v49, 16  ;;  %v1246_v56 = vshll.u32 %v786_v49, 16 }
  0xa6   : > { %v1582_v47 = vsel %vm13740_vm6, %v992_v22, %v1581_v41  ;;  %v278_v62 = vld [vmem:[#allocation2 + $0x50] sm:$0x1]  ;;  %v281_v5 = vld [vmem:[#allocation2 + $0x58] sm:$0x1]  ;;  %v738_v11 = vld [vmem:[%s13699_s25 + $0x20] sm:$0xf] }
  0xa7   : > { %2284 = vmatmul.bf16.gmra.mxu3 %v12224_v31  ;;  %1583 = vst [vmem:[#allocation2 + $0xf8] sm:$0xf] %v1582_v47  ;;  %v14098_v8 = vrot.slane %v1243_v54, 7  ;;  %v279_v4 = vsel %vm13721_vm4, 0, %v278_v62  ;;  %v282_v10 = vsel %vm13721_vm4, 0, %v281_v5  ;;  %v859_v12 = vshrl.u32 %v738_v11, 16 }
  0xa8   : > { %v1677_v60 = vld [vmem:[#allocation2 + $0x198] sm:$0xf]  ;;  %v344_v14 = vld [vmem:[#allocation2 + $0x100] sm:$0x1]  ;;  %v12163_v18 = vld [vmem:[#allocation2 + $0xf0] sm:$0xf] }
  0xa9   : > { %v12127_v46 = vld [vmem:[#allocation2 + $0x30] sm:$0xf]  ;;  %v1678_v6 = vsel %vm13740_vm6, %v1120_v53, %v1677_v60  ;;  %16882 = vst [vmem:[#allocation29_spill] sm:$0xff] %v14098_v8  ;;  %v1248_v21 = vor.u32 %v1246_v56, %v14098_v8  ;;  %v345_v22 = vsel %vm13721_vm4, 0, %v344_v14  ;;  %v14108_v31 = vrot.slane %v859_v12, 7 }
  0xaa   : > { %v12988_v29 = vld [vmem:[#allocation2 + $0x34] sm:$0xf0]  ;;  %1679 = vst [vmem:[#allocation2 + $0x198] sm:$0xf] %v1678_v6  ;;  %v862_v32 = vshll.u32 %v738_v11, 16 }
  0xab   : > { %v12128_v57 = vor.u32 %v12988_v29, %v12127_v46  ;;  %280 = vst [vmem:[#allocation2 + $0x50] sm:$0x1] %v279_v4  ;;  %v12195_v35 = vld [vmem:[#allocation2 + $0x190] sm:$0xf]  ;;  %v347_v38 = vld [vmem:[#allocation2 + $0x108] sm:$0x1] }
  0xac   : > { %v1773_v25 = vld [vmem:[#allocation2 + $0x238] sm:$0xf]  ;;  %283 = vst [vmem:[#allocation2 + $0x58] sm:$0x1] %v282_v10  ;;  %v348_v41 = vsel %vm13721_vm4, 0, %v347_v38  ;;  %v864_v29 = vor.u32 %v862_v32, %v14108_v31  ;;  %v13035_v4 = vld [vmem:[#allocation7 + $0x90] sm:$0xff] }
  0xad   : > { %2164 = vmatmul.bf16.gmra.mxu0 %v12128_v57  ;;  %v1774_v37 = vsel %vm13740_vm6, %v1248_v21, %v1773_v25  ;;  %346 = vst [vmem:[#allocation2 + $0x100] sm:$0x1] %v345_v22  ;;  %v755_v33 = vld [vmem:[%s13699_s25 + $0x64] sm:$0xf]  ;;  %v756_v46 = vld [vmem:[%s13699_s25 + $0x68] sm:$0xf]  ;;  %4668 = vmatpush.bf16.msrb.mxu2 %v13035_v4 }
  0xae   : > { %v12997_v34 = vld [vmem:[#allocation2 + $0xf4] sm:$0xf0]  ;;  %1775 = vst [vmem:[#allocation2 + $0x238] sm:$0xf] %v1774_v37  ;;  %v995_v47 = vshrl.u32 %v755_v33, 16  ;;  %v998_v49 = vshll.u32 %v755_v33, 16 }
  0xaf   : > { %v12164_v39 = vor.u32 %v12997_v34, %v12163_v18  ;;  %349 = vst [vmem:[#allocation2 + $0x108] sm:$0x1] %v348_v41  ;;  %v1003_v53 = vshrl.u32 %v756_v46, 16  ;;  %v1006_v54 = vshll.u32 %v756_v46, 16  ;;  %v404_v56 = vld [vmem:[#allocation2 + $0x1a0] sm:$0x1] }
  0xb0   : > { %v407_v57 = vld [vmem:[#allocation2 + $0x1a8] sm:$0x1]  ;;  %v14117_v62 = vrot.slane %v995_v47, 7  ;;  %v405_v5 = vsel %vm13721_vm4, 0, %v404_v56  ;;  %v12227_v12 = vld [vmem:[#allocation2 + $0x230] sm:$0xf] }
  0xb1   : > { %2209 = vmatmul.bf16.gmra.mxu1 %v12164_v39  ;;  %v13005_v60 = vld [vmem:[#allocation2 + $0x194] sm:$0xf0]  ;;  %v408_v6 = vsel %vm13721_vm4, 0, %v407_v57  ;;  %v14123_v11 = vrot.slane %v1003_v53, 7  ;;  %406 = vst [vmem:[#allocation2 + $0x1a0] sm:$0x1] %v405_v5 }
  0xb2   : > { %v12196_v10 = vor.u32 %v13005_v60, %v12195_v35  ;;  %v1000_v18 = vor.u32 %v998_v49, %v14117_v62  ;;  %409 = vst [vmem:[#allocation2 + $0x1a8] sm:$0x1] %v408_v6  ;;  %v771_v32 = vld [vmem:[%s13699_s25 + $0xa4] sm:$0xf]  ;;  %v772_v37 = vld [vmem:[%s13699_s25 + $0xa8] sm:$0xf] }
  0xb3   : > { %v1485_v14 = vld [vmem:[#allocation2 + $0x58] sm:$0xf]  ;;  %v1008_v22 = vor.u32 %v1006_v54, %v14123_v11  ;;  %v1123_v41 = vshrl.u32 %v771_v32, 16  ;;  %v1126_v33 = vshll.u32 %v771_v32, 16  ;;  %v1131_v47 = vshrl.u32 %v772_v37, 16  ;;  %v13075_v5 = vld [vmem:[#allocation7 + $0xd0] sm:$0xff] }
  0xb4   : > { %2249 = vmatmul.bf16.gmra.mxu2 %v12196_v10  ;;  %v1486_v21 = vsel %vm13740_vm6, %v864_v29, %v1485_v14  ;;  %v1587_v25 = vld [vmem:[#allocation2 + $0x100] sm:$0xf]  ;;  %v1134_v49 = vshll.u32 %v772_v37, 16  ;;  %v467_v53 = vld [vmem:[#allocation2 + $0x248] sm:$0x1]  ;;  %v13027_v10 = vld [vmem:[#allocation7 + $0x50] sm:$0xff]  ;;  %5350 = vmatpush.bf16.msrb.mxu3 %v13075_v5 }
  0xb5   : > { %v13013_v34 = vld [vmem:[#allocation2 + $0x234] sm:$0xf0]  ;;  %1487 = vst [vmem:[#allocation2 + $0x58] sm:$0xf] %v1486_v21  ;;  %v1588_v35 = vsel %vm13740_vm6, %v1000_v18, %v1587_v25  ;;  %v464_v29 = vld [vmem:[#allocation2 + $0x240] sm:$0x1]  ;;  %3599 = vmatpush.bf16.msrb.mxu1 %v13027_v10 }
  0xb6   : > { %v12228_v38 = vor.u32 %v13013_v34, %v12227_v12  ;;  %1589 = vst [vmem:[#allocation2 + $0x100] sm:$0xf] %v1588_v35  ;;  %v1593_v39 = vld [vmem:[#allocation2 + $0x108] sm:$0xf]  ;;  %v12131_v54 = vld [vmem:[#allocation2 + $0x50] sm:$0xf] }
  0xb7   : > { %v1594_v46 = vsel %vm13740_vm6, %v1008_v22, %v1593_v39  ;;  %v14135_v56 = vrot.slane %v1123_v41, 7  ;;  %v465_v57 = vsel %vm13721_vm4, 0, %v464_v29  ;;  %v468_v60 = vsel %vm13721_vm4, 0, %v467_v53  ;;  %v13083_v18 = vld [vmem:[#allocation7 + $0x110] sm:$0xff]  ;;  %v787_v22 = vld [vmem:[%s13699_s25 + $0xe4] sm:$0xf] }
  0xb8   : > { %2289 = vmatmul.bf16.gmra.mxu3 %v12228_v38  ;;  %1595 = vst [vmem:[#allocation2 + $0x108] sm:$0xf] %v1594_v46  ;;  %v14141_v6 = vrot.slane %v1131_v47, 7  ;;  %v1683_v4 = vld [vmem:[#allocation2 + $0x1a0] sm:$0xf]  ;;  %v1251_v35 = vshrl.u32 %v787_v22, 16  ;;  %6928 = vmatpush.bf16.msrb.mxu0 %v13083_v18 }
  0xb9   : > { %466 = vst [vmem:[#allocation2 + $0x240] sm:$0x1] %v465_v57  ;;  %v1128_v12 = vor.u32 %v1126_v33, %v14135_v56  ;;  %v1689_v14 = vld [vmem:[#allocation2 + $0x1a8] sm:$0xf]  ;;  %v1254_v37 = vshll.u32 %v787_v22, 16 }
  0xba   : > { %16883 = vst [vmem:[#allocation30_spill] sm:$0xff] %v14141_v6  ;;  %v1136_v21 = vor.u32 %v1134_v49, %v14141_v6  ;;  %v788_v25 = vld [vmem:[%s13699_s25 + $0xe8] sm:$0xf]  ;;  %v14151_v47 = vrot.slane %v1251_v35, 7  ;;  %v284_v29 = vld [vmem:[#allocation2 + $0x60] sm:$0x1] }
  0xbb   : > { %469 = vst [vmem:[#allocation2 + $0x248] sm:$0x1] %v468_v60  ;;  %v1684_v34 = vsel %vm13740_vm6, %v1128_v12, %v1683_v4  ;;  %v1259_v38 = vshrl.u32 %v788_v25, 16  ;;  %v1262_v46 = vshll.u32 %v788_v25, 16  ;;  %v285_v57 = vsel %vm13721_vm4, 0, %v284_v29  ;;  %v13094_v6 = vld [vmem:[#allocation7 + $0x168] sm:$0xff] }
  0xbc   : > { %v12989_v32 = vld [vmem:[#allocation2 + $0x54] sm:$0xf0]  ;;  %1685 = vst [vmem:[#allocation2 + $0x1a0] sm:$0xf] %v1684_v34  ;;  %v1690_v33 = vsel %vm13740_vm6, %v1136_v21, %v1689_v14  ;;  %v1256_v5 = vor.u32 %v1254_v37, %v14151_v47  ;;  %v739_v18 = vld [vmem:[%s13699_s25 + $0x24] sm:$0xf] }
  0xbd   : > { %v12132_v39 = vor.u32 %v12989_v32, %v12131_v54  ;;  %v12167_v41 = vld [vmem:[#allocation2 + $0x100] sm:$0xf]  ;;  %1691 = vst [vmem:[#allocation2 + $0x1a8] sm:$0xf] %v1690_v33  ;;  %v14153_v49 = vrot.slane %v1259_v38, 7  ;;  %v867_v32 = vshrl.u32 %v739_v18, 16 }
  0xbe   : > { %16884 = vst [vmem:[#allocation31_spill] sm:$0xff] %v14151_v47  ;;  %v287_v54 = vld [vmem:[#allocation2 + $0x68] sm:$0x1]  ;;  %v870_v34 = vshll.u32 %v739_v18, 16  ;;  %v350_v38 = vld [vmem:[#allocation2 + $0x110] sm:$0x1] }
  0xbf   : > { %16885 = vst [vmem:[#allocation32_spill] sm:$0xff] %v14153_v49  ;;  %2169 = vmatmul.bf16.gmra.mxu0 %v12132_v39  ;;  %v12998_v53 = vld [vmem:[#allocation2 + $0x104] sm:$0xf0]  ;;  %v1264_v4 = vor.u32 %v1262_v46, %v14153_v49  ;;  %v288_v14 = vsel %vm13721_vm4, 0, %v287_v54  ;;  %v351_v33 = vsel %vm13721_vm4, 0, %v350_v38 }
  0xc0   : > { %v12168_v60 = vor.u32 %v12998_v53, %v12167_v41  ;;  %v1779_v10 = vld [vmem:[#allocation2 + $0x240] sm:$0xf]  ;;  %286 = vst [vmem:[#allocation2 + $0x60] sm:$0x1] %v285_v57  ;;  %v740_v25 = vld [vmem:[%s13699_s25 + $0x28] sm:$0xf] }
  0xc1   : > { %v1780_v21 = vsel %vm13740_vm6, %v1256_v5, %v1779_v10  ;;  %289 = vst [vmem:[#allocation2 + $0x68] sm:$0x1] %v288_v14  ;;  %v875_v35 = vshrl.u32 %v740_v25, 16  ;;  %v878_v37 = vshll.u32 %v740_v25, 16  ;;  %v14167_v41 = vrot.slane %v867_v32, 7  ;;  %v13034_v25 = vld [vmem:[#allocation7 + $0x88] sm:$0xff] }
  0xc2   : > { %v1785_v12 = vld [vmem:[#allocation2 + $0x248] sm:$0xf]  ;;  %2214 = vmatmul.bf16.gmra.mxu1 %v12168_v60  ;;  %1781 = vst [vmem:[#allocation2 + $0x240] sm:$0xf] %v1780_v21  ;;  %v353_v54 = vld [vmem:[#allocation2 + $0x118] sm:$0x1]  ;;  %4669 = vmatpush.bf16.msrb.mxu2 %v13034_v25 }
  0xc3   : > { %v1786_v22 = vsel %vm13740_vm6, %v1264_v4, %v1785_v12  ;;  %v12199_v39 = vld [vmem:[#allocation2 + $0x1a0] sm:$0xf]  ;;  %v14171_v29 = vrot.slane %v875_v35, 7  ;;  %352 = vst [vmem:[#allocation2 + $0x110] sm:$0x1] %v351_v33  ;;  %v872_v57 = vor.u32 %v870_v34, %v14167_v41  ;;  %v354_v10 = vsel %vm13721_vm4, 0, %v353_v54 }
  0xc4   : > { %1787 = vst [vmem:[#allocation2 + $0x248] sm:$0xf] %v1786_v22  ;;  %v13006_v46 = vld [vmem:[#allocation2 + $0x1a4] sm:$0xf0]  ;;  %v757_v60 = vld [vmem:[%s13699_s25 + $0x6c] sm:$0xf] }
  0xc5   : > { %v12200_v53 = vor.u32 %v13006_v46, %v12199_v39  ;;  %v880_v5 = vor.u32 %v878_v37, %v14171_v29  ;;  %v758_v12 = vld [vmem:[%s13699_s25 + $0x70] sm:$0xf]  ;;  %355 = vst [vmem:[#allocation2 + $0x118] sm:$0x1] %v354_v10  ;;  %v1011_v18 = vshrl.u32 %v757_v60, 16  ;;  %v1014_v21 = vshll.u32 %v757_v60, 16 }
  0xc6   : > { %v1019_v22 = vshrl.u32 %v758_v12, 16  ;;  %v1022_v34 = vshll.u32 %v758_v12, 16  ;;  %v410_v33 = vld [vmem:[#allocation2 + $0x1b0] sm:$0x1]  ;;  %v773_v10 = vld [vmem:[%s13699_s25 + $0xac] sm:$0xf] }
  0xc7   : > { %v1491_v4 = vld [vmem:[#allocation2 + $0x60] sm:$0xf]  ;;  %2254 = vmatmul.bf16.gmra.mxu2 %v12200_v53  ;;  %v14183_v38 = vrot.slane %v1011_v18, 7  ;;  %v411_v53 = vsel %vm13721_vm4, 0, %v410_v33  ;;  %v13074_v12 = vld [vmem:[#allocation7 + $0xc8] sm:$0xff]  ;;  %v1139_v25 = vshrl.u32 %v773_v10, 16 }
  0xc8   : > { %v1492_v14 = vsel %vm13740_vm6, %v872_v57, %v1491_v4  ;;  %v1497_v32 = vld [vmem:[#allocation2 + $0x68] sm:$0xf]  ;;  %v14185_v39 = vrot.slane %v1019_v22, 7  ;;  %412 = vst [vmem:[#allocation2 + $0x1b0] sm:$0x1] %v411_v53  ;;  %5351 = vmatpush.bf16.msrb.mxu3 %v13074_v12 }
  0xc9   : > { %1493 = vst [vmem:[#allocation2 + $0x60] sm:$0xf] %v1492_v14  ;;  %v12231_v35 = vld [vmem:[#allocation2 + $0x240] sm:$0xf]  ;;  %v1498_v37 = vsel %vm13740_vm6, %v880_v5, %v1497_v32  ;;  %v1016_v54 = vor.u32 %v1014_v21, %v14183_v38  ;;  %v413_v5 = vld [vmem:[#allocation2 + $0x1b8] sm:$0x1] }
  0xca   : > { %16886 = vst [vmem:[#allocation33_spill] sm:$0xff] %v14183_v38  ;;  %v1024_v60 = vor.u32 %v1022_v34, %v14185_v39  ;;  %v1599_v4 = vld [vmem:[#allocation2 + $0x110] sm:$0xf]  ;;  %v414_v18 = vsel %vm13721_vm4, 0, %v413_v5  ;;  %v1142_v32 = vshll.u32 %v773_v10, 16  ;;  %v14199_v53 = vrot.slane %v1139_v25, 7 }
  0xcb   : > { %16887 = vst [vmem:[#allocation34_spill] sm:$0xff] %v14185_v39  ;;  %v13014_v46 = vld [vmem:[#allocation2 + $0x244] sm:$0xf0]  ;;  %v1600_v14 = vsel %vm13740_vm6, %v1016_v54, %v1599_v4  ;;  %v774_v22 = vld [vmem:[%s13699_s25 + $0xb0] sm:$0xf] }
  0xcc   : > { %1499 = vst [vmem:[#allocation2 + $0x68] sm:$0xf] %v1498_v37  ;;  %v12232_v57 = vor.u32 %v13014_v46, %v12231_v35  ;;  %v13026_v35 = vld [vmem:[#allocation7 + $0x48] sm:$0xff]  ;;  %v1605_v21 = vld [vmem:[#allocation2 + $0x118] sm:$0xf]  ;;  %v1147_v37 = vshrl.u32 %v774_v22, 16  ;;  %v1144_v10 = vor.u32 %v1142_v32, %v14199_v53 }
  0xcd   : > { %1601 = vst [vmem:[#allocation2 + $0x110] sm:$0xf] %v1600_v14  ;;  %v1150_v34 = vshll.u32 %v774_v22, 16  ;;  %v1606_v46 = vsel %vm13740_vm6, %v1024_v60, %v1605_v21  ;;  %3600 = vmatpush.bf16.msrb.mxu1 %v13026_v35  ;;  %v470_v4 = vld [vmem:[#allocation2 + $0x250] sm:$0x1] }
  0xce   : > { %2294 = vmatmul.bf16.gmra.mxu3 %v12232_v57  ;;  %415 = vst [vmem:[#allocation2 + $0x1b8] sm:$0x1] %v414_v18  ;;  %v13082_v57 = vld [vmem:[#allocation7 + $0x108] sm:$0xff]  ;;  %v14201_v54 = vrot.slane %v1147_v37, 7  ;;  %v471_v12 = vsel %vm13721_vm4, 0, %v470_v4 }
  0xcf   : > { %16888 = vst [vmem:[#allocation35_spill] sm:$0xff] %v14199_v53  ;;  %v473_v14 = vld [vmem:[#allocation2 + $0x258] sm:$0x1]  ;;  %6929 = vmatpush.bf16.msrb.mxu0 %v13082_v57  ;;  %v1695_v22 = vld [vmem:[#allocation2 + $0x1b0] sm:$0xf] }
  0xd0   : > { %v12135_v33 = vld [vmem:[#allocation2 + $0x60] sm:$0xf]  ;;  %1607 = vst [vmem:[#allocation2 + $0x118] sm:$0xf] %v1606_v46  ;;  %v474_v25 = vsel %vm13721_vm4, 0, %v473_v14  ;;  %v1152_v35 = vor.u32 %v1150_v34, %v14201_v54  ;;  %v1696_v21 = vsel %vm13740_vm6, %v1144_v10, %v1695_v22 }
  0xd1   : > { %16889 = vst [vmem:[#allocation36_spill] sm:$0xff] %v14201_v54  ;;  %v789_v32 = vld [vmem:[%s13699_s25 + $0xec] sm:$0xf]  ;;  %v790_v37 = vld [vmem:[%s13699_s25 + $0xf0] sm:$0xf] }
  0xd2   : > { %472 = vst [vmem:[#allocation2 + $0x250] sm:$0x1] %v471_v12  ;;  %v1267_v46 = vshrl.u32 %v789_v32, 16  ;;  %v1270_v57 = vshll.u32 %v789_v32, 16  ;;  %v1275_v4 = vshrl.u32 %v790_v37, 16 }
  0xd3   : > { %v12990_v5 = vld [vmem:[#allocation2 + $0x64] sm:$0xf0]  ;;  %475 = vst [vmem:[#allocation2 + $0x258] sm:$0x1] %v474_v25  ;;  %v290_v12 = vld [vmem:[#allocation2 + $0x70] sm:$0x1] }
  0xd4   : > { %v12136_v18 = vor.u32 %v12990_v5, %v12135_v33  ;;  %1697 = vst [vmem:[#allocation2 + $0x1b0] sm:$0xf] %v1696_v21  ;;  %v1278_v33 = vshll.u32 %v790_v37, 16  ;;  %v12171_v5 = vld [vmem:[#allocation2 + $0x110] sm:$0xf]  ;;  %v14214_v53 = vrot.slane %v1267_v46, 7 }
  0xd5   : > { %v293_v60 = vld [vmem:[#allocation2 + $0x78] sm:$0x1]  ;;  %v14216_v34 = vrot.slane %v1275_v4, 7  ;;  %v291_v10 = vsel %vm13721_vm4, 0, %v290_v12  ;;  %v741_v21 = vld [vmem:[%s13699_s25 + $0x2c] sm:$0xf] }
  0xd6   : > { %2174 = vmatmul.bf16.gmra.mxu0 %v12136_v18  ;;  %v1701_v14 = vld [vmem:[#allocation2 + $0x1b8] sm:$0xf]  ;;  %16890 = vst [vmem:[#allocation37_spill] sm:$0xff] %v14214_v53  ;;  %v294_v18 = vsel %vm13721_vm4, 0, %v293_v60  ;;  %v1272_v46 = vor.u32 %v1270_v57, %v14214_v53  ;;  %v742_v54 = vld [vmem:[%s13699_s25 + $0x30] sm:$0xf] }
  0xd7   : > { %16891 = vst [vmem:[#allocation38_spill] sm:$0xff] %v14216_v34  ;;  %v12999_v22 = vld [vmem:[#allocation2 + $0x114] sm:$0xf0]  ;;  %v1702_v25 = vsel %vm13740_vm6, %v1152_v35, %v1701_v14  ;;  %v1280_v4 = vor.u32 %v1278_v33, %v14216_v34  ;;  %v883_v60 = vshrl.u32 %v741_v21, 16  ;;  %v891_v32 = vshrl.u32 %v742_v54, 16 }
  0xd8   : > { %292 = vst [vmem:[#allocation2 + $0x70] sm:$0x1] %v291_v10  ;;  %v12172_v37 = vor.u32 %v12999_v22, %v12171_v5  ;;  %v886_v10 = vshll.u32 %v741_v21, 16  ;;  %v894_v5 = vshll.u32 %v742_v54, 16  ;;  %v759_v12 = vld [vmem:[%s13699_s25 + $0x74] sm:$0xf] }
  0xd9   : > { %1703 = vst [vmem:[#allocation2 + $0x1b8] sm:$0xf] %v1702_v25  ;;  %v1791_v49 = vld [vmem:[#allocation2 + $0x250] sm:$0xf]  ;;  %v14235_v25 = vrot.slane %v883_v60, 7  ;;  %v1027_v22 = vshrl.u32 %v759_v12, 16 }
  0xda   : > { %295 = vst [vmem:[#allocation2 + $0x78] sm:$0x1] %v294_v18  ;;  %2219 = vmatmul.bf16.gmra.mxu1 %v12172_v37  ;;  %v1792_v35 = vsel %vm13740_vm6, %v1272_v46, %v1791_v49  ;;  %v1797_v14 = vld [vmem:[#allocation2 + $0x258] sm:$0xf]  ;;  %v14238_v37 = vrot.slane %v891_v32, 7  ;;  %v1030_v42 = vshll.u32 %v759_v12, 16 }
  0xdb   : > { %v12203_v57 = vld [vmem:[#allocation2 + $0x1b0] sm:$0xf]  ;;  %1793 = vst [vmem:[#allocation2 + $0x250] sm:$0xf] %v1792_v35  ;;  %v1798_v33 = vsel %vm13740_vm6, %v1280_v4, %v1797_v14  ;;  %v356_v49 = vld [vmem:[#allocation2 + $0x120] sm:$0x1]  ;;  %v888_v54 = vor.u32 %v886_v10, %v14235_v25 }
  0xdc   : > { %1799 = vst [vmem:[#allocation2 + $0x258] sm:$0xf] %v1798_v33  ;;  %v357_v46 = vsel %vm13721_vm4, 0, %v356_v49  ;;  %v359_v35 = vld [vmem:[#allocation2 + $0x128] sm:$0x1]  ;;  %v896_v60 = vor.u32 %v894_v5, %v14238_v37 }
  0xdd   : > { %358 = vst [vmem:[#allocation2 + $0x120] sm:$0x1] %v357_v46  ;;  %v360_v32 = vsel %vm13721_vm4, 0, %v359_v35  ;;  %v760_v10 = vld [vmem:[%s13699_s25 + $0x78] sm:$0xf] }
  0xde   : > { %361 = vst [vmem:[#allocation2 + $0x128] sm:$0x1] %v360_v32  ;;  %v1035_v5 = vshrl.u32 %v760_v10, 16  ;;  %v1038_v34 = vshll.u32 %v760_v10, 16  ;;  %v416_v46 = vld [vmem:[#allocation2 + $0x1c0] sm:$0x1] }
  0xdf   : > { %v1503_v14 = vld [vmem:[#allocation2 + $0x70] sm:$0xf]  ;;  %v419_v53 = vld [vmem:[#allocation2 + $0x1c8] sm:$0x1]  ;;  %v14387_v39 = vld [vmem:[#allocation2 + $0x18] sm:$0xe] }
  0xe0   : > { %v13007_v33 = vld [vmem:[#allocation2 + $0x1b4] sm:$0xf0]  ;;  %v1504_v21 = vsel %vm13740_vm6, %v888_v54, %v1503_v14  ;;  %v14254_v54 = vrot.slane %v1027_v22, 7  ;;  %v14258_v14 = vrot.slane %v1035_v5, 7  ;;  %v420_v12 = vsel %vm13721_vm4, 0, %v419_v53 }
  0xe1   : > { %v12204_v18 = vor.u32 %v13007_v33, %v12203_v57  ;;  %1505 = vst [vmem:[#allocation2 + $0x70] sm:$0xf] %v1504_v21  ;;  %v1509_v49 = vld [vmem:[#allocation2 + $0x78] sm:$0xf]  ;;  %v417_v57 = vsel %vm13721_vm4, 0, %v416_v46  ;;  %v13033_v33 = vld [vmem:[#allocation7 + $0x80] sm:$0xff] }
  0xe2   : > { %v1510_v4 = vsel %vm13740_vm6, %v896_v60, %v1509_v49  ;;  %v12235_v35 = vld [vmem:[#allocation2 + $0x250] sm:$0xf]  ;;  %16892 = vst [vmem:[#allocation39_spill] sm:$0xff] %v14254_v54  ;;  %v1040_v10 = vor.u32 %v1038_v34, %v14258_v14  ;;  %v776_v46 = vld [vmem:[%s13699_s25 + $0xb8] sm:$0xf]  ;;  %4670 = vmatpush.bf16.msrb.mxu2 %v13033_v33  ;;  %v13025_v34 = vld [vmem:[#allocation7 + $0x40] sm:$0xff] }
  0xe3   : > { %2259 = vmatmul.bf16.gmra.mxu2 %v12204_v18  ;;  %1511 = vst [vmem:[#allocation2 + $0x78] sm:$0xf] %v1510_v4  ;;  %v13015_v21 = vld [vmem:[#allocation2 + $0x254] sm:$0xf0]  ;;  %v1032_v18 = vor.u32 %v1030_v42, %v14254_v54  ;;  %v775_v4 = vld [vmem:[%s13699_s25 + $0xb4] sm:$0xf]  ;;  %3601 = vmatpush.bf16.msrb.mxu1 %v13025_v34 }
  0xe4   : > { %16893 = vst [vmem:[#allocation40_spill] sm:$0xff] %v14258_v14  ;;  %v12236_v32 = vor.u32 %v13015_v21, %v12235_v35  ;;  %v1611_v49 = vld [vmem:[#allocation2 + $0x120] sm:$0xf]  ;;  %v1155_v5 = vshrl.u32 %v775_v4, 16  ;;  %v1158_v20 = vshll.u32 %v775_v4, 16  ;;  %v1163_v60 = vshrl.u32 %v776_v46, 16 }
  0xe5   : > { %418 = vst [vmem:[#allocation2 + $0x1c0] sm:$0x1] %v417_v57  ;;  %v1612_v57 = vsel %vm13740_vm6, %v1032_v18, %v1611_v49  ;;  %v1617_v53 = vld [vmem:[#allocation2 + $0x128] sm:$0xf]  ;;  %v1166_v35 = vshll.u32 %v776_v46, 16  ;;  %v13073_v42 = vld [vmem:[#allocation7 + $0xc0] sm:$0xff] }
  0xe6   : > { %421 = vst [vmem:[#allocation2 + $0x1c8] sm:$0x1] %v420_v12  ;;  %2299 = vmatmul.bf16.gmra.mxu3 %v12236_v32  ;;  %v1618_v12 = vsel %vm13740_vm6, %v1040_v10, %v1617_v53  ;;  %v14272_v22 = vrot.slane %v1155_v5, 7  ;;  %v14274_v24 = vrot.slane %v1163_v60, 7  ;;  %v476_v32 = vld [vmem:[#allocation2 + $0x260] sm:$0x1] }
  0xe7   : > { %1613 = vst [vmem:[#allocation2 + $0x120] sm:$0xf] %v1612_v57  ;;  %5352 = vmatpush.bf16.msrb.mxu3 %v13073_v42  ;;  %v13081_v18 = vld [vmem:[#allocation7 + $0x100] sm:$0xff]  ;;  %v477_v46 = vsel %vm13721_vm4, 0, %v476_v32  ;;  %v479_v57 = vld [vmem:[#allocation2 + $0x268] sm:$0x1] }
  0xe8   : > { %v12139_v21 = vld [vmem:[#allocation2 + $0x70] sm:$0xf]  ;;  %16894 = vst [vmem:[#allocation41_spill] sm:$0xff] %v14272_v22  ;;  %v1160_v33 = vor.u32 %v1158_v20, %v14272_v22  ;;  %v1168_v60 = vor.u32 %v1166_v35, %v14274_v24  ;;  %v480_v42 = vsel %vm13721_vm4, 0, %v479_v57  ;;  %6930 = vmatpush.bf16.msrb.mxu0 %v13081_v18  ;;  %v791_v32 = vld [vmem:[%s13699_s25 + $0xf4] sm:$0xf] }
  0xe9   : > { %1619 = vst [vmem:[#allocation2 + $0x128] sm:$0xf] %v1618_v12  ;;  %v1286_v35 = vshll.u32 %v791_v32, 16  ;;  %v296_v57 = vld [vmem:[#allocation2 + $0x80] sm:$0x1] }
  0xea   : > { %16895 = vst [vmem:[#allocation42_spill] sm:$0xff] %v14274_v24  ;;  %v12991_v49 = vld [vmem:[#allocation2 + $0x74] sm:$0xf0]  ;;  %v493_v22 = vld [vmem:[#allocation2 + $0xc] sm:$0x1] }
  0xeb   : > { %v12140_v5 = vor.u32 %v12991_v49, %v12139_v21  ;;  %478 = vst [vmem:[#allocation2 + $0x260] sm:$0x1] %v477_v46  ;;  %v792_v21 = vld [vmem:[%s13699_s25 + $0xf8] sm:$0xf]  ;;  %v1283_v49 = vshrl.u32 %v791_v32, 16 }
  0xec   : > { %v1707_v53 = vld [vmem:[#allocation2 + $0x1c0] sm:$0xf]  ;;  %481 = vst [vmem:[#allocation2 + $0x268] sm:$0x1] %v480_v42  ;;  %v1291_v46 = vshrl.u32 %v792_v21, 16  ;;  %v1294_v4 = vshll.u32 %v792_v21, 16 }
  0xed   : > { %v1708_v20 = vsel %vm13740_vm6, %v1160_v33, %v1707_v53  ;;  %v1713_v12 = vld [vmem:[#allocation2 + $0x1c8] sm:$0xf]  ;;  %2179 = vmatmul.bf16.gmra.mxu0 %v12140_v5  ;;  %v14290_v10 = vrot.slane %v1283_v49, 7  ;;  %v297_v33 = vsel %vm13721_vm4, 0, %v296_v57  ;;  %v743_v21 = vld [vmem:[%s13699_s25 + $0x34] sm:$0xf] }
  0xee   : > { %1709 = vst [vmem:[#allocation2 + $0x1c0] sm:$0xf] %v1708_v20  ;;  %v1714_v34 = vsel %vm13740_vm6, %v1168_v60, %v1713_v12  ;;  %v12175_v18 = vld [vmem:[#allocation2 + $0x120] sm:$0xf]  ;;  %v299_v5 = vld [vmem:[#allocation2 + $0x88] sm:$0x1] }
  0xef   : > { %1715 = vst [vmem:[#allocation2 + $0x1c8] sm:$0xf] %v1714_v34  ;;  %v14294_v42 = vrot.slane %v1291_v46, 7  ;;  %v300_v60 = vsel %vm13721_vm4, 0, %v299_v5  ;;  %v1288_v34 = vor.u32 %v1286_v35, %v14290_v10  ;;  %v744_v46 = vld [vmem:[%s13699_s25 + $0x38] sm:$0xf] }
  0xf0   : > { %16896 = vst [vmem:[#allocation43_spill] sm:$0xff] %v14290_v10  ;;  %v13000_v53 = vld [vmem:[#allocation2 + $0x124] sm:$0xf0]  ;;  %v899_v24 = vshrl.u32 %v743_v21, 16  ;;  %v902_v12 = vshll.u32 %v743_v21, 16 }
  0xf1   : > { %16897 = vst [vmem:[#allocation44_spill] sm:$0xff] %v14294_v42  ;;  %v12176_v32 = vor.u32 %v13000_v53, %v12175_v18  ;;  %v1296_v57 = vor.u32 %v1294_v4, %v14294_v42  ;;  %v907_v18 = vshrl.u32 %v744_v46, 16  ;;  %v910_v53 = vshll.u32 %v744_v46, 16  ;;  %v490_v35 = vld [vmem:[#allocation2 + $0x4] sm:$0x1]  ;;  %v14335_v55 = vpop.f32.mrf.mxu2 }
  0xf2   : > { %298 = vst [vmem:[#allocation2 + $0x80] sm:$0x1] %v297_v33  ;;  %v1803_v45 = vld [vmem:[#allocation2 + $0x260] sm:$0xf]  ;;  %v14305_v33 = vpop.f32.mrf.mxu1  ;;  %v14312_v49 = vrot.slane %v899_v24, 7 }
  0xf3   : > { %301 = vst [vmem:[#allocation2 + $0x88] sm:$0x1] %v300_v60  ;;  %2224 = vmatmul.bf16.gmra.mxu1 %v12176_v32  ;;  %v1804_v5 = vsel %vm13740_vm6, %v1288_v34, %v1803_v45  ;;  %v1809_v20 = vld [vmem:[#allocation2 + $0x268] sm:$0xf]  ;;  %v14314_v10 = vrot.slane %v907_v18, 7  ;;  %v13136_v32 = vld [vmem:[#allocation7 + $0x1b8] sm:$0xff] }
  0xf4   : > { %16898 = vst [vmem:[#allocation45_spill] sm:$0xff] %v14305_v33  ;;  %v1810_v4 = vsel %vm13740_vm6, %v1296_v57, %v1809_v20  ;;  %v904_v46 = vor.u32 %v902_v12, %v14312_v49  ;;  %v491_v57 = vsel %vm13715_vm3, 0, %v490_v35  ;;  %v494_v18 = vsel %vm13715_vm3, 0, %v493_v22  ;;  %8672 = vmatpush.bf16.msra.mxu2 %v13136_v32  ;;  %v14327_v12 = vpop.f32.mrf.mxu0  ;;  %v2376_v34 = vld [vmem:[#allocation2 + $0x8] sm:$0xf] }
  0xf5   : > { %v12207_v60 = vld [vmem:[#allocation2 + $0x1c0] sm:$0xf]  ;;  %1805 = vst [vmem:[#allocation2 + $0x260] sm:$0xf] %v1804_v5  ;;  %v912_v20 = vor.u32 %v910_v53, %v14314_v10  ;;  %v2523_v45 = vshll.u32 %v2376_v34, 16  ;;  %v14337_v5 = vpop.f32.mrf.mxu3 }
  0xf6   : > { %v13008_v42 = vld [vmem:[#allocation2 + $0x1c4] sm:$0xf0]  ;;  %1811 = vst [vmem:[#allocation2 + $0x268] sm:$0xf] %v1810_v4  ;;  %v2374_v4 = vld [vmem:[#allocation2] sm:$0xf] }
  0xf7   : > { %v12208_v21 = vor.u32 %v13008_v42, %v12207_v60  ;;  %492 = vst [vmem:[#allocation2 + $0x4] sm:$0x1] %v491_v57  ;;  %v2520_v57 = vshrl.u32 %v2376_v34, 16  ;;  %v14345_v32 = vld [vmem:[#allocation2 + $0x8] sm:$0xe] }
  0xf8   : > { %495 = vst [vmem:[#allocation2 + $0xc] sm:$0x1] %v494_v18  ;;  %v13144_v18 = vld [vmem:[#allocation7 + $0x1f8] sm:$0xff] }
  0xf9   : > { %v1515_v24 = vld [vmem:[#allocation2 + $0x80] sm:$0xf]  ;;  %2264 = vmatmul.bf16.gmra.mxu2 %v12208_v21  ;;  %v2506_v21 = vshrl.u32 %v2374_v4, 16  ;;  %16899 = vst [vmem:[#allocation46_spill] sm:$0xff] %v14335_v55  ;;  %v2525_v55 = vrot.slane %v2523_v45, 5  ;;  %10250 = vmatpush.bf16.msra.mxu3 %v13144_v18 }
  0xfa   : > { %v1516_v42 = vsel %vm13740_vm6, %v904_v46, %v1515_v24  ;;  %v1521_v60 = vld [vmem:[#allocation2 + $0x88] sm:$0xf]  ;;  %v2509_v46 = vshll.u32 %v2374_v4, 16  ;;  %16900 = vst [vmem:[#allocation47_spill] sm:$0xff] %v14337_v5  ;;  %v14341_v58 = vpop.f32.mrf.mxu1  ;;  %v14343_v4 = vld [vmem:[#allocation2] sm:$0xe] }
  0xfb   : > { %1517 = vst [vmem:[#allocation2 + $0x80] sm:$0xf] %v1516_v42  ;;  %v1522_v35 = vsel %vm13740_vm6, %v912_v20, %v1521_v60  ;;  %v2508_v53 = vrot.slane %v2506_v21, 4  ;;  %v13096_v5 = vld [vmem:[#allocation7 + $0x178] sm:$0xff]  ;;  %v2522_v20 = vrot.slane %v2520_v57, 4 }
  0xfc   : > { %1523 = vst [vmem:[#allocation2 + $0x88] sm:$0xf] %v1522_v35  ;;  %v12239_v24 = vld [vmem:[#allocation2 + $0x260] sm:$0xf]  ;;  %v2511_v22 = vrot.slane %v2509_v46, 5  ;;  %7989 = vmatpush.bf16.msra.mxu1 %v13096_v5 }
  0xfd   : > { %v13016_v60 = vld [vmem:[#allocation2 + $0x264] sm:$0xf0]  ;;  %16901 = vst [vmem:[#allocation48_spill] sm:$0xff] %v14341_v58  ;;  %v496_v21 = vld [vmem:[#allocation2 + $0x14] sm:$0x1]  ;;  %v14353_v58 = vpop.f32.mrf.mxu0  ;;  %v2526_v18 = vor.u32 %v2525_v55, %v2522_v20 }
  0xfe   : > { %v12240_v35 = vor.u32 %v13016_v60, %v12239_v24  ;;  %v2512_v34 = vor.u32 %v2511_v22, %v2508_v53  ;;  %v2375_v42 = vld [vmem:[#allocation2 + $0x4] sm:$0x1]  ;;  %v12305_v24 = vrot.slane %v14343_v4, 9  ;;  %v497_v60 = vsel %vm13715_vm3, 0, %v496_v21  ;;  %v13152_v22 = vld [vmem:[#allocation7 + $0x238] sm:$0xff] }
  0xff   : > { %v3956_v36 = vld [vmem:[#allocation2 + $0x4] sm:$0x1]  ;;  %498 = vst [vmem:[#allocation2 + $0x14] sm:$0x1] %v497_v60  ;;  %v2515_v45 = vshll.u32 %v2375_v42, 16  ;;  %v16902_v4 = vrot.slane %v13814_v51, 4  ;;  %11316 = vmatpush.bf16.msra.mxu0 %v13152_v22  ;;  %v14359_v60 = vpop.f32.mrf.mxu2 }
 0x100   : > { %2304 = vmatmul.bf16.gmra.mxu3 %v12240_v35  ;;  %v1440_v35 = vld [vmem:[#allocation2 + $0xc] sm:$0x1]  ;;  %v14351_v15 = vrot.slane %v2512_v34, 4  ;;  %v5706_v57 = vld [vmem:[#allocation2 + $0x8] sm:$0xf]  ;;  %16903 = vst [vmem:[#allocation49_spill] sm:$0xff] %v14359_v60 }
 0x101   : > { %v1441_v21 = vsel %vm13721_vm4, %v16902_v4, %v1440_v35  ;;  %v5708_v5 = vld [vmem:[#allocation2 + $0x10] sm:$0xf]  ;;  %v5835_v23 = vshrl.u32 %v5706_v57, 16  ;;  %v5838_v33 = vshll.u32 %v5706_v57, 16  ;;  %v499_v34 = vld [vmem:[#allocation2 + $0x1c] sm:$0x1] }
 0x102   : > { %v12143_v46 = vld [vmem:[#allocation2 + $0x80] sm:$0xf]  ;;  %1442 = vst [vmem:[#allocation2 + $0xc] sm:$0x1] %v1441_v21  ;;  %v4216_v42 = vrot.slane %v3956_v36, 5  ;;  %v5852_v53 = vshll.u32 %v5708_v5, 16  ;;  %v14371_v36 = vpop.f32.mrf.mxu1 }
 0x103   : > { %v12992_v19 = vld [vmem:[#allocation2 + $0x84] sm:$0xf0]  ;;  %v500_v51 = vsel %vm13715_vm3, 0, %v499_v34  ;;  %v5837_v30 = vrot.slane %v5835_v23, 4  ;;  %v5840_v35 = vrot.slane %v5838_v33, 5  ;;  %16907 = vst [vmem:[#allocation51_spill] sm:$0xff] %v14371_v36 }
 0x104   : > { %v12144_v17 = vor.u32 %v12992_v19, %v12143_v46  ;;  %v14361_v19 = vpop.f32.mrf.mxu3  ;;  %v5849_v46 = vshrl.u32 %v5708_v5, 16  ;;  %501 = vst [vmem:[#allocation2 + $0x1c] sm:$0x1] %v500_v51  ;;  %v2378_v55 = vld [vmem:[#allocation2 + $0x10] sm:$0xf]  ;;  %v5854_v4 = vrot.slane %v5852_v53, 5 }
 0x105   : > { %16904 = vst [vmem:[#allocation50_spill] sm:$0xff] %v14361_v19  ;;  %v12403_v22 = vld [vmem:[#allocation2 + $0x8] sm:$0xf]  ;;  %v13041_v57 = vld [vmem:[#allocation2 + $0xc] sm:$0xf0]  ;;  %v2534_v5 = vshrl.u32 %v2378_v55, 16  ;;  %v5841_v23 = vor.u32 %v5840_v35, %v5837_v30 }
 0x106   : > { %2184 = vmatmul.bf16.gmra.mxu0 %v12144_v17  ;;  %v5851_v17 = vrot.slane %v5849_v46, 4  ;;  %v2380_v21 = vld [vmem:[#allocation2 + $0x18] sm:$0xf]  ;;  %v2537_v19 = vshll.u32 %v2378_v55, 16  ;;  %v2517_v34 = vrot.slane %v2515_v45, 5  ;;  %v2527_v14 = vrot.slane %v2526_v18, 4 }
 0x107   : > { %v2548_v33 = vshrl.u32 %v2380_v21, 16  ;;  %v2551_v51 = vshll.u32 %v2380_v21, 16  ;;  %v14373_v60 = vld [vmem:[#allocation2 + $0x10] sm:$0xe]  ;;  %v1446_v46 = vld [vmem:[#allocation2 + $0x14] sm:$0x1]  ;;  %v4217_v55 = vsel %vm14367_vm11, %v12305_v24, %v4216_v42  ;;  %v12404_v42 = vor.u32 %v13041_v57, %v12403_v22 }
 0x108   : > { %v5855_v53 = vor.u32 %v5854_v4, %v5851_v17  ;;  %v2536_v54 = vrot.slane %v2534_v5, 4  ;;  %v2539_v36 = vrot.slane %v2537_v19, 5  ;;  %v16910_v30 = vrot.slane %v13922_v63, 4  ;;  %v502_v57 = vld [vmem:[#allocation2 + $0x24] sm:$0x1] }
 0x109   : > { %v2550_v35 = vrot.slane %v2548_v33, 4  ;;  %v2553_v21 = vrot.slane %v2551_v51, 5  ;;  %v14389_v38 = vrot.slane %v5841_v23, 4  ;;  %v12307_v19 = vrot.slane %v14373_v60, 9  ;;  %v2377_v4 = vld [vmem:[#allocation2 + $0xc] sm:$0x1]  ;;  %v14397_v33 = vpop.f32.mrf.mxu2 }
 0x10a   : > { %v1447_v45 = vsel %vm13721_vm4, %v16910_v30, %v1446_v46  ;;  %v14391_v18 = vrot.slane %v5855_v53, 4  ;;  %v2540_v17 = vor.u32 %v2539_v36, %v2536_v54  ;;  %v2518_v63 = vsel %vm14377_vm12, %v14351_v15, %v2517_v34  ;;  %v3958_v24 = vld [vmem:[#allocation2 + $0xc] sm:$0x1]  ;;  %16911 = vst [vmem:[#allocation52_spill] sm:$0xff] %v14397_v33  ;;  %v14401_v53 = vpop.f32.mrf.mxu0  ;;  %v5710_v33 = vld [vmem:[#allocation2 + $0x18] sm:$0xf] }
 0x10b   : > { %1448 = vst [vmem:[#allocation2 + $0x14] sm:$0x1] %v1447_v45  ;;  %v5707_v5 = vld [vmem:[#allocation2 + $0xc] sm:$0x1]  ;;  %v2529_v46 = vshll.u32 %v2377_v4, 16  ;;  %v4220_v23 = vrot.slane %v3958_v24, 5  ;;  %v2554_v36 = vor.u32 %v2553_v21, %v2550_v35  ;;  %v4487_v60 = vunpack.c.l.b16 %v4217_v55 }
 0x10c   : > { %v14399_v51 = vpop.f32.mrf.mxu3  ;;  %v5844_v30 = vshll.u32 %v5707_v5, 16  ;;  %16913 = vst [vmem:[#allocation54_spill] sm:$0xff] %v14401_v53  ;;  %v1452_v54 = vld [vmem:[#allocation2 + $0x1c] sm:$0x1]  ;;  %v16914_v45 = vrot.slane %v13935_v26, 4  ;;  %v14407_v34 = vrot.slane %v2540_v17, 4  ;;  %v3418_v55 = vunpack.c.l.b16 %v2518_v63 }
 0x10d   : > { %16912 = vst [vmem:[#allocation53_spill] sm:$0xff] %v14399_v51  ;;  %v2531_v51 = vrot.slane %v2529_v46, 5  ;;  %v16915_v4 = vrot.slane %v14345_v32, 9  ;;  %v503_v26 = vsel %vm13715_vm3, 0, %v502_v57  ;;  %v5712_v21 = vld [vmem:[#allocation2 + $0x20] sm:$0xf] }
 0x10e   : > { %v1453_v15 = vsel %vm13721_vm4, %v16914_v45, %v1452_v54  ;;  %v5846_v5 = vrot.slane %v5844_v30, 5  ;;  %504 = vst [vmem:[#allocation2 + $0x24] sm:$0x1] %v503_v26  ;;  %v5863_v17 = vshrl.u32 %v5710_v33, 16  ;;  %v5866_v54 = vshll.u32 %v5710_v33, 16 }
 0x10f   : > { %v4221_v24 = vsel %vm14367_vm11, %v16915_v4, %v4220_v23  ;;  %1454 = vst [vmem:[#allocation2 + $0x1c] sm:$0x1] %v1453_v15  ;;  %v2532_v46 = vsel %vm14377_vm12, %v2527_v14, %v2531_v51  ;;  %v14418_v45 = vrot.slane %v2554_v36, 4  ;;  %v14420_v32 = vld [vmem:[#allocation2 + $0x18] sm:$0xf]  ;;  %v5877_v23 = vshrl.u32 %v5712_v21, 16  ;;  %v14422_v15 = vpop.f32.mrf.mxu1 }
 0x110   : > { %v4488_v35 = vunpack.c.l.b16 %v4221_v24  ;;  %5353 = vmatmul.bf16.vlgmr.msrb.gmra.mxu3 %v12404_v42  ;;  %v5880_v30 = vshll.u32 %v5712_v21, 16  ;;  %16916 = vst [vmem:[#allocation55_spill] sm:$0xff] %v14422_v15  ;;  %v505_v4 = vld [vmem:[#allocation2 + $0x2c] sm:$0x1]  ;;  %v3419_v57 = vunpack.c.l.b16 %v2532_v46  ;;  %v5847_v42 = vsel %vm14377_vm12, %v14389_v38, %v5846_v5  ;;  %v14427_v36 = vld [vmem:[#allocation2 + $0x1c] sm:$0xf0] }
 0x111   : > { %v5865_v61 = vrot.slane %v5863_v17, 4  ;;  %v5868_v21 = vrot.slane %v5866_v54, 5  ;;  %v5879_v15 = vrot.slane %v5877_v23, 4  ;;  %v14433_v38 = vpop.f32.mrf.mxu2 }
 0x112   : > { %v4551_v63 = vpack.c.b16 %v4488_v35, %v4487_v60  ;;  %v5709_v24 = vld [vmem:[#allocation2 + $0x14] sm:$0x1]  ;;  %v3482_v59 = vpack.c.b16 %v3419_v57, %v3418_v55  ;;  %v5882_v53 = vrot.slane %v5880_v30, 5  ;;  %16917 = vst [vmem:[#allocation56_spill] sm:$0xff] %v14433_v38  ;;  %v6747_v55 = vunpack.c.l.b16 %v5847_v42 }
 0x113   : > { %v2379_v33 = vld [vmem:[#allocation2 + $0x14] sm:$0x1]  ;;  %v5858_v22 = vshll.u32 %v5709_v24, 16  ;;  %v506_v24 = vsel %vm13715_vm3, 0, %v505_v4  ;;  %v5869_v30 = vor.u32 %v5868_v21, %v5865_v61 }
 0x114   : > { %v3960_v26 = vld [vmem:[#allocation2 + $0x14] sm:$0x1]  ;;  %v2543_v14 = vshll.u32 %v2379_v33, 16  ;;  %4671 = vmatmul.bf16.vlgmr.msrb.gmra.mxu2 %v4551_v63  ;;  %v14435_v5 = vpop.f32.mrf.mxu3  ;;  %v2382_v33 = vld [vmem:[#allocation2 + $0x20] sm:$0xf]  ;;  %3602 = vmatmul.bf16.vlgmr.msrb.gmra.mxu1 %v3482_v59  ;;  %v14447_v59 = vpop.f32.mrf.mxu0 }
 0x115   : > { %v4224_v51 = vrot.slane %v3960_v26, 5  ;;  %v5860_v46 = vrot.slane %v5858_v22, 5  ;;  %16918 = vst [vmem:[#allocation57_spill] sm:$0xff] %v14435_v5  ;;  %v12408_v22 = vor.u32 %v14427_v36, %v14420_v32  ;;  %v1458_v26 = vld [vmem:[#allocation2 + $0x24] sm:$0x1]  ;;  %v16919_v32 = vrot.slane %v13999_v27, 4 }
 0x116   : > { %v2545_v60 = vrot.slane %v2543_v14, 5  ;;  %v2381_v17 = vld [vmem:[#allocation2 + $0x1c] sm:$0x1]  ;;  %507 = vst [vmem:[#allocation2 + $0x2c] sm:$0x1] %v506_v24 }
 0x117   : > { %v14431_v35 = vsel %vm14367_vm11, %v12307_v19, %v4224_v51  ;;  %v3962_v54 = vld [vmem:[#allocation2 + $0x1c] sm:$0x1]  ;;  %v5861_v19 = vsel %vm14377_vm12, %v14391_v18, %v5860_v46  ;;  %v2557_v63 = vshll.u32 %v2381_v17, 16  ;;  %v1459_v61 = vsel %vm13721_vm4, %v16919_v32, %v1458_v26  ;;  %v2384_v18 = vld [vmem:[#allocation2 + $0x28] sm:$0xf] }
 0x118   : > { %v5711_v23 = vld [vmem:[#allocation2 + $0x1c] sm:$0x1]  ;;  %v2546_v57 = vsel %vm14377_vm12, %v14407_v34, %v2545_v60  ;;  %v4228_v4 = vrot.slane %v3962_v54, 5  ;;  %v6748_v42 = vunpack.c.l.b16 %v5861_v19  ;;  %v4489_v14 = vunpack.c.l.b16 %v14431_v35  ;;  %1460 = vst [vmem:[#allocation2 + $0x24] sm:$0x1] %v1459_v61 }
 0x119   : > { %v5883_v51 = vor.u32 %v5882_v53, %v5879_v15  ;;  %v2559_v36 = vrot.slane %v2557_v63, 5  ;;  %v14454_v21 = vunpack.c.l.b16 %v2546_v57  ;;  %v16920_v34 = vrot.slane %v14387_v39, 9  ;;  %v14463_v15 = vpop.f32.mrf.mxu1  ;;  %v3963_v63 = vld [vmem:[#allocation2 + $0x20] sm:$0xe] }
 0x11a   : > { %v5872_v60 = vshll.u32 %v5711_v23, 16  ;;  %v6811_v24 = vpack.c.b16 %v6748_v42, %v6747_v55  ;;  %v5870_v17 = vrot.slane %v5869_v30, 4  ;;  %v2562_v35 = vshrl.u32 %v2382_v33, 16  ;;  %v508_v23 = vld [vmem:[#allocation2 + $0x34] sm:$0x1] }
 0x11b   : > { %v4229_v46 = vsel %vm14367_vm11, %v16920_v34, %v4228_v4  ;;  %v2565_v54 = vshll.u32 %v2382_v33, 16  ;;  %v2560_v27 = vsel %vm14377_vm12, %v14418_v45, %v2559_v36  ;;  %v2576_v19 = vshrl.u32 %v2384_v18, 16 }
 0x11c   : > { %v4490_v53 = vunpack.c.l.b16 %v4229_v46  ;;  %v2579_v57 = vshll.u32 %v2384_v18, 16  ;;  %6931 = vmatmul.bf16.vlgmr.msrb.gmra.mxu0 %v6811_v24  ;;  %v3421_v39 = vunpack.c.l.b16 %v2560_v27  ;;  %v5874_v26 = vrot.slane %v5872_v60, 5  ;;  %v5714_v46 = vld [vmem:[#allocation2 + $0x28] sm:$0xf]  ;;  %v14474_v27 = vpop.f32.mrf.mxu2 }
 0x11d   : > { %v2564_v4 = vrot.slane %v2562_v35, 4  ;;  %v2567_v32 = vrot.slane %v2565_v54, 5  ;;  %v2578_v30 = vrot.slane %v2576_v19, 4  ;;  %v5884_v61 = vrot.slane %v5883_v51, 4  ;;  %v1464_v36 = vld [vmem:[#allocation2 + $0x2c] sm:$0x1]  ;;  %v14476_v19 = vpop.f32.mrf.mxu3 }
 0x11e   : > { %v2581_v42 = vrot.slane %v2579_v57, 5  ;;  %v16921_v18 = vrot.slane %v14001_v28, 4  ;;  %v12309_v24 = vrot.slane %v3963_v63, 9  ;;  %v509_v35 = vsel %vm13715_vm3, 0, %v508_v23  ;;  %v5716_v54 = vld [vmem:[#allocation2 + $0x30] sm:$0xf] }
 0x11f   : > { %v2568_v34 = vor.u32 %v2567_v32, %v2564_v4  ;;  %16922 = vst [vmem:[#allocation58_spill] sm:$0xff] %v14474_v27  ;;  %v511_v57 = vld [vmem:[#allocation2 + $0x3c] sm:$0x1]  ;;  %v3483_v51 = vpack.c.b16 %v3421_v39, %v14454_v21  ;;  %v4552_v33 = vpack.c.b16 %v4490_v53, %v4489_v14  ;;  %v5713_v4 = vld [vmem:[#allocation2 + $0x24] sm:$0x1]  ;;  %v5875_v28 = vsel %vm14377_vm12, %v5870_v17, %v5874_v26 }
 0x120   : > { %v1465_v60 = vsel %vm13721_vm4, %v16921_v18, %v1464_v36  ;;  %16923 = vst [vmem:[#allocation59_spill] sm:$0xff] %v14476_v19  ;;  %5358 = vmatmul.bf16.gmra.mxu3 %v12408_v22  ;;  %v2383_v32 = vld [vmem:[#allocation2 + $0x24] sm:$0x1]  ;;  %v5886_v63 = vshll.u32 %v5713_v4, 16  ;;  %v14481_v36 = vpop.f32.mrf.mxu0  ;;  %v2582_v55 = vor.u32 %v2581_v42, %v2578_v30  ;;  %v3965_v19 = vld [vmem:[#allocation2 + $0x28] sm:$0xe] }
 0x121   : > { %1466 = vst [vmem:[#allocation2 + $0x2c] sm:$0x1] %v1465_v60  ;;  %v14483_v23 = vrot.slane %v2568_v34, 4  ;;  %v2571_v18 = vshll.u32 %v2383_v32, 16  ;;  %v3964_v45 = vld [vmem:[#allocation2 + $0x24] sm:$0x1]  ;;  %v6749_v60 = vunpack.c.l.b16 %v5875_v28 }
 0x122   : > { %v4232_v5 = vrot.slane %v3964_v45, 5  ;;  %510 = vst [vmem:[#allocation2 + $0x34] sm:$0x1] %v509_v35  ;;  %v5891_v21 = vshrl.u32 %v5714_v46, 16  ;;  %v5894_v14 = vshll.u32 %v5714_v46, 16  ;;  %v5905_v22 = vshrl.u32 %v5716_v54, 16 }
 0x123   : > { %v5888_v53 = vrot.slane %v5886_v63, 5  ;;  %v2573_v39 = vrot.slane %v2571_v18, 5  ;;  %v5908_v7 = vshll.u32 %v5716_v54, 16  ;;  %v512_v17 = vsel %vm13715_vm3, 0, %v511_v57  ;;  %v2386_v26 = vld [vmem:[#allocation2 + $0x30] sm:$0xf]  ;;  %v14492_v54 = vpop.f32.mrf.mxu1 }
 0x124   : > { %4676 = vmatmul.bf16.gmra.mxu2 %v4552_v33  ;;  %v4233_v34 = vsel %vm14367_vm11, %v12309_v24, %v4232_v5  ;;  %v5893_v30 = vrot.slane %v5891_v21, 4  ;;  %v5896_v42 = vrot.slane %v5894_v14, 5  ;;  %513 = vst [vmem:[#allocation2 + $0x3c] sm:$0x1] %v512_v17  ;;  %v849_v45 = vrot.slane %v14067_v43, 4  ;;  %3607 = vmatmul.bf16.gmra.mxu1 %v3483_v51 }
 0x125   : > { %v5889_v46 = vsel %vm14377_vm12, %v5884_v61, %v5888_v53  ;;  %v5907_v35 = vrot.slane %v5905_v22, 4  ;;  %v5910_v4 = vrot.slane %v5908_v7, 5  ;;  %16924 = vst [vmem:[#allocation60_spill] sm:$0xff] %v14492_v54  ;;  %v2583_v32 = vrot.slane %v2582_v55, 4  ;;  %v2388_v28 = vld [vmem:[#allocation2 + $0x38] sm:$0xf]  ;;  %v14499_v27 = vpop.f32.mrf.mxu3 }
 0x126   : > { %v6750_v57 = vunpack.c.l.b16 %v5889_v46  ;;  %v12310_v33 = vrot.slane %v3965_v19, 9  ;;  %v2590_v63 = vshrl.u32 %v2386_v26, 16  ;;  %v2574_v5 = vsel %vm14377_vm12, %v14483_v23, %v2573_v39  ;;  %v12411_v7 = vld [vmem:[#allocation2 + $0x28] sm:$0xf]  ;;  %v13043_v53 = vld [vmem:[#allocation2 + $0x2c] sm:$0xf0]  ;;  %v14497_v46 = vpop.f32.mrf.mxu2 }
 0x127   : > { %v4491_v43 = vunpack.c.l.b16 %v4233_v34  ;;  %v5897_v51 = vor.u32 %v5896_v42, %v5893_v30  ;;  %v5911_v19 = vor.u32 %v5910_v4, %v5907_v35  ;;  %16925 = vst [vmem:[#allocation61_spill] sm:$0xff] %v14497_v46  ;;  %v2593_v38 = vshll.u32 %v2386_v26, 16  ;;  %v272_v30 = vld [vmem:[#allocation2 + $0x40] sm:$0x1]  ;;  %v14508_v42 = vld [vmem:[%s13699_s25 + $0x1c] sm:$0xf] }
 0x128   : > { %v2385_v18 = vld [vmem:[#allocation2 + $0x2c] sm:$0x1]  ;;  %v6812_v14 = vpack.c.b16 %v6750_v57, %v6749_v60  ;;  %16926 = vst [vmem:[#allocation62_spill] sm:$0xff] %v14499_v27  ;;  %v2592_v52 = vrot.slane %v2590_v63, 4  ;;  %v16927_v60 = vrot.slane %v14063_v40, 4  ;;  %v2604_v57 = vshrl.u32 %v2388_v28, 16  ;;  %v14511_v63 = vpop.f32.mrf.mxu0 }
 0x129   : > { %v3966_v24 = vld [vmem:[#allocation2 + $0x2c] sm:$0x1]  ;;  %v2585_v61 = vshll.u32 %v2385_v18, 16  ;;  %v1470_v17 = vld [vmem:[#allocation2 + $0x34] sm:$0x1]  ;;  %v12412_v18 = vor.u32 %v13043_v53, %v12411_v7  ;;  %v3422_v7 = vunpack.c.l.b16 %v2574_v5  ;;  %v5898_v53 = vrot.slane %v5897_v51, 4 }
 0x12a   : > { %v5715_v21 = vld [vmem:[#allocation2 + $0x2c] sm:$0x1]  ;;  %v4236_v22 = vrot.slane %v3966_v24, 5  ;;  %v1471_v34 = vsel %vm13721_vm4, %v16927_v60, %v1470_v17  ;;  %v2595_v24 = vrot.slane %v2593_v38, 5  ;;  %v14517_v17 = vld [vmem:[#allocation2 + $0x30] sm:$0xe] }
 0x12b   : > { %v5900_v55 = vshll.u32 %v5715_v21, 16  ;;  %v2587_v23 = vrot.slane %v2585_v61, 5  ;;  %1472 = vst [vmem:[#allocation2 + $0x34] sm:$0x1] %v1471_v34  ;;  %v1476_v26 = vld [vmem:[#allocation2 + $0x3c] sm:$0x1]  ;;  %v14523_v46 = vpop.f32.mrf.mxu1 }
 0x12c   : > { %v4237_v39 = vsel %vm14367_vm11, %v12310_v33, %v4236_v22  ;;  %v514_v21 = vld [vmem:[#allocation2 + $0x44] sm:$0x1]  ;;  %6936 = vmatmul.bf16.gmra.mxu0 %v6812_v14  ;;  %v1477_v33 = vsel %vm13721_vm4, %v849_v45, %v1476_v26  ;;  %v2606_v61 = vrot.slane %v2604_v57, 4  ;;  %v2607_v22 = vshll.u32 %v2388_v28, 16  ;;  %v14519_v60 = vld [vmem:[#allocation2 + $0x38] sm:$0xe] }
 0x12d   : > { %v4492_v4 = vunpack.c.l.b16 %v4237_v39  ;;  %v2588_v40 = vsel %vm14377_vm12, %v2583_v32, %v2587_v23  ;;  %v14521_v39 = vrot.slane %v5911_v19, 4  ;;  %1478 = vst [vmem:[#allocation2 + $0x3c] sm:$0x1] %v1477_v33  ;;  %v2596_v38 = vor.u32 %v2595_v24, %v2592_v52  ;;  %v5718_v34 = vld [vmem:[#allocation2 + $0x38] sm:$0xf] }
 0x12e   : > { %v3423_v14 = vunpack.c.l.b16 %v2588_v40  ;;  %v5902_v27 = vrot.slane %v5900_v55, 5  ;;  %v2609_v32 = vrot.slane %v2607_v22, 5  ;;  %v520_v23 = vld [vmem:[#allocation2 + $0x54] sm:$0x1]  ;;  %16928 = vst [vmem:[#allocation63_spill] sm:$0xff] %v14523_v46  ;;  %v12311_v45 = vrot.slane %v14517_v17, 9 }
 0x12f   : > { %v4553_v35 = vpack.c.b16 %v4492_v4, %v4491_v43  ;;  %v12312_v28 = vrot.slane %v14519_v60, 9  ;;  %v273_v5 = vsel %vm13721_vm4, 0, %v272_v30  ;;  %v851_v51 = vshrl.u32 %v14508_v42, 16  ;;  %v523_v19 = vld [vmem:[#allocation2 + $0x5c] sm:$0x1] }
 0x130   : > { %5363 = vmatmul.bf16.gmra.mxu3 %v12412_v18  ;;  %v2610_v52 = vor.u32 %v2609_v32, %v2606_v61  ;;  %274 = vst [vmem:[#allocation2 + $0x40] sm:$0x1] %v273_v5  ;;  %v854_v43 = vshll.u32 %v14508_v42, 16  ;;  %v515_v55 = vsel %vm13715_vm3, 0, %v514_v21  ;;  %v5919_v57 = vshrl.u32 %v5718_v34, 16  ;;  %v14541_v5 = vpop.f32.mrf.mxu2 }
 0x131   : > { %v2597_v4 = vrot.slane %v2596_v38, 4  ;;  %v853_v26 = vrot.slane %v851_v51, 7  ;;  %516 = vst [vmem:[#allocation2 + $0x44] sm:$0x1] %v515_v55  ;;  %v5922_v24 = vshll.u32 %v5718_v34, 16  ;;  %v521_v40 = vsel %vm13715_vm3, 0, %v520_v23  ;;  %v14543_v23 = vpop.f32.mrf.mxu3 }
 0x132   : > { %v14535_v30 = vld [vmem:[#allocation2 + $0x50] sm:$0xf]  ;;  %v3484_v33 = vpack.c.b16 %v3423_v14, %v3422_v7  ;;  %v5717_v22 = vld [vmem:[#allocation2 + $0x34] sm:$0x1]  ;;  %v5903_v18 = vsel %vm14377_vm12, %v5898_v53, %v5902_v27  ;;  %v2611_v42 = vrot.slane %v2610_v52, 4  ;;  %v524_v21 = vsel %vm13715_vm3, 0, %v523_v19  ;;  %v14545_v52 = vpop.f32.mrf.mxu0 }
 0x133   : > { %v2387_v61 = vld [vmem:[#allocation2 + $0x34] sm:$0x1]  ;;  %v5914_v17 = vshll.u32 %v5717_v22, 16  ;;  %v857_v32 = vrot.slane %v853_v26, 4  ;;  %v5921_v34 = vrot.slane %v5919_v57, 4  ;;  %16929 = vst [vmem:[#allocation64_spill] sm:$0xff] %v14541_v5  ;;  %v856_v55 = vor.u32 %v854_v43, %v853_v26 }
 0x134   : > { %v2599_v60 = vshll.u32 %v2387_v61, 16  ;;  %v3968_v38 = vld [vmem:[#allocation2 + $0x34] sm:$0x1]  ;;  %16930 = vst [vmem:[#allocation65_spill] sm:$0xff] %v14543_v23  ;;  %4681 = vmatmul.bf16.gmra.mxu2 %v4553_v35  ;;  %v2389_v7 = vld [vmem:[#allocation2 + $0x3c] sm:$0x1]  ;;  %3612 = vmatmul.bf16.gmra.mxu1 %v3484_v33  ;;  %v6751_v5 = vunpack.c.l.b16 %v5903_v18 }
 0x135   : > { %v3970_v14 = vld [vmem:[#allocation2 + $0x3c] sm:$0x1]  ;;  %v4240_v51 = vrot.slane %v3968_v38, 5  ;;  %v5924_v27 = vrot.slane %v5922_v24, 5  ;;  %v5916_v53 = vrot.slane %v5914_v17, 5  ;;  %v2613_v19 = vshll.u32 %v2389_v7, 16 }
 0x136   : > { %v2601_v46 = vrot.slane %v2599_v60, 5  ;;  %v4244_v22 = vrot.slane %v3970_v14, 5  ;;  %v5719_v61 = vld [vmem:[#allocation2 + $0x3c] sm:$0x1]  ;;  %522 = vst [vmem:[#allocation2 + $0x54] sm:$0x1] %v521_v40 }
 0x137   : > { %v2618_v35 = vshrl.u32 %v14535_v30, 16  ;;  %v5917_v43 = vsel %vm14377_vm12, %v14521_v39, %v5916_v53  ;;  %v2615_v24 = vrot.slane %v2613_v19, 5  ;;  %v1479_v17 = vld [vmem:[#allocation2 + $0x40] sm:$0xf]  ;;  %525 = vst [vmem:[#allocation2 + $0x5c] sm:$0x1] %v524_v21  ;;  %v4241_v7 = vsel %vm14367_vm11, %v12311_v45, %v4240_v51  ;;  %v14565_v21 = vpop.f32.mrf.mxu1 }
 0x138   : > { %v2602_v26 = vsel %vm14377_vm12, %v2597_v4, %v2601_v46  ;;  %v13135_v60 = vld [vmem:[#allocation7 + $0x1b0] sm:$0xff]  ;;  %v6752_v38 = vunpack.c.l.b16 %v5917_v43  ;;  %v1482_v33 = vld [vmem:[#allocation2 + $0x44] sm:$0x1]  ;;  %v5925_v18 = vor.u32 %v5924_v27, %v5921_v34  ;;  %v5928_v40 = vshll.u32 %v5719_v61, 16  ;;  %v2392_v14 = vld [vmem:[#allocation2 + $0x58] sm:$0xf] }
 0x139   : > { %v2616_v57 = vsel %vm14377_vm12, %v2611_v42, %v2615_v24  ;;  %v4245_v39 = vsel %vm14367_vm11, %v12312_v28, %v4244_v22  ;;  %v1480_v46 = vsel %vm13740_vm6, %v856_v55, %v1479_v17  ;;  %v1483_v4 = vsel %vm13721_vm4, %v857_v32, %v1482_v33  ;;  %16931 = vst [vmem:[#allocation66_spill] sm:$0xff] %v14565_v21  ;;  %v526_v42 = vld [vmem:[#allocation2 + $0x64] sm:$0x1]  ;;  %v14572_v22 = vld [vmem:[#allocation2 + $0x50] sm:$0xe] }
 0x13a   : > { %8673 = vmatpush.bf16.msra.mxu2 %v13135_v60  ;;  %v865_v45 = vrot.slane %v14108_v31, 4  ;;  %v6813_v51 = vpack.c.b16 %v6752_v38, %v6751_v5  ;;  %v14569_v27 = vunpack.c.l.b16 %v2602_v26  ;;  %1481 = vst [vmem:[#allocation2 + $0x40] sm:$0xf] %v1480_v46  ;;  %v2620_v28 = vrot.slane %v2618_v35, 4  ;;  %v14578_v5 = vld [vmem:[#allocation2 + $0x58] sm:$0xe]  ;;  %v14582_v35 = vpop.f32.mrf.mxu2 }
 0x13b   : > { %1484 = vst [vmem:[#allocation2 + $0x44] sm:$0x1] %v1483_v4  ;;  %v2621_v53 = vshll.u32 %v14535_v30, 16  ;;  %v2632_v55 = vshrl.u32 %v2392_v14, 16  ;;  %v2635_v19 = vshll.u32 %v2392_v14, 16  ;;  %v14574_v32 = vunpack.c.l.b16 %v2616_v57  ;;  %v14584_v30 = vpop.f32.mrf.mxu3  ;;  %v14591_v4 = vpop.f32.mrf.mxu0 }
 0x13c   : > { %6941 = vmatmul.bf16.gmra.mxu0 %v6813_v51  ;;  %v4493_v61 = vunpack.c.l.b16 %v4241_v7  ;;  %v4494_v31 = vunpack.c.l.b16 %v4245_v39  ;;  %v14576_v43 = vrot.slane %v5925_v18, 4  ;;  %v5722_v26 = vld [vmem:[#allocation2 + $0x58] sm:$0xf]  ;;  %v14580_v17 = vrot.slane %v5928_v40, 5  ;;  %16932 = vst [vmem:[#allocation67_spill] sm:$0xff] %v14582_v35 }
 0x13d   : > { %v12415_v24 = vld [vmem:[#allocation2 + $0x38] sm:$0xf]  ;;  %16933 = vst [vmem:[#allocation68_spill] sm:$0xff] %v14584_v30  ;;  %v2391_v60 = vld [vmem:[#allocation2 + $0x54] sm:$0x1]  ;;  %v2623_v38 = vrot.slane %v2621_v53, 5  ;;  %v3485_v8 = vpack.c.b16 %v14574_v32, %v14569_v27 }
 0x13e   : > { %v2634_v33 = vrot.slane %v2632_v55, 4  ;;  %v2637_v14 = vrot.slane %v2635_v19, 5  ;;  %v1488_v7 = vld [vmem:[#allocation2 + $0x5c] sm:$0x1]  ;;  %v3972_v39 = vld [vmem:[#allocation2 + $0x54] sm:$0x1]  ;;  %v4554_v34 = vpack.c.b16 %v4494_v31, %v4493_v61 }
 0x13f   : > { %v527_v18 = vsel %vm13715_vm3, 0, %v526_v42  ;;  %v14589_v46 = vld [vmem:[#allocation2 + $0x60] sm:$0xf]  ;;  %v1489_v40 = vsel %vm13721_vm4, %v865_v45, %v1488_v7  ;;  %v2624_v51 = vor.u32 %v2623_v38, %v2620_v28  ;;  %v2627_v54 = vshll.u32 %v2391_v60, 16  ;;  %v13143_v53 = vld [vmem:[#allocation7 + $0x1f0] sm:$0xff]  ;;  %v14603_v27 = vpop.f32.mrf.mxu1 }
 0x140   : > { %528 = vst [vmem:[#allocation2 + $0x64] sm:$0x1] %v527_v18  ;;  %v13095_v55 = vld [vmem:[#allocation7 + $0x170] sm:$0xff]  ;;  %v2638_v57 = vor.u32 %v2637_v14, %v2634_v33  ;;  %v12313_v30 = vrot.slane %v14572_v22, 9  ;;  %v5947_v23 = vshrl.u32 %v5722_v26, 16  ;;  %v5931_v45 = vsel %vm14377_vm12, %v14576_v43, %v14580_v17  ;;  %10251 = vmatpush.bf16.msra.mxu3 %v13143_v53 }
 0x141   : > { %v13151_v19 = vld [vmem:[#allocation7 + $0x230] sm:$0xff]  ;;  %1490 = vst [vmem:[#allocation2 + $0x5c] sm:$0x1] %v1489_v40  ;;  %v529_v42 = vld [vmem:[#allocation2 + $0x6c] sm:$0x1]  ;;  %v12314_v28 = vrot.slane %v14578_v5, 9  ;;  %7990 = vmatpush.bf16.msra.mxu1 %v13095_v55 }
 0x142   : > { %v13044_v35 = vld [vmem:[#allocation2 + $0x3c] sm:$0xf0]  ;;  %v5950_v60 = vshll.u32 %v5722_v26, 16  ;;  %v5721_v31 = vld [vmem:[#allocation2 + $0x44] sm:$0x1]  ;;  %v4248_v33 = vrot.slane %v3972_v39, 5  ;;  %11317 = vmatpush.bf16.msra.mxu0 %v13151_v19 }
 0x143   : > { %v5720_v21 = vld [vmem:[#allocation2 + $0x40] sm:$0xf]  ;;  %v12416_v61 = vor.u32 %v13044_v35, %v12415_v24  ;;  %v5942_v14 = vshll.u32 %v5721_v31, 16  ;;  %16934 = vst [vmem:[#allocation69_spill] sm:$0xff] %v14603_v27  ;;  %v2625_v32 = vrot.slane %v2624_v51, 4  ;;  %v2629_v7 = vrot.slane %v2627_v54, 5 }
 0x144   : > { %v5933_v22 = vshrl.u32 %v5720_v21, 16  ;;  %v5936_v38 = vshll.u32 %v5720_v21, 16  ;;  %v5961_v18 = vshrl.u32 %v14589_v46, 16  ;;  %v2394_v40 = vld [vmem:[#allocation2 + $0x60] sm:$0xf]  ;;  %4686 = vmatmul.bf16.gmra.mxu2 %v4554_v34  ;;  %v2639_v26 = vrot.slane %v2638_v57, 4  ;;  %3617 = vmatmul.bf16.gmra.mxu1 %v3485_v8  ;;  %v14617_v8 = vpop.f32.mrf.mxu3 }
 0x145   : > { %5368 = vmatmul.bf16.gmra.mxu3 %v12416_v61  ;;  %v5949_v17 = vrot.slane %v5947_v23, 4  ;;  %v5944_v24 = vrot.slane %v5942_v14, 5  ;;  %v5952_v35 = vrot.slane %v5950_v60, 5  ;;  %v5964_v21 = vshll.u32 %v14589_v46, 16  ;;  %v2396_v53 = vld [vmem:[#allocation2 + $0x68] sm:$0xf]  ;;  %7991 = vmatpush.bf16.msra.mxu1 %v13094_v6 }
 0x146   : > { %v5935_v43 = vrot.slane %v5933_v22, 4  ;;  %v5938_v5 = vrot.slane %v5936_v38, 5  ;;  %v530_v39 = vsel %vm13715_vm3, 0, %v529_v42  ;;  %v2646_v55 = vshrl.u32 %v2394_v40, 16  ;;  %v14615_v42 = vpop.f32.mrf.mxu2  ;;  %16937 = vst [vmem:[#allocation71_spill] sm:$0xff] %v14617_v8 }
 0x147   : > { %v1494_v54 = vld [vmem:[#allocation2 + $0x64] sm:$0x1]  ;;  %531 = vst [vmem:[#allocation2 + $0x6c] sm:$0x1] %v530_v39  ;;  %v2649_v19 = vshll.u32 %v2394_v40, 16  ;;  %v6753_v34 = vunpack.c.l.b16 %v5931_v45  ;;  %v4249_v23 = vsel %vm14367_vm11, %v12313_v30, %v4248_v33  ;;  %v16935_v57 = vrot.slane %v14167_v41, 4  ;;  %v14619_v40 = vpop.f32.mrf.mxu0 }
 0x148   : > { %v5939_v51 = vor.u32 %v5938_v5, %v5935_v43  ;;  %v2393_v61 = vld [vmem:[#allocation2 + $0x5c] sm:$0x1]  ;;  %16936 = vst [vmem:[#allocation70_spill] sm:$0xff] %v14615_v42  ;;  %v5963_v45 = vrot.slane %v5961_v18, 4  ;;  %v2630_v30 = vsel %vm14377_vm12, %v2625_v32, %v2629_v7  ;;  %v5953_v33 = vor.u32 %v5952_v35, %v5949_v17  ;;  %v12419_v32 = vld [vmem:[#allocation2 + $0x58] sm:$0xf] }
 0x149   : > { %v3974_v31 = vld [vmem:[#allocation2 + $0x5c] sm:$0x1]  ;;  %v1495_v46 = vsel %vm13721_vm4, %v16935_v57, %v1494_v54  ;;  %v2641_v38 = vshll.u32 %v2393_v61, 16  ;;  %v5966_v43 = vrot.slane %v5964_v21, 5  ;;  %v2648_v57 = vrot.slane %v2646_v55, 4 }
 0x14a   : > { %v5723_v60 = vld [vmem:[#allocation2 + $0x5c] sm:$0x1]  ;;  %v5940_v22 = vrot.slane %v5939_v51, 4  ;;  %v4252_v14 = vrot.slane %v3974_v31, 5  ;;  %1496 = vst [vmem:[#allocation2 + $0x64] sm:$0x1] %v1495_v46  ;;  %v4495_v31 = vunpack.c.l.b16 %v4249_v23 }
 0x14b   : > { %v5956_v41 = vshll.u32 %v5723_v60, 16  ;;  %v2643_v39 = vrot.slane %v2641_v38, 5  ;;  %v2660_v51 = vshrl.u32 %v2396_v53, 16  ;;  %v2651_v18 = vrot.slane %v2649_v19, 5  ;;  %v13045_v7 = vld [vmem:[#allocation2 + $0x5c] sm:$0xf0]  ;;  %v14630_v38 = vpop.f32.mrf.mxu1 }
 0x14c   : > { %v5945_v5 = vsel %vm14377_vm12, %v5940_v22, %v5944_v24  ;;  %v4253_v54 = vsel %vm14367_vm11, %v12314_v28, %v4252_v14  ;;  %v5967_v17 = vor.u32 %v5966_v43, %v5963_v45  ;;  %v2663_v35 = vshll.u32 %v2396_v53, 16  ;;  %16938 = vst [vmem:[#allocation72_spill] sm:$0xff] %v14630_v38  ;;  %v532_v14 = vld [vmem:[#allocation2 + $0x74] sm:$0x1]  ;;  %v5726_v45 = vld [vmem:[#allocation2 + $0x68] sm:$0xf]  ;;  %v14639_v42 = vpop.f32.mrf.mxu3 }
 0x14d   : > { %v6754_v61 = vunpack.c.l.b16 %v5945_v5  ;;  %v2644_v46 = vsel %vm14377_vm12, %v2639_v26, %v2643_v39  ;;  %v4496_v8 = vunpack.c.l.b16 %v4253_v54  ;;  %v3426_v60 = vunpack.c.l.b16 %v2630_v30  ;;  %v3975_v39 = vld [vmem:[#allocation2 + $0x60] sm:$0xe]  ;;  %16941 = vst [vmem:[#allocation74_spill] sm:$0xff] %v14639_v42  ;;  %v2398_v42 = vld [vmem:[#allocation2 + $0x70] sm:$0xf] }
 0x14e   : > { %v5954_v22 = vrot.slane %v5953_v33, 4  ;;  %v1500_v28 = vld [vmem:[#allocation2 + $0x6c] sm:$0x1]  ;;  %v3427_v23 = vunpack.c.l.b16 %v2644_v46  ;;  %v5958_v55 = vrot.slane %v5956_v41, 5  ;;  %v16939_v19 = vrot.slane %v14171_v29, 4  ;;  %v14637_v29 = vpop.f32.mrf.mxu2 }
 0x14f   : > { %v6814_v24 = vpack.c.b16 %v6754_v61, %v6753_v34  ;;  %v2662_v5 = vrot.slane %v2660_v51, 4  ;;  %v12420_v53 = vor.u32 %v13045_v7, %v12419_v32  ;;  %v2652_v30 = vor.u32 %v2651_v18, %v2648_v57  ;;  %16940 = vst [vmem:[#allocation73_spill] sm:$0xff] %v14637_v29  ;;  %v5728_v32 = vld [vmem:[#allocation2 + $0x70] sm:$0xf]  ;;  %v3977_v57 = vld [vmem:[#allocation2 + $0x68] sm:$0xe]  ;;  %v14645_v18 = vpop.f32.mrf.mxu0 }
 0x150   : > { %v1501_v26 = vsel %vm13721_vm4, %v16939_v19, %v1500_v28  ;;  %v4555_v33 = vpack.c.b16 %v4496_v8, %v4495_v31  ;;  %v5968_v54 = vrot.slane %v5967_v17, 4  ;;  %v2665_v21 = vrot.slane %v2663_v35, 5 }
 0x151   : > { %6946 = vmatmul.bf16.gmra.mxu0 %v6814_v24  ;;  %v5725_v43 = vld [vmem:[#allocation2 + $0x64] sm:$0x1]  ;;  %1502 = vst [vmem:[#allocation2 + $0x6c] sm:$0x1] %v1501_v26  ;;  %v889_v41 = vrot.slane %v14235_v25, 4  ;;  %v533_v24 = vsel %vm13715_vm3, 0, %v532_v14  ;;  %v3486_v28 = vpack.c.b16 %v3427_v23, %v3426_v60  ;;  %v5959_v31 = vsel %vm14377_vm12, %v5954_v22, %v5958_v55 }
 0x152   : > { %v2395_v34 = vld [vmem:[#allocation2 + $0x64] sm:$0x1]  ;;  %v5970_v61 = vshll.u32 %v5725_v43, 16  ;;  %v5975_v7 = vshrl.u32 %v5726_v45, 16  ;;  %534 = vst [vmem:[#allocation2 + $0x74] sm:$0x1] %v533_v24  ;;  %v2666_v25 = vor.u32 %v2665_v21, %v2662_v5  ;;  %v6755_v55 = vunpack.c.l.b16 %v5959_v31 }
 0x153   : > { %v3976_v46 = vld [vmem:[#allocation2 + $0x64] sm:$0x1]  ;;  %v2655_v51 = vshll.u32 %v2395_v34, 16  ;;  %v5978_v8 = vshll.u32 %v5726_v45, 16  ;;  %v12315_v17 = vrot.slane %v3975_v39, 9  ;;  %v2653_v26 = vrot.slane %v2652_v30, 4 }
 0x154   : > { %v5972_v19 = vrot.slane %v5970_v61, 5  ;;  %v4256_v35 = vrot.slane %v3976_v46, 5  ;;  %4691 = vmatmul.bf16.gmra.mxu2 %v4555_v33  ;;  %v5989_v43 = vshrl.u32 %v5728_v32, 16  ;;  %v5992_v60 = vshll.u32 %v5728_v32, 16  ;;  %v535_v23 = vld [vmem:[#allocation2 + $0x7c] sm:$0x1]  ;;  %3622 = vmatmul.bf16.gmra.mxu1 %v3486_v28  ;;  %v14651_v33 = vpop.f32.mrf.mxu1 }
 0x155   : > { %5373 = vmatmul.bf16.gmra.mxu3 %v12420_v53  ;;  %v2657_v34 = vrot.slane %v2655_v51, 5  ;;  %v12316_v61 = vrot.slane %v3977_v57, 9  ;;  %v5977_v45 = vrot.slane %v5975_v7, 4  ;;  %v5980_v24 = vrot.slane %v5978_v8, 5  ;;  %16942 = vst [vmem:[#allocation75_spill] sm:$0xff] %v14651_v33 }
 0x156   : > { %v5973_v14 = vsel %vm14377_vm12, %v5968_v54, %v5972_v19  ;;  %v2667_v30 = vrot.slane %v2666_v25, 4  ;;  %v4257_v46 = vsel %vm14367_vm11, %v12315_v17, %v4256_v35  ;;  %v14655_v32 = vld [vmem:[#allocation2 + $0x68] sm:$0xf]  ;;  %v14657_v7 = vld [vmem:[#allocation2 + $0x6c] sm:$0xf0]  ;;  %v5991_v57 = vrot.slane %v5989_v43, 4  ;;  %v14669_v33 = vpop.f32.mrf.mxu2 }
 0x157   : > { %v6756_v5 = vunpack.c.l.b16 %v5973_v14  ;;  %v5994_v8 = vrot.slane %v5992_v60, 5  ;;  %v536_v28 = vsel %vm13715_vm3, 0, %v535_v23  ;;  %v2400_v31 = vld [vmem:[#allocation2 + $0x78] sm:$0xf]  ;;  %v2674_v14 = vshrl.u32 %v2398_v42, 16  ;;  %16943 = vst [vmem:[#allocation76_spill] sm:$0xff] %v14669_v33 }
 0x158   : > { %v2397_v39 = vld [vmem:[#allocation2 + $0x6c] sm:$0x1]  ;;  %v2658_v25 = vsel %vm14377_vm12, %v2653_v26, %v2657_v34  ;;  %537 = vst [vmem:[#allocation2 + $0x7c] sm:$0x1] %v536_v28  ;;  %v4497_v22 = vunpack.c.l.b16 %v4257_v46  ;;  %v14671_v26 = vpop.f32.mrf.mxu3  ;;  %v2677_v34 = vshll.u32 %v2398_v42, 16 }
 0x159   : > { %v3978_v53 = vld [vmem:[#allocation2 + $0x6c] sm:$0x1]  ;;  %v2669_v54 = vshll.u32 %v2397_v39, 16  ;;  %v1506_v35 = vld [vmem:[#allocation2 + $0x74] sm:$0x1]  ;;  %v6815_v21 = vpack.c.b16 %v6756_v5, %v6755_v55  ;;  %16944 = vst [vmem:[#allocation77_spill] sm:$0xff] %v14671_v26  ;;  %v5995_v55 = vor.u32 %v5994_v8, %v5991_v57 }
 0x15a   : > { %v4260_v51 = vrot.slane %v3978_v53, 5  ;;  %v5727_v19 = vld [vmem:[#allocation2 + $0x6c] sm:$0x1]  ;;  %v5981_v53 = vor.u32 %v5980_v24, %v5977_v45  ;;  %v1507_v43 = vsel %vm13721_vm4, %v889_v41, %v1506_v35  ;;  %v12424_v24 = vor.u32 %v14657_v7, %v14655_v32  ;;  %v5730_v5 = vld [vmem:[#allocation2 + $0x78] sm:$0xf] }
 0x15b   : > { %v2671_v39 = vrot.slane %v2669_v54, 5  ;;  %v5984_v60 = vshll.u32 %v5727_v19, 16  ;;  %1508 = vst [vmem:[#allocation2 + $0x74] sm:$0x1] %v1507_v43  ;;  %v538_v54 = vld [vmem:[#allocation2 + $0x84] sm:$0x1] }
 0x15c   : > { %v4261_v17 = vsel %vm14367_vm11, %v12316_v61, %v4260_v51  ;;  %v2688_v61 = vshrl.u32 %v2400_v31, 16  ;;  %v2676_v41 = vrot.slane %v2674_v14, 4  ;;  %v5732_v46 = vld [vmem:[#allocation2 + $0x80] sm:$0xf]  ;;  %v14676_v51 = vpop.f32.mrf.mxu0  ;;  %v5982_v19 = vrot.slane %v5981_v53, 4 }
 0x15d   : > { %v2672_v23 = vsel %vm14377_vm12, %v2667_v30, %v2671_v39  ;;  %v4498_v29 = vunpack.c.l.b16 %v4261_v17  ;;  %v3428_v30 = vunpack.c.l.b16 %v2658_v25  ;;  %v2679_v28 = vrot.slane %v2677_v34, 5  ;;  %v541_v17 = vld [vmem:[#allocation2 + $0x8c] sm:$0x1]  ;;  %v3979_v26 = vld [vmem:[#allocation2 + $0x70] sm:$0xe] }
 0x15e   : > { %v2691_v39 = vshll.u32 %v2400_v31, 16  ;;  %v3429_v35 = vunpack.c.l.b16 %v2672_v23  ;;  %v5986_v42 = vrot.slane %v5984_v60, 5  ;;  %v2690_v43 = vrot.slane %v2688_v61, 4  ;;  %v302_v14 = vld [vmem:[#allocation2 + $0x90] sm:$0x1]  ;;  %v14682_v60 = vpop.f32.mrf.mxu1 }
 0x15f   : > { %v539_v45 = vsel %vm13715_vm3, 0, %v538_v54  ;;  %v4556_v32 = vpack.c.b16 %v4498_v29, %v4497_v22  ;;  %v6003_v57 = vshrl.u32 %v5730_v5, 16  ;;  %v6006_v8 = vshll.u32 %v5730_v5, 16  ;;  %v1512_v25 = vld [vmem:[#allocation2 + $0x7c] sm:$0x1]  ;;  %16945 = vst [vmem:[#allocation78_spill] sm:$0xff] %v14682_v60 }
 0x160   : > { %v2693_v7 = vrot.slane %v2691_v39, 5  ;;  %540 = vst [vmem:[#allocation2 + $0x84] sm:$0x1] %v539_v45  ;;  %v5996_v33 = vrot.slane %v5995_v55, 4  ;;  %v2680_v53 = vor.u32 %v2679_v28, %v2676_v41  ;;  %v6017_v34 = vshrl.u32 %v5732_v46, 16 }
 0x161   : > { %6951 = vmatmul.bf16.gmra.mxu0 %v6815_v21  ;;  %v542_v31 = vsel %vm13715_vm3, 0, %v541_v17  ;;  %v16946_v23 = vrot.slane %v14238_v37, 4  ;;  %v14688_v29 = vld [vmem:[#allocation2 + $0x78] sm:$0xe]  ;;  %v14690_v22 = vrot.slane %v6003_v57, 4  ;;  %v6020_v61 = vshll.u32 %v5732_v46, 16 }
 0x162   : > { %543 = vst [vmem:[#allocation2 + $0x8c] sm:$0x1] %v542_v31  ;;  %v2402_v54 = vld [vmem:[#allocation2 + $0x80] sm:$0xf]  ;;  %v3487_v45 = vpack.c.b16 %v3429_v35, %v3428_v30  ;;  %v5729_v55 = vld [vmem:[#allocation2 + $0x74] sm:$0x1]  ;;  %v5987_v41 = vsel %vm14377_vm12, %v5982_v19, %v5986_v42  ;;  %v2694_v28 = vor.u32 %v2693_v7, %v2690_v43  ;;  %v14698_v19 = vpop.f32.mrf.mxu2  ;;  %v14700_v42 = vpop.f32.mrf.mxu3 }
 0x163   : > { %v1513_v21 = vsel %vm13721_vm4, %v16946_v23, %v1512_v25  ;;  %v2399_v5 = vld [vmem:[#allocation2 + $0x74] sm:$0x1]  ;;  %v5998_v39 = vshll.u32 %v5729_v55, 16  ;;  %v12317_v60 = vrot.slane %v3979_v26, 9  ;;  %v6008_v25 = vrot.slane %v6006_v8, 5  ;;  %16947 = vst [vmem:[#allocation79_spill] sm:$0xff] %v14698_v19 }
 0x164   : > { %1514 = vst [vmem:[#allocation2 + $0x7c] sm:$0x1] %v1513_v21  ;;  %v2683_v37 = vshll.u32 %v2399_v5, 16  ;;  %v3980_v17 = vld [vmem:[#allocation2 + $0x74] sm:$0x1]  ;;  %4696 = vmatmul.bf16.gmra.mxu2 %v4556_v32  ;;  %v2681_v57 = vrot.slane %v2680_v53, 4  ;;  %3627 = vmatmul.bf16.gmra.mxu1 %v3487_v45  ;;  %v6757_v32 = vunpack.c.l.b16 %v5987_v41 }
 0x165   : > { %5378 = vmatmul.bf16.gmra.mxu3 %v12424_v24  ;;  %v4264_v23 = vrot.slane %v3980_v17, 5  ;;  %v14694_v46 = vld [vmem:[#allocation2 + $0x78] sm:$0xf]  ;;  %v2702_v31 = vshrl.u32 %v2402_v54, 16  ;;  %v303_v30 = vsel %vm13721_vm4, 0, %v302_v14  ;;  %v6000_v35 = vrot.slane %v5998_v39, 5  ;;  %v14708_v39 = vpop.f32.mrf.mxu0 }
 0x166   : > { %16948 = vst [vmem:[#allocation80_spill] sm:$0xff] %v14700_v42  ;;  %v2685_v43 = vrot.slane %v2683_v37, 5  ;;  %v6019_v7 = vrot.slane %v6017_v34, 4  ;;  %v6022_v21 = vrot.slane %v6020_v61, 5  ;;  %v2404_v26 = vld [vmem:[#allocation2 + $0x88] sm:$0xf]  ;;  %v6009_v14 = vor.u32 %v6008_v25, %v14690_v22 }
 0x167   : > { %v2695_v24 = vrot.slane %v2694_v28, 4  ;;  %v12318_v8 = vrot.slane %v14688_v29, 9  ;;  %v14703_v53 = vld [vmem:[#allocation2 + $0x7c] sm:$0xf0]  ;;  %v1518_v55 = vld [vmem:[#allocation2 + $0x84] sm:$0x1]  ;;  %v6001_v5 = vsel %vm14377_vm12, %v5996_v33, %v6000_v35  ;;  %v4265_v34 = vsel %vm14367_vm11, %v12317_v60, %v4264_v23 }
 0x168   : > { %v16949_v61 = vrot.slane %v14312_v49, 4  ;;  %v2705_v29 = vshll.u32 %v2402_v54, 16  ;;  %304 = vst [vmem:[#allocation2 + $0x90] sm:$0x1] %v303_v30  ;;  %v6758_v41 = vunpack.c.l.b16 %v6001_v5  ;;  %v2686_v28 = vsel %vm14377_vm12, %v2681_v57, %v2685_v43  ;;  %v14719_v17 = vld [vmem:[%s13699_s25 + $0x3c] sm:$0xf] }
 0x169   : > { %v1524_v22 = vld [vmem:[#allocation2 + $0x8c] sm:$0x1]  ;;  %v2704_v37 = vrot.slane %v2702_v31, 4  ;;  %v2716_v33 = vshrl.u32 %v2404_v26, 16  ;;  %v12428_v49 = vor.u32 %v14703_v53, %v14694_v46  ;;  %v6023_v23 = vor.u32 %v6022_v21, %v6019_v7  ;;  %v3983_v46 = vld [vmem:[#allocation2 + $0x80] sm:$0xe] }
 0x16a   : > { %v1519_v45 = vsel %vm13721_vm4, %v16949_v61, %v1518_v55  ;;  %v16950_v54 = vrot.slane %v14314_v10, 4  ;;  %v4499_v43 = vunpack.c.l.b16 %v4265_v34  ;;  %v6816_v31 = vpack.c.b16 %v6758_v41, %v6757_v32  ;;  %v14727_v61 = vpop.f32.mrf.mxu1 }
 0x16b   : > { %1520 = vst [vmem:[#allocation2 + $0x84] sm:$0x1] %v1519_v45  ;;  %v2401_v25 = vld [vmem:[#allocation2 + $0x7c] sm:$0x1]  ;;  %v14729_v45 = vunpack.c.l.b16 %v2686_v28  ;;  %v2707_v42 = vrot.slane %v2705_v29, 5  ;;  %v2719_v19 = vshll.u32 %v2404_v26, 16 }
 0x16c   : > { %v3982_v35 = vld [vmem:[#allocation2 + $0x7c] sm:$0x1]  ;;  %v1525_v30 = vsel %vm13721_vm4, %v16950_v54, %v1524_v22  ;;  %v2697_v55 = vshll.u32 %v2401_v25, 16  ;;  %16951 = vst [vmem:[#allocation81_spill] sm:$0xff] %v14727_v61  ;;  %v6010_v7 = vrot.slane %v6009_v14, 4  ;;  %v2718_v21 = vrot.slane %v2716_v33, 4  ;;  %v14736_v14 = vpop.f32.mrf.mxu2  ;;  %v14738_v33 = vpop.f32.mrf.mxu3 }
 0x16d   : > { %v5731_v60 = vld [vmem:[#allocation2 + $0x7c] sm:$0x1]  ;;  %v4268_v57 = vrot.slane %v3982_v35, 5  ;;  %1526 = vst [vmem:[#allocation2 + $0x8c] sm:$0x1] %v1525_v30  ;;  %v2721_v34 = vrot.slane %v2719_v19, 5  ;;  %v2708_v28 = vor.u32 %v2707_v42, %v2704_v37 }
 0x16e   : > { %v6012_v5 = vshll.u32 %v5731_v60, 16  ;;  %v2699_v53 = vrot.slane %v2697_v55, 5  ;;  %v544_v22 = vld [vmem:[#allocation2 + $0x94] sm:$0x1]  ;;  %v915_v60 = vshrl.u32 %v14719_v17, 16  ;;  %v6024_v41 = vrot.slane %v6023_v23, 4 }
 0x16f   : > { %v4269_v10 = vsel %vm14367_vm11, %v12318_v8, %v4268_v57  ;;  %v3985_v29 = vld [vmem:[#allocation2 + $0x88] sm:$0xe]  ;;  %v12319_v26 = vrot.slane %v3983_v46, 9  ;;  %16952 = vst [vmem:[#allocation82_spill] sm:$0xff] %v14736_v14  ;;  %v918_v19 = vshll.u32 %v14719_v17, 16  ;;  %v2722_v42 = vor.u32 %v2721_v34, %v2718_v21 }
 0x170   : > { %v4500_v25 = vunpack.c.l.b16 %v4269_v10  ;;  %v6014_v35 = vrot.slane %v6012_v5, 5  ;;  %v2700_v32 = vsel %vm14377_vm12, %v2695_v24, %v2699_v53  ;;  %v5734_v54 = vld [vmem:[#allocation2 + $0x88] sm:$0xf]  ;;  %16953 = vst [vmem:[#allocation83_spill] sm:$0xff] %v14738_v33  ;;  %v545_v5 = vsel %vm13715_vm3, 0, %v544_v22 }
 0x171   : > { %6956 = vmatmul.bf16.gmra.mxu0 %v6816_v31  ;;  %v3431_v30 = vunpack.c.l.b16 %v2700_v32  ;;  %v917_v46 = vrot.slane %v915_v60, 7  ;;  %v1527_v53 = vld [vmem:[#allocation2 + $0x90] sm:$0xf]  ;;  %v14743_v31 = vpop.f32.mrf.mxu0  ;;  %v12320_v33 = vrot.slane %v3985_v29, 9  ;;  %546 = vst [vmem:[#allocation2 + $0x94] sm:$0x1] %v545_v5 }
 0x172   : > { %v4557_v55 = vpack.c.b16 %v4500_v25, %v4499_v43  ;;  %v5733_v8 = vld [vmem:[#allocation2 + $0x84] sm:$0x1]  ;;  %v6015_v43 = vsel %vm14377_vm12, %v6010_v7, %v6014_v35  ;;  %v6031_v22 = vshrl.u32 %v5734_v54, 16  ;;  %v2723_v35 = vrot.slane %v2722_v42, 4  ;;  %v553_v5 = vld [vmem:[#allocation2 + $0xac] sm:$0x1] }
 0x173   : > { %v2403_v57 = vld [vmem:[#allocation2 + $0x84] sm:$0x1]  ;;  %v6026_v24 = vshll.u32 %v5733_v8, 16  ;;  %v3488_v17 = vpack.c.b16 %v3431_v30, %v14729_v45  ;;  %v2709_v8 = vrot.slane %v2708_v28, 4  ;;  %v920_v60 = vor.u32 %v918_v19, %v917_v46  ;;  %v14751_v45 = vpop.f32.mrf.mxu1 }
 0x174   : > { %v2711_v23 = vshll.u32 %v2403_v57, 16  ;;  %v3984_v37 = vld [vmem:[#allocation2 + $0x84] sm:$0x1]  ;;  %v2405_v10 = vld [vmem:[#allocation2 + $0x8c] sm:$0x1]  ;;  %4701 = vmatmul.bf16.gmra.mxu2 %v4557_v55  ;;  %v6759_v38 = vunpack.c.l.b16 %v6015_v43  ;;  %16954 = vst [vmem:[#allocation84_spill] sm:$0xff] %v14751_v45 }
 0x175   : > { %v3986_v25 = vld [vmem:[#allocation2 + $0x8c] sm:$0x1]  ;;  %v4272_v32 = vrot.slane %v3984_v37, 5  ;;  %v6028_v14 = vrot.slane %v6026_v24, 5  ;;  %v2725_v61 = vshll.u32 %v2405_v10, 16  ;;  %5383 = vmatmul.bf16.gmra.mxu3 %v12428_v49  ;;  %v921_v28 = vrot.slane %v917_v46, 4  ;;  %3632 = vmatmul.bf16.gmra.mxu1 %v3488_v17 }
 0x176   : > { %v2713_v21 = vrot.slane %v2711_v23, 5  ;;  %v4276_v34 = vrot.slane %v3986_v25, 5  ;;  %v550_v29 = vld [vmem:[#allocation2 + $0xa4] sm:$0x1]  ;;  %v1528_v19 = vsel %vm13740_vm6, %v920_v60, %v1527_v53  ;;  %v2406_v24 = vld [vmem:[#allocation2 + $0xa0] sm:$0xf] }
 0x177   : > { %v6029_v7 = vsel %vm14377_vm12, %v6024_v41, %v6028_v14  ;;  %v2727_v37 = vrot.slane %v2725_v61, 5  ;;  %v4273_v30 = vsel %vm14367_vm11, %v12319_v26, %v4272_v32  ;;  %1529 = vst [vmem:[#allocation2 + $0x90] sm:$0xf] %v1528_v19  ;;  %v5735_v61 = vld [vmem:[#allocation2 + $0x8c] sm:$0x1]  ;;  %v6033_v55 = vrot.slane %v6031_v22, 4  ;;  %v14770_v32 = vpop.f32.mrf.mxu3 }
 0x178   : > { %v6760_v49 = vunpack.c.l.b16 %v6029_v7  ;;  %v4277_v41 = vsel %vm14367_vm11, %v12320_v33, %v4276_v34  ;;  %v6034_v14 = vshll.u32 %v5734_v54, 16  ;;  %v2714_v26 = vsel %vm14377_vm12, %v2709_v8, %v2713_v21  ;;  %v2408_v46 = vld [vmem:[#allocation2 + $0xa8] sm:$0xf]  ;;  %v556_v53 = vld [vmem:[#allocation2 + $0xb4] sm:$0x1]  ;;  %v14768_v54 = vpop.f32.mrf.mxu2  ;;  %16956 = vst [vmem:[#allocation86_spill] sm:$0xff] %v14770_v32 }
 0x179   : > { %v551_v42 = vsel %vm13715_vm3, 0, %v550_v29  ;;  %v2728_v43 = vsel %vm14377_vm12, %v2723_v35, %v2727_v37  ;;  %v554_v33 = vsel %vm13715_vm3, 0, %v553_v5  ;;  %v2730_v25 = vshrl.u32 %v2406_v24, 16  ;;  %16955 = vst [vmem:[#allocation85_spill] sm:$0xff] %v14768_v54  ;;  %v1530_v8 = vld [vmem:[#allocation2 + $0x94] sm:$0x1] }
 0x17a   : > { %v6036_v10 = vrot.slane %v6034_v14, 5  ;;  %552 = vst [vmem:[#allocation2 + $0xa4] sm:$0x1] %v551_v42  ;;  %v4501_v17 = vunpack.c.l.b16 %v4273_v30  ;;  %v4502_v22 = vunpack.c.l.b16 %v4277_v41  ;;  %v6040_v21 = vshll.u32 %v5735_v61, 16  ;;  %v14776_v29 = vld [vmem:[#allocation2 + $0xa0] sm:$0xe]  ;;  %v14780_v14 = vpop.f32.mrf.mxu0 }
 0x17b   : > { %555 = vst [vmem:[#allocation2 + $0xac] sm:$0x1] %v554_v33  ;;  %v2733_v34 = vshll.u32 %v2406_v24, 16  ;;  %v6817_v60 = vpack.c.b16 %v6760_v49, %v6759_v38  ;;  %v14772_v7 = vunpack.c.l.b16 %v2714_v26  ;;  %v1531_v35 = vsel %vm13721_vm4, %v921_v28, %v1530_v8  ;;  %v14778_v19 = vld [vmem:[#allocation2 + $0xa8] sm:$0xe] }
 0x17c   : > { %v6037_v37 = vor.u32 %v6036_v10, %v6033_v55  ;;  %v5738_v5 = vld [vmem:[#allocation2 + $0xa8] sm:$0xf]  ;;  %v14782_v30 = vunpack.c.l.b16 %v2728_v43  ;;  %1532 = vst [vmem:[#allocation2 + $0x94] sm:$0x1] %v1531_v35  ;;  %v14784_v61 = vrot.slane %v2730_v25, 4  ;;  %v2744_v24 = vshrl.u32 %v2408_v46, 16 }
 0x17d   : > { %v12431_v41 = vld [vmem:[#allocation2 + $0x88] sm:$0xf]  ;;  %v14786_v38 = vrot.slane %v2733_v34, 5  ;;  %v2747_v28 = vshll.u32 %v2408_v46, 16  ;;  %v557_v26 = vsel %vm13715_vm3, 0, %v556_v53  ;;  %v4558_v10 = vpack.c.b16 %v4502_v22, %v4501_v17  ;;  %v14793_v46 = vpop.f32.mrf.mxu1 }
 0x17e   : > { %v13134_v55 = vld [vmem:[#allocation7 + $0x1a8] sm:$0xff]  ;;  %v5740_v42 = vld [vmem:[#allocation2 + $0xb0] sm:$0xf]  ;;  %v6042_v43 = vrot.slane %v6040_v21, 5  ;;  %v12321_v23 = vrot.slane %v14776_v29, 9  ;;  %v6038_v35 = vrot.slane %v6037_v37, 4  ;;  %v3489_v53 = vpack.c.b16 %v14782_v30, %v14772_v7 }
 0x17f   : > { %v13048_v33 = vld [vmem:[#allocation2 + $0x8c] sm:$0xf0]  ;;  %8674 = vmatpush.bf16.msra.mxu2 %v13134_v55  ;;  %558 = vst [vmem:[#allocation2 + $0xb4] sm:$0x1] %v557_v26  ;;  %v2736_v17 = vor.u32 %v14786_v38, %v14784_v61  ;;  %v2746_v22 = vrot.slane %v2744_v24, 4  ;;  %v6059_v29 = vshrl.u32 %v5738_v5, 16 }
 0x180   : > { %v5736_v8 = vld [vmem:[#allocation2 + $0x90] sm:$0xf]  ;;  %16957 = vst [vmem:[#allocation87_spill] sm:$0xff] %v14793_v46  ;;  %v559_v37 = vld [vmem:[#allocation2 + $0xbc] sm:$0x1]  ;;  %v12432_v32 = vor.u32 %v13048_v33, %v12431_v41  ;;  %v2749_v55 = vrot.slane %v2747_v28, 5  ;;  %v6043_v24 = vsel %vm14377_vm12, %v6038_v35, %v6042_v43 }
 0x181   : > { %v6045_v25 = vshrl.u32 %v5736_v8, 16  ;;  %v6048_v57 = vshll.u32 %v5736_v8, 16  ;;  %6961 = vmatmul.bf16.gmra.mxu0 %v6817_v60  ;;  %v2407_v49 = vld [vmem:[#allocation2 + $0xa4] sm:$0x1]  ;;  %v16958_v60 = vrot.slane %v13732_v13, 4  ;;  %v6062_v7 = vshll.u32 %v5738_v5, 16 }
 0x182   : > { %v3988_v21 = vld [vmem:[#allocation2 + $0xa4] sm:$0x1]  ;;  %v1536_v34 = vld [vmem:[#allocation2 + $0xac] sm:$0x1]  ;;  %v2739_v46 = vshll.u32 %v2407_v49, 16  ;;  %v6073_v30 = vshrl.u32 %v5740_v42, 16  ;;  %v2750_v27 = vor.u32 %v2749_v55, %v2746_v22 }
 0x183   : > { %v6047_v8 = vrot.slane %v6045_v25, 4  ;;  %v6050_v54 = vrot.slane %v6048_v57, 5  ;;  %v1537_v26 = vsel %vm13721_vm4, %v16958_v60, %v1536_v34  ;;  %v13142_v45 = vld [vmem:[#allocation7 + $0x1e8] sm:$0xff]  ;;  %v5737_v38 = vld [vmem:[#allocation2 + $0x94] sm:$0x1]  ;;  %v4280_v57 = vrot.slane %v3988_v21, 5  ;;  %v14805_v25 = vpop.f32.mrf.mxu2  ;;  %v14807_v13 = vpop.f32.mrf.mxu3 }
 0x184   : > { %v13150_v61 = vld [vmem:[#allocation7 + $0x228] sm:$0xff]  ;;  %1538 = vst [vmem:[#allocation2 + $0xac] sm:$0x1] %v1537_v26  ;;  %v6076_v33 = vshll.u32 %v5740_v42, 16  ;;  %v6054_v28 = vshll.u32 %v5737_v38, 16  ;;  %v6061_v34 = vrot.slane %v6059_v29, 4  ;;  %10252 = vmatpush.bf16.msra.mxu3 %v13142_v45  ;;  %4706 = vmatmul.bf16.gmra.mxu2 %v4558_v10  ;;  %v14811_v42 = vpop.f32.mrf.mxu0 }
 0x185   : > { %v6051_v41 = vor.u32 %v6050_v54, %v6047_v8  ;;  %16959 = vst [vmem:[#allocation88_spill] sm:$0xff] %v14807_v13  ;;  %v6064_v49 = vrot.slane %v6062_v7, 5  ;;  %v6075_v5 = vrot.slane %v6073_v30, 4  ;;  %5388 = vmatmul.bf16.gmra.mxu3 %v12432_v32  ;;  %v560_v54 = vsel %vm13715_vm3, 0, %v559_v37  ;;  %v2410_v43 = vld [vmem:[#allocation2 + $0xb0] sm:$0xf]  ;;  %11318 = vmatpush.bf16.msra.mxu0 %v13150_v61 }
 0x186   : > { %v2412_v35 = vld [vmem:[#allocation2 + $0xb8] sm:$0xf]  ;;  %v6056_v21 = vrot.slane %v6054_v28, 5  ;;  %v6761_v8 = vunpack.c.l.b16 %v6043_v24  ;;  %v1542_v26 = vld [vmem:[#allocation2 + $0xb4] sm:$0x1]  ;;  %v6078_v38 = vrot.slane %v6076_v33, 5  ;;  %3637 = vmatmul.bf16.gmra.mxu1 %v3489_v53  ;;  %v4281_v32 = vsel %vm14367_vm11, %v12321_v23, %v4280_v57 }
 0x187   : > { %v6052_v60 = vrot.slane %v6051_v41, 4  ;;  %561 = vst [vmem:[#allocation2 + $0xbc] sm:$0x1] %v560_v54  ;;  %v2737_v45 = vrot.slane %v2736_v17, 4  ;;  %v2741_v6 = vrot.slane %v2739_v46, 5  ;;  %v16960_v10 = vrot.slane %v13834_v2, 4  ;;  %v14821_v46 = vpop.f32.mrf.mxu1 }
 0x188   : > { %v6065_v37 = vor.u32 %v6064_v49, %v6061_v34  ;;  %v2758_v55 = vshrl.u32 %v2410_v43, 16  ;;  %v2761_v7 = vshll.u32 %v2410_v43, 16  ;;  %v2751_v61 = vrot.slane %v2750_v27, 4  ;;  %v12435_v2 = vld [vmem:[#allocation2 + $0xa8] sm:$0xf] }
 0x189   : > { %v1543_v22 = vsel %vm13721_vm4, %v16960_v10, %v1542_v26  ;;  %v6057_v29 = vsel %vm14377_vm12, %v6052_v60, %v6056_v21  ;;  %v2772_v53 = vshrl.u32 %v2412_v35, 16  ;;  %v2775_v17 = vshll.u32 %v2412_v35, 16  ;;  %v13049_v34 = vld [vmem:[#allocation2 + $0xac] sm:$0xf0] }
 0x18a   : > { %1544 = vst [vmem:[#allocation2 + $0xb4] sm:$0x1] %v1543_v22  ;;  %v6762_v30 = vunpack.c.l.b16 %v6057_v29  ;;  %v4503_v41 = vunpack.c.l.b16 %v4281_v32  ;;  %v6079_v33 = vor.u32 %v6078_v38, %v6075_v5  ;;  %v2742_v28 = vsel %vm14377_vm12, %v2737_v45, %v2741_v6  ;;  %v3991_v10 = vld [vmem:[#allocation2 + $0xb0] sm:$0xe]  ;;  %v562_v22 = vld [vmem:[#allocation2 + $0xc4] sm:$0x1] }
 0x18b   : > { %v2409_v24 = vld [vmem:[#allocation2 + $0xac] sm:$0x1]  ;;  %v14825_v21 = vpop.f32.mrf.mxu3  ;;  %v6066_v27 = vrot.slane %v6065_v37, 4  ;;  %v2760_v35 = vrot.slane %v2758_v55, 4  ;;  %v2763_v26 = vrot.slane %v2761_v7, 5  ;;  %v16962_v32 = vrot.slane %v14778_v19, 9 }
 0x18c   : > { %v3990_v23 = vld [vmem:[#allocation2 + $0xac] sm:$0x1]  ;;  %v2753_v60 = vshll.u32 %v2409_v24, 16  ;;  %v6818_v43 = vpack.c.b16 %v6762_v30, %v6761_v8  ;;  %16961 = vst [vmem:[#allocation89_spill] sm:$0xff] %v14825_v21  ;;  %v2774_v45 = vrot.slane %v2772_v53, 4  ;;  %v2777_v6 = vrot.slane %v2775_v17, 5  ;;  %v14831_v24 = vpop.f32.mrf.mxu2 }
 0x18d   : > { %v5739_v57 = vld [vmem:[#allocation2 + $0xac] sm:$0x1]  ;;  %v4284_v54 = vrot.slane %v3990_v23, 5  ;;  %16963 = vst [vmem:[#allocation90_spill] sm:$0xff] %v14831_v24  ;;  %v6080_v30 = vrot.slane %v6079_v33, 4  ;;  %v16964_v37 = vrot.slane %v13844_v0, 4  ;;  %v2764_v0 = vor.u32 %v2763_v26, %v2760_v35 }
 0x18e   : > { %v6068_v49 = vshll.u32 %v5739_v57, 16  ;;  %v2755_v29 = vrot.slane %v2753_v60, 5  ;;  %v1548_v38 = vld [vmem:[#allocation2 + $0xbc] sm:$0x1]  ;;  %v14837_v7 = vld [vmem:[#allocation2 + $0xb8] sm:$0xe]  ;;  %v3434_v60 = vunpack.c.l.b16 %v2742_v28  ;;  %v2778_v24 = vor.u32 %v2777_v6, %v2774_v45 }
 0x18f   : > { %v4285_v5 = vsel %vm14367_vm11, %v16962_v32, %v4284_v54  ;;  %v1549_v55 = vsel %vm13721_vm4, %v16964_v37, %v1548_v38  ;;  %v5742_v57 = vld [vmem:[#allocation2 + $0xb8] sm:$0xf]  ;;  %v12436_v54 = vor.u32 %v13049_v34, %v12435_v2  ;;  %v14841_v32 = vpop.f32.mrf.mxu0  ;;  %v12323_v21 = vrot.slane %v3991_v10, 9  ;;  %v5744_v38 = vld [vmem:[#allocation2 + $0xc0] sm:$0xf] }
 0x190   : > { %v4504_v23 = vunpack.c.l.b16 %v4285_v5  ;;  %v6070_v8 = vrot.slane %v6068_v49, 5  ;;  %v2756_v19 = vsel %vm14377_vm12, %v2751_v61, %v2755_v29  ;;  %1550 = vst [vmem:[#allocation2 + $0xbc] sm:$0x1] %v1549_v55  ;;  %v563_v61 = vsel %vm13715_vm3, 0, %v562_v22 }
 0x191   : > { %v5741_v53 = vld [vmem:[#allocation2 + $0xb4] sm:$0x1]  ;;  %6966 = vmatmul.bf16.gmra.mxu0 %v6818_v43  ;;  %v3435_v33 = vunpack.c.l.b16 %v2756_v19  ;;  %564 = vst [vmem:[#allocation2 + $0xc4] sm:$0x1] %v563_v61  ;;  %v6087_v34 = vshrl.u32 %v5742_v57, 16  ;;  %v6090_v29 = vshll.u32 %v5742_v57, 16  ;;  %v3603_v10 = vpop.f32.mrf.mxu1 }
 0x192   : > { %v2411_v17 = vld [vmem:[#allocation2 + $0xb4] sm:$0x1]  ;;  %v6082_v49 = vshll.u32 %v5741_v53, 16  ;;  %v4559_v37 = vpack.c.b16 %v4504_v23, %v4503_v41  ;;  %v6071_v55 = vsel %vm14377_vm12, %v6066_v27, %v6070_v8  ;;  %v12324_v35 = vrot.slane %v14837_v7, 9  ;;  %v565_v53 = vld [vmem:[#allocation2 + $0xcc] sm:$0x1] }
 0x193   : > { %v3992_v5 = vld [vmem:[#allocation2 + $0xb4] sm:$0x1]  ;;  %v2767_v13 = vshll.u32 %v2411_v17, 16  ;;  %v3490_v43 = vpack.c.b16 %v3435_v33, %v3434_v60  ;;  %v6101_v26 = vshrl.u32 %v5744_v38, 16  ;;  %v5354_v19 = vpop.f32.mrf.mxu3  ;;  %v2765_v41 = vrot.slane %v2764_v0, 4 }
 0x194   : > { %v6084_v28 = vrot.slane %v6082_v49, 5  ;;  %v4288_v2 = vrot.slane %v3992_v5, 5  ;;  %v6089_v23 = vrot.slane %v6087_v34, 4  ;;  %v6092_v45 = vrot.slane %v6090_v29, 5  ;;  %4711 = vmatmul.bf16.gmra.mxu2 %v4559_v37  ;;  %v2414_v33 = vld [vmem:[#allocation2 + $0xc0] sm:$0xf] }
 0x195   : > { %v6104_v6 = vshll.u32 %v5744_v38, 16  ;;  %5393 = vmatmul.bf16.gmra.mxu3 %v12436_v54  ;;  %v2769_v57 = vrot.slane %v2767_v13, 5  ;;  %v2779_v60 = vrot.slane %v2778_v24, 4  ;;  %v6103_v17 = vrot.slane %v6101_v26, 4  ;;  %v14853_v61 = vld [vmem:[#allocation2 + $0xb8] sm:$0xf] }
 0x196   : > { %v6085_v22 = vsel %vm14377_vm12, %v6080_v30, %v6084_v28  ;;  %v6763_v27 = vunpack.c.l.b16 %v6071_v55  ;;  %v4289_v49 = vsel %vm14367_vm11, %v12323_v21, %v4288_v2  ;;  %v6093_v5 = vor.u32 %v6092_v45, %v6089_v23  ;;  %3642 = vmatmul.bf16.gmra.mxu1 %v3490_v43  ;;  %v14855_v28 = vld [vmem:[#allocation2 + $0xbc] sm:$0xf0] }
 0x197   : > { %v2413_v8 = vld [vmem:[#allocation2 + $0xbc] sm:$0x1]  ;;  %v3827_v38 = vadd.f32 %v3603_v10, %v14327_v12  ;;  %v6764_v13 = vunpack.c.l.b16 %v6085_v22  ;;  %v4672_v24 = vpop.f32.mrf.mxu2  ;;  %v6106_v34 = vrot.slane %v6104_v6, 5  ;;  %v566_v29 = vsel %vm13715_vm3, 0, %v565_v53 }
 0x198   : > { %v3994_v7 = vld [vmem:[#allocation2 + $0xbc] sm:$0x1]  ;;  %v2781_v37 = vshll.u32 %v2413_v8, 16  ;;  %v2786_v55 = vshrl.u32 %v2414_v33, 16  ;;  %v2770_v2 = vsel %vm14377_vm12, %v2765_v41, %v2769_v57  ;;  %v1554_v26 = vld [vmem:[#allocation2 + $0xc4] sm:$0x1] }
 0x199   : > { %v5743_v0 = vld [vmem:[#allocation2 + $0xbc] sm:$0x1]  ;;  %v4292_v54 = vrot.slane %v3994_v7, 5  ;;  %v4896_v21 = vadd.f32 %v4672_v24, %v3827_v38  ;;  %567 = vst [vmem:[#allocation2 + $0xcc] sm:$0x1] %v566_v29  ;;  %v6932_v10 = vpop.f32.mrf.mxu0  ;;  %v16965_v23 = vrot.slane %v13945_v44, 4  ;;  %v6107_v53 = vor.u32 %v6106_v34, %v6103_v17  ;;  %v3605_v38 = vpop.f32.mrf.mxu1 }
 0x19a   : > { %v6096_v30 = vshll.u32 %v5743_v0, 16  ;;  %v2783_v12 = vrot.slane %v2781_v37, 5  ;;  %v6094_v6 = vrot.slane %v6093_v5, 4  ;;  %v2416_v8 = vld [vmem:[#allocation2 + $0xc8] sm:$0xf]  ;;  %v2788_v57 = vrot.slane %v2786_v55, 4 }
 0x19b   : > { %v4293_v43 = vsel %vm14367_vm11, %v12324_v35, %v4292_v54  ;;  %v1555_v45 = vsel %vm13721_vm4, %v16965_v23, %v1554_v26  ;;  %v5578_v7 = vadd.f32 %v5354_v19, %v4896_v21  ;;  %v2789_v0 = vshll.u32 %v2414_v33, 16  ;;  %v5356_v37 = vpop.f32.mrf.mxu3  ;;  %v568_v29 = vld [vmem:[#allocation2 + $0xd4] sm:$0x1]  ;;  %v5746_v19 = vld [vmem:[#allocation2 + $0xc8] sm:$0xf] }
 0x19c   : > { %v6098_v22 = vrot.slane %v6096_v30, 5  ;;  %v2784_v41 = vsel %vm14377_vm12, %v2779_v60, %v2783_v12  ;;  %1556 = vst [vmem:[#allocation2 + $0xc4] sm:$0x1] %v1555_v45  ;;  %v6819_v35 = vpack.c.b16 %v6764_v13, %v6763_v27  ;;  %v4505_v54 = vunpack.c.l.b16 %v4289_v49  ;;  %v3995_v13 = vld [vmem:[#allocation2 + $0xc0] sm:$0xe] }
 0x19d   : > { %v4506_v24 = vunpack.c.l.b16 %v4293_v43  ;;  %v12440_v44 = vor.u32 %v14855_v28, %v14853_v61  ;;  %v3436_v5 = vunpack.c.l.b16 %v2770_v2  ;;  %v2791_v30 = vrot.slane %v2789_v0, 5  ;;  %v5748_v28 = vld [vmem:[#allocation2 + $0xd0] sm:$0xf]  ;;  %v14884_v0 = vld [vmem:[#allocation2 + $0xc8] sm:$0xf] }
 0x19e   : > { %v2800_v17 = vshrl.u32 %v2416_v8, 16  ;;  %v2803_v34 = vshll.u32 %v2416_v8, 16  ;;  %v3828_v21 = vadd.f32 %v3605_v38, %v14353_v58  ;;  %v3437_v60 = vunpack.c.l.b16 %v2784_v41  ;;  %v14882_v41 = vld [vmem:[#allocation2 + $0xc8] sm:$0xe] }
 0x19f   : > { %v6099_v33 = vsel %vm14377_vm12, %v6094_v6, %v6098_v22  ;;  %v6108_v27 = vrot.slane %v6107_v53, 4  ;;  %v2792_v55 = vor.u32 %v2791_v30, %v2788_v57  ;;  %v569_v61 = vsel %vm13715_vm3, 0, %v568_v29  ;;  %v4674_v2 = vpop.f32.mrf.mxu2 }
 0x1a0   : > { %v2802_v49 = vrot.slane %v2800_v17, 4  ;;  %v2805_v12 = vrot.slane %v2803_v34, 5  ;;  %v4560_v43 = vpack.c.b16 %v4506_v24, %v4505_v54  ;;  %v1560_v26 = vld [vmem:[#allocation2 + $0xcc] sm:$0x1]  ;;  %570 = vst [vmem:[#allocation2 + $0xd4] sm:$0x1] %v569_v61  ;;  %v14876_v45 = vadd.f32 %v6932_v10, %v5578_v7 }
 0x1a1   : > { %6971 = vmatmul.bf16.gmra.mxu0 %v6819_v35  ;;  %v6115_v23 = vshrl.u32 %v5746_v19, 16  ;;  %v6118_v58 = vshll.u32 %v5746_v19, 16  ;;  %v4897_v8 = vadd.f32 %v4674_v2, %v3828_v21  ;;  %v16966_v6 = vrot.slane %v13950_v50, 4  ;;  %v571_v35 = vld [vmem:[#allocation2 + $0xdc] sm:$0x1]  ;;  %v6934_v38 = vpop.f32.mrf.mxu0  ;;  %v3608_v21 = vpop.f32.mrf.mxu1 }
 0x1a2   : > { %v2793_v53 = vrot.slane %v2792_v55, 4  ;;  %v12325_v57 = vrot.slane %v3995_v13, 9  ;;  %v3491_v54 = vpack.c.b16 %v3437_v60, %v3436_v5  ;;  %v14886_v29 = vunpack.c.l.b16 %v6099_v33  ;;  %v14888_v19 = vld [vmem:[#allocation2 + $0xcc] sm:$0xf0] }
 0x1a3   : > { %v1561_v22 = vsel %vm13721_vm4, %v16966_v6, %v1560_v26  ;;  %v5745_v24 = vld [vmem:[#allocation2 + $0xc4] sm:$0x1]  ;;  %v5579_v7 = vadd.f32 %v5356_v37, %v4897_v8  ;;  %v2806_v17 = vor.u32 %v2805_v12, %v2802_v49  ;;  %v5359_v55 = vpop.f32.mrf.mxu3  ;;  %v6117_v61 = vrot.slane %v6115_v23, 4  ;;  %v2418_v23 = vld [vmem:[#allocation2 + $0xd0] sm:$0xf] }
 0x1a4   : > { %1562 = vst [vmem:[#allocation2 + $0xcc] sm:$0x1] %v1561_v22  ;;  %v2415_v10 = vld [vmem:[#allocation2 + $0xc4] sm:$0x1]  ;;  %v6110_v30 = vshll.u32 %v5745_v24, 16  ;;  %v6120_v2 = vrot.slane %v6118_v58, 5  ;;  %4716 = vmatmul.bf16.gmra.mxu2 %v4560_v43 }
 0x1a5   : > { %v2795_v50 = vshll.u32 %v2415_v10, 16  ;;  %v3996_v34 = vld [vmem:[#allocation2 + $0xc4] sm:$0x1]  ;;  %v6129_v26 = vshrl.u32 %v5748_v28, 16  ;;  %5398 = vmatmul.bf16.gmra.mxu3 %v12440_v44  ;;  %v12326_v33 = vrot.slane %v14882_v41, 9  ;;  %v6132_v6 = vshll.u32 %v5748_v28, 16 }
 0x1a6   : > { %v4296_v13 = vrot.slane %v3996_v34, 5  ;;  %v6112_v5 = vrot.slane %v6110_v30, 5  ;;  %v572_v8 = vsel %vm13715_vm3, 0, %v571_v35  ;;  %v16967_v58 = vld [vmem:[#allocation54_spill] sm:$0xff]  ;;  %3647 = vmatmul.bf16.gmra.mxu1 %v3491_v54  ;;  %v2807_v10 = vrot.slane %v2806_v17, 4  ;;  %v16968_v30 = vld [vmem:[#allocation23_spill] sm:$0xff] }
 0x1a7   : > { %v2797_v60 = vrot.slane %v2795_v50, 5  ;;  %v6131_v12 = vrot.slane %v6129_v26, 4  ;;  %v3829_v22 = vadd.f32 %v3608_v21, %v16967_v58  ;;  %v1566_v43 = vld [vmem:[#allocation2 + $0xd4] sm:$0x1]  ;;  %v6134_v41 = vrot.slane %v6132_v6, 5  ;;  %v4677_v24 = vpop.f32.mrf.mxu2 }
 0x1a8   : > { %v4297_v37 = vsel %vm14367_vm11, %v12325_v57, %v4296_v13  ;;  %v6113_v44 = vsel %vm14377_vm12, %v6108_v27, %v6112_v5  ;;  %573 = vst [vmem:[#allocation2 + $0xdc] sm:$0x1] %v572_v8  ;;  %v16969_v50 = vrot.slane %v16968_v30, 4  ;;  %v6121_v34 = vor.u32 %v6120_v2, %v6117_v61  ;;  %v2420_v21 = vld [vmem:[#allocation2 + $0xd8] sm:$0xf] }
 0x1a9   : > { %v2798_v28 = vsel %vm14377_vm12, %v2793_v53, %v2797_v60  ;;  %v6766_v57 = vunpack.c.l.b16 %v6113_v44  ;;  %v4898_v54 = vadd.f32 %v4677_v24, %v3829_v22  ;;  %v4507_v5 = vunpack.c.l.b16 %v4297_v37  ;;  %v6937_v60 = vpop.f32.mrf.mxu0  ;;  %v3610_v22 = vpop.f32.mrf.mxu1 }
 0x1aa   : > { %v1567_v35 = vsel %vm13721_vm4, %v16969_v50, %v1566_v43  ;;  %v14906_v26 = vunpack.c.l.b16 %v2798_v28  ;;  %v14908_v53 = vadd.f32 %v6934_v38, %v5579_v7  ;;  %v6135_v58 = vor.u32 %v6134_v41, %v6131_v12  ;;  %v3999_v7 = vld [vmem:[#allocation2 + $0xd0] sm:$0xe] }
 0x1ab   : > { %v2417_v13 = vld [vmem:[#allocation2 + $0xcc] sm:$0x1]  ;;  %1568 = vst [vmem:[#allocation2 + $0xd4] sm:$0x1] %v1567_v35  ;;  %v2814_v44 = vshrl.u32 %v2418_v23, 16  ;;  %v6820_v30 = vpack.c.b16 %v6766_v57, %v14886_v29  ;;  %v5580_v43 = vadd.f32 %v5359_v55, %v4898_v54  ;;  %v2817_v2 = vshll.u32 %v2418_v23, 16  ;;  %v5361_v24 = vpop.f32.mrf.mxu3 }
 0x1ac   : > { %v3998_v27 = vld [vmem:[#allocation2 + $0xcc] sm:$0x1]  ;;  %v2809_v6 = vshll.u32 %v2417_v13, 16  ;;  %v2828_v38 = vshrl.u32 %v2420_v21, 16  ;;  %v6122_v13 = vrot.slane %v6121_v34, 4  ;;  %v3830_v12 = vadd.f32 %v3610_v22, %v14447_v59  ;;  %v16970_v54 = vld [vmem:[#allocation24_spill] sm:$0xff] }
 0x1ad   : > { %v4300_v8 = vrot.slane %v3998_v27, 5  ;;  %v5747_v17 = vld [vmem:[#allocation2 + $0xcc] sm:$0x1]  ;;  %v2816_v50 = vrot.slane %v2814_v44, 4  ;;  %v2819_v49 = vrot.slane %v2817_v2, 5  ;;  %v6136_v55 = vrot.slane %v6135_v58, 4 }
 0x1ae   : > { %v6124_v61 = vshll.u32 %v5747_v17, 16  ;;  %v2811_v28 = vrot.slane %v2809_v6, 5  ;;  %v2831_v41 = vshll.u32 %v2420_v21, 16  ;;  %v16971_v6 = vrot.slane %v16970_v54, 4  ;;  %v332_v34 = vld [vmem:[#allocation2 + $0xe0] sm:$0x1] }
 0x1af   : > { %v4301_v37 = vsel %vm14367_vm11, %v12326_v33, %v4300_v8  ;;  %v1572_v23 = vld [vmem:[#allocation2 + $0xdc] sm:$0x1]  ;;  %v2830_v8 = vrot.slane %v2828_v38, 4  ;;  %v12327_v17 = vrot.slane %v3999_v7, 9  ;;  %v4679_v44 = vpop.f32.mrf.mxu2  ;;  %v14920_v58 = vadd.f32 %v6937_v60, %v5580_v43 }
 0x1b0   : > { %v4508_v35 = vunpack.c.l.b16 %v4301_v37  ;;  %v6126_v27 = vrot.slane %v6124_v61, 5  ;;  %v2812_v29 = vsel %vm14377_vm12, %v2807_v10, %v2811_v28  ;;  %v1573_v33 = vsel %vm13721_vm4, %v16971_v6, %v1572_v23  ;;  %v753_v38 = vld [vmem:[%s13699_s25 + $0x5c] sm:$0xf] }
 0x1b1   : > { %v3439_v57 = vunpack.c.l.b16 %v2812_v29  ;;  %6976 = vmatmul.bf16.gmra.mxu0 %v6820_v30  ;;  %1574 = vst [vmem:[#allocation2 + $0xdc] sm:$0x1] %v1573_v33  ;;  %v2820_v10 = vor.u32 %v2819_v49, %v2816_v50  ;;  %v4899_v21 = vadd.f32 %v4679_v44, %v3830_v12  ;;  %v6939_v23 = vpop.f32.mrf.mxu0  ;;  %v333_v43 = vsel %vm13721_vm4, 0, %v332_v34  ;;  %v574_v50 = vld [vmem:[#allocation2 + $0xe4] sm:$0x1] }
 0x1b2   : > { %v4561_v61 = vpack.c.b16 %v4508_v35, %v4507_v5  ;;  %v5749_v59 = vld [vmem:[#allocation2 + $0xd4] sm:$0x1]  ;;  %v6127_v22 = vsel %vm14377_vm12, %v6122_v13, %v6126_v27  ;;  %v2833_v5 = vrot.slane %v2831_v41, 5  ;;  %v4001_v35 = vld [vmem:[#allocation2 + $0xd8] sm:$0xe]  ;;  %v3613_v13 = vpop.f32.mrf.mxu1  ;;  %v979_v33 = vshrl.u32 %v753_v38, 16 }
 0x1b3   : > { %v2419_v2 = vld [vmem:[#allocation2 + $0xd4] sm:$0x1]  ;;  %v6138_v28 = vshll.u32 %v5749_v59, 16  ;;  %v3492_v7 = vpack.c.b16 %v3439_v57, %v14906_v26  ;;  %v14926_v30 = vrot.slane %v2820_v10, 4  ;;  %v5581_v6 = vadd.f32 %v5361_v24, %v4899_v21  ;;  %v5364_v27 = vpop.f32.mrf.mxu3  ;;  %334 = vst [vmem:[#allocation2 + $0xe0] sm:$0x1] %v333_v43 }
 0x1b4   : > { %v2823_v37 = vshll.u32 %v2419_v2, 16  ;;  %v4000_v29 = vld [vmem:[#allocation2 + $0xd4] sm:$0x1]  ;;  %v2834_v12 = vor.u32 %v2833_v5, %v2830_v8  ;;  %v982_v44 = vshll.u32 %v753_v38, 16  ;;  %v5750_v59 = vld [vmem:[#allocation2 + $0xd8] sm:$0xf]  ;;  %4721 = vmatmul.bf16.gmra.mxu2 %v4561_v61  ;;  %v16972_v26 = vor.u32 %v14888_v19, %v14884_v0 }
 0x1b5   : > { %v4304_v54 = vrot.slane %v4000_v29, 5  ;;  %v6140_v49 = vrot.slane %v6138_v28, 5  ;;  %v14935_v41 = vunpack.c.l.b16 %v6127_v22  ;;  %v12328_v34 = vrot.slane %v4001_v35, 9  ;;  %v580_v61 = vld [vmem:[#allocation2 + $0xf4] sm:$0x1] }
 0x1b6   : > { %v2825_v60 = vrot.slane %v2823_v37, 5  ;;  %5403 = vmatmul.bf16.gmra.mxu3 %v16972_v26  ;;  %v3831_v8 = vadd.f32 %v3613_v13, %v14481_v36  ;;  %v2835_v10 = vrot.slane %v2834_v12, 4  ;;  %v14940_v21 = vrot.slane %v979_v33, 7  ;;  %v583_v28 = vld [vmem:[#allocation2 + $0xfc] sm:$0x1]  ;;  %3652 = vmatmul.bf16.gmra.mxu1 %v3492_v7 }
 0x1b7   : > { %v6141_v24 = vsel %vm14377_vm12, %v6136_v55, %v6140_v49  ;;  %v4305_v57 = vsel %vm14367_vm11, %v12327_v17, %v4304_v54  ;;  %v575_v22 = vsel %vm13715_vm3, 0, %v574_v50  ;;  %v6143_v17 = vshrl.u32 %v5750_v59, 16  ;;  %v4682_v36 = vpop.f32.mrf.mxu2  ;;  %v2424_v33 = vld [vmem:[#allocation2 + $0xf8] sm:$0xf] }
 0x1b8   : > { %v6768_v2 = vunpack.c.l.b16 %v6141_v24  ;;  %v2421_v0 = vld [vmem:[#allocation2 + $0xdc] sm:$0x1]  ;;  %v2826_v19 = vsel %vm14377_vm12, %v14926_v30, %v2825_v60  ;;  %v14947_v37 = vadd.f32 %v6939_v23, %v5581_v6  ;;  %v4509_v5 = vunpack.c.l.b16 %v4305_v57  ;;  %576 = vst [vmem:[#allocation2 + $0xe4] sm:$0x1] %v575_v22  ;;  %v2422_v60 = vld [vmem:[#allocation2 + $0xf0] sm:$0xf] }
 0x1b9   : > { %v4002_v55 = vld [vmem:[#allocation2 + $0xdc] sm:$0x1]  ;;  %v2837_v29 = vshll.u32 %v2421_v0, 16  ;;  %v984_v35 = vor.u32 %v982_v44, %v14940_v21  ;;  %v4900_v49 = vadd.f32 %v4682_v36, %v3831_v8  ;;  %v6145_v43 = vrot.slane %v6143_v17, 4  ;;  %v6942_v13 = vpop.f32.mrf.mxu0  ;;  %v14966_v22 = vld [vmem:[#allocation2 + $0xf0] sm:$0xe] }
 0x1ba   : > { %v4308_v38 = vrot.slane %v4002_v55, 5  ;;  %v5751_v7 = vld [vmem:[#allocation2 + $0xdc] sm:$0x1]  ;;  %v6821_v54 = vpack.c.b16 %v6768_v2, %v14935_v41  ;;  %v6146_v30 = vshll.u32 %v5750_v59, 16  ;;  %v581_v50 = vsel %vm13715_vm3, 0, %v580_v61  ;;  %v3615_v59 = vpop.f32.mrf.mxu1 }
 0x1bb   : > { %v2839_v12 = vrot.slane %v2837_v29, 5  ;;  %v6152_v6 = vshll.u32 %v5751_v7, 16  ;;  %v5582_v26 = vadd.f32 %v5364_v27, %v4900_v49  ;;  %v1575_v24 = vld [vmem:[#allocation2 + $0xe0] sm:$0xf]  ;;  %582 = vst [vmem:[#allocation2 + $0xf4] sm:$0x1] %v581_v50  ;;  %v14962_v0 = vunpack.c.l.b16 %v2826_v19  ;;  %v5366_v17 = vpop.f32.mrf.mxu3 }
 0x1bc   : > { %v4309_v23 = vsel %vm14367_vm11, %v12328_v34, %v4308_v38  ;;  %v6148_v57 = vrot.slane %v6146_v30, 5  ;;  %v584_v41 = vsel %vm13715_vm3, 0, %v583_v28  ;;  %v985_v2 = vrot.slane %v14940_v21, 4  ;;  %v586_v28 = vld [vmem:[#allocation2 + $0x104] sm:$0x1] }
 0x1bd   : > { %v4510_v44 = vunpack.c.l.b16 %v4309_v23  ;;  %v2840_v8 = vsel %vm14377_vm12, %v2835_v10, %v2839_v12  ;;  %v1576_v34 = vsel %vm13740_vm6, %v984_v35, %v1575_v24  ;;  %585 = vst [vmem:[#allocation2 + $0xfc] sm:$0x1] %v584_v41  ;;  %v2842_v61 = vshrl.u32 %v2422_v60, 16  ;;  %v13133_v21 = vld [vmem:[#allocation7 + $0x1a0] sm:$0xff]  ;;  %v5754_v23 = vld [vmem:[#allocation2 + $0xf8] sm:$0xf] }
 0x1be   : > { %v14964_v27 = vunpack.c.l.b16 %v2840_v8  ;;  %1577 = vst [vmem:[#allocation2 + $0xe0] sm:$0xf] %v1576_v34  ;;  %v6149_v55 = vor.u32 %v6148_v57, %v6145_v43  ;;  %v2845_v29 = vshll.u32 %v2422_v60, 16  ;;  %v2856_v10 = vshrl.u32 %v2424_v33, 16  ;;  %v16973_v7 = vld [vmem:[#allocation33_spill] sm:$0xff]  ;;  %8675 = vmatpush.bf16.msra.mxu2 %v13133_v21 }
 0x1bf   : > { %v2844_v36 = vrot.slane %v2842_v61, 4  ;;  %v2859_v38 = vshll.u32 %v2424_v33, 16  ;;  %v3832_v35 = vadd.f32 %v3615_v59, %v14511_v63  ;;  %v4562_v30 = vpack.c.b16 %v4510_v44, %v4509_v5  ;;  %v1578_v19 = vld [vmem:[#allocation2 + $0xe4] sm:$0x1]  ;;  %v4684_v43 = vpop.f32.mrf.mxu2  ;;  %v12447_v50 = vld [vmem:[#allocation2 + $0xd8] sm:$0xf] }
 0x1c0   : > { %v14970_v12 = vrot.slane %v6152_v6, 5  ;;  %v1579_v24 = vsel %vm13721_vm4, %v985_v2, %v1578_v19  ;;  %v2847_v57 = vrot.slane %v2845_v29, 5  ;;  %v2858_v60 = vrot.slane %v2856_v10, 4  ;;  %v14974_v33 = vld [vmem:[#allocation2 + $0xf8] sm:$0xe] }
 0x1c1   : > { %6981 = vmatmul.bf16.gmra.mxu0 %v6821_v54  ;;  %v2861_v41 = vrot.slane %v2859_v38, 5  ;;  %v4901_v8 = vadd.f32 %v4684_v43, %v3832_v35  ;;  %1580 = vst [vmem:[#allocation2 + $0xe4] sm:$0x1] %v1579_v24  ;;  %v14976_v63 = vrot.slane %v6149_v55, 4  ;;  %v12329_v5 = vrot.slane %v14966_v22, 9  ;;  %v14985_v10 = vpop.f32.mrf.mxu0  ;;  %v13141_v35 = vld [vmem:[#allocation7 + $0x1e0] sm:$0xff] }
 0x1c2   : > { %v587_v54 = vsel %vm13715_vm3, 0, %v586_v28  ;;  %v3493_v6 = vpack.c.b16 %v14964_v27, %v14962_v0  ;;  %v2423_v44 = vld [vmem:[#allocation2 + $0xf4] sm:$0x1]  ;;  %v2848_v59 = vor.u32 %v2847_v57, %v2844_v36  ;;  %v5756_v61 = vld [vmem:[#allocation2 + $0x100] sm:$0xf]  ;;  %v14983_v29 = vadd.f32 %v6942_v13, %v5582_v26  ;;  %v3618_v0 = vpop.f32.mrf.mxu1  ;;  %10253 = vmatpush.bf16.msra.mxu3 %v13141_v35 }
 0x1c3   : > { %v2862_v2 = vor.u32 %v2861_v41, %v2858_v60  ;;  %v4004_v34 = vld [vmem:[#allocation2 + $0xf4] sm:$0x1]  ;;  %588 = vst [vmem:[#allocation2 + $0x104] sm:$0x1] %v587_v54  ;;  %v14987_v55 = vadd.f32 %v5366_v17, %v4901_v8  ;;  %v2851_v22 = vshll.u32 %v2423_v44, 16  ;;  %v12330_v21 = vrot.slane %v14974_v33, 9 }
 0x1c4   : > { %v1584_v38 = vld [vmem:[#allocation2 + $0xfc] sm:$0x1]  ;;  %v6171_v28 = vshrl.u32 %v5754_v23, 16  ;;  %v589_v19 = vld [vmem:[#allocation2 + $0x10c] sm:$0x1]  ;;  %v16974_v43 = vrot.slane %v14080_v9, 4  ;;  %4726 = vmatmul.bf16.gmra.mxu2 %v4562_v30  ;;  %v6155_v57 = vsel %vm14377_vm12, %v14976_v63, %v14970_v12 }
 0x1c5   : > { %v13052_v27 = vld [vmem:[#allocation2 + $0xdc] sm:$0xf0]  ;;  %v2849_v26 = vrot.slane %v2848_v59, 4  ;;  %v4312_v24 = vrot.slane %v4004_v34, 5  ;;  %v2853_v44 = vrot.slane %v2851_v22, 5  ;;  %v14998_v9 = vrot.slane %v2862_v2, 4 }
 0x1c6   : > { %v5752_v36 = vld [vmem:[#allocation2 + $0xe0] sm:$0xf]  ;;  %v1585_v13 = vsel %vm13721_vm4, %v16974_v43, %v1584_v38  ;;  %v12448_v17 = vor.u32 %v13052_v27, %v12447_v50  ;;  %v6173_v49 = vrot.slane %v6171_v28, 4  ;;  %v6174_v38 = vshll.u32 %v5754_v23, 16  ;;  %3657 = vmatmul.bf16.gmra.mxu1 %v3493_v6 }
 0x1c7   : > { %v6157_v60 = vshrl.u32 %v5752_v36, 16  ;;  %v6160_v41 = vshll.u32 %v5752_v36, 16  ;;  %1586 = vst [vmem:[#allocation2 + $0xfc] sm:$0x1] %v1585_v13  ;;  %v13093_v8 = vld [vmem:[#allocation7 + $0x160] sm:$0xff]  ;;  %v3833_v59 = vadd.f32 %v3618_v0, %v14545_v52  ;;  %v6185_v34 = vshrl.u32 %v5756_v61, 16  ;;  %v4687_v63 = vpop.f32.mrf.mxu2 }
 0x1c8   : > { %v13149_v54 = vld [vmem:[#allocation7 + $0x220] sm:$0xff]  ;;  %5408 = vmatmul.bf16.gmra.mxu3 %v12448_v17  ;;  %v5369_v36 = vpop.f32.mrf.mxu3  ;;  %v4313_v35 = vsel %vm14367_vm11, %v12329_v5, %v4312_v24  ;;  %v6176_v43 = vrot.slane %v6174_v38, 5  ;;  %v6188_v22 = vshll.u32 %v5756_v61, 16  ;;  %7992 = vmatpush.bf16.msra.mxu1 %v13093_v8  ;;  %v590_v23 = vsel %vm13715_vm3, 0, %v589_v19 }
 0x1c9   : > { %v6159_v30 = vrot.slane %v6157_v60, 4  ;;  %v6162_v50 = vrot.slane %v6160_v41, 5  ;;  %v2426_v27 = vld [vmem:[#allocation2 + $0x100] sm:$0xf]  ;;  %v5753_v12 = vld [vmem:[#allocation2 + $0xe4] sm:$0x1]  ;;  %11319 = vmatpush.bf16.msra.mxu0 %v13149_v54  ;;  %v4902_v2 = vadd.f32 %v4687_v63, %v3833_v59  ;;  %v2854_v28 = vsel %vm14377_vm12, %v2849_v26, %v2853_v44 }
 0x1ca   : > { %v6166_v6 = vshll.u32 %v5753_v12, 16  ;;  %v1590_v0 = vld [vmem:[#allocation2 + $0x104] sm:$0x1]  ;;  %591 = vst [vmem:[#allocation2 + $0x10c] sm:$0x1] %v590_v23  ;;  %v16975_v13 = vrot.slane %v14117_v62, 4  ;;  %v6177_v24 = vor.u32 %v6176_v43, %v6173_v49  ;;  %v6769_v54 = vunpack.c.l.b16 %v6155_v57  ;;  %v3620_v38 = vpop.f32.mrf.mxu1 }
 0x1cb   : > { %v6163_v52 = vor.u32 %v6162_v50, %v6159_v30  ;;  %v6187_v61 = vrot.slane %v6185_v34, 4  ;;  %v6190_v17 = vrot.slane %v6188_v22, 5  ;;  %v15011_v8 = vadd.f32 %v5369_v36, %v4902_v2  ;;  %v2428_v57 = vld [vmem:[#allocation2 + $0x108] sm:$0xf]  ;;  %v12451_v23 = vld [vmem:[#allocation2 + $0xf8] sm:$0xf] }
 0x1cc   : > { %v1591_v5 = vsel %vm13721_vm4, %v16975_v13, %v1590_v0  ;;  %v6168_v41 = vrot.slane %v6166_v6, 5  ;;  %v2870_v19 = vshrl.u32 %v2426_v27, 16  ;;  %v15013_v26 = vunpack.c.l.b16 %v2854_v28 }
 0x1cd   : > { %v6164_v60 = vrot.slane %v6163_v52, 4  ;;  %1592 = vst [vmem:[#allocation2 + $0x104] sm:$0x1] %v1591_v5  ;;  %v4511_v30 = vunpack.c.l.b16 %v4313_v35  ;;  %v15017_v50 = vadd.f32 %v14985_v10, %v14987_v55  ;;  %v6191_v36 = vor.u32 %v6190_v17, %v6187_v61  ;;  %v13053_v55 = vld [vmem:[#allocation2 + $0xfc] sm:$0xf0] }
 0x1ce   : > { %v2425_v59 = vld [vmem:[#allocation2 + $0xfc] sm:$0x1]  ;;  %v15019_v49 = vpop.f32.mrf.mxu0  ;;  %v3834_v22 = vadd.f32 %v3620_v38, %v14591_v4  ;;  %v6178_v52 = vrot.slane %v6177_v24, 4  ;;  %v2872_v2 = vrot.slane %v2870_v19, 4  ;;  %v2873_v28 = vshll.u32 %v2426_v27, 16 }
 0x1cf   : > { %v4006_v44 = vld [vmem:[#allocation2 + $0xfc] sm:$0x1]  ;;  %v6169_v34 = vsel %vm14377_vm12, %v6164_v60, %v6168_v41  ;;  %v2865_v12 = vshll.u32 %v2425_v59, 16  ;;  %v4689_v13 = vpop.f32.mrf.mxu2  ;;  %v2884_v41 = vshrl.u32 %v2428_v57, 16  ;;  %v16976_v33 = vrot.slane %v14123_v11, 4 }
 0x1d0   : > { %v5755_v62 = vld [vmem:[#allocation2 + $0xfc] sm:$0x1]  ;;  %v4316_v63 = vrot.slane %v4006_v44, 5  ;;  %v6770_v43 = vunpack.c.l.b16 %v6169_v34  ;;  %v5371_v5 = vpop.f32.mrf.mxu3  ;;  %v4903_v4 = vadd.f32 %v4689_v13, %v3834_v22  ;;  %v2875_v38 = vrot.slane %v2873_v28, 5 }
 0x1d1   : > { %v6180_v35 = vshll.u32 %v5755_v62, 16  ;;  %v2867_v6 = vrot.slane %v2865_v12, 5  ;;  %v1596_v60 = vld [vmem:[#allocation2 + $0x10c] sm:$0x1]  ;;  %v592_v62 = vld [vmem:[#allocation2 + $0x114] sm:$0x1] }
 0x1d2   : > { %v4317_v10 = vsel %vm14367_vm11, %v12330_v21, %v4316_v63  ;;  %v6822_v0 = vpack.c.b16 %v6770_v43, %v6769_v54  ;;  %v1597_v21 = vsel %vm13721_vm4, %v16976_v33, %v1596_v60  ;;  %v12452_v54 = vor.u32 %v13053_v55, %v12451_v23  ;;  %v3623_v11 = vpop.f32.mrf.mxu1  ;;  %v5764_v33 = vld [vmem:[#allocation2 + $0x120] sm:$0xf] }
 0x1d3   : > { %v4512_v61 = vunpack.c.l.b16 %v4317_v10  ;;  %v6182_v17 = vrot.slane %v6180_v35, 5  ;;  %v2868_v24 = vsel %vm14377_vm12, %v14998_v9, %v2867_v6  ;;  %1598 = vst [vmem:[#allocation2 + $0x10c] sm:$0x1] %v1597_v21  ;;  %v15035_v34 = vadd.f32 %v5371_v5, %v4903_v4  ;;  %v4007_v9 = vld [vmem:[#allocation2 + $0x100] sm:$0xe] }
 0x1d4   : > { %6986 = vmatmul.bf16.gmra.mxu0 %v6822_v0  ;;  %v3443_v27 = vunpack.c.l.b16 %v2868_v24  ;;  %v5757_v59 = vld [vmem:[#allocation2 + $0x104] sm:$0x1]  ;;  %v6192_v12 = vrot.slane %v6191_v36, 4  ;;  %v2876_v43 = vor.u32 %v2875_v38, %v2872_v2  ;;  %v2886_v10 = vrot.slane %v2884_v41, 4  ;;  %v5758_v0 = vld [vmem:[#allocation2 + $0x108] sm:$0xf] }
 0x1d5   : > { %v4563_v19 = vpack.c.b16 %v4512_v61, %v4511_v30  ;;  %v2427_v44 = vld [vmem:[#allocation2 + $0x104] sm:$0x1]  ;;  %v6194_v63 = vshll.u32 %v5757_v59, 16  ;;  %v2887_v28 = vshll.u32 %v2428_v57, 16  ;;  %v3835_v23 = vadd.f32 %v3623_v11, %v14619_v40  ;;  %v4009_v2 = vld [vmem:[#allocation2 + $0x108] sm:$0xe] }
 0x1d6   : > { %v4008_v22 = vld [vmem:[#allocation2 + $0x104] sm:$0x1]  ;;  %v3494_v35 = vpack.c.b16 %v3443_v27, %v15013_v26  ;;  %v2879_v6 = vshll.u32 %v2427_v44, 16  ;;  %v15038_v30 = vpop.f32.mrf.mxu0  ;;  %v6183_v55 = vsel %vm14377_vm12, %v6178_v52, %v6182_v17  ;;  %v2877_v13 = vrot.slane %v2876_v43, 4  ;;  %v16977_v24 = vld [vmem:[#allocation34_spill] sm:$0xff] }
 0x1d7   : > { %4731 = vmatmul.bf16.gmra.mxu2 %v4563_v19  ;;  %v6196_v36 = vrot.slane %v6194_v63, 5  ;;  %v2889_v61 = vrot.slane %v2887_v28, 5  ;;  %v12331_v60 = vrot.slane %v4007_v9, 9  ;;  %v4320_v4 = vrot.slane %v4008_v22, 5  ;;  %v4692_v52 = vpop.f32.mrf.mxu2  ;;  %v5760_v63 = vld [vmem:[#allocation2 + $0x110] sm:$0xf] }
 0x1d8   : > { %v2881_v5 = vrot.slane %v2879_v6, 5  ;;  %3662 = vmatmul.bf16.gmra.mxu1 %v3494_v35  ;;  %5413 = vmatmul.bf16.gmra.mxu3 %v12452_v54  ;;  %v593_v57 = vsel %vm13715_vm3, 0, %v592_v62  ;;  %v6199_v40 = vshrl.u32 %v5758_v0, 16  ;;  %v6202_v41 = vshll.u32 %v5758_v0, 16  ;;  %v5374_v17 = vpop.f32.mrf.mxu3 }
 0x1d9   : > { %v6197_v26 = vsel %vm14377_vm12, %v6192_v12, %v6196_v36  ;;  %v2890_v38 = vor.u32 %v2889_v61, %v2886_v10  ;;  %v12332_v27 = vrot.slane %v4009_v2, 9  ;;  %594 = vst [vmem:[#allocation2 + $0x114] sm:$0x1] %v593_v57  ;;  %v6771_v19 = vunpack.c.l.b16 %v6183_v55  ;;  %v2430_v2 = vld [vmem:[#allocation2 + $0x110] sm:$0xf] }
 0x1da   : > { %v2882_v21 = vsel %vm14377_vm12, %v2877_v13, %v2881_v5  ;;  %v6772_v54 = vunpack.c.l.b16 %v6197_v26  ;;  %v4904_v59 = vadd.f32 %v4692_v52, %v3835_v23  ;;  %v2429_v44 = vld [vmem:[#allocation2 + $0x10c] sm:$0x1]  ;;  %v15052_v62 = vadd.f32 %v15019_v49, %v15011_v8  ;;  %v595_v23 = vld [vmem:[#allocation2 + $0x11c] sm:$0x1]  ;;  %v3625_v55 = vpop.f32.mrf.mxu1  ;;  %v12455_v26 = vld [vmem:[#allocation2 + $0x108] sm:$0xf] }
 0x1db   : > { %v4010_v12 = vld [vmem:[#allocation2 + $0x10c] sm:$0x1]  ;;  %v2891_v43 = vrot.slane %v2890_v38, 4  ;;  %v2893_v9 = vshll.u32 %v2429_v44, 16  ;;  %v4321_v22 = vsel %vm14367_vm11, %v12331_v60, %v4320_v4  ;;  %v15058_v10 = vunpack.c.l.b16 %v2882_v21  ;;  %v2432_v52 = vld [vmem:[#allocation2 + $0x118] sm:$0xf] }
 0x1dc   : > { %16978 = vst [vmem:[#allocation54_spill] sm:$0xff] %v15052_v62  ;;  %v4324_v11 = vrot.slane %v4010_v12, 5  ;;  %v5759_v35 = vld [vmem:[#allocation2 + $0x10c] sm:$0x1]  ;;  %v15056_v6 = vadd.f32 %v5374_v17, %v4904_v59  ;;  %v6201_v28 = vrot.slane %v6199_v40, 4  ;;  %v6204_v0 = vrot.slane %v6202_v41, 5 }
 0x1dd   : > { %v2895_v36 = vrot.slane %v2893_v9, 5  ;;  %v6213_v49 = vshrl.u32 %v5760_v63, 16  ;;  %v6216_v13 = vshll.u32 %v5760_v63, 16  ;;  %v6823_v61 = vpack.c.b16 %v6772_v54, %v6771_v19  ;;  %v13054_v41 = vld [vmem:[#allocation2 + $0x10c] sm:$0xf0] }
 0x1de   : > { %v4325_v8 = vsel %vm14367_vm11, %v12332_v27, %v4324_v11  ;;  %v15062_v5 = vpop.f32.mrf.mxu0  ;;  %v4513_v60 = vunpack.c.l.b16 %v4321_v22  ;;  %v6208_v57 = vshll.u32 %v5759_v35, 16  ;;  %v596_v38 = vsel %vm13715_vm3, 0, %v595_v23  ;;  %v16979_v54 = vld [vmem:[#allocation39_spill] sm:$0xff] }
 0x1df   : > { %v4514_v4 = vunpack.c.l.b16 %v4325_v8  ;;  %v2896_v40 = vsel %vm14377_vm12, %v2891_v43, %v2895_v36  ;;  %v6215_v17 = vrot.slane %v6213_v49, 4  ;;  %v6218_v21 = vrot.slane %v6216_v13, 5  ;;  %597 = vst [vmem:[#allocation2 + $0x11c] sm:$0x1] %v596_v38  ;;  %v4694_v9 = vpop.f32.mrf.mxu2  ;;  %v598_v8 = vld [vmem:[#allocation2 + $0x124] sm:$0x1] }
 0x1e0   : > { %v3836_v27 = vadd.f32 %v3625_v55, %v14645_v18  ;;  %v3445_v59 = vunpack.c.l.b16 %v2896_v40  ;;  %v1602_v44 = vld [vmem:[#allocation2 + $0x114] sm:$0x1]  ;;  %v6205_v12 = vor.u32 %v6204_v0, %v6201_v28  ;;  %v2898_v19 = vshrl.u32 %v2430_v2, 16  ;;  %v5376_v22 = vpop.f32.mrf.mxu3  ;;  %v5762_v28 = vld [vmem:[#allocation2 + $0x118] sm:$0xf] }
 0x1e1   : > { %v16980_v11 = vrot.slane %v16973_v7, 4  ;;  %v2901_v35 = vshll.u32 %v2430_v2, 16  ;;  %v2912_v36 = vshrl.u32 %v2432_v52, 16  ;;  %v4564_v49 = vpack.c.b16 %v4514_v4, %v4513_v60  ;;  %v16981_v0 = vld [vmem:[#allocation40_spill] sm:$0xff]  ;;  %v4011_v62 = vld [vmem:[#allocation2 + $0x110] sm:$0xe] }
 0x1e2   : > { %v4905_v23 = vadd.f32 %v4694_v9, %v3836_v27  ;;  %v6219_v18 = vor.u32 %v6218_v21, %v6215_v17  ;;  %v2900_v55 = vrot.slane %v2898_v19, 4  ;;  %v1041_v13 = vrot.slane %v16981_v0, 4  ;;  %v601_v27 = vld [vmem:[#allocation2 + $0x12c] sm:$0x1]  ;;  %v3628_v60 = vpop.f32.mrf.mxu1 }
 0x1e3   : > { %v1603_v43 = vsel %vm13721_vm4, %v16980_v11, %v1602_v44  ;;  %v12456_v40 = vor.u32 %v13054_v41, %v12455_v26  ;;  %v6210_v38 = vrot.slane %v6208_v57, 5  ;;  %v2903_v63 = vrot.slane %v2901_v35, 5 }
 0x1e4   : > { %1604 = vst [vmem:[#allocation2 + $0x114] sm:$0x1] %v1603_v43  ;;  %6991 = vmatmul.bf16.gmra.mxu0 %v6823_v61  ;;  %v15075_v7 = vadd.f32 %v5376_v22, %v4905_v23  ;;  %v3495_v44 = vpack.c.b16 %v3445_v59, %v15058_v10  ;;  %v6206_v2 = vrot.slane %v6205_v12, 4  ;;  %v2915_v11 = vshll.u32 %v2432_v52, 16  ;;  %v15091_v23 = vld [vmem:[#allocation2 + $0x118] sm:$0xf] }
 0x1e5   : > { %v2904_v4 = vor.u32 %v2903_v63, %v2900_v55  ;;  %v2914_v17 = vrot.slane %v2912_v36, 4  ;;  %v599_v21 = vsel %vm13715_vm3, 0, %v598_v8  ;;  %v6227_v19 = vshrl.u32 %v5762_v28, 16  ;;  %v15089_v8 = vld [vmem:[#allocation2 + $0x118] sm:$0xe] }
 0x1e6   : > { %v15080_v61 = vpop.f32.mrf.mxu0  ;;  %v6220_v26 = vrot.slane %v6219_v18, 4  ;;  %v2917_v57 = vrot.slane %v2915_v11, 5  ;;  %600 = vst [vmem:[#allocation2 + $0x124] sm:$0x1] %v599_v21  ;;  %v6230_v41 = vshll.u32 %v5762_v28, 16  ;;  %v6241_v9 = vshrl.u32 %v5764_v33, 16 }
 0x1e7   : > { %4736 = vmatmul.bf16.gmra.mxu2 %v4564_v49  ;;  %v1608_v10 = vld [vmem:[#allocation2 + $0x11c] sm:$0x1]  ;;  %v12333_v59 = vrot.slane %v4011_v62, 9  ;;  %v6229_v52 = vrot.slane %v6227_v19, 4  ;;  %v6244_v12 = vshll.u32 %v5764_v33, 16  ;;  %v602_v63 = vsel %vm13715_vm3, 0, %v601_v27  ;;  %v4697_v55 = vpop.f32.mrf.mxu2 }
 0x1e8   : > { %v3837_v22 = vadd.f32 %v3628_v60, %v14676_v51  ;;  %3667 = vmatmul.bf16.gmra.mxu1 %v3495_v44  ;;  %5418 = vmatmul.bf16.gmra.mxu3 %v12456_v40  ;;  %v16982_v43 = vrot.slane %v16977_v24, 4  ;;  %v2905_v36 = vrot.slane %v2904_v4, 4  ;;  %v15093_v62 = vld [vmem:[#allocation2 + $0x11c] sm:$0xf0]  ;;  %v6232_v33 = vrot.slane %v6230_v41, 5  ;;  %v5379_v28 = vpop.f32.mrf.mxu3 }
 0x1e9   : > { %603 = vst [vmem:[#allocation2 + $0x12c] sm:$0x1] %v602_v63  ;;  %v2434_v49 = vld [vmem:[#allocation2 + $0x120] sm:$0xf]  ;;  %v6211_v51 = vsel %vm14377_vm12, %v6206_v2, %v6210_v38  ;;  %v2918_v40 = vor.u32 %v2917_v57, %v2914_v17  ;;  %v15099_v44 = vadd.f32 %v15038_v30, %v15035_v34  ;;  %v15103_v11 = vadd.f32 %v15062_v5, %v15056_v6 }
 0x1ea   : > { %v1609_v35 = vsel %vm13721_vm4, %v16982_v43, %v1608_v10  ;;  %v4906_v60 = vadd.f32 %v4697_v55, %v3837_v22  ;;  %v6243_v19 = vrot.slane %v6241_v9, 4  ;;  %v6233_v38 = vor.u32 %v6232_v33, %v6229_v52 }
 0x1eb   : > { %v5761_v18 = vld [vmem:[#allocation2 + $0x114] sm:$0x1]  ;;  %1610 = vst [vmem:[#allocation2 + $0x11c] sm:$0x1] %v1609_v35  ;;  %v6246_v2 = vrot.slane %v6244_v12, 5  ;;  %v2926_v10 = vshrl.u32 %v2434_v49, 16  ;;  %v6773_v43 = vunpack.c.l.b16 %v6211_v51  ;;  %v3630_v35 = vpop.f32.mrf.mxu1  ;;  %v12460_v5 = vor.u32 %v15093_v62, %v15091_v23 }
 0x1ec   : > { %v2431_v24 = vld [vmem:[#allocation2 + $0x114] sm:$0x1]  ;;  %v6222_v27 = vshll.u32 %v5761_v18, 16  ;;  %v5588_v17 = vadd.f32 %v5379_v28, %v4906_v60  ;;  %v2919_v34 = vrot.slane %v2918_v40, 4  ;;  %v12334_v6 = vrot.slane %v15089_v8, 9 }
 0x1ed   : > { %v2907_v4 = vshll.u32 %v2431_v24, 16  ;;  %v4012_v21 = vld [vmem:[#allocation2 + $0x114] sm:$0x1]  ;;  %v1614_v22 = vld [vmem:[#allocation2 + $0x124] sm:$0x1]  ;;  %v6234_v33 = vrot.slane %v6233_v38, 4  ;;  %v6247_v8 = vor.u32 %v6246_v2, %v6243_v19  ;;  %v3838_v62 = vadd.f32 %v3630_v35, %v14708_v39 }
 0x1ee   : > { %v4328_v41 = vrot.slane %v4012_v21, 5  ;;  %v6224_v63 = vrot.slane %v6222_v27, 5  ;;  %v6957_v9 = vpop.f32.mrf.mxu0  ;;  %v2929_v18 = vshll.u32 %v2434_v49, 16  ;;  %v16983_v55 = vrot.slane %v16979_v54, 4  ;;  %v2436_v24 = vld [vmem:[#allocation2 + $0x128] sm:$0xf] }
 0x1ef   : > { %v2909_v57 = vrot.slane %v2907_v4, 5  ;;  %v2928_v23 = vrot.slane %v2926_v10, 4  ;;  %v15123_v49 = vadd.f32 %v6957_v9, %v5588_v17  ;;  %v4699_v60 = vpop.f32.mrf.mxu2  ;;  %v6248_v17 = vrot.slane %v6247_v8, 4 }
 0x1f0   : > { %v4329_v30 = vsel %vm14367_vm11, %v12333_v59, %v4328_v41  ;;  %v6225_v52 = vsel %vm14377_vm12, %v6220_v26, %v6224_v63  ;;  %v1615_v59 = vsel %vm13721_vm4, %v16983_v55, %v1614_v22  ;;  %v1620_v28 = vld [vmem:[#allocation2 + $0x12c] sm:$0x1]  ;;  %v5381_v4 = vpop.f32.mrf.mxu3  ;;  %v4907_v39 = vadd.f32 %v4699_v60, %v3838_v62 }
 0x1f1   : > { %v2910_v12 = vsel %vm14377_vm12, %v2905_v36, %v2909_v57  ;;  %v6774_v51 = vunpack.c.l.b16 %v6225_v52  ;;  %v4515_v26 = vunpack.c.l.b16 %v4329_v30  ;;  %1616 = vst [vmem:[#allocation2 + $0x124] sm:$0x1] %v1615_v59  ;;  %v1621_v36 = vsel %vm13721_vm4, %v1041_v13, %v1620_v28  ;;  %v4015_v57 = vld [vmem:[#allocation2 + $0x120] sm:$0xe] }
 0x1f2   : > { %v2433_v40 = vld [vmem:[#allocation2 + $0x11c] sm:$0x1]  ;;  %16984 = vst [vmem:[#allocation23_spill] sm:$0xff] %v15123_v49  ;;  %v3446_v19 = vunpack.c.l.b16 %v2910_v12  ;;  %v2931_v10 = vrot.slane %v2929_v18, 5  ;;  %v2940_v63 = vshrl.u32 %v2436_v24, 16  ;;  %v2943_v35 = vshll.u32 %v2436_v24, 16 }
 0x1f3   : > { %v4014_v27 = vld [vmem:[#allocation2 + $0x11c] sm:$0x1]  ;;  %v6824_v54 = vpack.c.b16 %v6774_v51, %v6773_v43  ;;  %v2921_v21 = vshll.u32 %v2433_v40, 16  ;;  %1622 = vst [vmem:[#allocation2 + $0x12c] sm:$0x1] %v1621_v36  ;;  %v15127_v30 = vadd.f32 %v5381_v4, %v4907_v39  ;;  %v3633_v51 = vpop.f32.mrf.mxu1  ;;  %v12335_v28 = vrot.slane %v4015_v57, 9 }
 0x1f4   : > { %v4332_v41 = vrot.slane %v4014_v27, 5  ;;  %v5763_v38 = vld [vmem:[#allocation2 + $0x11c] sm:$0x1]  ;;  %v4017_v43 = vld [vmem:[#allocation2 + $0x128] sm:$0xe]  ;;  %v2932_v52 = vor.u32 %v2931_v10, %v2928_v23  ;;  %v2942_v55 = vrot.slane %v2940_v63, 4  ;;  %v3839_v36 = vadd.f32 %v3633_v51, %v14743_v31 }
 0x1f5   : > { %v6236_v2 = vshll.u32 %v5763_v38, 16  ;;  %6996 = vmatmul.bf16.gmra.mxu0 %v6824_v54  ;;  %v2923_v0 = vrot.slane %v2921_v21, 5  ;;  %v362_v12 = vld [vmem:[#allocation2 + $0x130] sm:$0x1]  ;;  %v2945_v59 = vrot.slane %v2943_v35, 5  ;;  %v12336_v40 = vrot.slane %v4017_v43, 9 }
 0x1f6   : > { %v4333_v13 = vsel %vm14367_vm11, %v12334_v6, %v4332_v41  ;;  %v15131_v62 = vpop.f32.mrf.mxu0  ;;  %v761_v27 = vld [vmem:[%s13699_s25 + $0x7c] sm:$0xf]  ;;  %v2933_v60 = vrot.slane %v2932_v52, 4  ;;  %v16986_v51 = vld [vmem:[#allocation31_spill] sm:$0xff] }
 0x1f7   : > { %v4516_v22 = vunpack.c.l.b16 %v4333_v13  ;;  %v6238_v9 = vrot.slane %v6236_v2, 5  ;;  %v2924_v18 = vsel %vm14377_vm12, %v2919_v34, %v2923_v0  ;;  %16985 = vst [vmem:[#allocation24_spill] sm:$0xff] %v15131_v62  ;;  %v2946_v4 = vor.u32 %v2945_v59, %v2942_v55  ;;  %v4702_v2 = vpop.f32.mrf.mxu2 }
 0x1f8   : > { %v3447_v6 = vunpack.c.l.b16 %v2924_v18  ;;  %v5765_v23 = vld [vmem:[#allocation2 + $0x124] sm:$0x1]  ;;  %v363_v34 = vsel %vm13721_vm4, 0, %v362_v12  ;;  %5423 = vmatmul.bf16.gmra.mxu3 %v12460_v5  ;;  %v5384_v10 = vpop.f32.mrf.mxu3  ;;  %v1043_v13 = vshrl.u32 %v761_v27, 16  ;;  %v4908_v43 = vadd.f32 %v4702_v2, %v3839_v36  ;;  %v16987_v36 = vld [vmem:[#allocation32_spill] sm:$0xff] }
 0x1f9   : > { %v4565_v8 = vpack.c.b16 %v4516_v22, %v4515_v26  ;;  %v6239_v24 = vsel %vm14377_vm12, %v6234_v33, %v6238_v9  ;;  %v2435_v54 = vld [vmem:[#allocation2 + $0x124] sm:$0x1]  ;;  %v6250_v41 = vshll.u32 %v5765_v23, 16  ;;  %v2947_v63 = vrot.slane %v2946_v4, 4  ;;  %364 = vst [vmem:[#allocation2 + $0x130] sm:$0x1] %v363_v34 }
 0x1fa   : > { %v3496_v21 = vpack.c.b16 %v3447_v6, %v3446_v19  ;;  %v15139_v38 = vunpack.c.l.b16 %v6239_v24  ;;  %v2437_v26 = vld [vmem:[#allocation2 + $0x12c] sm:$0x1]  ;;  %v2935_v39 = vshll.u32 %v2435_v54, 16  ;;  %v4016_v33 = vld [vmem:[#allocation2 + $0x124] sm:$0x1]  ;;  %v15143_v52 = vrot.slane %v1043_v13, 7 }
 0x1fb   : > { %4741 = vmatmul.bf16.gmra.mxu2 %v4565_v8  ;;  %v2949_v31 = vshll.u32 %v2437_v26, 16  ;;  %v4018_v57 = vld [vmem:[#allocation2 + $0x12c] sm:$0x1]  ;;  %v4336_v0 = vrot.slane %v4016_v33, 5  ;;  %v6252_v35 = vrot.slane %v6250_v41, 5  ;;  %v1046_v12 = vshll.u32 %v761_v27, 16  ;;  %v3635_v4 = vpop.f32.mrf.mxu1 }
 0x1fc   : > { %3672 = vmatmul.bf16.gmra.mxu1 %v3496_v21  ;;  %v2937_v22 = vrot.slane %v2935_v39, 5  ;;  %v4340_v19 = vrot.slane %v4018_v57, 5  ;;  %v15148_v59 = vadd.f32 %v5384_v10, %v4908_v43  ;;  %v604_v8 = vld [vmem:[#allocation2 + $0x134] sm:$0x1]  ;;  %v5766_v24 = vld [vmem:[#allocation2 + $0x128] sm:$0xf]  ;;  %v3840_v10 = vadd.f32 %v3635_v4, %v14780_v14 }
 0x1fd   : > { %v2951_v5 = vrot.slane %v2949_v31, 5  ;;  %v4337_v9 = vsel %vm14367_vm11, %v12335_v28, %v4336_v0  ;;  %v6253_v55 = vsel %vm14377_vm12, %v6248_v17, %v6252_v35  ;;  %v5767_v34 = vld [vmem:[#allocation2 + $0x12c] sm:$0x1]  ;;  %v610_v26 = vld [vmem:[#allocation2 + $0x144] sm:$0x1]  ;;  %v6255_v31 = vshrl.u32 %v5766_v24, 16 }
 0x1fe   : > { %v2938_v6 = vsel %vm14377_vm12, %v2933_v60, %v2937_v22  ;;  %v6776_v54 = vunpack.c.l.b16 %v6253_v55  ;;  %v4341_v27 = vsel %vm14367_vm11, %v12336_v40, %v4340_v19  ;;  %v15157_v21 = vpop.f32.mrf.mxu0  ;;  %v4517_v41 = vunpack.c.l.b16 %v4337_v9  ;;  %v613_v39 = vld [vmem:[#allocation2 + $0x14c] sm:$0x1]  ;;  %v2438_v33 = vld [vmem:[#allocation2 + $0x140] sm:$0xf]  ;;  %v2440_v40 = vld [vmem:[#allocation2 + $0x148] sm:$0xf] }
 0x1ff   : > { %v2952_v28 = vsel %vm14377_vm12, %v2947_v63, %v2951_v5  ;;  %v15159_v17 = vunpack.c.l.b16 %v2938_v6  ;;  %v1048_v60 = vor.u32 %v1046_v12, %v15143_v52  ;;  %v605_v63 = vsel %vm13715_vm3, 0, %v604_v8  ;;  %v13132_v57 = vld [vmem:[#allocation7 + $0x198] sm:$0xff]  ;;  %v15168_v22 = vld [vmem:[#allocation2 + $0x140] sm:$0xe]  ;;  %v4704_v19 = vpop.f32.mrf.mxu2  ;;  %v616_v6 = vld [vmem:[#allocation2 + $0x154] sm:$0x1] }
 0x200   : > { %v6825_v2 = vpack.c.b16 %v6776_v54, %v15139_v38  ;;  %v15166_v0 = vunpack.c.l.b16 %v2952_v28  ;;  %v4518_v13 = vunpack.c.l.b16 %v4341_v27  ;;  %606 = vst [vmem:[#allocation2 + $0x134] sm:$0x1] %v605_v63  ;;  %v6258_v35 = vshll.u32 %v5766_v24, 16  ;;  %v5386_v5 = vpop.f32.mrf.mxu3  ;;  %v1623_v9 = vld [vmem:[#allocation2 + $0x130] sm:$0xf]  ;;  %8676 = vmatpush.bf16.msra.mxu2 %v13132_v57 }
 0x201   : > { %v6264_v43 = vshll.u32 %v5767_v34, 16  ;;  %v6257_v38 = vrot.slane %v6255_v31, 4  ;;  %v611_v14 = vsel %vm13715_vm3, 0, %v610_v26  ;;  %v614_v12 = vsel %vm13715_vm3, 0, %v613_v39  ;;  %v5770_v8 = vld [vmem:[#allocation2 + $0x148] sm:$0xf] }
 0x202   : > { %v2954_v55 = vshrl.u32 %v2438_v33, 16  ;;  %v16988_v54 = vld [vmem:[#allocation35_spill] sm:$0xff]  ;;  %v4909_v24 = vadd.f32 %v4704_v19, %v3840_v10  ;;  %v1624_v28 = vsel %vm13740_vm6, %v1048_v60, %v1623_v9  ;;  %v6260_v27 = vrot.slane %v6258_v35, 5  ;;  %612 = vst [vmem:[#allocation2 + $0x144] sm:$0x1] %v611_v14 }
 0x203   : > { %v15177_v34 = vld [vmem:[#allocation2 + $0x148] sm:$0xe]  ;;  %1625 = vst [vmem:[#allocation2 + $0x130] sm:$0xf] %v1624_v28  ;;  %v2957_v63 = vshll.u32 %v2438_v33, 16  ;;  %v2968_v31 = vshrl.u32 %v2440_v40, 16  ;;  %v4566_v57 = vpack.c.b16 %v4518_v13, %v4517_v41  ;;  %v3638_v10 = vpop.f32.mrf.mxu1  ;;  %v3497_v60 = vpack.c.b16 %v15166_v0, %v15159_v17 }
 0x204   : > { %v2956_v26 = vrot.slane %v2954_v55, 4  ;;  %v2971_v39 = vshll.u32 %v2440_v40, 16  ;;  %v5591_v23 = vadd.f32 %v5386_v5, %v4909_v24  ;;  %v1049_v18 = vrot.slane %v15143_v52, 4  ;;  %615 = vst [vmem:[#allocation2 + $0x14c] sm:$0x1] %v614_v12 }
 0x205   : > { %7001 = vmatmul.bf16.gmra.mxu0 %v6825_v2  ;;  %v6261_v49 = vor.u32 %v6260_v27, %v6257_v38  ;;  %v15182_v35 = vrot.slane %v6264_v43, 5  ;;  %v2959_v19 = vrot.slane %v2957_v63, 5  ;;  %v5772_v9 = vld [vmem:[#allocation2 + $0x150] sm:$0xf]  ;;  %v12463_v33 = vld [vmem:[#allocation2 + $0x128] sm:$0xf]  ;;  %v3841_v13 = vadd.f32 %v3638_v10, %v14811_v42 }
 0x206   : > { %v6964_v14 = vpop.f32.mrf.mxu0  ;;  %v15185_v55 = vrot.slane %v2968_v31, 4  ;;  %v617_v52 = vsel %vm13715_vm3, 0, %v616_v6  ;;  %v6283_v40 = vshrl.u32 %v5770_v8, 16  ;;  %v15191_v0 = vrot.slane %v2971_v39, 5  ;;  %v15197_v24 = vld [vmem:[#allocation2 + $0x148] sm:$0xf] }
 0x207   : > { %v1626_v5 = vld [vmem:[#allocation2 + $0x134] sm:$0x1]  ;;  %v2960_v17 = vor.u32 %v2959_v19, %v2956_v26  ;;  %618 = vst [vmem:[#allocation2 + $0x154] sm:$0x1] %v617_v52  ;;  %v6286_v43 = vshll.u32 %v5770_v8, 16  ;;  %v15195_v12 = vrot.slane %v6261_v49, 4  ;;  %v4707_v42 = vpop.f32.mrf.mxu2  ;;  %v15207_v39 = vadd.f32 %v15157_v21, %v15148_v59 }
 0x208   : > { %v1627_v38 = vsel %vm13721_vm4, %v1049_v18, %v1626_v5  ;;  %v15199_v28 = vld [vmem:[#allocation2 + $0x14c] sm:$0xf0]  ;;  %v15201_v6 = vrot.slane %v6283_v40, 4  ;;  %v6297_v27 = vshrl.u32 %v5772_v9, 16  ;;  %v5389_v26 = vpop.f32.mrf.mxu3  ;;  %v6300_v8 = vshll.u32 %v5772_v9, 16  ;;  %v16991_v9 = vld [vmem:[#allocation13_spill] sm:$0xff] }
 0x209   : > { %1628 = vst [vmem:[#allocation2 + $0x134] sm:$0x1] %v1627_v38  ;;  %v2439_v63 = vld [vmem:[#allocation2 + $0x144] sm:$0x1]  ;;  %v15203_v31 = vrot.slane %v2960_v17, 4  ;;  %v6288_v19 = vrot.slane %v6286_v43, 5  ;;  %v15209_v52 = vadd.f32 %v6964_v14, %v5591_v23 }
 0x20a   : > { %16989 = vst [vmem:[#allocation33_spill] sm:$0xff] %v15207_v39  ;;  %v13056_v49 = vld [vmem:[#allocation2 + $0x12c] sm:$0xf0]  ;;  %v2963_v10 = vshll.u32 %v2439_v63, 16  ;;  %v4020_v41 = vld [vmem:[#allocation2 + $0x144] sm:$0x1] }
 0x20b   : > { %4746 = vmatmul.bf16.gmra.mxu2 %v4566_v57  ;;  %v5768_v18 = vld [vmem:[#allocation2 + $0x130] sm:$0xf]  ;;  %v4910_v57 = vadd.f32 %v4707_v42, %v3841_v13  ;;  %16990 = vst [vmem:[#allocation34_spill] sm:$0xff] %v15209_v52  ;;  %v12464_v40 = vor.u32 %v13056_v49, %v12463_v33  ;;  %v1632_v4 = vld [vmem:[#allocation2 + $0x14c] sm:$0x1]  ;;  %v16992_v62 = vrot.slane %v16991_v9, 4  ;;  %v3640_v33 = vpop.f32.mrf.mxu1  ;;  %v6289_v49 = vor.u32 %v6288_v19, %v15201_v6 }
 0x20c   : > { %3677 = vmatmul.bf16.gmra.mxu1 %v3497_v60  ;;  %v6269_v5 = vshrl.u32 %v5768_v18, 16  ;;  %v6272_v38 = vshll.u32 %v5768_v18, 16  ;;  %v619_v17 = vld [vmem:[#allocation2 + $0x15c] sm:$0x1]  ;;  %v2965_v21 = vrot.slane %v2963_v10, 5  ;;  %v4344_v60 = vrot.slane %v4020_v41, 5 }
 0x20d   : > { %v5592_v2 = vadd.f32 %v5389_v26, %v4910_v57  ;;  %v1633_v59 = vsel %vm13721_vm4, %v16992_v62, %v1632_v4  ;;  %v13140_v39 = vld [vmem:[#allocation7 + $0x1d8] sm:$0xff]  ;;  %5428 = vmatmul.bf16.gmra.mxu3 %v12464_v40  ;;  %v6299_v63 = vrot.slane %v6297_v27, 4  ;;  %v6267_v62 = vsel %vm14377_vm12, %v15195_v12, %v15182_v35  ;;  %v2442_v57 = vld [vmem:[#allocation2 + $0x150] sm:$0xf]  ;;  %v17004_v43 = vld [vmem:[#allocation37_spill] sm:$0xff] }
 0x20e   : > { %v13092_v13 = vld [vmem:[#allocation7 + $0x158] sm:$0xff]  ;;  %v6271_v23 = vrot.slane %v6269_v5, 4  ;;  %v6274_v14 = vrot.slane %v6272_v38, 5  ;;  %1634 = vst [vmem:[#allocation2 + $0x14c] sm:$0x1] %v1633_v59  ;;  %v6967_v26 = vpop.f32.mrf.mxu0  ;;  %v2974_v4 = vor.u32 %v15191_v0, %v15185_v55  ;;  %v6302_v18 = vrot.slane %v6300_v8, 5  ;;  %10254 = vmatpush.bf16.msra.mxu3 %v13140_v39 }
 0x20f   : > { %v13148_v42 = vld [vmem:[#allocation7 + $0x218] sm:$0xff]  ;;  %v1638_v41 = vld [vmem:[#allocation2 + $0x154] sm:$0x1]  ;;  %7993 = vmatpush.bf16.msra.mxu1 %v13092_v13  ;;  %v3842_v40 = vadd.f32 %v3640_v33, %v14841_v32  ;;  %v2966_v27 = vsel %vm14377_vm12, %v15203_v31, %v2965_v21  ;;  %v16995_v12 = vrot.slane %v15168_v22, 9  ;;  %v620_v8 = vsel %vm13715_vm3, 0, %v619_v17  ;;  %v4709_v9 = vpop.f32.mrf.mxu2 }
 0x210   : > { %v6275_v10 = vor.u32 %v6274_v14, %v6271_v23  ;;  %v16993_v5 = vld [vmem:[#allocation15_spill] sm:$0xff]  ;;  %11320 = vmatpush.bf16.msra.mxu0 %v13148_v42  ;;  %v15232_v55 = vld [vmem:[#allocation2 + $0x158] sm:$0xf]  ;;  %v6303_v32 = vor.u32 %v6302_v18, %v6299_v63  ;;  %v15240_v31 = vadd.f32 %v6967_v26, %v5592_v2  ;;  %v5391_v59 = vpop.f32.mrf.mxu3  ;;  %621 = vst [vmem:[#allocation2 + $0x15c] sm:$0x1] %v620_v8  ;;  %v2982_v21 = vshrl.u32 %v2442_v57, 16 }
 0x211   : > { %v16994_v38 = vrot.slane %v16993_v5, 4  ;;  %v5769_v0 = vld [vmem:[#allocation2 + $0x134] sm:$0x1]  ;;  %v4345_v6 = vsel %vm14367_vm11, %v16995_v12, %v4344_v60  ;;  %v2985_v13 = vshll.u32 %v2442_v57, 16  ;;  %v4911_v42 = vadd.f32 %v4709_v9, %v3842_v40  ;;  %v15247_v2 = vld [vmem:[#allocation2 + $0x150] sm:$0xe] }
 0x212   : > { %16996 = vst [vmem:[#allocation39_spill] sm:$0xff] %v15240_v31  ;;  %v6276_v39 = vrot.slane %v6275_v10, 4  ;;  %v6278_v19 = vshll.u32 %v5769_v0, 16  ;;  %v2975_v23 = vrot.slane %v2974_v4, 4  ;;  %v15242_v22 = vrot.slane %v6289_v49, 4  ;;  %v16999_v9 = vld [vmem:[#allocation45_spill] sm:$0xff] }
 0x213   : > { %v1639_v35 = vsel %vm13721_vm4, %v16994_v38, %v1638_v41  ;;  %v15244_v14 = vrot.slane %v6303_v32, 4  ;;  %v2984_v33 = vrot.slane %v2982_v21, 4  ;;  %v2987_v63 = vrot.slane %v2985_v13, 5  ;;  %v3643_v49 = vpop.f32.mrf.mxu1 }
 0x214   : > { %1640 = vst [vmem:[#allocation2 + $0x154] sm:$0x1] %v1639_v35  ;;  %v6280_v60 = vrot.slane %v6278_v19, 5  ;;  %v2996_v17 = vshrl.u32 %v15232_v55, 16  ;;  %v6777_v26 = vunpack.c.l.b16 %v6267_v62  ;;  %v15249_v41 = vadd.f32 %v5391_v59, %v4911_v42 }
 0x215   : > { %v2441_v18 = vld [vmem:[#allocation2 + $0x14c] sm:$0x1]  ;;  %v3450_v10 = vunpack.c.l.b16 %v2966_v27  ;;  %v4519_v57 = vunpack.c.l.b16 %v4345_v6  ;;  %v2988_v8 = vor.u32 %v2987_v63, %v2984_v33  ;;  %v2999_v62 = vshll.u32 %v15232_v55, 16 }
 0x216   : > { %16997 = vst [vmem:[#allocation40_spill] sm:$0xff] %v15249_v41  ;;  %v4022_v5 = vld [vmem:[#allocation2 + $0x14c] sm:$0x1]  ;;  %v6281_v4 = vsel %vm14377_vm12, %v6276_v39, %v6280_v60  ;;  %v2977_v38 = vshll.u32 %v2441_v18, 16  ;;  %v15253_v32 = vpop.f32.mrf.mxu0  ;;  %v12339_v19 = vrot.slane %v15247_v2, 9  ;;  %v3843_v27 = vadd.f32 %v3643_v49, %v16999_v9  ;;  %v17001_v49 = vld [vmem:[#allocation16_spill] sm:$0xff] }
 0x217   : > { %v5771_v40 = vld [vmem:[#allocation2 + $0x14c] sm:$0x1]  ;;  %v4348_v35 = vrot.slane %v4022_v5, 5  ;;  %v6778_v12 = vunpack.c.l.b16 %v6281_v4  ;;  %16998 = vst [vmem:[#allocation31_spill] sm:$0xff] %v15253_v32  ;;  %v17000_v6 = vrot.slane %v15177_v34, 9  ;;  %v2998_v33 = vrot.slane %v2996_v17, 4  ;;  %v4712_v2 = vpop.f32.mrf.mxu2 }
 0x218   : > { %v6292_v0 = vshll.u32 %v5771_v40, 16  ;;  %v2979_v59 = vrot.slane %v2977_v38, 5  ;;  %v1644_v40 = vld [vmem:[#allocation2 + $0x15c] sm:$0x1]  ;;  %v5394_v4 = vpop.f32.mrf.mxu3  ;;  %v17002_v38 = vrot.slane %v17001_v49, 4  ;;  %v3001_v49 = vrot.slane %v2999_v62, 5 }
 0x219   : > { %v4349_v39 = vsel %vm14367_vm11, %v17000_v6, %v4348_v35  ;;  %v6826_v60 = vpack.c.b16 %v6778_v12, %v6777_v26  ;;  %v2989_v35 = vrot.slane %v2988_v8, 4  ;;  %v622_v26 = vld [vmem:[#allocation2 + $0x164] sm:$0x1]  ;;  %v5774_v8 = vld [vmem:[#allocation2 + $0x158] sm:$0xf] }
 0x21a   : > { %v6294_v13 = vrot.slane %v6292_v0, 5  ;;  %v4520_v18 = vunpack.c.l.b16 %v4349_v39  ;;  %v2980_v55 = vsel %vm14377_vm12, %v2975_v23, %v2979_v59  ;;  %v1645_v34 = vsel %vm13721_vm4, %v17002_v38, %v1644_v40  ;;  %v15268_v0 = vld [vmem:[#allocation2 + $0x158] sm:$0xf]  ;;  %v15273_v59 = vld [vmem:[#allocation2 + $0x15c] sm:$0xf0] }
 0x21b   : > { %v5773_v21 = vld [vmem:[#allocation2 + $0x154] sm:$0x1]  ;;  %7006 = vmatmul.bf16.gmra.mxu0 %v6826_v60  ;;  %v3451_v12 = vunpack.c.l.b16 %v2980_v55  ;;  %1646 = vst [vmem:[#allocation2 + $0x15c] sm:$0x1] %v1645_v34  ;;  %v4912_v39 = vadd.f32 %v4712_v2, %v3843_v27  ;;  %v3645_v62 = vpop.f32.mrf.mxu1  ;;  %v5776_v55 = vld [vmem:[#allocation2 + $0x160] sm:$0xf] }
 0x21c   : > { %v2443_v42 = vld [vmem:[#allocation2 + $0x154] sm:$0x1]  ;;  %v6306_v5 = vshll.u32 %v5773_v21, 16  ;;  %v4567_v6 = vpack.c.b16 %v4520_v18, %v4519_v57  ;;  %v6295_v17 = vsel %vm14377_vm12, %v15242_v22, %v6294_v13  ;;  %v4025_v57 = vld [vmem:[#allocation2 + $0x158] sm:$0xe]  ;;  %v623_v18 = vsel %vm13715_vm3, 0, %v622_v26 }
 0x21d   : > { %v4024_v63 = vld [vmem:[#allocation2 + $0x154] sm:$0x1]  ;;  %v2991_v9 = vshll.u32 %v2443_v42, 16  ;;  %v17003_v42 = vld [vmem:[#allocation36_spill] sm:$0xff]  ;;  %v3498_v60 = vpack.c.b16 %v3451_v12, %v3450_v10  ;;  %v17005_v22 = vor.u32 %v15199_v28, %v15197_v24  ;;  %v15282_v13 = vunpack.c.l.b16 %v6295_v17  ;;  %624 = vst [vmem:[#allocation2 + $0x164] sm:$0x1] %v623_v18 }
 0x21e   : > { %v6308_v23 = vrot.slane %v6306_v5, 5  ;;  %v4352_v40 = vrot.slane %v4024_v63, 5  ;;  %4751 = vmatmul.bf16.gmra.mxu2 %v4567_v6  ;;  %v5594_v27 = vadd.f32 %v5394_v4, %v4912_v39  ;;  %v3002_v5 = vor.u32 %v3001_v49, %v2998_v33  ;;  %v625_v10 = vld [vmem:[#allocation2 + $0x16c] sm:$0x1]  ;;  %v6972_v2 = vpop.f32.mrf.mxu0  ;;  %v17006_v33 = vld [vmem:[#allocation48_spill] sm:$0xff] }
 0x21f   : > { %v2993_v21 = vrot.slane %v2991_v9, 5  ;;  %5433 = vmatmul.bf16.gmra.mxu3 %v17005_v22  ;;  %3682 = vmatmul.bf16.gmra.mxu1 %v3498_v60  ;;  %v6311_v4 = vshrl.u32 %v5774_v8, 16  ;;  %v3844_v9 = vadd.f32 %v3645_v62, %v17006_v33  ;;  %v12340_v12 = vrot.slane %v4025_v57, 9  ;;  %v2446_v18 = vld [vmem:[#allocation2 + $0x160] sm:$0xf] }
 0x220   : > { %v6309_v34 = vsel %vm14377_vm12, %v15244_v14, %v6308_v23  ;;  %v4353_v28 = vsel %vm14367_vm11, %v12339_v19, %v4352_v40  ;;  %v3003_v26 = vrot.slane %v3002_v5, 4  ;;  %v6314_v6 = vshll.u32 %v5774_v8, 16  ;;  %v4714_v23 = vpop.f32.mrf.mxu2  ;;  %v5396_v22 = vpop.f32.mrf.mxu3  ;;  %v15298_v62 = vld [vmem:[#allocation2 + $0x168] sm:$0xf]  ;;  %v15302_v63 = vld [vmem:[#allocation2 + $0x16c] sm:$0xf0] }
 0x221   : > { %v2994_v24 = vsel %vm14377_vm12, %v2989_v35, %v2993_v21  ;;  %v6313_v17 = vrot.slane %v6311_v4, 4  ;;  %v6325_v39 = vshrl.u32 %v5776_v55, 16  ;;  %v6328_v49 = vshll.u32 %v5776_v55, 16 }
 0x222   : > { %v626_v60 = vsel %vm13715_vm3, 0, %v625_v10  ;;  %v6780_v14 = vunpack.c.l.b16 %v6309_v34  ;;  %v2445_v35 = vld [vmem:[#allocation2 + $0x15c] sm:$0x1]  ;;  %v15296_v21 = vunpack.c.l.b16 %v2994_v24  ;;  %v4521_v40 = vunpack.c.l.b16 %v4353_v28 }
 0x223   : > { %v4026_v19 = vld [vmem:[#allocation2 + $0x15c] sm:$0x1]  ;;  %v15300_v57 = vadd.f32 %v6972_v2, %v5594_v27  ;;  %v4913_v8 = vadd.f32 %v4714_v23, %v3844_v9  ;;  %v3005_v5 = vshll.u32 %v2445_v35, 16  ;;  %v6316_v4 = vrot.slane %v6314_v6, 5  ;;  %627 = vst [vmem:[#allocation2 + $0x16c] sm:$0x1] %v626_v60  ;;  %v3648_v27 = vpop.f32.mrf.mxu1 }
 0x224   : > { %v5775_v32 = vld [vmem:[#allocation2 + $0x15c] sm:$0x1]  ;;  %v4356_v55 = vrot.slane %v4026_v19, 5  ;;  %v6327_v33 = vrot.slane %v6325_v39, 4  ;;  %v6330_v34 = vrot.slane %v6328_v49, 5  ;;  %v3010_v38 = vshrl.u32 %v2446_v18, 16 }
 0x225   : > { %17007 = vst [vmem:[#allocation32_spill] sm:$0xff] %v15300_v57  ;;  %v6320_v10 = vshll.u32 %v5775_v32, 16  ;;  %v5595_v24 = vadd.f32 %v5396_v22, %v4913_v8  ;;  %v3007_v41 = vrot.slane %v3005_v5, 5  ;;  %v1650_v31 = vld [vmem:[#allocation2 + $0x164] sm:$0x1]  ;;  %v6317_v52 = vor.u32 %v6316_v4, %v6313_v17  ;;  %v17008_v9 = vld [vmem:[#allocation19_spill] sm:$0xff] }
 0x226   : > { %v4357_v28 = vsel %vm14367_vm11, %v12340_v12, %v4356_v55  ;;  %v17009_v23 = vrot.slane %v17008_v9, 4  ;;  %v6331_v39 = vor.u32 %v6330_v34, %v6327_v33  ;;  %v2448_v49 = vld [vmem:[#allocation2 + $0x168] sm:$0xf]  ;;  %v6827_v60 = vpack.c.b16 %v6780_v14, %v15282_v13  ;;  %v6974_v35 = vpop.f32.mrf.mxu0  ;;  %v15313_v19 = vld [vmem:[#allocation2 + $0x160] sm:$0xe]  ;;  %v17010_v8 = vld [vmem:[#allocation51_spill] sm:$0xff] }
 0x227   : > { %v4522_v2 = vunpack.c.l.b16 %v4357_v28  ;;  %v6322_v32 = vrot.slane %v6320_v10, 5  ;;  %v3008_v22 = vsel %vm14377_vm12, %v3003_v26, %v3007_v41  ;;  %v6318_v12 = vrot.slane %v6317_v52, 4  ;;  %v628_v10 = vld [vmem:[#allocation2 + $0x174] sm:$0x1]  ;;  %v5778_v28 = vld [vmem:[#allocation2 + $0x168] sm:$0xf] }
 0x228   : > { %v1651_v6 = vsel %vm13721_vm4, %v17009_v23, %v1650_v31  ;;  %v3845_v5 = vadd.f32 %v3648_v27, %v17010_v8  ;;  %v3453_v55 = vunpack.c.l.b16 %v3008_v22  ;;  %v3012_v31 = vrot.slane %v3010_v38, 4  ;;  %v4717_v26 = vpop.f32.mrf.mxu2  ;;  %v5399_v9 = vpop.f32.mrf.mxu3  ;;  %v5780_v38 = vld [vmem:[#allocation2 + $0x170] sm:$0xf] }
 0x229   : > { %1652 = vst [vmem:[#allocation2 + $0x164] sm:$0x1] %v1651_v6  ;;  %v3013_v4 = vshll.u32 %v2446_v18, 16  ;;  %v4568_v33 = vpack.c.b16 %v4522_v2, %v4521_v40  ;;  %v15318_v34 = vrot.slane %v6331_v39, 4  ;;  %v3024_v13 = vshrl.u32 %v2448_v49, 16  ;;  %v17011_v40 = vld [vmem:[#allocation20_spill] sm:$0xff] }
 0x22a   : > { %v3027_v14 = vshll.u32 %v2448_v49, 16  ;;  %v3499_v41 = vpack.c.b16 %v3453_v55, %v15296_v21  ;;  %v6323_v52 = vsel %vm14377_vm12, %v6318_v12, %v6322_v32  ;;  %v1656_v23 = vld [vmem:[#allocation2 + $0x16c] sm:$0x1]  ;;  %v12341_v27 = vrot.slane %v15313_v19, 9  ;;  %v15328_v21 = vld [vmem:[#allocation2 + $0x168] sm:$0xe] }
 0x22b   : > { %v3015_v6 = vrot.slane %v3013_v4, 5  ;;  %7011 = vmatmul.bf16.gmra.mxu0 %v6827_v60  ;;  %v4914_v18 = vadd.f32 %v4717_v26, %v3845_v5  ;;  %v17012_v2 = vrot.slane %v17011_v40, 4  ;;  %v3026_v49 = vrot.slane %v3024_v13, 4  ;;  %v631_v19 = vld [vmem:[#allocation2 + $0x17c] sm:$0x1] }
 0x22c   : > { %v3029_v22 = vrot.slane %v3027_v14, 5  ;;  %v629_v12 = vsel %vm13715_vm3, 0, %v628_v10  ;;  %v6339_v8 = vshrl.u32 %v5778_v28, 16  ;;  %v6342_v55 = vshll.u32 %v5778_v28, 16 }
 0x22d   : > { %v1657_v39 = vsel %vm13721_vm4, %v17012_v2, %v1656_v23  ;;  %v3016_v32 = vor.u32 %v3015_v6, %v3012_v31  ;;  %v15332_v60 = vadd.f32 %v5399_v9, %v4914_v18  ;;  %630 = vst [vmem:[#allocation2 + $0x174] sm:$0x1] %v629_v12  ;;  %v6353_v4 = vshrl.u32 %v5780_v38, 16  ;;  %v2450_v23 = vld [vmem:[#allocation2 + $0x170] sm:$0xf]  ;;  %v3650_v6 = vpop.f32.mrf.mxu1 }
 0x22e   : > { %1658 = vst [vmem:[#allocation2 + $0x16c] sm:$0x1] %v1657_v39  ;;  %4756 = vmatmul.bf16.gmra.mxu2 %v4568_v33  ;;  %v3030_v5 = vor.u32 %v3029_v22, %v3026_v49  ;;  %v6356_v26 = vshll.u32 %v5780_v38, 16  ;;  %v17013_v13 = vor.u32 %v15273_v59, %v15268_v0  ;;  %v15337_v31 = vunpack.c.l.b16 %v6323_v52  ;;  %v15342_v9 = vpop.f32.mrf.mxu0  ;;  %v17014_v38 = vld [vmem:[#allocation55_spill] sm:$0xff] }
 0x22f   : > { %v12342_v28 = vrot.slane %v15328_v21, 9  ;;  %v6341_v40 = vrot.slane %v6339_v8, 4  ;;  %v15340_v33 = vadd.f32 %v6974_v35, %v5595_v24  ;;  %3687 = vmatmul.bf16.gmra.mxu1 %v3499_v41  ;;  %v3846_v2 = vadd.f32 %v3650_v6, %v17014_v38 }
 0x230   : > { %5438 = vmatmul.bf16.gmra.mxu3 %v17013_v13  ;;  %v5777_v14 = vld [vmem:[#allocation2 + $0x164] sm:$0x1]  ;;  %v3017_v39 = vrot.slane %v3016_v32, 4  ;;  %v6344_v22 = vrot.slane %v6342_v55, 5  ;;  %v6355_v52 = vrot.slane %v6353_v4, 4  ;;  %v6358_v12 = vrot.slane %v6356_v26, 5  ;;  %v4719_v35 = vpop.f32.mrf.mxu2  ;;  %v5401_v21 = vpop.f32.mrf.mxu3 }
 0x231   : > { %v2447_v10 = vld [vmem:[#allocation2 + $0x164] sm:$0x1]  ;;  %v6334_v18 = vshll.u32 %v5777_v14, 16  ;;  %v3031_v57 = vrot.slane %v3030_v5, 4  ;;  %v632_v24 = vsel %vm13715_vm3, 0, %v631_v19  ;;  %v3038_v32 = vshrl.u32 %v2450_v23, 16 }
 0x232   : > { %v3019_v49 = vshll.u32 %v2447_v10, 16  ;;  %v4028_v0 = vld [vmem:[#allocation2 + $0x164] sm:$0x1]  ;;  %v6345_v8 = vor.u32 %v6344_v22, %v6341_v40  ;;  %633 = vst [vmem:[#allocation2 + $0x17c] sm:$0x1] %v632_v24  ;;  %v3041_v14 = vshll.u32 %v2450_v23, 16  ;;  %v4915_v4 = vadd.f32 %v4719_v35, %v3846_v2 }
 0x233   : > { %v4360_v59 = vrot.slane %v4028_v0, 5  ;;  %v6336_v13 = vrot.slane %v6334_v18, 5  ;;  %v6359_v10 = vor.u32 %v6358_v12, %v6355_v52 }
 0x234   : > { %v3021_v17 = vrot.slane %v3019_v49, 5  ;;  %v1662_v40 = vld [vmem:[#allocation2 + $0x174] sm:$0x1]  ;;  %v5597_v0 = vadd.f32 %v5401_v21, %v4915_v4  ;;  %v3040_v4 = vrot.slane %v3038_v32, 4  ;;  %v17017_v32 = vld [vmem:[#allocation26_spill] sm:$0xff] }
 0x235   : > { %v4361_v41 = vsel %vm14367_vm11, %v12341_v27, %v4360_v59  ;;  %v6337_v55 = vsel %vm14377_vm12, %v15318_v34, %v6336_v13  ;;  %v2449_v26 = vld [vmem:[#allocation2 + $0x16c] sm:$0x1]  ;;  %v17015_v59 = vld [vmem:[#allocation25_spill] sm:$0xff]  ;;  %v6346_v34 = vrot.slane %v6345_v8, 4  ;;  %v2452_v13 = vld [vmem:[#allocation2 + $0x178] sm:$0xf] }
 0x236   : > { %v3022_v5 = vsel %vm14377_vm12, %v3017_v39, %v3021_v17  ;;  %v4030_v6 = vld [vmem:[#allocation2 + $0x16c] sm:$0x1]  ;;  %v6782_v18 = vunpack.c.l.b16 %v6337_v55  ;;  %v3033_v38 = vshll.u32 %v2449_v26, 16  ;;  %v4523_v27 = vunpack.c.l.b16 %v4361_v41  ;;  %v3653_v17 = vpop.f32.mrf.mxu1  ;;  %v6979_v12 = vpop.f32.mrf.mxu0  ;;  %v4031_v26 = vld [vmem:[#allocation2 + $0x170] sm:$0xe] }
 0x237   : > { %v5779_v19 = vld [vmem:[#allocation2 + $0x16c] sm:$0x1]  ;;  %v4364_v49 = vrot.slane %v4030_v6, 5  ;;  %v17016_v23 = vrot.slane %v17015_v59, 4  ;;  %v3454_v35 = vunpack.c.l.b16 %v3022_v5  ;;  %v15361_v55 = vrot.slane %v6359_v10, 4 }
 0x238   : > { %v6348_v2 = vshll.u32 %v5779_v19, 16  ;;  %v6828_v24 = vpack.c.b16 %v6782_v18, %v15337_v31  ;;  %v3035_v39 = vrot.slane %v3033_v38, 5  ;;  %v3043_v6 = vrot.slane %v3041_v14, 5  ;;  %v769_v59 = vld [vmem:[%s13699_s25 + $0x9c] sm:$0xf]  ;;  %v4722_v10 = vpop.f32.mrf.mxu2 }
 0x239   : > { %v1663_v22 = vsel %vm13721_vm4, %v17016_v23, %v1662_v40  ;;  %v4365_v52 = vsel %vm14367_vm11, %v12342_v28, %v4364_v49  ;;  %v3052_v31 = vshrl.u32 %v2452_v13, 16  ;;  %v3055_v19 = vshll.u32 %v2452_v13, 16  ;;  %v1668_v49 = vld [vmem:[#allocation2 + $0x17c] sm:$0x1]  ;;  %v392_v40 = vld [vmem:[#allocation2 + $0x180] sm:$0x1]  ;;  %v5404_v23 = vpop.f32.mrf.mxu3 }
 0x23a   : > { %1664 = vst [vmem:[#allocation2 + $0x174] sm:$0x1] %v1663_v22  ;;  %v4524_v21 = vunpack.c.l.b16 %v4365_v52  ;;  %v6350_v41 = vrot.slane %v6348_v2, 5  ;;  %v3036_v8 = vsel %vm14377_vm12, %v3031_v57, %v3035_v39  ;;  %v3847_v5 = vadd.f32 %v3653_v17, %v14463_v15  ;;  %v634_v39 = vld [vmem:[#allocation2 + $0x184] sm:$0x1] }
 0x23b   : > { %v3455_v18 = vunpack.c.l.b16 %v3036_v8  ;;  %v17018_v22 = vrot.slane %v17017_v32, 4  ;;  %v3044_v14 = vor.u32 %v3043_v6, %v3040_v4  ;;  %v3054_v2 = vrot.slane %v3052_v31, 4  ;;  %7016 = vmatmul.bf16.gmra.mxu0 %v6828_v24  ;;  %v5782_v52 = vld [vmem:[#allocation2 + $0x178] sm:$0xf] }
 0x23c   : > { %v4569_v38 = vpack.c.b16 %v4524_v21, %v4523_v27  ;;  %v6351_v28 = vsel %vm14377_vm12, %v6346_v34, %v6350_v41  ;;  %v12343_v13 = vrot.slane %v4031_v26, 9  ;;  %v4916_v17 = vadd.f32 %v4722_v10, %v3847_v5  ;;  %v15375_v41 = vld [vmem:[#allocation2 + $0x178] sm:$0xe] }
 0x23d   : > { %v1669_v57 = vsel %vm13721_vm4, %v17018_v22, %v1668_v49  ;;  %v3500_v15 = vpack.c.b16 %v3455_v18, %v3454_v35  ;;  %v15373_v27 = vunpack.c.l.b16 %v6351_v28  ;;  %v3057_v34 = vrot.slane %v3055_v19, 5 }
 0x23e   : > { %1670 = vst [vmem:[#allocation2 + $0x17c] sm:$0x1] %v1669_v57  ;;  %v3045_v21 = vrot.slane %v3044_v14, 4  ;;  %v393_v8 = vsel %vm13721_vm4, 0, %v392_v40  ;;  %v1107_v32 = vshrl.u32 %v769_v59, 16  ;;  %v1110_v49 = vshll.u32 %v769_v59, 16  ;;  %4761 = vmatmul.bf16.gmra.mxu2 %v4569_v38  ;;  %v3655_v28 = vpop.f32.mrf.mxu1  ;;  %v6982_v10 = vpop.f32.mrf.mxu0 }
 0x23f   : > { %v5598_v26 = vadd.f32 %v5404_v23, %v4916_v17  ;;  %v3058_v24 = vor.u32 %v3057_v34, %v3054_v2  ;;  %v15381_v31 = vadd.f32 %v15342_v9, %v15332_v60  ;;  %v15383_v19 = vadd.f32 %v6979_v12, %v5597_v0  ;;  %394 = vst [vmem:[#allocation2 + $0x180] sm:$0x1] %v393_v8  ;;  %v17021_v23 = vld [vmem:[#allocation60_spill] sm:$0xff]  ;;  %v640_v8 = vld [vmem:[#allocation2 + $0x194] sm:$0x1] }
 0x240   : > { %v17020_v5 = vor.u32 %v15302_v63, %v15298_v62  ;;  %v1109_v38 = vrot.slane %v1107_v32, 7  ;;  %3692 = vmatmul.bf16.gmra.mxu1 %v3500_v15  ;;  %v3848_v22 = vadd.f32 %v3655_v28, %v17021_v23  ;;  %v12344_v57 = vrot.slane %v15375_v41, 9  ;;  %v643_v14 = vld [vmem:[#allocation2 + $0x19c] sm:$0x1]  ;;  %v13131_v32 = vld [vmem:[#allocation7 + $0x190] sm:$0xff] }
 0x241   : > { %v5781_v4 = vld [vmem:[#allocation2 + $0x174] sm:$0x1]  ;;  %17019 = vst [vmem:[#allocation35_spill] sm:$0xff] %v15383_v19  ;;  %v635_v60 = vsel %vm13715_vm3, 0, %v634_v39  ;;  %v6367_v9 = vshrl.u32 %v5782_v52, 16  ;;  %v3059_v63 = vrot.slane %v3058_v24, 4  ;;  %v4724_v39 = vpop.f32.mrf.mxu2  ;;  %8677 = vmatpush.bf16.msra.mxu2 %v13131_v32 }
 0x242   : > { %v2451_v6 = vld [vmem:[#allocation2 + $0x174] sm:$0x1]  ;;  %5443 = vmatmul.bf16.gmra.mxu3 %v17020_v5  ;;  %v6362_v18 = vshll.u32 %v5781_v4, 16  ;;  %636 = vst [vmem:[#allocation2 + $0x184] sm:$0x1] %v635_v60  ;;  %v1112_v2 = vor.u32 %v1110_v49, %v1109_v38  ;;  %v1113_v17 = vrot.slane %v1109_v38, 4  ;;  %v5406_v4 = vpop.f32.mrf.mxu3  ;;  %v4917_v28 = vadd.f32 %v4724_v39, %v3848_v22 }
 0x243   : > { %v4032_v35 = vld [vmem:[#allocation2 + $0x174] sm:$0x1]  ;;  %v3047_v40 = vshll.u32 %v2451_v6, 16  ;;  %v6369_v34 = vrot.slane %v6367_v9, 4  ;;  %v6370_v15 = vshll.u32 %v5782_v52, 16  ;;  %v641_v23 = vsel %vm13715_vm3, 0, %v640_v8 }
 0x244   : > { %v4368_v59 = vrot.slane %v4032_v35, 5  ;;  %v6364_v0 = vrot.slane %v6362_v18, 5  ;;  %v15399_v18 = vadd.f32 %v6982_v10, %v5598_v26  ;;  %v2454_v60 = vld [vmem:[#allocation2 + $0x190] sm:$0xf]  ;;  %v15406_v9 = vadd.f32 %v5406_v4, %v4917_v28  ;;  %642 = vst [vmem:[#allocation2 + $0x194] sm:$0x1] %v641_v23 }
 0x245   : > { %v3049_v12 = vrot.slane %v3047_v40, 5  ;;  %v2453_v6 = vld [vmem:[#allocation2 + $0x17c] sm:$0x1]  ;;  %v6372_v38 = vrot.slane %v6370_v15, 5  ;;  %v644_v10 = vsel %vm13715_vm3, 0, %v643_v14 }
 0x246   : > { %v4369_v62 = vsel %vm14367_vm11, %v12343_v13, %v4368_v59  ;;  %v6365_v41 = vsel %vm14377_vm12, %v15361_v55, %v6364_v0  ;;  %v4034_v35 = vld [vmem:[#allocation2 + $0x17c] sm:$0x1]  ;;  %17022 = vst [vmem:[#allocation13_spill] sm:$0xff] %v15399_v18  ;;  %v3061_v52 = vshll.u32 %v2453_v6, 16  ;;  %v1671_v26 = vld [vmem:[#allocation2 + $0x180] sm:$0xf]  ;;  %v3658_v22 = vpop.f32.mrf.mxu1 }
 0x247   : > { %v3050_v24 = vsel %vm14377_vm12, %v3045_v21, %v3049_v12  ;;  %v4525_v13 = vunpack.c.l.b16 %v4369_v62  ;;  %v5783_v5 = vld [vmem:[#allocation2 + $0x17c] sm:$0x1]  ;;  %v6784_v49 = vunpack.c.l.b16 %v6365_v41  ;;  %v4372_v59 = vrot.slane %v4034_v35, 5  ;;  %645 = vst [vmem:[#allocation2 + $0x19c] sm:$0x1] %v644_v10  ;;  %v17023_v41 = vld [vmem:[#allocation63_spill] sm:$0xff] }
 0x248   : > { %v15401_v40 = vunpack.c.l.b16 %v3050_v24  ;;  %v6376_v55 = vshll.u32 %v5783_v5, 16  ;;  %v3063_v0 = vrot.slane %v3061_v52, 5  ;;  %v1672_v62 = vsel %vm13740_vm6, %v1112_v2, %v1671_v26  ;;  %v2456_v32 = vld [vmem:[#allocation2 + $0x198] sm:$0xf]  ;;  %v646_v35 = vld [vmem:[#allocation2 + $0x1a4] sm:$0x1] }
 0x249   : > { %v6829_v21 = vpack.c.b16 %v6784_v49, %v15373_v27  ;;  %v4373_v12 = vsel %vm14367_vm11, %v12344_v57, %v4372_v59  ;;  %v6373_v15 = vor.u32 %v6372_v38, %v6369_v34  ;;  %v6984_v27 = vpop.f32.mrf.mxu0  ;;  %v3849_v39 = vadd.f32 %v3658_v22, %v17023_v41  ;;  %1673 = vst [vmem:[#allocation2 + $0x180] sm:$0xf] %v1672_v62  ;;  %v1674_v14 = vld [vmem:[#allocation2 + $0x184] sm:$0x1]  ;;  %v15419_v49 = vld [vmem:[#allocation2 + $0x190] sm:$0xe]  ;;  %v4727_v10 = vpop.f32.mrf.mxu2 }
 0x24a   : > { %v6378_v8 = vrot.slane %v6376_v55, 5  ;;  %v3064_v4 = vsel %vm14377_vm12, %v3059_v63, %v3063_v0  ;;  %v4526_v6 = vunpack.c.l.b16 %v4373_v12  ;;  %v3066_v24 = vshrl.u32 %v2454_v60, 16  ;;  %v15421_v28 = vld [vmem:[#allocation2 + $0x198] sm:$0xe]  ;;  %v17024_v55 = vld [vmem:[#allocation41_spill] sm:$0xff] }
 0x24b   : > { %v3457_v5 = vunpack.c.l.b16 %v3064_v4  ;;  %v1675_v57 = vsel %vm13721_vm4, %v1113_v17, %v1674_v14  ;;  %v6374_v2 = vrot.slane %v6373_v15, 4  ;;  %v3069_v34 = vshll.u32 %v2454_v60, 16  ;;  %v12479_v26 = vld [vmem:[#allocation2 + $0x178] sm:$0xf]  ;;  %7021 = vmatmul.bf16.gmra.mxu0 %v6829_v21  ;;  %v15430_v41 = vld [vmem:[#allocation2 + $0x19c] sm:$0xf0]  ;;  %v5409_v4 = vpop.f32.mrf.mxu3 }
 0x24c   : > { %v4570_v52 = vpack.c.b16 %v4526_v6, %v4525_v13  ;;  %1676 = vst [vmem:[#allocation2 + $0x184] sm:$0x1] %v1675_v57  ;;  %v3068_v59 = vrot.slane %v3066_v24, 4  ;;  %v3080_v38 = vshrl.u32 %v2456_v32, 16  ;;  %v3083_v63 = vshll.u32 %v2456_v32, 16 }
 0x24d   : > { %v3501_v0 = vpack.c.b16 %v3457_v5, %v15401_v40  ;;  %v3071_v22 = vrot.slane %v3069_v34, 5  ;;  %v15425_v12 = vld [vmem:[#allocation2 + $0x198] sm:$0xf]  ;;  %v4918_v17 = vadd.f32 %v4727_v10, %v3849_v39  ;;  %v12345_v15 = vrot.slane %v15419_v49, 9  ;;  %v2455_v40 = vld [vmem:[#allocation2 + $0x194] sm:$0x1] }
 0x24e   : > { %v3082_v60 = vrot.slane %v3080_v38, 4  ;;  %v3085_v62 = vrot.slane %v3083_v63, 5  ;;  %v15428_v13 = vld [vmem:[#allocation2 + $0x198] sm:$0xf]  ;;  %v6379_v32 = vsel %vm14377_vm12, %v6374_v2, %v6378_v8  ;;  %v4036_v14 = vld [vmem:[#allocation2 + $0x194] sm:$0x1]  ;;  %4766 = vmatmul.bf16.gmra.mxu2 %v4570_v52  ;;  %v3660_v2 = vpop.f32.mrf.mxu1  ;;  %v15445_v52 = vadd.f32 %v6984_v27, %v15406_v9 }
 0x24f   : > { %v3072_v6 = vor.u32 %v3071_v22, %v3068_v59  ;;  %v647_v21 = vsel %vm13715_vm3, 0, %v646_v35  ;;  %v15437_v39 = vadd.f32 %v5409_v4, %v4918_v17  ;;  %v1680_v5 = vld [vmem:[#allocation2 + $0x19c] sm:$0x1]  ;;  %v3075_v57 = vshll.u32 %v2455_v40, 16  ;;  %v5788_v38 = vld [vmem:[#allocation2 + $0x1a0] sm:$0xf] }
 0x250   : > { %v3086_v34 = vor.u32 %v3085_v62, %v3082_v60  ;;  %v4376_v49 = vrot.slane %v4036_v14, 5  ;;  %648 = vst [vmem:[#allocation2 + $0x1a4] sm:$0x1] %v647_v21  ;;  %v13060_v63 = vld [vmem:[#allocation2 + $0x17c] sm:$0xf0]  ;;  %v17025_v59 = vrot.slane %v14092_v48, 4  ;;  %3697 = vmatmul.bf16.gmra.mxu1 %v3501_v0  ;;  %v15447_v4 = vunpack.c.l.b16 %v6379_v32 }
 0x251   : > { %v5784_v8 = vld [vmem:[#allocation2 + $0x180] sm:$0xf]  ;;  %v3073_v22 = vrot.slane %v3072_v6, 4  ;;  %v6395_v35 = vshrl.u32 %v15425_v12, 16  ;;  %17026 = vst [vmem:[#allocation15_spill] sm:$0xff] %v15445_v52  ;;  %v12480_v17 = vor.u32 %v13060_v63, %v12479_v26  ;;  %v13139_v40 = vld [vmem:[#allocation7 + $0x1d0] sm:$0xff]  ;;  %v6987_v27 = vpop.f32.mrf.mxu0 }
 0x252   : > { %v1681_v10 = vsel %vm13721_vm4, %v17025_v59, %v1680_v5  ;;  %v6381_v60 = vshrl.u32 %v5784_v8, 16  ;;  %v6384_v62 = vshll.u32 %v5784_v8, 16  ;;  %v13091_v14 = vld [vmem:[#allocation7 + $0x150] sm:$0xff]  ;;  %v17027_v48 = vld [vmem:[#allocation66_spill] sm:$0xff]  ;;  %v3077_v24 = vrot.slane %v3075_v57, 5  ;;  %v4729_v59 = vpop.f32.mrf.mxu2  ;;  %10255 = vmatpush.bf16.msra.mxu3 %v13139_v40 }
 0x253   : > { %1682 = vst [vmem:[#allocation2 + $0x19c] sm:$0x1] %v1681_v10  ;;  %v5785_v21 = vld [vmem:[#allocation2 + $0x184] sm:$0x1]  ;;  %v3850_v23 = vadd.f32 %v3660_v2, %v17027_v48  ;;  %v15450_v5 = vrot.slane %v3086_v34, 4  ;;  %v13147_v9 = vld [vmem:[#allocation7 + $0x210] sm:$0xff]  ;;  %5448 = vmatmul.bf16.gmra.mxu3 %v12480_v17  ;;  %v4377_v32 = vsel %vm14367_vm11, %v12345_v15, %v4376_v49  ;;  %7994 = vmatpush.bf16.msra.mxu1 %v13091_v14 }
 0x254   : > { %v6383_v0 = vrot.slane %v6381_v60, 4  ;;  %v6386_v26 = vrot.slane %v6384_v62, 5  ;;  %v6390_v63 = vshll.u32 %v5785_v21, 16  ;;  %v649_v8 = vld [vmem:[#allocation2 + $0x1ac] sm:$0x1]  ;;  %v6397_v10 = vrot.slane %v6395_v35, 4  ;;  %11321 = vmatpush.bf16.msra.mxu0 %v13147_v9  ;;  %v5411_v62 = vpop.f32.mrf.mxu3 }
 0x255   : > { %v6398_v57 = vshll.u32 %v15425_v12, 16  ;;  %v6409_v34 = vshrl.u32 %v5788_v38, 16  ;;  %v6412_v2 = vshll.u32 %v5788_v38, 16  ;;  %v2458_v48 = vld [vmem:[#allocation2 + $0x1a0] sm:$0xf]  ;;  %v4919_v17 = vadd.f32 %v4729_v59, %v3850_v23 }
 0x256   : > { %v6387_v6 = vor.u32 %v6386_v26, %v6383_v0  ;;  %v6392_v52 = vrot.slane %v6390_v63, 5  ;;  %v3078_v60 = vsel %vm14377_vm12, %v3073_v22, %v3077_v24  ;;  %v650_v35 = vsel %vm13715_vm3, 0, %v649_v8  ;;  %v3663_v9 = vpop.f32.mrf.mxu1 }
 0x257   : > { %v1686_v21 = vld [vmem:[#allocation2 + $0x1a4] sm:$0x1]  ;;  %v6400_v15 = vrot.slane %v6398_v57, 5  ;;  %v6411_v49 = vrot.slane %v6409_v34, 4  ;;  %v6414_v14 = vrot.slane %v6412_v2, 5  ;;  %v15461_v18 = vadd.f32 %v5411_v62, %v4919_v17 }
 0x258   : > { %v6388_v12 = vrot.slane %v6387_v6, 4  ;;  %v17028_v38 = vrot.slane %v14135_v56, 4  ;;  %651 = vst [vmem:[#allocation2 + $0x1ac] sm:$0x1] %v650_v35  ;;  %v3094_v23 = vshrl.u32 %v2458_v48, 16  ;;  %v3458_v22 = vunpack.c.l.b16 %v3078_v60  ;;  %v17030_v62 = vld [vmem:[#allocation69_spill] sm:$0xff] }
 0x259   : > { %v4527_v26 = vunpack.c.l.b16 %v4377_v32  ;;  %v6401_v63 = vor.u32 %v6400_v15, %v6397_v10  ;;  %v15468_v59 = vadd.f32 %v6987_v27, %v15437_v39  ;;  %v6415_v34 = vor.u32 %v6414_v14, %v6411_v49  ;;  %v2460_v2 = vld [vmem:[#allocation2 + $0x1a8] sm:$0xf] }
 0x25a   : > { %v1687_v40 = vsel %vm13721_vm4, %v17028_v38, %v1686_v21  ;;  %v2457_v24 = vld [vmem:[#allocation2 + $0x19c] sm:$0x1]  ;;  %v6393_v6 = vsel %vm14377_vm12, %v6388_v12, %v6392_v52  ;;  %v3851_v21 = vadd.f32 %v3663_v9, %v17030_v62  ;;  %v15473_v38 = vpop.f32.mrf.mxu0  ;;  %v17031_v10 = vrot.slane %v15421_v28, 9  ;;  %v4732_v14 = vpop.f32.mrf.mxu2 }
 0x25b   : > { %v4038_v0 = vld [vmem:[#allocation2 + $0x19c] sm:$0x1]  ;;  %1688 = vst [vmem:[#allocation2 + $0x1a4] sm:$0x1] %v1687_v40  ;;  %v3089_v8 = vshll.u32 %v2457_v24, 16  ;;  %v6786_v17 = vunpack.c.l.b16 %v6393_v6  ;;  %v6402_v35 = vrot.slane %v6401_v63, 4 }
 0x25c   : > { %17029 = vst [vmem:[#allocation45_spill] sm:$0xff] %v15468_v59  ;;  %v4380_v56 = vrot.slane %v4038_v0, 5  ;;  %v5787_v57 = vld [vmem:[#allocation2 + $0x19c] sm:$0x1]  ;;  %v3096_v27 = vrot.slane %v3094_v23, 4  ;;  %v3097_v52 = vshll.u32 %v2458_v48, 16  ;;  %v4920_v24 = vadd.f32 %v4732_v14, %v3851_v21  ;;  %v5414_v23 = vpop.f32.mrf.mxu3 }
 0x25d   : > { %v6404_v60 = vshll.u32 %v5787_v57, 16  ;;  %v3091_v32 = vrot.slane %v3089_v8, 5  ;;  %v6830_v15 = vpack.c.b16 %v6786_v17, %v15447_v4  ;;  %v3108_v40 = vshrl.u32 %v2460_v2, 16  ;;  %v4039_v6 = vld [vmem:[#allocation2 + $0x1a0] sm:$0xe] }
 0x25e   : > { %v4381_v39 = vsel %vm14367_vm11, %v17031_v10, %v4380_v56  ;;  %v3099_v0 = vrot.slane %v3097_v52, 5  ;;  %v3111_v63 = vshll.u32 %v2460_v2, 16  ;;  %v6416_v56 = vrot.slane %v6415_v34, 4  ;;  %v652_v4 = vld [vmem:[#allocation2 + $0x1b4] sm:$0x1] }
 0x25f   : > { %v4528_v12 = vunpack.c.l.b16 %v4381_v39  ;;  %v6406_v49 = vrot.slane %v6404_v60, 5  ;;  %v3092_v9 = vsel %vm14377_vm12, %v15450_v5, %v3091_v32  ;;  %7026 = vmatmul.bf16.gmra.mxu0 %v6830_v15  ;;  %v1692_v48 = vld [vmem:[#allocation2 + $0x1ac] sm:$0x1]  ;;  %v3110_v57 = vrot.slane %v3108_v40, 4  ;;  %v5790_v17 = vld [vmem:[#allocation2 + $0x1a8] sm:$0xf]  ;;  %v3665_v15 = vpop.f32.mrf.mxu1 }
 0x260   : > { %v3459_v28 = vunpack.c.l.b16 %v3092_v9  ;;  %v15485_v10 = vadd.f32 %v5414_v23, %v4920_v24  ;;  %v17032_v5 = vld [vmem:[#allocation30_spill] sm:$0xff]  ;;  %v3100_v39 = vor.u32 %v3099_v0, %v3096_v27  ;;  %v3113_v14 = vrot.slane %v3111_v63, 5 }
 0x261   : > { %v4571_v8 = vpack.c.b16 %v4528_v12, %v4527_v26  ;;  %v6407_v60 = vsel %vm14377_vm12, %v6402_v35, %v6406_v49  ;;  %v17033_v21 = vrot.slane %v17032_v5, 4  ;;  %v17034_v40 = vld [vmem:[#allocation42_spill] sm:$0xff]  ;;  %v12347_v24 = vrot.slane %v4039_v6, 9 }
 0x262   : > { %v5789_v62 = vld [vmem:[#allocation2 + $0x1a4] sm:$0x1]  ;;  %v3502_v34 = vpack.c.b16 %v3459_v28, %v3458_v22  ;;  %v3101_v35 = vrot.slane %v3100_v39, 4  ;;  %v4041_v49 = vld [vmem:[#allocation2 + $0x1a8] sm:$0xe]  ;;  %v15492_v59 = vunpack.c.l.b16 %v6407_v60  ;;  %v3114_v27 = vor.u32 %v3113_v14, %v3110_v57  ;;  %v15494_v0 = vpop.f32.mrf.mxu0  ;;  %v17036_v28 = vld [vmem:[#allocation72_spill] sm:$0xff] }
 0x263   : > { %v1693_v2 = vsel %vm13721_vm4, %v17033_v21, %v1692_v48  ;;  %v2459_v32 = vld [vmem:[#allocation2 + $0x1a4] sm:$0x1]  ;;  %4771 = vmatmul.bf16.gmra.mxu2 %v4571_v8  ;;  %v6418_v52 = vshll.u32 %v5789_v62, 16  ;;  %v17035_v22 = vor.u32 %v15430_v41, %v15428_v13  ;;  %v3852_v63 = vadd.f32 %v3665_v15, %v17036_v28  ;;  %v5792_v62 = vld [vmem:[#allocation2 + $0x1b0] sm:$0xf] }
 0x264   : > { %v4040_v26 = vld [vmem:[#allocation2 + $0x1a4] sm:$0x1]  ;;  %1694 = vst [vmem:[#allocation2 + $0x1ac] sm:$0x1] %v1693_v2  ;;  %v3103_v12 = vshll.u32 %v2459_v32, 16  ;;  %3702 = vmatmul.bf16.gmra.mxu1 %v3502_v34  ;;  %v653_v6 = vsel %vm13715_vm3, 0, %v652_v4  ;;  %v4734_v2 = vpop.f32.mrf.mxu2  ;;  %v5416_v15 = vpop.f32.mrf.mxu3 }
 0x265   : > { %v4384_v23 = vrot.slane %v4040_v26, 5  ;;  %v6420_v5 = vrot.slane %v6418_v52, 5  ;;  %5453 = vmatmul.bf16.gmra.mxu3 %v17035_v22  ;;  %v6423_v21 = vshrl.u32 %v5790_v17, 16  ;;  %v655_v60 = vld [vmem:[#allocation2 + $0x1bc] sm:$0x1]  ;;  %v3115_v13 = vrot.slane %v3114_v27, 4 }
 0x266   : > { %v3105_v48 = vrot.slane %v3103_v12, 5  ;;  %v12348_v41 = vrot.slane %v4041_v49, 9  ;;  %654 = vst [vmem:[#allocation2 + $0x1b4] sm:$0x1] %v653_v6  ;;  %v4921_v26 = vadd.f32 %v4734_v2, %v3852_v63  ;;  %v6426_v12 = vshll.u32 %v5790_v17, 16 }
 0x267   : > { %v4385_v8 = vsel %vm14367_vm11, %v12347_v24, %v4384_v23  ;;  %v6421_v57 = vsel %vm14377_vm12, %v6416_v56, %v6420_v5  ;;  %v6425_v52 = vrot.slane %v6423_v21, 4  ;;  %v6437_v4 = vshrl.u32 %v5792_v62, 16  ;;  %v2462_v23 = vld [vmem:[#allocation2 + $0x1b0] sm:$0xf]  ;;  %v3668_v17 = vpop.f32.mrf.mxu1 }
 0x268   : > { %v3106_v32 = vsel %vm14377_vm12, %v3101_v35, %v3105_v48  ;;  %v6788_v39 = vunpack.c.l.b16 %v6421_v57  ;;  %v4529_v34 = vunpack.c.l.b16 %v4385_v8  ;;  %v6440_v14 = vshll.u32 %v5792_v62, 16  ;;  %v17038_v62 = vld [vmem:[#allocation75_spill] sm:$0xff]  ;;  %v2464_v57 = vld [vmem:[#allocation2 + $0x1b8] sm:$0xf] }
 0x269   : > { %v656_v24 = vsel %vm13715_vm3, 0, %v655_v60  ;;  %v15511_v5 = vadd.f32 %v5416_v15, %v4921_v26  ;;  %v15513_v48 = vunpack.c.l.b16 %v3106_v32  ;;  %v15517_v22 = vadd.f32 %v15473_v38, %v15461_v18  ;;  %v12487_v26 = vld [vmem:[#allocation2 + $0x1a8] sm:$0xf]  ;;  %v13062_v15 = vld [vmem:[#allocation2 + $0x1ac] sm:$0xf0] }
 0x26a   : > { %v6831_v56 = vpack.c.b16 %v6788_v39, %v15492_v59  ;;  %v6428_v8 = vrot.slane %v6426_v12, 5  ;;  %657 = vst [vmem:[#allocation2 + $0x1bc] sm:$0x1] %v656_v24  ;;  %v3853_v21 = vadd.f32 %v3668_v17, %v17038_v62  ;;  %v6439_v59 = vrot.slane %v6437_v4, 4 }
 0x26b   : > { %v2461_v35 = vld [vmem:[#allocation2 + $0x1ac] sm:$0x1]  ;;  %17037 = vst [vmem:[#allocation16_spill] sm:$0xff] %v15517_v22  ;;  %v6442_v60 = vrot.slane %v6440_v14, 5  ;;  %v3122_v2 = vshrl.u32 %v2462_v23, 16  ;;  %v3125_v17 = vshll.u32 %v2462_v23, 16 }
 0x26c   : > { %v4042_v49 = vld [vmem:[#allocation2 + $0x1ac] sm:$0x1]  ;;  %v3117_v28 = vshll.u32 %v2461_v35, 16  ;;  %v6429_v18 = vor.u32 %v6428_v8, %v6425_v52  ;;  %v15524_v35 = vpop.f32.mrf.mxu0  ;;  %v17039_v14 = vrot.slane %v16988_v54, 4  ;;  %v4737_v52 = vpop.f32.mrf.mxu2  ;;  %v15534_v8 = vld [vmem:[#allocation2 + $0x1b0] sm:$0xe] }
 0x26d   : > { %v5791_v27 = vld [vmem:[#allocation2 + $0x1ac] sm:$0x1]  ;;  %v4388_v63 = vrot.slane %v4042_v49, 5  ;;  %v1698_v49 = vld [vmem:[#allocation2 + $0x1b4] sm:$0x1]  ;;  %v6443_v24 = vor.u32 %v6442_v60, %v6439_v59  ;;  %v4922_v59 = vadd.f32 %v4737_v52, %v3853_v21  ;;  %v5419_v54 = vpop.f32.mrf.mxu3 }
 0x26e   : > { %v6432_v6 = vshll.u32 %v5791_v27, 16  ;;  %v3119_v32 = vrot.slane %v3117_v28, 5  ;;  %v3124_v27 = vrot.slane %v3122_v2, 4  ;;  %v15532_v28 = vrot.slane %v6429_v18, 4  ;;  %v15536_v23 = vld [vmem:[#allocation2 + $0x1b8] sm:$0xe] }
 0x26f   : > { %v4389_v39 = vsel %vm14367_vm11, %v12348_v41, %v4388_v63  ;;  %v1699_v41 = vsel %vm13721_vm4, %v17039_v14, %v1698_v49  ;;  %v3136_v63 = vshrl.u32 %v2464_v57, 16  ;;  %v658_v60 = vld [vmem:[#allocation2 + $0x1c4] sm:$0x1]  ;;  %7031 = vmatmul.bf16.gmra.mxu0 %v6831_v56  ;;  %v3127_v2 = vrot.slane %v3125_v17, 5  ;;  %v5794_v49 = vld [vmem:[#allocation2 + $0x1b8] sm:$0xf]  ;;  %v3670_v56 = vpop.f32.mrf.mxu1 }
 0x270   : > { %v15522_v38 = vrot.slane %v6432_v6, 5  ;;  %v4530_v12 = vunpack.c.l.b16 %v4389_v39  ;;  %v3120_v4 = vsel %vm14377_vm12, %v3115_v13, %v3119_v32  ;;  %v12488_v39 = vor.u32 %v13062_v15, %v12487_v26  ;;  %1700 = vst [vmem:[#allocation2 + $0x1b4] sm:$0x1] %v1699_v41  ;;  %v661_v41 = vld [vmem:[#allocation2 + $0x1cc] sm:$0x1] }
 0x271   : > { %v3461_v6 = vunpack.c.l.b16 %v3120_v4  ;;  %v15538_v13 = vrot.slane %v6443_v24, 4  ;;  %v3138_v32 = vrot.slane %v3136_v63, 4  ;;  %v3139_v18 = vshll.u32 %v2464_v57, 16  ;;  %v1704_v21 = vld [vmem:[#allocation2 + $0x1bc] sm:$0x1] }
 0x272   : > { %v4572_v62 = vpack.c.b16 %v4530_v12, %v4529_v34  ;;  %v6435_v34 = vsel %vm14377_vm12, %v15532_v28, %v15522_v38  ;;  %v5604_v26 = vadd.f32 %v5419_v54, %v4922_v59  ;;  %v12349_v15 = vrot.slane %v15534_v8, 9  ;;  %v5796_v12 = vld [vmem:[#allocation2 + $0x1c0] sm:$0xf]  ;;  %v17041_v38 = vld [vmem:[#allocation78_spill] sm:$0xff] }
 0x273   : > { %v3503_v14 = vpack.c.b16 %v3461_v6, %v15513_v48  ;;  %v17040_v24 = vrot.slane %v17003_v42, 4  ;;  %v3128_v17 = vor.u32 %v3127_v2, %v3124_v27  ;;  %v3141_v4 = vrot.slane %v3139_v18, 5  ;;  %v15551_v52 = vld [vmem:[#allocation2 + $0x1c0] sm:$0xf]  ;;  %v15556_v2 = vld [vmem:[#allocation2 + $0x1b8] sm:$0xf] }
 0x274   : > { %4776 = vmatmul.bf16.gmra.mxu2 %v4572_v62  ;;  %v3854_v28 = vadd.f32 %v3670_v56, %v17041_v38  ;;  %v659_v63 = vsel %vm13715_vm3, 0, %v658_v60  ;;  %v6451_v8 = vshrl.u32 %v5794_v49, 16  ;;  %v6454_v6 = vshll.u32 %v5794_v49, 16  ;;  %v6997_v54 = vpop.f32.mrf.mxu0  ;;  %v15558_v18 = vld [vmem:[#allocation2 + $0x1bc] sm:$0xf0] }
 0x275   : > { %v1705_v57 = vsel %vm13721_vm4, %v17040_v24, %v1704_v21  ;;  %3707 = vmatmul.bf16.gmra.mxu1 %v3503_v14  ;;  %v3129_v42 = vrot.slane %v3128_v17, 4  ;;  %v3142_v62 = vor.u32 %v3141_v4, %v3138_v32  ;;  %660 = vst [vmem:[#allocation2 + $0x1c4] sm:$0x1] %v659_v63  ;;  %v6465_v59 = vshrl.u32 %v5796_v12, 16  ;;  %5458 = vmatmul.bf16.gmra.mxu3 %v12488_v39  ;;  %v4739_v14 = vpop.f32.mrf.mxu2 }
 0x276   : > { %1706 = vst [vmem:[#allocation2 + $0x1bc] sm:$0x1] %v1705_v57  ;;  %v6468_v27 = vshll.u32 %v5796_v12, 16  ;;  %v6453_v21 = vrot.slane %v6451_v8, 4  ;;  %v6456_v56 = vrot.slane %v6454_v6, 5  ;;  %v662_v24 = vsel %vm13715_vm3, 0, %v661_v41  ;;  %v5421_v6 = vpop.f32.mrf.mxu3 }
 0x277   : > { %v3150_v60 = vshrl.u32 %v15551_v52, 16  ;;  %v5793_v49 = vld [vmem:[#allocation2 + $0x1b4] sm:$0x1]  ;;  %v3143_v32 = vrot.slane %v3142_v62, 4  ;;  %v15563_v17 = vrot.slane %v6465_v59, 4  ;;  %v15567_v39 = vadd.f32 %v15494_v0, %v15485_v10 }
 0x278   : > { %v2463_v57 = vld [vmem:[#allocation2 + $0x1b4] sm:$0x1]  ;;  %v15571_v12 = vadd.f32 %v15524_v35, %v15511_v5  ;;  %v6446_v4 = vshll.u32 %v5793_v49, 16  ;;  %v4923_v38 = vadd.f32 %v4739_v14, %v3854_v28  ;;  %v6457_v8 = vor.u32 %v6456_v56, %v6453_v21  ;;  %663 = vst [vmem:[#allocation2 + $0x1cc] sm:$0x1] %v662_v24 }
 0x279   : > { %17042 = vst [vmem:[#allocation36_spill] sm:$0xff] %v15567_v39  ;;  %v3131_v63 = vshll.u32 %v2463_v57, 16  ;;  %v4044_v41 = vld [vmem:[#allocation2 + $0x1b4] sm:$0x1]  ;;  %v6470_v48 = vrot.slane %v6468_v27, 5  ;;  %v3152_v62 = vrot.slane %v3150_v60, 4  ;;  %v6789_v39 = vunpack.c.l.b16 %v6435_v34  ;;  %v3673_v57 = vpop.f32.mrf.mxu1 }
 0x27a   : > { %v4392_v9 = vrot.slane %v4044_v41, 5  ;;  %v3153_v59 = vshll.u32 %v15551_v52, 16  ;;  %v6448_v22 = vrot.slane %v6446_v4, 5  ;;  %v15574_v19 = vadd.f32 %v5421_v6, %v4923_v38  ;;  %v17045_v6 = vld [vmem:[#allocation81_spill] sm:$0xff] }
 0x27b   : > { %v3133_v10 = vrot.slane %v3131_v63, 5  ;;  %v6458_v0 = vrot.slane %v6457_v8, 4  ;;  %v12492_v21 = vor.u32 %v15558_v18, %v15556_v2  ;;  %v15580_v24 = vadd.f32 %v6997_v54, %v5604_v26  ;;  %v2468_v54 = vld [vmem:[#allocation2 + $0x1c8] sm:$0xf] }
 0x27c   : > { %v4393_v28 = vsel %vm14367_vm11, %v12349_v15, %v4392_v9  ;;  %v6449_v52 = vsel %vm14377_vm12, %v15538_v13, %v6448_v22  ;;  %v1710_v49 = vld [vmem:[#allocation2 + $0x1c4] sm:$0x1]  ;;  %v17043_v9 = vrot.slane %v17024_v55, 4  ;;  %v6471_v26 = vor.u32 %v6470_v48, %v15563_v17  ;;  %v6999_v38 = vpop.f32.mrf.mxu0 }
 0x27d   : > { %v2465_v5 = vld [vmem:[#allocation2 + $0x1bc] sm:$0x1]  ;;  %v3134_v27 = vsel %vm14377_vm12, %v3129_v42, %v3133_v10  ;;  %v6790_v14 = vunpack.c.l.b16 %v6449_v52  ;;  %v4531_v4 = vunpack.c.l.b16 %v4393_v28  ;;  %v17044_v13 = vrot.slane %v15536_v23, 9  ;;  %v422_v28 = vld [vmem:[#allocation2 + $0x1d0] sm:$0x1] }
 0x27e   : > { %v4046_v35 = vld [vmem:[#allocation2 + $0x1bc] sm:$0x1]  ;;  %v3145_v60 = vshll.u32 %v2465_v5, 16  ;;  %v1711_v15 = vsel %vm13721_vm4, %v17043_v9, %v1710_v49  ;;  %v3462_v22 = vunpack.c.l.b16 %v3134_v27  ;;  %v3855_v55 = vadd.f32 %v3673_v57, %v17045_v6  ;;  %v4742_v49 = vpop.f32.mrf.mxu2  ;;  %v4049_v9 = vld [vmem:[#allocation2 + $0x1c8] sm:$0xe] }
 0x27f   : > { %v5795_v56 = vld [vmem:[#allocation2 + $0x1bc] sm:$0x1]  ;;  %v4396_v34 = vrot.slane %v4046_v35, 5  ;;  %1712 = vst [vmem:[#allocation2 + $0x1c4] sm:$0x1] %v1711_v15  ;;  %v6832_v8 = vpack.c.b16 %v6790_v14, %v6789_v39  ;;  %v3155_v35 = vrot.slane %v3153_v59, 5  ;;  %v5424_v14 = vpop.f32.mrf.mxu3 }
 0x280   : > { %v3147_v63 = vrot.slane %v3145_v60, 5  ;;  %v6460_v41 = vshll.u32 %v5795_v56, 16  ;;  %v1716_v5 = vld [vmem:[#allocation2 + $0x1cc] sm:$0x1]  ;;  %v17046_v52 = vrot.slane %v17034_v40, 4  ;;  %v3164_v27 = vshrl.u32 %v2468_v54, 16 }
 0x281   : > { %v4397_v42 = vsel %vm14367_vm11, %v17044_v13, %v4396_v34  ;;  %v4047_v60 = vld [vmem:[#allocation2 + $0x1c0] sm:$0xe]  ;;  %v777_v34 = vld [vmem:[%s13699_s25 + $0xbc] sm:$0xf]  ;;  %7036 = vmatmul.bf16.gmra.mxu0 %v6832_v8  ;;  %v3156_v59 = vor.u32 %v3155_v35, %v3152_v62  ;;  %v3167_v57 = vshll.u32 %v2468_v54, 16  ;;  %v6472_v15 = vrot.slane %v6471_v26, 4 }
 0x282   : > { %v4532_v10 = vunpack.c.l.b16 %v4397_v42  ;;  %v3148_v48 = vsel %vm14377_vm12, %v3143_v32, %v3147_v63  ;;  %v6462_v17 = vrot.slane %v6460_v41, 5  ;;  %v1717_v23 = vsel %vm13721_vm4, %v17046_v52, %v1716_v5  ;;  %v664_v62 = vld [vmem:[#allocation2 + $0x1d4] sm:$0x1]  ;;  %v17047_v52 = vld [vmem:[#allocation84_spill] sm:$0xff] }
 0x283   : > { %v3463_v39 = vunpack.c.l.b16 %v3148_v48  ;;  %1718 = vst [vmem:[#allocation2 + $0x1cc] sm:$0x1] %v1717_v23  ;;  %v4924_v40 = vadd.f32 %v4742_v49, %v3855_v55  ;;  %v3166_v63 = vrot.slane %v3164_v27, 4  ;;  %v3157_v42 = vrot.slane %v3156_v59, 4 }
 0x284   : > { %v4573_v56 = vpack.c.b16 %v4532_v10, %v4531_v4  ;;  %v6463_v32 = vsel %vm14377_vm12, %v6458_v0, %v6462_v17  ;;  %v3169_v41 = vrot.slane %v3167_v57, 5  ;;  %v12351_v6 = vrot.slane %v4047_v60, 9  ;;  %v3675_v0 = vpop.f32.mrf.mxu1  ;;  %v7002_v60 = vpop.f32.mrf.mxu0 }
 0x285   : > { %v3504_v13 = vpack.c.b16 %v3463_v39, %v3462_v22  ;;  %v5606_v8 = vadd.f32 %v5424_v14, %v4924_v40  ;;  %v12352_v5 = vrot.slane %v4049_v9, 9  ;;  %v423_v4 = vsel %vm13721_vm4, 0, %v422_v28  ;;  %5463 = vmatmul.bf16.gmra.mxu3 %v12492_v21 }
 0x286   : > { %4781 = vmatmul.bf16.gmra.mxu2 %v4573_v56  ;;  %v1171_v10 = vshrl.u32 %v777_v34, 16  ;;  %v5797_v54 = vld [vmem:[#allocation2 + $0x1c4] sm:$0x1]  ;;  %v15608_v35 = vunpack.c.l.b16 %v6463_v32  ;;  %v3170_v55 = vor.u32 %v3169_v41, %v3166_v63  ;;  %v15611_v22 = vadd.f32 %v6999_v38, %v15574_v19  ;;  %424 = vst [vmem:[#allocation2 + $0x1d0] sm:$0x1] %v423_v4  ;;  %v4744_v21 = vpop.f32.mrf.mxu2 }
 0x287   : > { %3712 = vmatmul.bf16.gmra.mxu1 %v3504_v13  ;;  %v2467_v26 = vld [vmem:[#allocation2 + $0x1c4] sm:$0x1]  ;;  %v6474_v17 = vshll.u32 %v5797_v54, 16  ;;  %v3856_v28 = vadd.f32 %v3675_v0, %v17047_v52  ;;  %v1174_v49 = vshll.u32 %v777_v34, 16  ;;  %v665_v14 = vsel %vm13715_vm3, 0, %v664_v62  ;;  %v5426_v54 = vpop.f32.mrf.mxu3 }
 0x288   : > { %v4048_v48 = vld [vmem:[#allocation2 + $0x1c4] sm:$0x1]  ;;  %v3159_v23 = vshll.u32 %v2467_v26, 16  ;;  %v3171_v39 = vrot.slane %v3170_v55, 4  ;;  %v15617_v56 = vrot.slane %v1171_v10, 7  ;;  %v15623_v18 = vadd.f32 %v7002_v60, %v5606_v8 }
 0x289   : > { %v4400_v27 = vrot.slane %v4048_v48, 5  ;;  %v6476_v19 = vrot.slane %v6474_v17, 5  ;;  %666 = vst [vmem:[#allocation2 + $0x1d4] sm:$0x1] %v665_v14  ;;  %v5798_v34 = vld [vmem:[#allocation2 + $0x1c8] sm:$0xf]  ;;  %v4925_v41 = vadd.f32 %v4744_v21, %v3856_v28 }
 0x28a   : > { %v2469_v38 = vld [vmem:[#allocation2 + $0x1cc] sm:$0x1]  ;;  %v3161_v59 = vrot.slane %v3159_v23, 5  ;;  %17048 = vst [vmem:[#allocation37_spill] sm:$0xff] %v15623_v18  ;;  %v1176_v63 = vor.u32 %v1174_v49, %v15617_v56  ;;  %v1177_v10 = vrot.slane %v15617_v56, 4  ;;  %v6482_v28 = vshll.u32 %v5798_v34, 16 }
 0x28b   : > { %v4050_v57 = vld [vmem:[#allocation2 + $0x1cc] sm:$0x1]  ;;  %v4401_v2 = vsel %vm14367_vm11, %v12351_v6, %v4400_v27  ;;  %v3173_v9 = vshll.u32 %v2469_v38, 16  ;;  %v6477_v13 = vsel %vm14377_vm12, %v6472_v15, %v6476_v19  ;;  %v670_v8 = vld [vmem:[#allocation2 + $0x1e4] sm:$0x1]  ;;  %v15633_v17 = vadd.f32 %v5426_v54, %v4925_v41  ;;  %v17050_v41 = vld [vmem:[#allocation87_spill] sm:$0xff] }
 0x28c   : > { %v4404_v32 = vrot.slane %v4050_v57, 5  ;;  %v4533_v40 = vunpack.c.l.b16 %v4401_v2  ;;  %v3162_v4 = vsel %vm14377_vm12, %v3157_v42, %v3161_v59  ;;  %v5799_v6 = vld [vmem:[#allocation2 + $0x1cc] sm:$0x1]  ;;  %v6792_v62 = vunpack.c.l.b16 %v6477_v13  ;;  %v2470_v23 = vld [vmem:[#allocation2 + $0x1e0] sm:$0xf]  ;;  %v3678_v60 = vpop.f32.mrf.mxu1 }
 0x28d   : > { %v3175_v0 = vrot.slane %v3173_v9, 5  ;;  %v3464_v26 = vunpack.c.l.b16 %v3162_v4  ;;  %v673_v48 = vld [vmem:[#allocation2 + $0x1ec] sm:$0x1]  ;;  %v6479_v15 = vshrl.u32 %v5798_v34, 16  ;;  %v2472_v27 = vld [vmem:[#allocation2 + $0x1e8] sm:$0xf]  ;;  %v3857_v4 = vadd.f32 %v3678_v60, %v17050_v41 }
 0x28e   : > { %v4405_v55 = vsel %vm14367_vm11, %v12352_v5, %v4404_v32  ;;  %v6833_v42 = vpack.c.b16 %v6792_v62, %v15608_v35  ;;  %v1719_v49 = vld [vmem:[#allocation2 + $0x1d0] sm:$0xf]  ;;  %v6488_v14 = vshll.u32 %v5799_v6, 16  ;;  %v671_v19 = vsel %vm13715_vm3, 0, %v670_v8  ;;  %v15640_v5 = vld [vmem:[#allocation2 + $0x1e0] sm:$0xe] }
 0x28f   : > { %v4534_v52 = vunpack.c.l.b16 %v4405_v55  ;;  %v3176_v56 = vsel %vm14377_vm12, %v3171_v39, %v3175_v0  ;;  %v17049_v38 = vld [vmem:[#allocation38_spill] sm:$0xff]  ;;  %v1720_v21 = vsel %vm13740_vm6, %v1176_v63, %v1719_v49  ;;  %672 = vst [vmem:[#allocation2 + $0x1e4] sm:$0x1] %v671_v19  ;;  %v6481_v39 = vrot.slane %v6479_v15, 4  ;;  %v4747_v0 = vpop.f32.mrf.mxu2  ;;  %v676_v15 = vld [vmem:[#allocation2 + $0x1f4] sm:$0x1]  ;;  %v7004_v49 = vpop.f32.mrf.mxu0 }
 0x290   : > { %v3465_v57 = vunpack.c.l.b16 %v3176_v56  ;;  %v15645_v35 = vld [vmem:[#allocation2 + $0x1e8] sm:$0xe]  ;;  %1721 = vst [vmem:[#allocation2 + $0x1d0] sm:$0xf] %v1720_v21  ;;  %v6484_v32 = vrot.slane %v6482_v28, 5  ;;  %v15647_v34 = vrot.slane %v6488_v14, 5  ;;  %v15663_v41 = vadd.f32 %v7004_v49, %v15633_v17 }
 0x291   : > { %v4574_v2 = vpack.c.b16 %v4534_v52, %v4533_v40  ;;  %v13130_v9 = vld [vmem:[#allocation7 + $0x188] sm:$0xff]  ;;  %v674_v13 = vsel %vm13715_vm3, 0, %v673_v48  ;;  %v1722_v8 = vld [vmem:[#allocation2 + $0x1d4] sm:$0x1]  ;;  %v3178_v40 = vshrl.u32 %v2470_v23, 16  ;;  %v3181_v62 = vshll.u32 %v2470_v23, 16  ;;  %7041 = vmatmul.bf16.gmra.mxu0 %v6833_v42 }
 0x292   : > { %v3505_v6 = vpack.c.b16 %v3465_v57, %v3464_v26  ;;  %675 = vst [vmem:[#allocation2 + $0x1ec] sm:$0x1] %v674_v13  ;;  %8678 = vmatpush.bf16.msra.mxu2 %v13130_v9  ;;  %v1723_v63 = vsel %vm13721_vm4, %v1177_v10, %v1722_v8  ;;  %v6485_v54 = vor.u32 %v6484_v32, %v6481_v39  ;;  %v3192_v55 = vshrl.u32 %v2472_v27, 16  ;;  %v15654_v28 = vld [vmem:[#allocation2 + $0x1e8] sm:$0xf] }
 0x293   : > { %v3195_v52 = vshll.u32 %v2472_v27, 16  ;;  %1724 = vst [vmem:[#allocation2 + $0x1d4] sm:$0x1] %v1723_v63  ;;  %v4926_v48 = vadd.f32 %v4747_v0, %v3857_v4  ;;  %v3180_v60 = vrot.slane %v3178_v40, 4  ;;  %v3183_v26 = vrot.slane %v3181_v62, 5  ;;  %v13138_v39 = vld [vmem:[#allocation7 + $0x1c8] sm:$0xff]  ;;  %v5429_v62 = vpop.f32.mrf.mxu3 }
 0x294   : > { %v12353_v56 = vrot.slane %v15640_v5, 9  ;;  %v12495_v23 = vld [vmem:[#allocation2 + $0x1c8] sm:$0xf]  ;;  %v6486_v42 = vrot.slane %v6485_v54, 4  ;;  %v3194_v14 = vrot.slane %v3192_v55, 4  ;;  %v12354_v10 = vrot.slane %v15645_v35, 9  ;;  %v3680_v5 = vpop.f32.mrf.mxu1  ;;  %10256 = vmatpush.bf16.msra.mxu3 %v13138_v39 }
 0x295   : > { %v3197_v19 = vrot.slane %v3195_v52, 5  ;;  %v3184_v57 = vor.u32 %v3183_v26, %v3180_v60  ;;  %v677_v27 = vsel %vm13715_vm3, 0, %v676_v15  ;;  %v6507_v21 = vshrl.u32 %v15654_v28, 16  ;;  %v13090_v32 = vld [vmem:[#allocation7 + $0x148] sm:$0xff]  ;;  %17051 = vst [vmem:[#allocation48_spill] sm:$0xff] %v15663_v41 }
 0x296   : > { %4786 = vmatmul.bf16.gmra.mxu2 %v4574_v2  ;;  %v6510_v9 = vshll.u32 %v15654_v28, 16  ;;  %v2471_v13 = vld [vmem:[#allocation2 + $0x1e4] sm:$0x1]  ;;  %678 = vst [vmem:[#allocation2 + $0x1f4] sm:$0x1] %v677_v27  ;;  %v6491_v40 = vsel %vm14377_vm12, %v6486_v42, %v15647_v34  ;;  %7995 = vmatpush.bf16.msra.mxu1 %v13090_v32  ;;  %v5608_v15 = vadd.f32 %v5429_v62, %v4926_v48  ;;  %v13146_v60 = vld [vmem:[#allocation7 + $0x208] sm:$0xff] }
 0x297   : > { %3717 = vmatmul.bf16.gmra.mxu1 %v3505_v6  ;;  %v4052_v2 = vld [vmem:[#allocation2 + $0x1e4] sm:$0x1]  ;;  %v13064_v4 = vld [vmem:[#allocation2 + $0x1cc] sm:$0xf0]  ;;  %v3185_v63 = vrot.slane %v3184_v57, 4  ;;  %v3187_v54 = vshll.u32 %v2471_v13, 16  ;;  %v3198_v0 = vor.u32 %v3197_v19, %v3194_v14  ;;  %v3858_v17 = vadd.f32 %v3680_v5, %v14821_v46  ;;  %11322 = vmatpush.bf16.msra.mxu0 %v13146_v60 }
 0x298   : > { %v5800_v8 = vld [vmem:[#allocation2 + $0x1d0] sm:$0xf]  ;;  %v12496_v6 = vor.u32 %v13064_v4, %v12495_v23  ;;  %v17052_v26 = vld [vmem:[#allocation14_spill] sm:$0xff]  ;;  %v4408_v42 = vrot.slane %v4052_v2, 5  ;;  %v4749_v23 = vpop.f32.mrf.mxu2  ;;  %v6793_v32 = vunpack.c.l.b16 %v6491_v40  ;;  %v679_v46 = vld [vmem:[#allocation2 + $0x1fc] sm:$0x1] }
 0x299   : > { %v6493_v55 = vshrl.u32 %v5800_v8, 16  ;;  %v6496_v52 = vshll.u32 %v5800_v8, 16  ;;  %v1728_v28 = vld [vmem:[#allocation2 + $0x1ec] sm:$0x1]  ;;  %v17053_v49 = vrot.slane %v17052_v26, 4  ;;  %v3189_v34 = vrot.slane %v3187_v54, 5 }
 0x29a   : > { %v5804_v57 = vld [vmem:[#allocation2 + $0x1f0] sm:$0xf]  ;;  %5468 = vmatmul.bf16.gmra.mxu3 %v12496_v6  ;;  %v5801_v14 = vld [vmem:[#allocation2 + $0x1d4] sm:$0x1]  ;;  %v4927_v13 = vadd.f32 %v4749_v23, %v3858_v17  ;;  %v15673_v4 = vrot.slane %v3198_v0, 4  ;;  %v4409_v2 = vsel %vm14367_vm11, %v12353_v56, %v4408_v42  ;;  %v6509_v54 = vrot.slane %v6507_v21, 4  ;;  %v7007_v17 = vpop.f32.mrf.mxu0 }
 0x29b   : > { %v1729_v27 = vsel %vm13721_vm4, %v17053_v49, %v1728_v28  ;;  %v6495_v19 = vrot.slane %v6493_v55, 4  ;;  %v6498_v39 = vrot.slane %v6496_v52, 5  ;;  %v6502_v48 = vshll.u32 %v5801_v14, 16  ;;  %v2474_v5 = vld [vmem:[#allocation2 + $0x1f0] sm:$0xf]  ;;  %v17054_v26 = vld [vmem:[#allocation17_spill] sm:$0xff]  ;;  %v5431_v56 = vpop.f32.mrf.mxu3 }
 0x29c   : > { %1730 = vst [vmem:[#allocation2 + $0x1ec] sm:$0x1] %v1729_v27  ;;  %v3190_v62 = vsel %vm14377_vm12, %v3185_v63, %v3189_v34  ;;  %v15679_v6 = vld [vmem:[#allocation2 + $0x1f8] sm:$0xf]  ;;  %v6512_v28 = vrot.slane %v6510_v9, 5  ;;  %v6521_v60 = vshrl.u32 %v5804_v57, 16 }
 0x29d   : > { %v6499_v8 = vor.u32 %v6498_v39, %v6495_v19  ;;  %v6504_v55 = vrot.slane %v6502_v48, 5  ;;  %v1734_v52 = vld [vmem:[#allocation2 + $0x1f4] sm:$0x1]  ;;  %v6524_v40 = vshll.u32 %v5804_v57, 16  ;;  %v17055_v49 = vrot.slane %v17054_v26, 4 }
 0x29e   : > { %v680_v63 = vsel %vm13715_vm3, 0, %v679_v46  ;;  %v3206_v34 = vshrl.u32 %v2474_v5, 16  ;;  %v6513_v21 = vor.u32 %v6512_v28, %v6509_v54  ;;  %v6523_v42 = vrot.slane %v6521_v60, 4  ;;  %v12499_v26 = vld [vmem:[#allocation2 + $0x1e8] sm:$0xf]  ;;  %v3683_v28 = vpop.f32.mrf.mxu1 }
 0x29f   : > { %v6500_v0 = vrot.slane %v6499_v8, 4  ;;  %v1735_v27 = vsel %vm13721_vm4, %v17055_v49, %v1734_v52  ;;  %v6526_v14 = vrot.slane %v6524_v40, 5  ;;  %v3209_v19 = vshll.u32 %v2474_v5, 16  ;;  %681 = vst [vmem:[#allocation2 + $0x1fc] sm:$0x1] %v680_v63 }
 0x2a0   : > { %1736 = vst [vmem:[#allocation2 + $0x1f4] sm:$0x1] %v1735_v27  ;;  %v15689_v57 = vadd.f32 %v5431_v56, %v4927_v13  ;;  %v3208_v39 = vrot.slane %v3206_v34, 4  ;;  %v3220_v23 = vshrl.u32 %v15679_v6, 16  ;;  %v3466_v52 = vunpack.c.l.b16 %v3190_v62  ;;  %v4055_v13 = vld [vmem:[#allocation2 + $0x1f0] sm:$0xe] }
 0x2a1   : > { %v6505_v9 = vsel %vm14377_vm12, %v6500_v0, %v6504_v55  ;;  %v6527_v27 = vor.u32 %v6526_v14, %v6523_v42  ;;  %v15692_v54 = vadd.f32 %v7007_v17, %v5608_v15  ;;  %v4535_v40 = vunpack.c.l.b16 %v4409_v2  ;;  %v13065_v63 = vld [vmem:[#allocation2 + $0x1ec] sm:$0xf0] }
 0x2a2   : > { %v6794_v48 = vunpack.c.l.b16 %v6505_v9  ;;  %v6514_v34 = vrot.slane %v6513_v21, 4  ;;  %v3211_v59 = vrot.slane %v3209_v19, 5  ;;  %v3222_v15 = vrot.slane %v3220_v23, 4 }
 0x2a3   : > { %v2473_v8 = vld [vmem:[#allocation2 + $0x1ec] sm:$0x1]  ;;  %17056 = vst [vmem:[#allocation19_spill] sm:$0xff] %v15692_v54  ;;  %v6528_v56 = vrot.slane %v6527_v27, 4  ;;  %v3223_v2 = vshll.u32 %v15679_v6, 16  ;;  %v12500_v35 = vor.u32 %v13065_v63, %v12499_v26 }
 0x2a4   : > { %v4054_v46 = vld [vmem:[#allocation2 + $0x1ec] sm:$0x1]  ;;  %v3201_v5 = vshll.u32 %v2473_v8, 16  ;;  %v6834_v0 = vpack.c.b16 %v6794_v48, %v6793_v32  ;;  %v3212_v14 = vor.u32 %v3211_v59, %v3208_v39  ;;  %v12355_v8 = vrot.slane %v4055_v13, 9  ;;  %v5434_v39 = vpop.f32.mrf.mxu3 }
 0x2a5   : > { %v5803_v49 = vld [vmem:[#allocation2 + $0x1ec] sm:$0x1]  ;;  %v4412_v60 = vrot.slane %v4054_v46, 5  ;;  %v15699_v46 = vpop.f32.mrf.mxu0 }
 0x2a6   : > { %v6516_v55 = vshll.u32 %v5803_v49, 16  ;;  %v3203_v9 = vrot.slane %v3201_v5, 5  ;;  %7046 = vmatmul.bf16.gmra.mxu0 %v6834_v0  ;;  %v17057_v32 = vld [vmem:[#allocation46_spill] sm:$0xff]  ;;  %v4752_v49 = vpop.f32.mrf.mxu2  ;;  %v3213_v26 = vrot.slane %v3212_v14, 4  ;;  %v5808_v14 = vld [vmem:[#allocation2 + $0x200] sm:$0xf] }
 0x2a7   : > { %v4413_v62 = vsel %vm14367_vm11, %v12354_v10, %v4412_v60  ;;  %v3859_v21 = vadd.f32 %v3683_v28, %v17057_v32  ;;  %v5805_v48 = vld [vmem:[#allocation2 + $0x1f4] sm:$0x1]  ;;  %v1740_v60 = vld [vmem:[#allocation2 + $0x1fc] sm:$0x1]  ;;  %v17058_v28 = vld [vmem:[#allocation18_spill] sm:$0xff] }
 0x2a8   : > { %v6518_v42 = vrot.slane %v6516_v55, 5  ;;  %v4536_v17 = vunpack.c.l.b16 %v4413_v62  ;;  %v3204_v19 = vsel %vm14377_vm12, %v15673_v4, %v3203_v9  ;;  %v2475_v10 = vld [vmem:[#allocation2 + $0x1f4] sm:$0x1]  ;;  %v6530_v6 = vshll.u32 %v5805_v48, 16  ;;  %v682_v55 = vld [vmem:[#allocation2 + $0x204] sm:$0x1]  ;;  %v3685_v48 = vpop.f32.mrf.mxu1 }
 0x2a9   : > { %v4056_v27 = vld [vmem:[#allocation2 + $0x1f4] sm:$0x1]  ;;  %v3467_v23 = vunpack.c.l.b16 %v3204_v19  ;;  %v4928_v13 = vadd.f32 %v4752_v49, %v3859_v21  ;;  %v17059_v0 = vrot.slane %v17058_v28, 4  ;;  %v3215_v63 = vshll.u32 %v2475_v10, 16  ;;  %v15711_v9 = vld [vmem:[#allocation2 + $0x1f8] sm:$0xe] }
 0x2aa   : > { %v4575_v5 = vpack.c.b16 %v4536_v17, %v4535_v40  ;;  %v6519_v59 = vsel %vm14377_vm12, %v6514_v34, %v6518_v42  ;;  %v5806_v62 = vld [vmem:[#allocation2 + $0x1f8] sm:$0xf]  ;;  %v6532_v40 = vrot.slane %v6530_v6, 5  ;;  %v3225_v34 = vrot.slane %v3223_v2, 5  ;;  %v17060_v17 = vld [vmem:[#allocation43_spill] sm:$0xff]  ;;  %5473 = vmatmul.bf16.gmra.mxu3 %v12500_v35  ;;  %v17061_v6 = vld [vmem:[#allocation49_spill] sm:$0xff] }
 0x2ab   : > { %v1741_v4 = vsel %vm13721_vm4, %v17059_v0, %v1740_v60  ;;  %v3506_v32 = vpack.c.b16 %v3467_v23, %v3466_v52  ;;  %v4416_v42 = vrot.slane %v4056_v27, 5  ;;  %v5610_v21 = vadd.f32 %v5434_v39, %v4928_v13  ;;  %v685_v27 = vld [vmem:[#allocation2 + $0x20c] sm:$0x1]  ;;  %v2478_v28 = vld [vmem:[#allocation2 + $0x200] sm:$0xf]  ;;  %v17064_v19 = vld [vmem:[#allocation52_spill] sm:$0xff] }
 0x2ac   : > { %4791 = vmatmul.bf16.gmra.mxu2 %v4575_v5  ;;  %1742 = vst [vmem:[#allocation2 + $0x1fc] sm:$0x1] %v1741_v4  ;;  %v3217_v49 = vrot.slane %v3215_v63, 5  ;;  %v683_v60 = vsel %vm13715_vm3, 0, %v682_v55  ;;  %v6533_v10 = vsel %vm14377_vm12, %v6528_v56, %v6532_v40  ;;  %v6795_v52 = vunpack.c.l.b16 %v6519_v59 }
 0x2ad   : > { %3722 = vmatmul.bf16.gmra.mxu1 %v3506_v32  ;;  %v3226_v23 = vor.u32 %v3225_v34, %v3222_v15  ;;  %v4417_v2 = vsel %vm14367_vm11, %v12355_v8, %v4416_v42  ;;  %v6796_v5 = vunpack.c.l.b16 %v6533_v10  ;;  %v3860_v35 = vadd.f32 %v3685_v48, %v17061_v6  ;;  %684 = vst [vmem:[#allocation2 + $0x204] sm:$0x1] %v683_v60  ;;  %v7012_v59 = vpop.f32.mrf.mxu0  ;;  %v5436_v42 = vpop.f32.mrf.mxu3 }
 0x2ae   : > { %v12356_v39 = vrot.slane %v15711_v9, 9  ;;  %v6535_v13 = vshrl.u32 %v5806_v62, 16  ;;  %v3218_v55 = vsel %vm14377_vm12, %v3213_v26, %v3217_v49  ;;  %v4537_v0 = vunpack.c.l.b16 %v4417_v2  ;;  %v4754_v15 = vpop.f32.mrf.mxu2 }
 0x2af   : > { %v6538_v4 = vshll.u32 %v5806_v62, 16  ;;  %v6549_v56 = vshrl.u32 %v5808_v14, 16  ;;  %v3227_v63 = vrot.slane %v3226_v23, 4  ;;  %v6552_v8 = vshll.u32 %v5808_v14, 16 }
 0x2b0   : > { %v6537_v32 = vrot.slane %v6535_v13, 4  ;;  %v686_v40 = vsel %vm13715_vm3, 0, %v685_v27  ;;  %v4929_v34 = vadd.f32 %v4754_v15, %v3860_v35  ;;  %v3234_v60 = vshrl.u32 %v2478_v28, 16  ;;  %v12503_v13 = vld [vmem:[#allocation2 + $0x1f8] sm:$0xf] }
 0x2b1   : > { %v6540_v9 = vrot.slane %v6538_v4, 5  ;;  %v6551_v48 = vrot.slane %v6549_v56, 4  ;;  %687 = vst [vmem:[#allocation2 + $0x20c] sm:$0x1] %v686_v40  ;;  %v6835_v10 = vpack.c.b16 %v6796_v5, %v6795_v52  ;;  %v15726_v26 = vunpack.c.l.b16 %v3218_v55  ;;  %v3688_v56 = vpop.f32.mrf.mxu1  ;;  %v2480_v5 = vld [vmem:[#allocation2 + $0x208] sm:$0xf] }
 0x2b2   : > { %v15730_v23 = vadd.f32 %v15699_v46, %v15689_v57  ;;  %v15732_v14 = vadd.f32 %v7012_v59, %v5610_v21  ;;  %v15734_v2 = vadd.f32 %v5436_v42, %v4929_v34  ;;  %v6554_v52 = vrot.slane %v6552_v8, 5  ;;  %v13066_v46 = vld [vmem:[#allocation2 + $0x1fc] sm:$0xf0] }
 0x2b3   : > { %v2477_v6 = vld [vmem:[#allocation2 + $0x1fc] sm:$0x1]  ;;  %v6541_v4 = vor.u32 %v6540_v9, %v6537_v32  ;;  %v3236_v55 = vrot.slane %v3234_v60, 4  ;;  %v3237_v40 = vshll.u32 %v2478_v28, 16  ;;  %v3861_v54 = vadd.f32 %v3688_v56, %v17064_v19  ;;  %v17065_v42 = vld [vmem:[#allocation21_spill] sm:$0xff] }
 0x2b4   : > { %v4058_v62 = vld [vmem:[#allocation2 + $0x1fc] sm:$0x1]  ;;  %17062 = vst [vmem:[#allocation51_spill] sm:$0xff] %v15730_v23  ;;  %v3229_v27 = vshll.u32 %v2477_v6, 16  ;;  %v1746_v21 = vld [vmem:[#allocation2 + $0x204] sm:$0x1]  ;;  %v6555_v8 = vor.u32 %v6554_v52, %v6551_v48 }
 0x2b5   : > { %v5807_v49 = vld [vmem:[#allocation2 + $0x1fc] sm:$0x1]  ;;  %17063 = vst [vmem:[#allocation20_spill] sm:$0xff] %v15732_v14  ;;  %v4420_v35 = vrot.slane %v4058_v62, 5  ;;  %v6542_v59 = vrot.slane %v6541_v4, 4  ;;  %v17066_v6 = vrot.slane %v17065_v42, 4  ;;  %v5439_v48 = vpop.f32.mrf.mxu3 }
 0x2b6   : > { %v6544_v15 = vshll.u32 %v5807_v49, 16  ;;  %v3231_v41 = vrot.slane %v3229_v27, 5  ;;  %7051 = vmatmul.bf16.gmra.mxu0 %v6835_v10  ;;  %v3239_v19 = vrot.slane %v3237_v40, 5  ;;  %v3248_v60 = vshrl.u32 %v2480_v5, 16  ;;  %v4757_v56 = vpop.f32.mrf.mxu2  ;;  %v17067_v10 = vld [vmem:[#allocation22_spill] sm:$0xff] }
 0x2b7   : > { %v4421_v57 = vsel %vm14367_vm11, %v12356_v39, %v4420_v35  ;;  %v1747_v32 = vsel %vm13721_vm4, %v17066_v6, %v1746_v21  ;;  %v3251_v62 = vshll.u32 %v2480_v5, 16  ;;  %v7014_v39 = vpop.f32.mrf.mxu0  ;;  %v12504_v35 = vor.u32 %v13066_v46, %v12503_v13  ;;  %v4059_v21 = vld [vmem:[#allocation2 + $0x200] sm:$0xe]  ;;  %v688_v40 = vld [vmem:[#allocation2 + $0x214] sm:$0x1] }
 0x2b8   : > { %v4538_v34 = vunpack.c.l.b16 %v4421_v57  ;;  %v6546_v9 = vrot.slane %v6544_v15, 5  ;;  %v3232_v28 = vsel %vm14377_vm12, %v3227_v63, %v3231_v41  ;;  %1748 = vst [vmem:[#allocation2 + $0x204] sm:$0x1] %v1747_v32  ;;  %v1752_v57 = vld [vmem:[#allocation2 + $0x20c] sm:$0x1]  ;;  %v4930_v15 = vadd.f32 %v4757_v56, %v3861_v54 }
 0x2b9   : > { %v3469_v49 = vunpack.c.l.b16 %v3232_v28  ;;  %v17068_v52 = vrot.slane %v17067_v10, 4  ;;  %v3240_v63 = vor.u32 %v3239_v19, %v3236_v55  ;;  %v5810_v5 = vld [vmem:[#allocation2 + $0x208] sm:$0xf]  ;;  %v5812_v42 = vld [vmem:[#allocation2 + $0x210] sm:$0xf]  ;;  %v3250_v13 = vrot.slane %v3248_v60, 4  ;;  %v3690_v28 = vpop.f32.mrf.mxu1 }
 0x2ba   : > { %v4576_v27 = vpack.c.b16 %v4538_v34, %v4537_v0  ;;  %v6547_v4 = vsel %vm14377_vm12, %v6542_v59, %v6546_v9  ;;  %v3253_v46 = vrot.slane %v3251_v62, 5  ;;  %v691_v59 = vld [vmem:[#allocation2 + $0x21c] sm:$0x1]  ;;  %v6556_v34 = vrot.slane %v6555_v8, 4  ;;  %v4061_v32 = vld [vmem:[#allocation2 + $0x208] sm:$0xe]  ;;  %5478 = vmatmul.bf16.gmra.mxu3 %v12504_v35 }
 0x2bb   : > { %v1753_v41 = vsel %vm13721_vm4, %v17068_v52, %v1752_v57  ;;  %v3507_v0 = vpack.c.b16 %v3469_v49, %v15726_v26  ;;  %v15752_v6 = vunpack.c.l.b16 %v6547_v4  ;;  %v15754_v54 = vadd.f32 %v5439_v48, %v4930_v15  ;;  %v15756_v19 = vld [vmem:[#allocation2 + $0x208] sm:$0xf]  ;;  %v15758_v56 = vld [vmem:[#allocation2 + $0x20c] sm:$0xf0] }
 0x2bc   : > { %1754 = vst [vmem:[#allocation2 + $0x20c] sm:$0x1] %v1753_v41  ;;  %4796 = vmatmul.bf16.gmra.mxu2 %v4576_v27  ;;  %v12357_v9 = vrot.slane %v4059_v21, 9  ;;  %v3254_v55 = vor.u32 %v3253_v46, %v3250_v13  ;;  %v689_v26 = vsel %vm13715_vm3, 0, %v688_v40  ;;  %v6563_v60 = vshrl.u32 %v5810_v5, 16  ;;  %v17069_v21 = vld [vmem:[#allocation56_spill] sm:$0xff] }
 0x2bd   : > { %v6566_v62 = vshll.u32 %v5810_v5, 16  ;;  %v2482_v49 = vld [vmem:[#allocation2 + $0x210] sm:$0xf]  ;;  %3727 = vmatmul.bf16.gmra.mxu1 %v3507_v0  ;;  %v3241_v8 = vrot.slane %v3240_v63, 4  ;;  %690 = vst [vmem:[#allocation2 + $0x214] sm:$0x1] %v689_v26  ;;  %v3862_v15 = vadd.f32 %v3690_v28, %v17069_v21  ;;  %v15766_v41 = vadd.f32 %v7014_v39, %v15734_v2 }
 0x2be   : > { %v6577_v27 = vshrl.u32 %v5812_v42, 16  ;;  %v6580_v4 = vshll.u32 %v5812_v42, 16  ;;  %v692_v35 = vsel %vm13715_vm3, 0, %v691_v59  ;;  %v3255_v10 = vrot.slane %v3254_v55, 4  ;;  %v4759_v42 = vpop.f32.mrf.mxu2  ;;  %v5441_v55 = vpop.f32.mrf.mxu3 }
 0x2bf   : > { %v5809_v57 = vld [vmem:[#allocation2 + $0x204] sm:$0x1]  ;;  %v12358_v52 = vrot.slane %v4061_v32, 9  ;;  %17070 = vst [vmem:[#allocation55_spill] sm:$0xff] %v15766_v41  ;;  %v6565_v0 = vrot.slane %v6563_v60, 4  ;;  %v6568_v63 = vrot.slane %v6566_v62, 5  ;;  %v15768_v46 = vpop.f32.mrf.mxu0  ;;  %v4931_v21 = vadd.f32 %v4759_v42, %v3862_v15 }
 0x2c0   : > { %v2479_v48 = vld [vmem:[#allocation2 + $0x204] sm:$0x1]  ;;  %v6558_v40 = vshll.u32 %v5809_v57, 16  ;;  %v6579_v14 = vrot.slane %v6577_v27, 4  ;;  %v6582_v59 = vrot.slane %v6580_v4, 5  ;;  %v3262_v23 = vshrl.u32 %v2482_v49, 16 }
 0x2c1   : > { %v3243_v5 = vshll.u32 %v2479_v48, 16  ;;  %v4060_v13 = vld [vmem:[#allocation2 + $0x204] sm:$0x1]  ;;  %693 = vst [vmem:[#allocation2 + $0x21c] sm:$0x1] %v692_v35  ;;  %v12508_v39 = vor.u32 %v15758_v56, %v15756_v19  ;;  %v3265_v48 = vshll.u32 %v2482_v49, 16  ;;  %v15776_v4 = vadd.f32 %v5441_v55, %v4931_v21 }
 0x2c2   : > { %v4424_v26 = vrot.slane %v4060_v13, 5  ;;  %v6560_v28 = vrot.slane %v6558_v40, 5  ;;  %v3693_v13 = vpop.f32.mrf.mxu1  ;;  %v17073_v21 = vld [vmem:[#allocation58_spill] sm:$0xff]  ;;  %v5814_v41 = vld [vmem:[#allocation2 + $0x218] sm:$0xf] }
 0x2c3   : > { %v2481_v32 = vld [vmem:[#allocation2 + $0x20c] sm:$0x1]  ;;  %v3245_v18 = vrot.slane %v3243_v5, 5  ;;  %v3863_v55 = vadd.f32 %v3693_v13, %v17073_v21 }
 0x2c4   : > { %v4062_v2 = vld [vmem:[#allocation2 + $0x20c] sm:$0x1]  ;;  %v3257_v57 = vshll.u32 %v2481_v32, 16  ;;  %v4425_v60 = vsel %vm14367_vm11, %v12357_v9, %v4424_v26  ;;  %v6561_v27 = vsel %vm14377_vm12, %v6556_v34, %v6560_v28  ;;  %v1758_v56 = vld [vmem:[#allocation2 + $0x214] sm:$0x1]  ;;  %v6569_v9 = vor.u32 %v6568_v63, %v6565_v0 }
 0x2c5   : > { %v4428_v62 = vrot.slane %v4062_v2, 5  ;;  %v3246_v35 = vsel %vm14377_vm12, %v3241_v8, %v3245_v18  ;;  %v4539_v15 = vunpack.c.l.b16 %v4425_v60  ;;  %v5811_v40 = vld [vmem:[#allocation2 + $0x20c] sm:$0x1]  ;;  %v6798_v5 = vunpack.c.l.b16 %v6561_v27  ;;  %v17071_v32 = vld [vmem:[#allocation27_spill] sm:$0xff]  ;;  %v2484_v18 = vld [vmem:[#allocation2 + $0x218] sm:$0xf] }
 0x2c6   : > { %v3259_v42 = vrot.slane %v3257_v57, 5  ;;  %v3470_v26 = vunpack.c.l.b16 %v3246_v35  ;;  %v17072_v2 = vrot.slane %v17071_v32, 4  ;;  %v6583_v28 = vor.u32 %v6582_v59, %v6579_v14  ;;  %v452_v0 = vld [vmem:[#allocation2 + $0x220] sm:$0x1]  ;;  %v15791_v32 = vld [vmem:[%s13699_s25 + $0xdc] sm:$0xf] }
 0x2c7   : > { %v4429_v19 = vsel %vm14367_vm11, %v12358_v52, %v4428_v62  ;;  %v6836_v8 = vpack.c.b16 %v6798_v5, %v15752_v6  ;;  %v6572_v52 = vshll.u32 %v5811_v40, 16  ;;  %v3264_v27 = vrot.slane %v3262_v23, 4  ;;  %v7019_v14 = vpop.f32.mrf.mxu0  ;;  %v4762_v6 = vpop.f32.mrf.mxu2  ;;  %v17074_v5 = vld [vmem:[#allocation28_spill] sm:$0xff] }
 0x2c8   : > { %v4540_v49 = vunpack.c.l.b16 %v4429_v19  ;;  %v1759_v34 = vsel %vm13721_vm4, %v17072_v2, %v1758_v56  ;;  %v3260_v57 = vsel %vm14377_vm12, %v3255_v10, %v3259_v42  ;;  %v1764_v62 = vld [vmem:[#allocation2 + $0x21c] sm:$0x1]  ;;  %v3267_v35 = vrot.slane %v3265_v48, 5  ;;  %v4063_v19 = vld [vmem:[#allocation2 + $0x210] sm:$0xe]  ;;  %v5444_v48 = vpop.f32.mrf.mxu3 }
 0x2c9   : > { %1760 = vst [vmem:[#allocation2 + $0x214] sm:$0x1] %v1759_v34  ;;  %v3471_v63 = vunpack.c.l.b16 %v3260_v57  ;;  %7056 = vmatmul.bf16.gmra.mxu0 %v6836_v8  ;;  %v6570_v59 = vrot.slane %v6569_v9, 4  ;;  %v17075_v13 = vrot.slane %v17074_v5, 4  ;;  %v3276_v42 = vshrl.u32 %v2484_v18, 16 }
 0x2ca   : > { %v4577_v60 = vpack.c.b16 %v4540_v49, %v4539_v15  ;;  %v3279_v40 = vshll.u32 %v2484_v18, 16  ;;  %v15797_v56 = vld [vmem:[#allocation2 + $0x218] sm:$0xe]  ;;  %v6574_v49 = vrot.slane %v6572_v52, 5  ;;  %v4932_v23 = vadd.f32 %v4762_v6, %v3863_v55  ;;  %v694_v34 = vld [vmem:[#allocation2 + $0x224] sm:$0x1]  ;;  %5483 = vmatmul.bf16.gmra.mxu3 %v12508_v39  ;;  %v3695_v55 = vpop.f32.mrf.mxu1 }
 0x2cb   : > { %v1765_v10 = vsel %vm13721_vm4, %v17075_v13, %v1764_v62  ;;  %v3508_v15 = vpack.c.b16 %v3471_v63, %v3470_v26  ;;  %v3268_v2 = vor.u32 %v3267_v35, %v3264_v27  ;;  %v6584_v8 = vrot.slane %v6583_v28, 4  ;;  %v700_v52 = vld [vmem:[#allocation2 + $0x234] sm:$0x1]  ;;  %v17076_v6 = vld [vmem:[#allocation61_spill] sm:$0xff] }
 0x2cc   : > { %1766 = vst [vmem:[#allocation2 + $0x21c] sm:$0x1] %v1765_v10  ;;  %v3278_v21 = vrot.slane %v3276_v42, 4  ;;  %v3281_v9 = vrot.slane %v3279_v40, 5  ;;  %v12359_v57 = vrot.slane %v4063_v19, 9  ;;  %4801 = vmatmul.bf16.gmra.mxu2 %v4577_v60  ;;  %v15799_v5 = vadd.f32 %v5444_v48, %v4932_v23 }
 0x2cd   : > { %v3269_v62 = vrot.slane %v3268_v2, 4  ;;  %v12360_v18 = vrot.slane %v15797_v56, 9  ;;  %v453_v26 = vsel %vm13721_vm4, 0, %v452_v0  ;;  %v1235_v28 = vshrl.u32 %v15791_v32, 16  ;;  %3732 = vmatmul.bf16.gmra.mxu1 %v3508_v15 }
 0x2ce   : > { %v3282_v63 = vor.u32 %v3281_v9, %v3278_v21  ;;  %454 = vst [vmem:[#allocation2 + $0x220] sm:$0x1] %v453_v26  ;;  %v1238_v27 = vshll.u32 %v15791_v32, 16  ;;  %v695_v60 = vsel %vm13715_vm3, 0, %v694_v34  ;;  %v6575_v19 = vsel %vm14377_vm12, %v6570_v59, %v6574_v49 }
 0x2cf   : > { %v3864_v13 = vadd.f32 %v3695_v55, %v17076_v6  ;;  %v15813_v39 = vadd.f32 %v15768_v46, %v15754_v54  ;;  %v15816_v42 = vadd.f32 %v7019_v14, %v15776_v4  ;;  %696 = vst [vmem:[#allocation2 + $0x224] sm:$0x1] %v695_v60  ;;  %v1237_v15 = vrot.slane %v1235_v28, 7  ;;  %v15820_v49 = vpop.f32.mrf.mxu0  ;;  %v4764_v54 = vpop.f32.mrf.mxu2  ;;  %v13129_v6 = vld [vmem:[#allocation7 + $0x180] sm:$0xff] }
 0x2d0   : > { %v5813_v35 = vld [vmem:[#allocation2 + $0x214] sm:$0x1]  ;;  %v3283_v56 = vrot.slane %v3282_v63, 4  ;;  %v6591_v48 = vshrl.u32 %v5814_v41, 16  ;;  %v6594_v2 = vshll.u32 %v5814_v41, 16  ;;  %v701_v59 = vsel %vm13715_vm3, 0, %v700_v52  ;;  %v5446_v52 = vpop.f32.mrf.mxu3  ;;  %8679 = vmatpush.bf16.msra.mxu2 %v13129_v6 }
 0x2d1   : > { %v2483_v0 = vld [vmem:[#allocation2 + $0x214] sm:$0x1]  ;;  %17077 = vst [vmem:[#allocation25_spill] sm:$0xff] %v15813_v39  ;;  %v6586_v32 = vshll.u32 %v5813_v35, 16  ;;  %v6799_v21 = vunpack.c.l.b16 %v6575_v19  ;;  %v4933_v26 = vadd.f32 %v4764_v54, %v3864_v13  ;;  %v1240_v35 = vor.u32 %v1238_v27, %v1237_v15  ;;  %v2486_v27 = vld [vmem:[#allocation2 + $0x230] sm:$0xf] }
 0x2d2   : > { %v4064_v10 = vld [vmem:[#allocation2 + $0x214] sm:$0x1]  ;;  %17078 = vst [vmem:[#allocation26_spill] sm:$0xff] %v15816_v42  ;;  %v3271_v40 = vshll.u32 %v2483_v0, 16  ;;  %v1241_v19 = vrot.slane %v1237_v15, 4  ;;  %v6596_v54 = vrot.slane %v6594_v2, 5 }
 0x2d3   : > { %v4432_v23 = vrot.slane %v4064_v10, 5  ;;  %v6588_v34 = vrot.slane %v6586_v32, 5  ;;  %v2485_v46 = vld [vmem:[#allocation2 + $0x21c] sm:$0x1]  ;;  %702 = vst [vmem:[#allocation2 + $0x234] sm:$0x1] %v701_v59  ;;  %v15828_v10 = vadd.f32 %v5446_v52, %v4933_v26 }
 0x2d4   : > { %v3273_v9 = vrot.slane %v3271_v40, 5  ;;  %v4066_v4 = vld [vmem:[#allocation2 + $0x21c] sm:$0x1]  ;;  %v3285_v55 = vshll.u32 %v2485_v46, 16  ;;  %v15839_v2 = vld [vmem:[#allocation2 + $0x230] sm:$0xe] }
 0x2d5   : > { %v4433_v14 = vsel %vm14367_vm11, %v12359_v57, %v4432_v23  ;;  %v4436_v63 = vrot.slane %v4066_v4, 5  ;;  %v6589_v41 = vsel %vm14377_vm12, %v6584_v8, %v6588_v34  ;;  %17079 = vst [vmem:[#allocation60_spill] sm:$0xff] %v15828_v10  ;;  %v1767_v13 = vld [vmem:[#allocation2 + $0x220] sm:$0xf]  ;;  %v5815_v40 = vld [vmem:[#allocation2 + $0x21c] sm:$0x1]  ;;  %v3698_v23 = vpop.f32.mrf.mxu1 }
 0x2d6   : > { %v4541_v28 = vunpack.c.l.b16 %v4433_v14  ;;  %v3274_v60 = vsel %vm14377_vm12, %v3269_v62, %v3273_v9  ;;  %v6800_v0 = vunpack.c.l.b16 %v6589_v41  ;;  %v3287_v32 = vrot.slane %v3285_v55, 5  ;;  %v703_v62 = vld [vmem:[#allocation2 + $0x23c] sm:$0x1]  ;;  %v1770_v26 = vld [vmem:[#allocation2 + $0x224] sm:$0x1] }
 0x2d7   : > { %v3472_v57 = vunpack.c.l.b16 %v3274_v60  ;;  %v4437_v59 = vsel %vm14367_vm11, %v12360_v18, %v4436_v63  ;;  %v1768_v8 = vsel %vm13740_vm6, %v1240_v35, %v1767_v13  ;;  %v6593_v34 = vrot.slane %v6591_v48, 4  ;;  %v17080_v46 = vld [vmem:[#allocation64_spill] sm:$0xff]  ;;  %v4767_v13 = vpop.f32.mrf.mxu2  ;;  %v17084_v10 = vld [vmem:[#allocation29_spill] sm:$0xff] }
 0x2d8   : > { %v6837_v15 = vpack.c.b16 %v6800_v0, %v6799_v21  ;;  %v3865_v9 = vadd.f32 %v3698_v23, %v17080_v46  ;;  %v3288_v4 = vsel %vm14377_vm12, %v3283_v56, %v3287_v32  ;;  %v4542_v14 = vunpack.c.l.b16 %v4437_v59  ;;  %1769 = vst [vmem:[#allocation2 + $0x220] sm:$0xf] %v1768_v8  ;;  %v2488_v48 = vld [vmem:[#allocation2 + $0x238] sm:$0xf]  ;;  %v15843_v56 = vpop.f32.mrf.mxu0 }
 0x2d9   : > { %v3473_v55 = vunpack.c.l.b16 %v3288_v4  ;;  %v1771_v18 = vsel %vm13721_vm4, %v1241_v19, %v1770_v26  ;;  %v6597_v63 = vor.u32 %v6596_v54, %v6593_v34  ;;  %v6600_v41 = vshll.u32 %v5815_v40, 16  ;;  %17081 = vst [vmem:[#allocation63_spill] sm:$0xff] %v15843_v56  ;;  %v12511_v34 = vld [vmem:[#allocation2 + $0x218] sm:$0xf]  ;;  %v15854_v26 = vld [vmem:[#allocation2 + $0x23c] sm:$0xf0] }
 0x2da   : > { %v4578_v52 = vpack.c.b16 %v4542_v14, %v4541_v28  ;;  %1772 = vst [vmem:[#allocation2 + $0x224] sm:$0x1] %v1771_v18  ;;  %v704_v21 = vsel %vm13715_vm3, 0, %v703_v62  ;;  %v3290_v60 = vshrl.u32 %v2486_v27, 16  ;;  %v3293_v35 = vshll.u32 %v2486_v27, 16  ;;  %7061 = vmatmul.bf16.gmra.mxu0 %v6837_v15 }
 0x2db   : > { %v3509_v6 = vpack.c.b16 %v3473_v55, %v3472_v57  ;;  %v6598_v0 = vrot.slane %v6597_v63, 4  ;;  %v6602_v32 = vrot.slane %v6600_v41, 5  ;;  %705 = vst [vmem:[#allocation2 + $0x23c] sm:$0x1] %v704_v21  ;;  %v2487_v19 = vld [vmem:[#allocation2 + $0x234] sm:$0x1]  ;;  %v4934_v40 = vadd.f32 %v4767_v13, %v3865_v9  ;;  %v5449_v63 = vpop.f32.mrf.mxu3 }
 0x2dc   : > { %v3292_v23 = vrot.slane %v3290_v60, 4  ;;  %v3295_v59 = vrot.slane %v3293_v35, 5  ;;  %v3299_v8 = vshll.u32 %v2487_v19, 16  ;;  %v4068_v28 = vld [vmem:[#allocation2 + $0x234] sm:$0x1]  ;;  %v3304_v62 = vshrl.u32 %v2488_v48, 16  ;;  %4806 = vmatmul.bf16.gmra.mxu2 %v4578_v52 }
 0x2dd   : > { %v6603_v54 = vsel %vm14377_vm12, %v6598_v0, %v6602_v32  ;;  %v3307_v27 = vshll.u32 %v2488_v48, 16  ;;  %v15847_v15 = vld [vmem:[#allocation2 + $0x238] sm:$0xf]  ;;  %v12361_v9 = vrot.slane %v15839_v2, 9  ;;  %v4440_v14 = vrot.slane %v4068_v28, 5  ;;  %v3700_v41 = vpop.f32.mrf.mxu1  ;;  %3737 = vmatmul.bf16.gmra.mxu1 %v3509_v6  ;;  %v13137_v19 = vld [vmem:[#allocation7 + $0x1c0] sm:$0xff] }
 0x2de   : > { %v3296_v57 = vor.u32 %v3295_v59, %v3292_v23  ;;  %v15849_v46 = vrot.slane %v3299_v8, 5  ;;  %v15851_v4 = vld [vmem:[#allocation2 + $0x238] sm:$0xe]  ;;  %v3306_v21 = vrot.slane %v3304_v62, 4  ;;  %v15858_v48 = vadd.f32 %v15820_v49, %v15799_v5  ;;  %v706_v2 = vld [vmem:[#allocation2 + $0x244] sm:$0x1]  ;;  %10257 = vmatpush.bf16.msra.mxu3 %v13137_v19 }
 0x2df   : > { %v13068_v55 = vld [vmem:[#allocation2 + $0x21c] sm:$0xf0]  ;;  %v3309_v60 = vrot.slane %v3307_v27, 5  ;;  %v15860_v32 = vadd.f32 %v5449_v63, %v4934_v40  ;;  %v5818_v13 = vld [vmem:[#allocation2 + $0x238] sm:$0xf]  ;;  %v15862_v28 = vunpack.c.l.b16 %v6603_v54  ;;  %v17083_v40 = vld [vmem:[#allocation67_spill] sm:$0xff]  ;;  %v4769_v56 = vpop.f32.mrf.mxu2 }
 0x2e0   : > { %v5816_v18 = vld [vmem:[#allocation2 + $0x220] sm:$0xf]  ;;  %17082 = vst [vmem:[#allocation41_spill] sm:$0xff] %v15858_v48  ;;  %v12512_v52 = vor.u32 %v13068_v55, %v12511_v34  ;;  %v3297_v62 = vrot.slane %v3296_v57, 4  ;;  %v17085_v48 = vrot.slane %v17084_v10, 4 }
 0x2e1   : > { %v6605_v35 = vshrl.u32 %v5816_v18, 16  ;;  %v6608_v0 = vshll.u32 %v5816_v18, 16  ;;  %v13089_v23 = vld [vmem:[#allocation7 + $0x140] sm:$0xff]  ;;  %v3310_v27 = vor.u32 %v3309_v60, %v3306_v21  ;;  %v3866_v18 = vadd.f32 %v3700_v41, %v17083_v40  ;;  %v709_v41 = vld [vmem:[#allocation2 + $0x24c] sm:$0x1] }
 0x2e2   : > { %v13145_v59 = vld [vmem:[#allocation7 + $0x200] sm:$0xff]  ;;  %5488 = vmatmul.bf16.gmra.mxu3 %v12512_v52  ;;  %v1776_v63 = vld [vmem:[#allocation2 + $0x23c] sm:$0x1]  ;;  %7996 = vmatpush.bf16.msra.mxu1 %v13089_v23  ;;  %v3302_v57 = vsel %vm14377_vm12, %v3297_v62, %v15849_v46  ;;  %v15876_v21 = vsel %vm14367_vm11, %v12361_v9, %v4440_v14  ;;  %v707_v46 = vsel %vm13715_vm3, 0, %v706_v2  ;;  %v6622_v62 = vshll.u32 %v5818_v13, 16 }
 0x2e3   : > { %v5817_v8 = vld [vmem:[#allocation2 + $0x224] sm:$0x1]  ;;  %v5820_v49 = vld [vmem:[#allocation2 + $0x240] sm:$0xf]  ;;  %v6607_v6 = vrot.slane %v6605_v35, 4  ;;  %v6610_v34 = vrot.slane %v6608_v0, 5  ;;  %v1777_v54 = vsel %vm13721_vm4, %v17085_v48, %v1776_v63  ;;  %11323 = vmatpush.bf16.msra.mxu0 %v13145_v59  ;;  %v7027_v35 = vpop.f32.mrf.mxu0  ;;  %v4935_v23 = vadd.f32 %v4769_v56, %v3866_v18 }
 0x2e4   : > { %v6614_v55 = vshll.u32 %v5817_v8, 16  ;;  %v2490_v52 = vld [vmem:[#allocation2 + $0x240] sm:$0xf]  ;;  %1778 = vst [vmem:[#allocation2 + $0x23c] sm:$0x1] %v1777_v54  ;;  %v15879_v48 = vrot.slane %v3310_v27, 4 }
 0x2e5   : > { %v6611_v0 = vor.u32 %v6610_v34, %v6607_v6  ;;  %v6619_v8 = vshrl.u32 %v5818_v13, 16  ;;  %v6633_v9 = vshrl.u32 %v5820_v49, 16  ;;  %v2492_v14 = vld [vmem:[#allocation2 + $0x248] sm:$0xf]  ;;  %708 = vst [vmem:[#allocation2 + $0x244] sm:$0x1] %v707_v46  ;;  %v5451_v6 = vpop.f32.mrf.mxu3  ;;  %v3703_v13 = vpop.f32.mrf.mxu1 }
 0x2e6   : > { %v6616_v10 = vrot.slane %v6614_v55, 5  ;;  %v6636_v19 = vshll.u32 %v5820_v49, 16  ;;  %v710_v59 = vsel %vm13715_vm3, 0, %v709_v41  ;;  %v3318_v63 = vshrl.u32 %v2490_v52, 16  ;;  %v15890_v60 = vld [vmem:[#allocation2 + $0x240] sm:$0xe] }
 0x2e7   : > { %v6612_v40 = vrot.slane %v6611_v0, 4  ;;  %v6621_v34 = vrot.slane %v6619_v8, 4  ;;  %v6624_v56 = vrot.slane %v6622_v62, 5  ;;  %v6635_v55 = vrot.slane %v6633_v9, 4  ;;  %711 = vst [vmem:[#allocation2 + $0x24c] sm:$0x1] %v710_v59 }
 0x2e8   : > { %v3321_v27 = vshll.u32 %v2490_v52, 16  ;;  %v15887_v18 = vadd.f32 %v5451_v6, %v4935_v23  ;;  %v6638_v54 = vrot.slane %v6636_v19, 5  ;;  %v3320_v0 = vrot.slane %v3318_v63, 4 }
 0x2e9   : > { %v6617_v2 = vsel %vm14377_vm12, %v6612_v40, %v6616_v10  ;;  %v4543_v49 = vunpack.c.l.b16 %v15876_v21  ;;  %v6625_v5 = vor.u32 %v6624_v56, %v6621_v34  ;;  %v15892_v8 = vunpack.c.l.b16 %v3302_v57  ;;  %v17086_v10 = vld [vmem:[#allocation70_spill] sm:$0xff] }
 0x2ea   : > { %v6802_v46 = vunpack.c.l.b16 %v6617_v2  ;;  %v3323_v41 = vrot.slane %v3321_v27, 5  ;;  %v6639_v62 = vor.u32 %v6638_v54, %v6635_v55  ;;  %v3332_v9 = vshrl.u32 %v2492_v14, 16  ;;  %v712_v2 = vld [vmem:[#allocation2 + $0x254] sm:$0x1]  ;;  %v4772_v55 = vpop.f32.mrf.mxu2  ;;  %v15901_v54 = vld [vmem:[#allocation2 + $0x248] sm:$0xe] }
 0x2eb   : > { %v3335_v52 = vshll.u32 %v2492_v14, 16  ;;  %v3867_v23 = vadd.f32 %v3703_v13, %v17086_v10  ;;  %v2489_v40 = vld [vmem:[#allocation2 + $0x23c] sm:$0x1]  ;;  %v15897_v21 = vadd.f32 %v7027_v35, %v15860_v32  ;;  %v15899_v34 = vpop.f32.mrf.mxu0  ;;  %v6626_v13 = vrot.slane %v6625_v5, 4  ;;  %v5822_v10 = vld [vmem:[#allocation2 + $0x248] sm:$0xf] }
 0x2ec   : > { %v6838_v59 = vpack.c.b16 %v6802_v46, %v15862_v28  ;;  %v4070_v6 = vld [vmem:[#allocation2 + $0x23c] sm:$0x1]  ;;  %v3324_v63 = vor.u32 %v3323_v41, %v3320_v0  ;;  %v3313_v56 = vshll.u32 %v2489_v40, 16  ;;  %v1782_v14 = vld [vmem:[#allocation2 + $0x244] sm:$0x1]  ;;  %v15904_v46 = vrot.slane %v6639_v62, 4 }
 0x2ed   : > { %v5819_v19 = vld [vmem:[#allocation2 + $0x23c] sm:$0x1]  ;;  %17087 = vst [vmem:[#allocation66_spill] sm:$0xff] %v15897_v21  ;;  %v4444_v57 = vrot.slane %v4070_v6, 5  ;;  %v4936_v0 = vadd.f32 %v4772_v55, %v3867_v23  ;;  %v3334_v41 = vrot.slane %v3332_v9, 4  ;;  %v17088_v35 = vrot.slane %v15851_v4, 9  ;;  %v5454_v62 = vpop.f32.mrf.mxu3 }
 0x2ee   : > { %v6628_v27 = vshll.u32 %v5819_v19, 16  ;;  %7066 = vmatmul.bf16.gmra.mxu0 %v6838_v59  ;;  %v3315_v32 = vrot.slane %v3313_v56, 5  ;;  %v17089_v6 = vrot.slane %v16986_v51, 4  ;;  %v1788_v59 = vld [vmem:[#allocation2 + $0x24c] sm:$0x1]  ;;  %v17090_v9 = vrot.slane %v16987_v36, 4 }
 0x2ef   : > { %v4445_v40 = vsel %vm14367_vm11, %v17088_v35, %v4444_v57  ;;  %v5824_v21 = vld [vmem:[#allocation2 + $0x250] sm:$0xf]  ;;  %v15918_v4 = vrot.slane %v3324_v63, 4  ;;  %v3337_v56 = vrot.slane %v3335_v52, 5  ;;  %v715_v57 = vld [vmem:[#allocation2 + $0x25c] sm:$0x1]  ;;  %v5618_v55 = vadd.f32 %v5454_v62, %v4936_v0 }
 0x2f0   : > { %v1783_v19 = vsel %vm13721_vm4, %v17089_v6, %v1782_v14  ;;  %v6630_v28 = vrot.slane %v6628_v27, 5  ;;  %v4544_v5 = vunpack.c.l.b16 %v4445_v40  ;;  %v1789_v23 = vsel %vm13721_vm4, %v17090_v9, %v1788_v59  ;;  %v3705_v27 = vpop.f32.mrf.mxu1  ;;  %v15926_v36 = vld [vmem:[#allocation2 + $0x250] sm:$0xf]  ;;  %v17091_v63 = vld [vmem:[#allocation73_spill] sm:$0xff] }
 0x2f1   : > { %1784 = vst [vmem:[#allocation2 + $0x244] sm:$0x1] %v1783_v19  ;;  %v3316_v51 = vsel %vm14377_vm12, %v15879_v48, %v3315_v32  ;;  %v12364_v14 = vrot.slane %v15901_v54, 9  ;;  %v713_v35 = vsel %vm13715_vm3, 0, %v712_v2  ;;  %v3868_v19 = vadd.f32 %v3705_v27, %v17091_v63  ;;  %v15934_v32 = vld [vmem:[#allocation2 + $0x248] sm:$0xf] }
 0x2f2   : > { %1790 = vst [vmem:[#allocation2 + $0x24c] sm:$0x1] %v1789_v23  ;;  %v3475_v40 = vunpack.c.l.b16 %v3316_v51  ;;  %v4579_v6 = vpack.c.b16 %v4544_v5, %v4543_v49  ;;  %v6631_v52 = vsel %vm14377_vm12, %v6626_v13, %v6630_v28  ;;  %v17092_v48 = vor.u32 %v15854_v26, %v15847_v15  ;;  %v15937_v49 = vld [vmem:[#allocation2 + $0x24c] sm:$0xf0]  ;;  %v4774_v15 = vpop.f32.mrf.mxu2 }
 0x2f3   : > { %714 = vst [vmem:[#allocation2 + $0x254] sm:$0x1] %v713_v35  ;;  %v3338_v0 = vor.u32 %v3337_v56, %v3334_v41  ;;  %v6647_v54 = vshrl.u32 %v5822_v10, 16  ;;  %v6650_v59 = vshll.u32 %v5822_v10, 16  ;;  %v6661_v2 = vshrl.u32 %v5824_v21, 16  ;;  %v7032_v9 = vpop.f32.mrf.mxu0 }
 0x2f4   : > { %5493 = vmatmul.bf16.gmra.mxu3 %v17092_v48  ;;  %v3510_v62 = vpack.c.b16 %v3475_v40, %v15892_v8  ;;  %4811 = vmatmul.bf16.gmra.mxu2 %v4579_v6  ;;  %v6664_v5 = vshll.u32 %v5824_v21, 16  ;;  %v716_v28 = vsel %vm13715_vm3, 0, %v715_v57  ;;  %v3346_v13 = vshrl.u32 %v15926_v36, 16 }
 0x2f5   : > { %v3339_v26 = vrot.slane %v3338_v0, 4  ;;  %v6649_v41 = vrot.slane %v6647_v54, 4  ;;  %v6652_v23 = vrot.slane %v6650_v59, 5  ;;  %v6663_v56 = vrot.slane %v6661_v2, 4  ;;  %717 = vst [vmem:[#allocation2 + $0x25c] sm:$0x1] %v716_v28 }
 0x2f6   : > { %3742 = vmatmul.bf16.gmra.mxu1 %v3510_v62  ;;  %v4937_v10 = vadd.f32 %v4774_v15, %v3868_v19  ;;  %v6666_v51 = vrot.slane %v6664_v5, 5  ;;  %v15942_v8 = vrot.slane %v3346_v13, 4  ;;  %v3349_v27 = vshll.u32 %v15926_v36, 16  ;;  %v5456_v19 = vpop.f32.mrf.mxu3 }
 0x2f7   : > { %v15949_v6 = vadd.f32 %v15899_v34, %v15887_v18  ;;  %v15951_v63 = vadd.f32 %v7032_v9, %v5618_v55  ;;  %v6803_v0 = vunpack.c.l.b16 %v6631_v52  ;;  %v6653_v62 = vor.u32 %v6652_v23, %v6649_v41  ;;  %v17094_v9 = vld [vmem:[#allocation76_spill] sm:$0xff] }
 0x2f8   : > { %v5821_v21 = vld [vmem:[#allocation2 + $0x244] sm:$0x1]  ;;  %v15953_v36 = vadd.f32 %v5456_v19, %v4937_v10  ;;  %v3708_v5 = vpop.f32.mrf.mxu1  ;;  %v17093_v18 = vrot.slane %v17004_v43, 4  ;;  %v6667_v52 = vor.u32 %v6666_v51, %v6663_v56  ;;  %v17095_v41 = vrot.slane %v15890_v60, 9 }
 0x2f9   : > { %v2491_v35 = vld [vmem:[#allocation2 + $0x244] sm:$0x1]  ;;  %v6642_v48 = vshll.u32 %v5821_v21, 16  ;;  %v2493_v54 = vld [vmem:[#allocation2 + $0x24c] sm:$0x1]  ;;  %v3869_v21 = vadd.f32 %v3708_v5, %v17094_v9  ;;  %v3351_v9 = vrot.slane %v3349_v27, 5 }
 0x2fa   : > { %v4072_v40 = vld [vmem:[#allocation2 + $0x244] sm:$0x1]  ;;  %v3327_v59 = vshll.u32 %v2491_v35, 16  ;;  %v4074_v2 = vld [vmem:[#allocation2 + $0x24c] sm:$0x1]  ;;  %v3341_v28 = vshll.u32 %v2493_v54, 16 }
 0x2fb   : > { %v4448_v13 = vrot.slane %v4072_v40, 5  ;;  %v4452_v15 = vrot.slane %v4074_v2, 5  ;;  %v1794_v57 = vld [vmem:[#allocation2 + $0x254] sm:$0x1]  ;;  %v6644_v42 = vrot.slane %v6642_v48, 5  ;;  %v15972_v60 = vpop.f32.mrf.mxu0  ;;  %v6654_v54 = vrot.slane %v6653_v62, 4 }
 0x2fc   : > { %v3329_v39 = vrot.slane %v3327_v59, 5  ;;  %v1795_v34 = vsel %vm13721_vm4, %v17093_v18, %v1794_v57  ;;  %v5823_v55 = vld [vmem:[#allocation2 + $0x24c] sm:$0x1]  ;;  %v3343_v35 = vrot.slane %v3341_v28, 5  ;;  %v1800_v57 = vld [vmem:[#allocation2 + $0x25c] sm:$0x1]  ;;  %v4777_v59 = vpop.f32.mrf.mxu2 }
 0x2fd   : > { %v4449_v23 = vsel %vm14367_vm11, %v17095_v41, %v4448_v13  ;;  %v4453_v10 = vsel %vm14367_vm11, %v12364_v14, %v4452_v15  ;;  %1796 = vst [vmem:[#allocation2 + $0x254] sm:$0x1] %v1795_v34  ;;  %v6645_v43 = vsel %vm14377_vm12, %v15904_v46, %v6644_v42  ;;  %v6656_v14 = vshll.u32 %v5823_v55, 16  ;;  %v2496_v2 = vld [vmem:[#allocation2 + $0x258] sm:$0xf] }
 0x2fe   : > { %v3330_v56 = vsel %vm14377_vm12, %v15918_v4, %v3329_v39  ;;  %v4545_v51 = vunpack.c.l.b16 %v4449_v23  ;;  %v4546_v40 = vunpack.c.l.b16 %v4453_v10  ;;  %v6804_v48 = vunpack.c.l.b16 %v6645_v43  ;;  %v4075_v5 = vld [vmem:[#allocation2 + $0x250] sm:$0xe]  ;;  %v15976_v15 = vld [vmem:[#allocation2 + $0x258] sm:$0xe]  ;;  %v5459_v55 = vpop.f32.mrf.mxu3  ;;  %v15988_v27 = vld [vmem:[#allocation2 + $0x260] sm:$0xf] }
 0x2ff   : > { %v3344_v19 = vsel %vm14377_vm12, %v3339_v26, %v3343_v35  ;;  %v3476_v28 = vunpack.c.l.b16 %v3330_v56  ;;  %v4938_v13 = vadd.f32 %v4777_v59, %v3869_v21  ;;  %v6658_v4 = vrot.slane %v6656_v14, 5  ;;  %v718_v26 = vld [vmem:[#allocation2 + $0x264] sm:$0x1]  ;;  %v5826_v56 = vld [vmem:[#allocation2 + $0x258] sm:$0xf]  ;;  %v17098_v59 = vld [vmem:[#allocation79_spill] sm:$0xff] }
 0x300   : > { %v3477_v42 = vunpack.c.l.b16 %v3344_v19  ;;  %v4580_v46 = vpack.c.b16 %v4546_v40, %v4545_v51  ;;  %v6839_v39 = vpack.c.b16 %v6804_v48, %v6803_v0  ;;  %v17096_v18 = vrot.slane %v17049_v38, 4  ;;  %v3710_v0 = vpop.f32.mrf.mxu1 }
 0x301   : > { %v6668_v62 = vrot.slane %v6667_v52, 4  ;;  %v3360_v35 = vshrl.u32 %v2496_v2, 16  ;;  %v3363_v41 = vshll.u32 %v2496_v2, 16  ;;  %v12365_v23 = vrot.slane %v4075_v5, 9 }
 0x302   : > { %v1801_v34 = vsel %vm13721_vm4, %v17096_v18, %v1800_v57  ;;  %7071 = vmatmul.bf16.gmra.mxu0 %v6839_v39  ;;  %v6659_v21 = vsel %vm14377_vm12, %v6654_v54, %v6658_v4  ;;  %v15984_v10 = vadd.f32 %v5459_v55, %v4938_v13  ;;  %v3352_v38 = vor.u32 %v3351_v9, %v15942_v8 }
 0x303   : > { %1802 = vst [vmem:[#allocation2 + $0x25c] sm:$0x1] %v1801_v34  ;;  %v12366_v43 = vrot.slane %v15976_v15, 9  ;;  %v3511_v52 = vpack.c.b16 %v3477_v42, %v3476_v28  ;;  %v15990_v40 = vunpack.c.l.b16 %v6659_v21  ;;  %v3362_v48 = vrot.slane %v3360_v35, 4  ;;  %v15998_v4 = vpop.f32.mrf.mxu0 }
 0x304   : > { %v5825_v51 = vld [vmem:[#allocation2 + $0x254] sm:$0x1]  ;;  %v3365_v19 = vrot.slane %v3363_v41, 5  ;;  %v17097_v54 = vor.u32 %v15937_v49, %v15934_v32  ;;  %v3870_v2 = vadd.f32 %v3710_v0, %v17098_v59  ;;  %v3353_v8 = vrot.slane %v3352_v38, 4  ;;  %4816 = vmatmul.bf16.gmra.mxu2 %v4580_v46  ;;  %v4779_v34 = vpop.f32.mrf.mxu2 }
 0x305   : > { %v2495_v57 = vld [vmem:[#allocation2 + $0x254] sm:$0x1]  ;;  %v6670_v14 = vshll.u32 %v5825_v51, 16  ;;  %v719_v28 = vsel %vm13715_vm3, 0, %v718_v26  ;;  %v6675_v42 = vshrl.u32 %v5826_v56, 16  ;;  %v6678_v32 = vshll.u32 %v5826_v56, 16 }
 0x306   : > { %5498 = vmatmul.bf16.gmra.mxu3 %v17097_v54  ;;  %v3355_v5 = vshll.u32 %v2495_v57, 16  ;;  %v4076_v13 = vld [vmem:[#allocation2 + $0x254] sm:$0x1]  ;;  %v3366_v15 = vor.u32 %v3365_v19, %v3362_v48  ;;  %720 = vst [vmem:[#allocation2 + $0x264] sm:$0x1] %v719_v28  ;;  %v6689_v49 = vshrl.u32 %v15988_v27, 16  ;;  %3747 = vmatmul.bf16.gmra.mxu1 %v3511_v52  ;;  %v4939_v55 = vadd.f32 %v4779_v34, %v3870_v2  ;;  %v5461_v57 = vpop.f32.mrf.mxu3 }
 0x307   : > { %v4456_v39 = vrot.slane %v4076_v13, 5  ;;  %v6672_v18 = vrot.slane %v6670_v14, 5  ;;  %v6677_v41 = vrot.slane %v6675_v42, 4  ;;  %v16009_v56 = vadd.f32 %v15972_v60, %v15953_v36  ;;  %v12523_v60 = vld [vmem:[#allocation2 + $0x258] sm:$0xf]  ;;  %v17099_v28 = vld [vmem:[#allocation82_spill] sm:$0xff] }
 0x308   : > { %v3357_v9 = vrot.slane %v3355_v5, 5  ;;  %v3367_v35 = vrot.slane %v3366_v15, 4  ;;  %v3713_v14 = vpop.f32.mrf.mxu1  ;;  %v721_v5 = vld [vmem:[#allocation2 + $0x26c] sm:$0x1]  ;;  %v13071_v34 = vld [vmem:[#allocation2 + $0x25c] sm:$0xf0] }
 0x309   : > { %v4457_v46 = vsel %vm14367_vm11, %v12365_v23, %v4456_v39  ;;  %v6673_v26 = vsel %vm14377_vm12, %v6668_v62, %v6672_v18  ;;  %v16011_v23 = vadd.f32 %v5461_v57, %v4939_v55  ;;  %v6680_v62 = vrot.slane %v6678_v32, 5 }
 0x30a   : > { %v2497_v21 = vld [vmem:[#allocation2 + $0x25c] sm:$0x1]  ;;  %v3358_v0 = vsel %vm14377_vm12, %v3353_v8, %v3357_v9  ;;  %v6806_v52 = vunpack.c.l.b16 %v6673_v26  ;;  %v4547_v54 = vunpack.c.l.b16 %v4457_v46  ;;  %v2498_v8 = vld [vmem:[#allocation2 + $0x260] sm:$0xf]  ;;  %v6691_v39 = vrot.slane %v6689_v49, 4 }
 0x30b   : > { %v4078_v38 = vld [vmem:[#allocation2 + $0x25c] sm:$0x1]  ;;  %v3369_v48 = vshll.u32 %v2497_v21, 16  ;;  %v16013_v59 = vunpack.c.l.b16 %v3358_v0  ;;  %v3871_v42 = vadd.f32 %v3713_v14, %v17099_v28  ;;  %v6681_v9 = vor.u32 %v6680_v62, %v6677_v41  ;;  %v2500_v46 = vld [vmem:[#allocation2 + $0x268] sm:$0xf] }
 0x30c   : > { %v5827_v51 = vld [vmem:[#allocation2 + $0x25c] sm:$0x1]  ;;  %v4460_v19 = vrot.slane %v4078_v38, 5  ;;  %v6840_v13 = vpack.c.b16 %v6806_v52, %v15990_v40  ;;  %v6692_v55 = vshll.u32 %v15988_v27, 16  ;;  %v722_v40 = vsel %vm13715_vm3, 0, %v721_v5  ;;  %v4782_v52 = vpop.f32.mrf.mxu2 }
 0x30d   : > { %v6684_v2 = vshll.u32 %v5827_v51, 16  ;;  %v3371_v15 = vrot.slane %v3369_v48, 5  ;;  %v1806_v26 = vld [vmem:[#allocation2 + $0x264] sm:$0x1]  ;;  %v3374_v21 = vshrl.u32 %v2498_v8, 16  ;;  %v3377_v0 = vshll.u32 %v2498_v8, 16 }
 0x30e   : > { %v4461_v36 = vsel %vm14367_vm11, %v12366_v43, %v4460_v19  ;;  %v7039_v43 = vpop.f32.mrf.mxu0  ;;  %v17100_v49 = vrot.slane %v17060_v17, 4  ;;  %v6682_v41 = vrot.slane %v6681_v9, 4  ;;  %723 = vst [vmem:[#allocation2 + $0x26c] sm:$0x1] %v722_v40  ;;  %v4940_v57 = vadd.f32 %v4782_v52, %v3871_v42  ;;  %v482_v8 = vld [vmem:[#allocation2 + $0x270] sm:$0x1] }
 0x30f   : > { %v4548_v18 = vunpack.c.l.b16 %v4461_v36  ;;  %v3372_v32 = vsel %vm14377_vm12, %v3367_v35, %v3371_v15  ;;  %v6686_v27 = vrot.slane %v6684_v2, 5  ;;  %v6694_v35 = vrot.slane %v6692_v55, 5  ;;  %v5464_v36 = vpop.f32.mrf.mxu3  ;;  %v793_v28 = vld [vmem:[%s13699_s25 + $0xfc] sm:$0xf]  ;;  %v5830_v42 = vld [vmem:[#allocation2 + $0x268] sm:$0xf] }
 0x310   : > { %v3479_v38 = vunpack.c.l.b16 %v3372_v32  ;;  %v1807_v51 = vsel %vm13721_vm4, %v17100_v49, %v1806_v26  ;;  %v16028_v48 = vrot.slane %v3374_v21, 4  ;;  %v3379_v19 = vrot.slane %v3377_v0, 5  ;;  %v724_v32 = vld [vmem:[#allocation2 + $0x274] sm:$0x1]  ;;  %v17101_v9 = vld [vmem:[#allocation44_spill] sm:$0xff]  ;;  %v3715_v40 = vpop.f32.mrf.mxu1  ;;  %s13512_s25 = scalar_lea.hbm %s13511_s20, 256 }
 0x311   : > { %1808 = vst [vmem:[#allocation2 + $0x264] sm:$0x1] %v1807_v51  ;;  %v12524_v14 = vor.u32 %v13071_v34, %v12523_v60  ;;  %v3388_v62 = vshrl.u32 %v2500_v46, 16  ;;  %v3391_v5 = vshll.u32 %v2500_v46, 16  ;;  %v4581_v15 = vpack.c.b16 %v4548_v18, %v4547_v54  ;;  %v4079_v18 = vld [vmem:[#allocation2 + $0x260] sm:$0xe]  ;;  %p13513_p1 = scmp.ne.s32.totalorder %s13511_s20, %s13512_s25  ;;  %p13518_p9 = scmp.lt.s32.totalorder %s13516_s28, %s13512_s25 }
 0x312   : > { %v6695_v17 = vor.u32 %v6694_v35, %v6691_v39  ;;  %v1297_v26 = vrot.slane %v17101_v9, 4  ;;  %7076 = vmatmul.bf16.gmra.mxu0 %v6840_v13  ;;  %v5622_v2 = vadd.f32 %v5464_v36, %v4940_v57  ;;  %v3512_v21 = vpack.c.b16 %v3479_v38, %v16013_v59  ;;  %v17102_v51 = vld [vmem:[#allocation85_spill] sm:$0xff]  ;;  %v16041_v52 = vld [vmem:[#allocation2 + $0x268] sm:$0xe] }
 0x313   : > { %v3390_v49 = vrot.slane %v3388_v62, 4  ;;  %v3393_v55 = vrot.slane %v3391_v5, 5  ;;  %v6687_v60 = vsel %vm14377_vm12, %v6682_v41, %v6686_v27  ;;  %v3380_v34 = vor.u32 %v3379_v19, %v16028_v48  ;;  %p13514_p4 = pnand %p13513_p1, %p13663_p3  ;;  %p13519_p2 = por %p13518_p9, %p13517_p11 }
 0x314   : > { %v483_v54 = vsel %vm13721_vm4, 0, %v482_v8  ;;  %v6696_v39 = vrot.slane %v6695_v17, 4  ;;  %v1299_v13 = vshrl.u32 %v793_v28, 16  ;;  %v1302_v46 = vshll.u32 %v793_v28, 16  ;;  %4821 = vmatmul.bf16.gmra.mxu2 %v4581_v15  ;;  %v4784_v19 = vpop.f32.mrf.mxu2 }
 0x315   : > { %484 = vst [vmem:[#allocation2 + $0x270] sm:$0x1] %v483_v54  ;;  %v725_v0 = vsel %vm13715_vm3, 0, %v724_v32  ;;  %v3872_v59 = vadd.f32 %v3715_v40, %v17102_v51  ;;  %v1812_v38 = vld [vmem:[#allocation2 + $0x26c] sm:$0x1]  ;;  %v6703_v41 = vshrl.u32 %v5830_v42, 16  ;;  %v16045_v27 = vadd.f32 %v15998_v4, %v15984_v10  ;;  %p13515_p8 = pneg %p13514_p4 }
 0x316   : > { %5503 = vmatmul.bf16.gmra.mxu3 %v12524_v14  ;;  %726 = vst [vmem:[#allocation2 + $0x274] sm:$0x1] %v725_v0  ;;  %v16048_v35 = vadd.f32 %v7039_v43, %v16011_v23  ;;  %v7042_v57 = vpop.f32.mrf.mxu0  ;;  %v1813_v14 = vsel %vm13721_vm4, %v1297_v26, %v1812_v38  ;;  %v3394_v5 = vor.u32 %v3393_v55, %v3390_v49  ;;  %v1301_v8 = vrot.slane %v1299_v13, 7  ;;  %v9033_v32 = vld [vmem:[#allocation2 + $0x10] sm:$0xf] }
 0x317   : > { %17103 = vst [vmem:[#allocation69_spill] sm:$0xff] %v16045_v27  ;;  %v6706_v15 = vshll.u32 %v5830_v42, 16  ;;  %3752 = vmatmul.bf16.gmra.mxu1 %v3512_v21  ;;  %v4941_v36 = vadd.f32 %v4784_v19, %v3872_v59  ;;  %v16052_v4 = vadd.f32 %v7042_v57, %v5622_v2  ;;  %v6807_v23 = vunpack.c.l.b16 %v6687_v60  ;;  %v5466_v40 = vpop.f32.mrf.mxu3  ;;  %v7284_v51 = vld [vmem:[#allocation2 + $0x8] sm:$0xe]  ;;  %v7285_v59 = vld [vmem:[#allocation2 + $0xc] sm:$0x1]  ;;  %p13520_p10 = pnand %p13519_p2, %p13515_p8 }
 0x318   : > { %17104 = vst [vmem:[#allocation30_spill] sm:$0xff] %v16048_v35  ;;  %v5829_v48 = vld [vmem:[#allocation2 + $0x264] sm:$0x1]  ;;  %v1304_v43 = vor.u32 %v1302_v46, %v1301_v8  ;;  %v12367_v54 = vrot.slane %v4079_v18, 9  ;;  %v1305_v26 = vrot.slane %v1301_v8, 4  ;;  %v3718_v55 = vpop.f32.mrf.mxu1  ;;  %v3381_v42 = vrot.slane %v3380_v34, 4 }
 0x319   : > { %v2499_v62 = vld [vmem:[#allocation2 + $0x264] sm:$0x1]  ;;  %v6698_v17 = vshll.u32 %v5829_v48, 16  ;;  %1814 = vst [vmem:[#allocation2 + $0x26c] sm:$0x1] %v1813_v14  ;;  %v16054_v49 = vadd.f32 %v5466_v40, %v4941_v36  ;;  %v12368_v13 = vrot.slane %v16041_v52, 9  ;;  %v3873_v34 = vadd.f32 %v3718_v55, %v14805_v25 }
 0x31a   : > { %v3383_v28 = vshll.u32 %v2499_v62, 16  ;;  %v4080_v10 = vld [vmem:[#allocation2 + $0x264] sm:$0x1]  ;;  %17105 = vst [vmem:[#allocation42_spill] sm:$0xff] %v16052_v4  ;;  %v3395_v60 = vrot.slane %v3394_v5, 4  ;;  %v6705_v38 = vrot.slane %v6703_v41, 4 }
 0x31b   : > { %v6700_v9 = vrot.slane %v6698_v17, 5  ;;  %v4464_v0 = vrot.slane %v4080_v10, 5  ;;  %v6708_v57 = vrot.slane %v6706_v15, 5  ;;  %v12593_v14 = vrot.slane %v7284_v51, 9  ;;  %v7286_v5 = vld [vmem:[#allocation2 + $0x10] sm:$0xe] }
 0x31c   : > { %v3385_v21 = vrot.slane %v3383_v28, 5  ;;  %v1815_v46 = vld [vmem:[#allocation2 + $0x270] sm:$0xf]  ;;  %v9162_v62 = vshrl.u32 %v9033_v32, 16  ;;  %v7542_v8 = vrot.slane %v7285_v59, 5  ;;  %v4787_v36 = vpop.f32.mrf.mxu2  ;;  %v9165_v55 = vshll.u32 %v9033_v32, 16 }
 0x31d   : > { %v6701_v2 = vsel %vm14377_vm12, %v6696_v39, %v6700_v9  ;;  %v1816_v18 = vsel %vm13740_vm6, %v1304_v43, %v1815_v46  ;;  %v1818_v19 = vld [vmem:[#allocation2 + $0x274] sm:$0x1]  ;;  %v4465_v52 = vsel %vm14367_vm11, %v12367_v54, %v4464_v0  ;;  %v6709_v9 = vor.u32 %v6708_v57, %v6705_v38 }
 0x31e   : > { %v6808_v48 = vunpack.c.l.b16 %v6701_v2  ;;  %1817 = vst [vmem:[#allocation2 + $0x270] sm:$0xf] %v1816_v18  ;;  %v1819_v39 = vsel %vm13721_vm4, %v1305_v26, %v1818_v19  ;;  %v3386_v16 = vsel %vm14377_vm12, %v3381_v42, %v3385_v21  ;;  %v16068_v28 = vpop.f32.mrf.mxu0  ;;  %v4942_v40 = vadd.f32 %v4787_v36, %v3873_v34  ;;  %v7287_v54 = vld [vmem:[#allocation2 + $0x14] sm:$0x1]  ;;  %v9035_v2 = vld [vmem:[#allocation2 + $0x18] sm:$0xf] }
 0x31f   : > { %1820 = vst [vmem:[#allocation2 + $0x274] sm:$0x1] %v1819_v39  ;;  %v4549_v0 = vunpack.c.l.b16 %v4465_v52  ;;  %v9034_v26 = vld [vmem:[#allocation2 + $0x14] sm:$0x1]  ;;  %v9164_v51 = vrot.slane %v9162_v62, 4  ;;  %v3480_v59 = vunpack.c.l.b16 %v3386_v16  ;;  %v12594_v18 = vrot.slane %v7286_v5, 9 }
 0x320   : > { %v6841_v41 = vpack.c.b16 %v6808_v48, %v6807_v23  ;;  %v2501_v15 = vld [vmem:[#allocation2 + $0x26c] sm:$0x1]  ;;  %v12527_v48 = vld [vmem:[#allocation2 + $0x268] sm:$0xf]  ;;  %v7546_v19 = vrot.slane %v7287_v54, 5  ;;  %v9167_v39 = vrot.slane %v9165_v55, 5  ;;  %v16076_v32 = vsel %vm14367_vm11, %v12593_v14, %v7542_v8 }
 0x321   : > { %v4082_v17 = vld [vmem:[#allocation2 + $0x26c] sm:$0x1]  ;;  %v3397_v25 = vshll.u32 %v2501_v15, 16  ;;  %v6710_v57 = vrot.slane %v6709_v9, 4  ;;  %v9036_v62 = vld [vmem:[#allocation2 + $0x1c] sm:$0x1] }
 0x322   : > { %v4468_v10 = vrot.slane %v4082_v17, 5  ;;  %v5831_v43 = vld [vmem:[#allocation2 + $0x26c] sm:$0x1]  ;;  %7081 = vmatmul.bf16.gmra.mxu0 %v6841_v41  ;;  %v9171_v34 = vshll.u32 %v9034_v26, 16  ;;  %v5469_v41 = vpop.f32.mrf.mxu3  ;;  %v3720_v17 = vpop.f32.mrf.mxu1  ;;  %v9168_v36 = vor.u32 %v9167_v39, %v9164_v51  ;;  %v9176_v5 = vshrl.u32 %v9035_v2, 16 }
 0x323   : > { %v3399_v23 = vrot.slane %v3397_v25, 5  ;;  %v6712_v21 = vshll.u32 %v5831_v43, 16  ;;  %v16078_v14 = vadd.f32 %v5469_v41, %v4942_v40  ;;  %v9179_v39 = vshll.u32 %v9035_v2, 16 }
 0x324   : > { %v4469_v42 = vsel %vm14367_vm11, %v12368_v13, %v4468_v10  ;;  %v4789_v8 = vpop.f32.mrf.mxu2 }
 0x325   : > { %v4550_v46 = vunpack.c.l.b16 %v4469_v42  ;;  %v3400_v38 = vsel %vm14377_vm12, %v3395_v60, %v3399_v23  ;;  %v13072_v15 = vld [vmem:[#allocation2 + $0x26c] sm:$0xf0]  ;;  %v6714_v43 = vrot.slane %v6712_v21, 5  ;;  %v17106_v42 = vld [vmem:[#allocation90_spill] sm:$0xff]  ;;  %v9178_v21 = vrot.slane %v9176_v5, 4 }
 0x326   : > { %v3481_v52 = vunpack.c.l.b16 %v3400_v38  ;;  %v5832_v16 = vld [vmem:[#allocation2 + $0x270] sm:$0xf]  ;;  %v12528_v25 = vor.u32 %v13072_v15, %v12527_v48  ;;  %v5833_v10 = vld [vmem:[#allocation2 + $0x274] sm:$0x1]  ;;  %v3874_v51 = vadd.f32 %v3720_v17, %v17106_v42  ;;  %v9169_v48 = vrot.slane %v9168_v36, 4 }
 0x327   : > { %v4582_v13 = vpack.c.b16 %v4550_v46, %v4549_v0  ;;  %v6717_v54 = vshrl.u32 %v5832_v16, 16  ;;  %v6720_v60 = vshll.u32 %v5832_v16, 16  ;;  %v6726_v55 = vshll.u32 %v5833_v10, 16  ;;  %v12691_v17 = vld [vmem:[#allocation2 + $0x10] sm:$0xf] }
 0x328   : > { %v3513_v9 = vpack.c.b16 %v3481_v52, %v3480_v59  ;;  %v7547_v0 = vsel %vm14367_vm11, %v12594_v18, %v7546_v19  ;;  %5508 = vmatmul.bf16.gmra.mxu3 %v12528_v25  ;;  %v9173_v46 = vrot.slane %v9171_v34, 5  ;;  %v9185_v38 = vshll.u32 %v9036_v62, 16  ;;  %v16083_v59 = vpop.f32.mrf.mxu0  ;;  %v13097_v36 = vld [vmem:[#allocation2 + $0x14] sm:$0xf0]  ;;  %v9037_v10 = vld [vmem:[#allocation2 + $0x20] sm:$0xf] }
 0x329   : > { %4826 = vmatmul.bf16.gmra.mxu2 %v4582_v13  ;;  %v6719_v26 = vrot.slane %v6717_v54, 4  ;;  %v6722_v23 = vrot.slane %v6720_v60, 5  ;;  %v6715_v40 = vsel %vm14377_vm12, %v6710_v57, %v6714_v43  ;;  %v6728_v13 = vrot.slane %v6726_v55, 5  ;;  %v10611_v54 = vld [vmem:[#allocation2 + $0x10] sm:$0xe] }
 0x32a   : > { %3757 = vmatmul.bf16.gmra.mxu1 %v3513_v9  ;;  %v4943_v15 = vadd.f32 %v4789_v8, %v3874_v51  ;;  %v9181_v18 = vrot.slane %v9179_v39, 5  ;;  %v7813_v16 = vunpack.c.l.b16 %v16076_v32  ;;  %v7814_v41 = vunpack.c.l.b16 %v7547_v0  ;;  %v5471_v25 = vpop.f32.mrf.mxu3  ;;  %v10612_v32 = vld [vmem:[#allocation2 + $0x14] sm:$0x1]  ;;  %v10613_v55 = vld [vmem:[#allocation2 + $0x18] sm:$0xe]  ;;  %v3723_v8 = vpop.f32.mrf.mxu1 }
 0x32b   : > { %v6723_v52 = vor.u32 %v6722_v23, %v6719_v26  ;;  %v6809_v34 = vunpack.c.l.b16 %v6715_v40  ;;  %v9174_v2 = vsel %vm14377_vm12, %v9169_v48, %v9173_v46  ;;  %v9187_v5 = vrot.slane %v9185_v38, 5  ;;  %v10614_v23 = vld [vmem:[#allocation2 + $0x1c] sm:$0x1]  ;;  %v9039_v42 = vld [vmem:[#allocation2 + $0x28] sm:$0xf] }
 0x32c   : > { %v9182_v62 = vor.u32 %v9181_v18, %v9178_v21  ;;  %v16092_v43 = vadd.f32 %v5471_v25, %v4943_v15  ;;  %v12692_v0 = vor.u32 %v13097_v36, %v12691_v17  ;;  %v10074_v26 = vunpack.c.l.b16 %v9174_v2  ;;  %v9038_v40 = vld [vmem:[#allocation2 + $0x24] sm:$0x1]  ;;  %v17107_v17 = vld [vmem:[#allocation47_spill] sm:$0xff] }
 0x32d   : > { %v6724_v19 = vrot.slane %v6723_v52, 4  ;;  %v9190_v51 = vshrl.u32 %v9037_v10, 16  ;;  %v9193_v46 = vshll.u32 %v9037_v10, 16  ;;  %v7877_v21 = vpack.c.b16 %v7814_v41, %v7813_v16  ;;  %v9040_v52 = vld [vmem:[#allocation2 + $0x2c] sm:$0x1] }
 0x32e   : > { %v9183_v9 = vrot.slane %v9182_v62, 4  ;;  %v12881_v38 = vrot.slane %v10611_v54, 9  ;;  %v10869_v18 = vrot.slane %v10612_v32, 5  ;;  %v3875_v36 = vadd.f32 %v3723_v8, %v17107_v17  ;;  %v7291_v8 = vld [vmem:[#allocation2 + $0x24] sm:$0x1] }
 0x32f   : > { %v6729_v57 = vsel %vm14377_vm12, %v6724_v19, %v6728_v13  ;;  %v9192_v19 = vrot.slane %v9190_v51, 4  ;;  %v9195_v25 = vrot.slane %v9193_v46, 5  ;;  %v12882_v2 = vrot.slane %v10613_v55, 9  ;;  %v4792_v41 = vpop.f32.mrf.mxu2  ;;  %v7289_v51 = vld [vmem:[#allocation2 + $0x1c] sm:$0x1] }
 0x330   : > { %v6810_v60 = vunpack.c.l.b16 %v6729_v57  ;;  %v9188_v39 = vsel %vm14377_vm12, %v9183_v9, %v9187_v5  ;;  %v16096_v13 = vpop.f32.mrf.mxu0  ;;  %v9204_v62 = vshrl.u32 %v9039_v42, 16  ;;  %v9207_v10 = vshll.u32 %v9039_v42, 16  ;;  %v7290_v46 = vld [vmem:[#allocation2 + $0x20] sm:$0xe] }
 0x331   : > { %v10075_v15 = vunpack.c.l.b16 %v9188_v39  ;;  %v10873_v16 = vrot.slane %v10614_v23, 5  ;;  %v9199_v57 = vshll.u32 %v9038_v40, 16  ;;  %v9213_v5 = vshll.u32 %v9040_v52, 16  ;;  %v7288_v39 = vld [vmem:[#allocation2 + $0x18] sm:$0xe] }
 0x332   : > { %v6842_v48 = vpack.c.b16 %v6810_v60, %v6809_v34  ;;  %v4944_v54 = vadd.f32 %v4792_v41, %v3875_v36  ;;  %v5474_v60 = vpop.f32.mrf.mxu3  ;;  %v9196_v9 = vor.u32 %v9195_v25, %v9192_v19  ;;  %v9206_v4 = vrot.slane %v9204_v62, 4  ;;  %v3725_v42 = vpop.f32.mrf.mxu1 }
 0x333   : > { %v10138_v34 = vpack.c.b16 %v10075_v15, %v10074_v26  ;;  %v9209_v35 = vrot.slane %v9207_v10, 5  ;;  %v10870_v26 = vsel %vm14367_vm11, %v12881_v38, %v10869_v18  ;;  %v10874_v23 = vsel %vm14367_vm11, %v12882_v2, %v10873_v16  ;;  %v17108_v10 = vld [vmem:[#allocation50_spill] sm:$0xff]  ;;  %v9043_v2 = vld [vmem:[#allocation2 + $0x38] sm:$0xf] }
 0x334   : > { %7086 = vmatmul.bf16.gmra.mxu0 %v6842_v48  ;;  %v16099_v32 = vadd.f32 %v5474_v60, %v4944_v54  ;;  %v9197_v48 = vrot.slane %v9196_v9, 4  ;;  %v9201_v40 = vrot.slane %v9199_v57, 5  ;;  %v9215_v15 = vrot.slane %v9213_v5, 5 }
 0x335   : > { %v9210_v55 = vor.u32 %v9209_v35, %v9206_v4  ;;  %v12595_v25 = vrot.slane %v7288_v39, 9  ;;  %v7550_v17 = vrot.slane %v7289_v51, 5  ;;  %v12596_v36 = vrot.slane %v7290_v46, 9  ;;  %v10615_v39 = vld [vmem:[#allocation2 + $0x20] sm:$0xe] }
 0x336   : > { %v7554_v35 = vrot.slane %v7291_v8, 5  ;;  %v11140_v4 = vunpack.c.l.b16 %v10870_v26  ;;  %v11141_v62 = vunpack.c.l.b16 %v10874_v23  ;;  %v3876_v38 = vadd.f32 %v3725_v42, %v17108_v10  ;;  %v10616_v8 = vld [vmem:[#allocation2 + $0x24] sm:$0x1]  ;;  %v517_v10 = vld [vmem:[#allocation2 + $0x4c] sm:$0x1] }
 0x337   : > { %v9211_v52 = vrot.slane %v9210_v55, 4  ;;  %v16110_v18 = vadd.f32 %v16068_v28, %v16054_v49  ;;  %v9202_v5 = vsel %vm14377_vm12, %v9197_v48, %v9201_v40  ;;  %v7551_v60 = vsel %vm14367_vm11, %v12595_v25, %v7550_v17  ;;  %v12695_v49 = vld [vmem:[#allocation2 + $0x20] sm:$0xf]  ;;  %v13098_v28 = vld [vmem:[#allocation2 + $0x24] sm:$0xf0] }
 0x338   : > { %10258 = vmatmul.bf16.vlgmr.msra.gmra.mxu3 %v10138_v34  ;;  %v16105_v19 = vpop.f32.mrf.mxu0  ;;  %v7555_v9 = vsel %vm14367_vm11, %v12596_v36, %v7554_v35  ;;  %v11204_v51 = vpack.c.b16 %v11141_v62, %v11140_v4  ;;  %v10617_v55 = vld [vmem:[#allocation2 + $0x28] sm:$0xe]  ;;  %v9232_v26 = vshrl.u32 %v9043_v2, 16  ;;  %v9235_v23 = vshll.u32 %v9043_v2, 16  ;;  %v9042_v36 = vld [vmem:[#allocation2 + $0x34] sm:$0x1] }
 0x339   : > { %8680 = vmatmul.bf16.vlgmr.msra.gmra.mxu2 %v12692_v0  ;;  %v9041_v0 = vld [vmem:[#allocation2 + $0x30] sm:$0xf]  ;;  %17109 = vst [vmem:[#allocation72_spill] sm:$0xff] %v16110_v18  ;;  %v9216_v54 = vsel %vm14377_vm12, %v9211_v52, %v9215_v15  ;;  %v10076_v48 = vunpack.c.l.b16 %v9202_v5  ;;  %v275_v15 = vld [vmem:[#allocation2 + $0x48] sm:$0x1]  ;;  %v7815_v25 = vunpack.c.l.b16 %v7551_v60  ;;  %v7816_v17 = vunpack.c.l.b16 %v7555_v9  ;;  %v17110_v2 = vld [vmem:[#allocation53_spill] sm:$0xff] }
 0x33a   : > { %7997 = vmatmul.bf16.vlgmr.msra.gmra.mxu1 %v7877_v21  ;;  %v4794_v21 = vpop.f32.mrf.mxu2  ;;  %v9218_v34 = vshrl.u32 %v9041_v0, 16  ;;  %v9221_v16 = vshll.u32 %v9041_v0, 16  ;;  %v5476_v57 = vpop.f32.mrf.mxu3  ;;  %v10077_v40 = vunpack.c.l.b16 %v9216_v54  ;;  %v9234_v35 = vrot.slane %v9232_v26, 4 }
 0x33b   : > { %v4945_v41 = vadd.f32 %v4794_v21, %v3876_v38  ;;  %v3728_v42 = vpop.f32.mrf.mxu1  ;;  %v10618_v38 = vld [vmem:[#allocation2 + $0x2c] sm:$0x1]  ;;  %v9237_v21 = vrot.slane %v9235_v23, 5  ;;  %v12696_v4 = vor.u32 %v13098_v28, %v12695_v49  ;;  %v12883_v62 = vrot.slane %v10615_v39, 9 }
 0x33c   : > { %v9220_v0 = vrot.slane %v9218_v34, 4  ;;  %v9223_v52 = vrot.slane %v9221_v16, 5  ;;  %v3877_v27 = vadd.f32 %v3728_v42, %v17110_v2  ;;  %v12884_v5 = vrot.slane %v10617_v55, 9  ;;  %v7292_v42 = vld [vmem:[#allocation2 + $0x28] sm:$0xe] }
 0x33d   : > { %v5627_v46 = vadd.f32 %v5476_v57, %v4945_v41  ;;  %v10877_v41 = vrot.slane %v10616_v8, 5  ;;  %v9044_v57 = vld [vmem:[#allocation2 + $0x3c] sm:$0x1]  ;;  %v276_v34 = vsel %vm13721_vm4, 0, %v275_v15  ;;  %v518_v16 = vsel %vm13715_vm3, 0, %v517_v10 }
 0x33e   : > { %v10139_v54 = vpack.c.b16 %v10077_v40, %v10076_v48  ;;  %v10881_v60 = vrot.slane %v10618_v38, 5  ;;  %v9224_v26 = vor.u32 %v9223_v52, %v9220_v0  ;;  %v9227_v23 = vshll.u32 %v9042_v36, 16  ;;  %277 = vst [vmem:[#allocation2 + $0x48] sm:$0x1] %v276_v34  ;;  %v7293_v0 = vld [vmem:[#allocation2 + $0x2c] sm:$0x1] }
 0x33f   : > { %v7878_v49 = vpack.c.b16 %v7816_v17, %v7815_v25  ;;  %v9238_v8 = vor.u32 %v9237_v21, %v9234_v35  ;;  %519 = vst [vmem:[#allocation2 + $0x4c] sm:$0x1] %v518_v16  ;;  %v16127_v55 = vadd.f32 %v16083_v59, %v16078_v14  ;;  %v16131_v15 = vadd.f32 %v16096_v13, %v16092_v43  ;;  %v7295_v52 = vld [vmem:[#allocation2 + $0x34] sm:$0x1]  ;;  %v9045_v36 = vld [vmem:[#allocation2 + $0x40] sm:$0xf] }
 0x340   : > { %v7054_v18 = vpop.f32.mrf.mxu0  ;;  %v10878_v48 = vsel %vm14367_vm11, %v12883_v62, %v10877_v41  ;;  %v16137_v10 = vadd.f32 %v16105_v19, %v16099_v32  ;;  %v10882_v14 = vsel %vm14367_vm11, %v12884_v5, %v10881_v60  ;;  %v9225_v25 = vrot.slane %v9224_v26, 4 }
 0x341   : > { %v9229_v43 = vrot.slane %v9227_v23, 5  ;;  %v16141_v13 = vadd.f32 %v7054_v18, %v5627_v46  ;;  %v9239_v17 = vrot.slane %v9238_v8, 4  ;;  %v12597_v35 = vrot.slane %v7292_v42, 9  ;;  %v12699_v8 = vld [vmem:[#allocation2 + $0x30] sm:$0xf] }
 0x342   : > { %v4797_v9 = vpop.f32.mrf.mxu2  ;;  %v5479_v39 = vpop.f32.mrf.mxu3  ;;  %17111 = vst [vmem:[#allocation75_spill] sm:$0xff] %v16137_v10  ;;  %v7558_v21 = vrot.slane %v7293_v0, 5  ;;  %v7562_v62 = vrot.slane %v7295_v52, 5  ;;  %v11142_v32 = vunpack.c.l.b16 %v10878_v48  ;;  %v11143_v19 = vunpack.c.l.b16 %v10882_v14  ;;  %v10619_v0 = vld [vmem:[#allocation2 + $0x30] sm:$0xe] }
 0x343   : > { %v4946_v28 = vadd.f32 %v4797_v9, %v3877_v27  ;;  %v7294_v27 = vld [vmem:[#allocation2 + $0x30] sm:$0xe]  ;;  %v3730_v59 = vpop.f32.mrf.mxu1  ;;  %17112 = vst [vmem:[#allocation78_spill] sm:$0xff] %v16141_v13  ;;  %v9230_v16 = vsel %vm14377_vm12, %v9225_v25, %v9229_v43  ;;  %v9246_v18 = vshrl.u32 %v9045_v36, 16  ;;  %v9249_v46 = vshll.u32 %v9045_v36, 16 }
 0x344   : > { %11324 = vmatmul.bf16.vlgmr.msra.gmra.mxu0 %v11204_v51  ;;  %v9241_v51 = vshll.u32 %v9044_v57, 16  ;;  %v17113_v57 = vld [vmem:[#allocation57_spill] sm:$0xff]  ;;  %v11205_v42 = vpack.c.b16 %v11143_v19, %v11142_v32  ;;  %v10078_v14 = vunpack.c.l.b16 %v9230_v16  ;;  %v10622_v25 = vld [vmem:[#allocation2 + $0x3c] sm:$0x1]  ;;  %v17115_v19 = vld [vmem:[#allocation59_spill] sm:$0xff] }
 0x345   : > { %v5628_v40 = vadd.f32 %v5479_v39, %v4946_v28  ;;  %v3878_v2 = vadd.f32 %v3730_v59, %v17113_v57  ;;  %v9047_v34 = vld [vmem:[#allocation2 + $0x48] sm:$0xf]  ;;  %v7559_v28 = vsel %vm14367_vm11, %v12597_v35, %v7558_v21  ;;  %v9046_v43 = vld [vmem:[#allocation2 + $0x44] sm:$0x1]  ;;  %v7296_v16 = vld [vmem:[#allocation2 + $0x38] sm:$0xe] }
 0x346   : > { %v9243_v38 = vrot.slane %v9241_v51, 5  ;;  %v9260_v23 = vshrl.u32 %v9047_v34, 16  ;;  %v13099_v51 = vld [vmem:[#allocation2 + $0x34] sm:$0xf0]  ;;  %v7817_v36 = vunpack.c.l.b16 %v7559_v28  ;;  %v7299_v28 = vld [vmem:[#allocation2 + $0x44] sm:$0x1] }
 0x347   : > { %v12700_v57 = vor.u32 %v13099_v51, %v12699_v8 }
 0x348   : > { %10263 = vmatmul.bf16.gmra.mxu3 %v10139_v54  ;;  %v7057_v41 = vpop.f32.mrf.mxu0  ;;  %v9244_v26 = vsel %vm14377_vm12, %v9239_v17, %v9243_v38  ;;  %v9248_v17 = vrot.slane %v9246_v18, 4  ;;  %v9251_v38 = vrot.slane %v9249_v46, 5  ;;  %v9262_v35 = vrot.slane %v9260_v23, 4  ;;  %v7297_v18 = vld [vmem:[#allocation2 + $0x3c] sm:$0x1] }
 0x349   : > { %8685 = vmatmul.bf16.gmra.mxu2 %v12696_v4  ;;  %v12598_v4 = vrot.slane %v7294_v27, 9  ;;  %v16146_v54 = vadd.f32 %v7057_v41, %v5628_v40  ;;  %v10620_v40 = vld [vmem:[#allocation2 + $0x34] sm:$0x1]  ;;  %v10621_v27 = vld [vmem:[#allocation2 + $0x38] sm:$0xe]  ;;  %v10079_v59 = vunpack.c.l.b16 %v9244_v26 }
 0x34a   : > { %8002 = vmatmul.bf16.gmra.mxu1 %v7878_v49  ;;  %v4799_v5 = vpop.f32.mrf.mxu2  ;;  %v5481_v9 = vpop.f32.mrf.mxu3  ;;  %v9263_v49 = vshll.u32 %v9047_v34, 16  ;;  %v7298_v46 = vld [vmem:[#allocation2 + $0x40] sm:$0xe] }
 0x34b   : > { %17114 = vst [vmem:[#allocation81_spill] sm:$0xff] %v16146_v54  ;;  %v4947_v60 = vadd.f32 %v4799_v5, %v3878_v2  ;;  %v7563_v39 = vsel %vm14367_vm11, %v12598_v4, %v7562_v62  ;;  %v3733_v52 = vpop.f32.mrf.mxu1  ;;  %v12885_v4 = vrot.slane %v10619_v0, 9  ;;  %v10885_v62 = vrot.slane %v10620_v40, 5  ;;  %v9048_v2 = vld [vmem:[#allocation2 + $0x4c] sm:$0x1] }
 0x34c   : > { %v7818_v41 = vunpack.c.l.b16 %v7563_v39  ;;  %v9265_v21 = vrot.slane %v9263_v49, 5  ;;  %v3879_v34 = vadd.f32 %v3733_v52, %v17115_v19  ;;  %v12886_v5 = vrot.slane %v10621_v27, 9 }
 0x34d   : > { %v5629_v48 = vadd.f32 %v5481_v9, %v4947_v60  ;;  %v10889_v60 = vrot.slane %v10622_v25, 5  ;;  %v9255_v9 = vshll.u32 %v9046_v43, 16  ;;  %v10140_v26 = vpack.c.b16 %v10079_v59, %v10078_v14 }
 0x34e   : > { %v9252_v39 = vor.u32 %v9251_v38, %v9248_v17  ;;  %v7879_v23 = vpack.c.b16 %v7818_v41, %v7817_v36  ;;  %v9266_v51 = vor.u32 %v9265_v21, %v9262_v35  ;;  %v9269_v0 = vshll.u32 %v9048_v2, 16  ;;  %v9049_v35 = vld [vmem:[#allocation2 + $0x60] sm:$0xf] }
 0x34f   : > { %v12599_v40 = vrot.slane %v7296_v16, 9  ;;  %v7566_v25 = vrot.slane %v7297_v18, 5  ;;  %v12600_v14 = vrot.slane %v7298_v46, 9  ;;  %v7570_v59 = vrot.slane %v7299_v28, 5 }
 0x350   : > { %v7059_v32 = vpop.f32.mrf.mxu0  ;;  %v10890_v43 = vsel %vm14367_vm11, %v12886_v5, %v10889_v60  ;;  %v9257_v38 = vrot.slane %v9255_v9, 5  ;;  %v9267_v36 = vrot.slane %v9266_v51, 4  ;;  %v9271_v41 = vrot.slane %v9269_v0, 5  ;;  %v12703_v0 = vld [vmem:[#allocation2 + $0x40] sm:$0xf] }
 0x351   : > { %v16157_v52 = vadd.f32 %v7059_v32, %v5629_v48  ;;  %v7567_v32 = vsel %vm14367_vm11, %v12599_v40, %v7566_v25  ;;  %v7571_v19 = vsel %vm14367_vm11, %v12600_v14, %v7570_v59  ;;  %v9274_v60 = vshrl.u32 %v9049_v35, 16  ;;  %v10624_v40 = vld [vmem:[#allocation2 + $0x44] sm:$0x1]  ;;  %v13100_v14 = vld [vmem:[#allocation2 + $0x44] sm:$0xf0] }
 0x352   : > { %v4802_v54 = vpop.f32.mrf.mxu2  ;;  %v5484_v8 = vpop.f32.mrf.mxu3  ;;  %v9277_v16 = vshll.u32 %v9049_v35, 16  ;;  %v9272_v18 = vsel %vm14377_vm12, %v9267_v36, %v9271_v41  ;;  %v7820_v51 = vunpack.c.l.b16 %v7571_v19  ;;  %v9050_v35 = vld [vmem:[#allocation2 + $0x64] sm:$0x1]  ;;  %v12704_v19 = vor.u32 %v13100_v14, %v12703_v0 }
 0x353   : > { %v4948_v49 = vadd.f32 %v4802_v54, %v3879_v34  ;;  %17116 = vst [vmem:[#allocation84_spill] sm:$0xff] %v16157_v52  ;;  %v3735_v17 = vpop.f32.mrf.mxu1  ;;  %v9253_v54 = vrot.slane %v9252_v39, 4 }
 0x354   : > { %11329 = vmatmul.bf16.gmra.mxu0 %v11205_v42  ;;  %v10886_v42 = vsel %vm14367_vm11, %v12885_v4, %v10885_v62  ;;  %v9051_v4 = vld [vmem:[#allocation2 + $0x68] sm:$0xf]  ;;  %v11145_v62 = vunpack.c.l.b16 %v10890_v43  ;;  %v10081_v43 = vunpack.c.l.b16 %v9272_v18 }
 0x355   : > { %v5630_v27 = vadd.f32 %v5484_v8, %v4948_v49  ;;  %v11144_v21 = vunpack.c.l.b16 %v10886_v42  ;;  %v9258_v5 = vsel %vm14377_vm12, %v9253_v54, %v9257_v38  ;;  %v9288_v46 = vshrl.u32 %v9051_v4, 16  ;;  %v10623_v42 = vld [vmem:[#allocation2 + $0x40] sm:$0xe]  ;;  %v10626_v38 = vld [vmem:[#allocation2 + $0x4c] sm:$0x1] }
 0x356   : > { %v9291_v28 = vshll.u32 %v9051_v4, 16  ;;  %v7819_v8 = vunpack.c.l.b16 %v7567_v32  ;;  %v10080_v59 = vunpack.c.l.b16 %v9258_v5  ;;  %v9279_v54 = vrot.slane %v9277_v16, 5 }
 0x357   : > { %v9290_v36 = vrot.slane %v9288_v46, 4  ;;  %v12887_v4 = vrot.slane %v10623_v42, 9  ;;  %v10897_v5 = vrot.slane %v10626_v38, 5  ;;  %v7301_v42 = vld [vmem:[#allocation2 + $0x5c] sm:$0x1] }
 0x358   : > { %10268 = vmatmul.bf16.gmra.mxu3 %v10140_v26  ;;  %v7062_v48 = vpop.f32.mrf.mxu0  ;;  %v9293_v41 = vrot.slane %v9291_v28, 5  ;;  %v7880_v32 = vpack.c.b16 %v7820_v51, %v7819_v8  ;;  %v7303_v8 = vld [vmem:[#allocation2 + $0x64] sm:$0x1]  ;;  %v9055_v38 = vld [vmem:[#allocation2 + $0x78] sm:$0xf] }
 0x359   : > { %8690 = vmatmul.bf16.gmra.mxu2 %v12700_v57  ;;  %v17117_v57 = vld [vmem:[#allocation62_spill] sm:$0xff]  ;;  %v16168_v9 = vadd.f32 %v7062_v48, %v5630_v27  ;;  %v10893_v48 = vrot.slane %v10624_v40, 5  ;;  %v7302_v40 = vld [vmem:[#allocation2 + $0x60] sm:$0xe] }
 0x35a   : > { %8007 = vmatmul.bf16.gmra.mxu1 %v7879_v23  ;;  %v3880_v2 = vadd.f32 %v3735_v17, %v17117_v57  ;;  %v4804_v34 = vpop.f32.mrf.mxu2  ;;  %v5486_v39 = vpop.f32.mrf.mxu3  ;;  %v11206_v23 = vpack.c.b16 %v11145_v62, %v11144_v21  ;;  %v10625_v27 = vld [vmem:[#allocation2 + $0x48] sm:$0xe]  ;;  %v9276_v17 = vrot.slane %v9274_v60, 4  ;;  %v9052_v21 = vld [vmem:[#allocation2 + $0x6c] sm:$0x1]  ;;  %v17119_v57 = vld [vmem:[#allocation65_spill] sm:$0xff] }
 0x35b   : > { %17118 = vst [vmem:[#allocation38_spill] sm:$0xff] %v16168_v9  ;;  %v3738_v25 = vpop.f32.mrf.mxu1  ;;  %v9283_v60 = vshll.u32 %v9050_v35, 16  ;;  %v9294_v9 = vor.u32 %v9293_v41, %v9290_v36  ;;  %v9297_v52 = vshll.u32 %v9052_v21, 16  ;;  %v10894_v28 = vsel %vm14367_vm11, %v12887_v4, %v10893_v48  ;;  %v17121_v21 = vld [vmem:[#allocation68_spill] sm:$0xff] }
 0x35c   : > { %v4949_v26 = vadd.f32 %v4804_v34, %v3880_v2  ;;  %v3881_v2 = vadd.f32 %v3738_v25, %v17119_v57  ;;  %v12888_v34 = vrot.slane %v10625_v27, 9  ;;  %v7574_v36 = vrot.slane %v7301_v42, 5  ;;  %v12707_v42 = vld [vmem:[#allocation2 + $0x60] sm:$0xf] }
 0x35d   : > { %v12602_v41 = vrot.slane %v7302_v40, 9  ;;  %v7578_v4 = vrot.slane %v7303_v8, 5  ;;  %v10630_v8 = vld [vmem:[#allocation2 + $0x6c] sm:$0x1] }
 0x35e   : > { %v5631_v49 = vadd.f32 %v5486_v39, %v4949_v26  ;;  %v10141_v26 = vpack.c.b16 %v10081_v43, %v10080_v59  ;;  %v9280_v39 = vor.u32 %v9279_v54, %v9276_v17  ;;  %v10898_v51 = vsel %vm14367_vm11, %v12888_v34, %v10897_v5  ;;  %v9053_v43 = vld [vmem:[#allocation2 + $0x70] sm:$0xf] }
 0x35f   : > { %v9285_v59 = vrot.slane %v9283_v60, 5  ;;  %v9295_v17 = vrot.slane %v9294_v9, 4  ;;  %v9299_v54 = vrot.slane %v9297_v52, 5  ;;  %v11147_v48 = vunpack.c.l.b16 %v10898_v51  ;;  %v10627_v60 = vld [vmem:[#allocation2 + $0x60] sm:$0xe] }
 0x360   : > { %v7064_v62 = vpop.f32.mrf.mxu0  ;;  %v9281_v14 = vrot.slane %v9280_v39, 4  ;;  %v9302_v57 = vshrl.u32 %v9053_v43, 16  ;;  %v7579_v39 = vsel %vm14367_vm11, %v12602_v41, %v7578_v4  ;;  %v9056_v4 = vld [vmem:[#allocation2 + $0x7c] sm:$0x1] }
 0x361   : > { %v16173_v46 = vadd.f32 %v7064_v62, %v5631_v49  ;;  %v11146_v49 = vunpack.c.l.b16 %v10894_v28  ;;  %v9300_v52 = vsel %vm14377_vm12, %v9295_v17, %v9299_v54  ;;  %v10629_v28 = vld [vmem:[#allocation2 + $0x68] sm:$0xe]  ;;  %v7822_v41 = vunpack.c.l.b16 %v7579_v39  ;;  %v7306_v39 = vld [vmem:[#allocation2 + $0x70] sm:$0xe] }
 0x362   : > { %v4807_v18 = vpop.f32.mrf.mxu2  ;;  %v9286_v34 = vsel %vm14377_vm12, %v9281_v14, %v9285_v59  ;;  %v9304_v51 = vrot.slane %v9302_v57, 4  ;;  %v13101_v14 = vld [vmem:[#allocation2 + $0x64] sm:$0xf0]  ;;  %v10083_v59 = vunpack.c.l.b16 %v9300_v52  ;;  %v7305_v52 = vld [vmem:[#allocation2 + $0x6c] sm:$0x1] }
 0x363   : > { %v4950_v16 = vadd.f32 %v4807_v18, %v3881_v2  ;;  %17120 = vst [vmem:[#allocation87_spill] sm:$0xff] %v16173_v46  ;;  %v3740_v25 = vpop.f32.mrf.mxu1  ;;  %v9305_v2 = vshll.u32 %v9053_v43, 16  ;;  %v10082_v40 = vunpack.c.l.b16 %v9286_v34  ;;  %v9054_v43 = vld [vmem:[#allocation2 + $0x74] sm:$0x1]  ;;  %v7304_v57 = vld [vmem:[#allocation2 + $0x68] sm:$0xe] }
 0x364   : > { %11334 = vmatmul.bf16.gmra.mxu0 %v11206_v23  ;;  %v7300_v23 = vld [vmem:[#allocation2 + $0x58] sm:$0xe]  ;;  %v3882_v62 = vadd.f32 %v3740_v25, %v17121_v21  ;;  %v12889_v21 = vrot.slane %v10627_v60, 9  ;;  %v9311_v34 = vshll.u32 %v9054_v43, 16  ;;  %v12603_v60 = vrot.slane %v7304_v57, 9 }
 0x365   : > { %v5489_v0 = vpop.f32.mrf.mxu3  ;;  %v12601_v35 = vrot.slane %v7300_v23, 9  ;;  %v11207_v23 = vpack.c.b16 %v11147_v48, %v11146_v49  ;;  %v12890_v49 = vrot.slane %v10629_v28, 9  ;;  %v10905_v48 = vrot.slane %v10630_v8, 5  ;;  %v17124_v8 = vld [vmem:[#allocation71_spill] sm:$0xff] }
 0x366   : > { %v5632_v27 = vadd.f32 %v5489_v0, %v4950_v16  ;;  %v10628_v16 = vld [vmem:[#allocation2 + $0x64] sm:$0x1]  ;;  %v9307_v0 = vrot.slane %v9305_v2, 5  ;;  %v10142_v46 = vpack.c.b16 %v10083_v59, %v10082_v40  ;;  %v7582_v28 = vrot.slane %v7305_v52, 5  ;;  %v9057_v59 = vld [vmem:[#allocation2 + $0x80] sm:$0xf] }
 0x367   : > { %v7575_v9 = vsel %vm14367_vm11, %v12601_v35, %v7574_v36  ;;  %v305_v52 = vld [vmem:[#allocation2 + $0x98] sm:$0x1] }
 0x368   : > { %10273 = vmatmul.bf16.gmra.mxu3 %v10141_v26  ;;  %v9316_v26 = vshrl.u32 %v9055_v38, 16  ;;  %v7821_v36 = vunpack.c.l.b16 %v7575_v9  ;;  %v9308_v2 = vor.u32 %v9307_v0, %v9304_v51  ;;  %v10906_v9 = vsel %vm14367_vm11, %v12890_v49, %v10905_v48 }
 0x369   : > { %8695 = vmatmul.bf16.gmra.mxu2 %v12704_v19  ;;  %v9330_v49 = vshrl.u32 %v9057_v59, 16  ;;  %v9333_v48 = vshll.u32 %v9057_v59, 16 }
 0x36a   : > { %8012 = vmatmul.bf16.gmra.mxu1 %v7880_v32  ;;  %v4809_v19 = vpop.f32.mrf.mxu2  ;;  %v9319_v32 = vshll.u32 %v9055_v38, 16  ;;  %v9318_v17 = vrot.slane %v9316_v26, 4  ;;  %v9325_v26 = vshll.u32 %v9056_v4, 16  ;;  %v12604_v4 = vrot.slane %v7306_v39, 9  ;;  %v12711_v39 = vld [vmem:[#allocation2 + $0x70] sm:$0xf] }
 0x36b   : > { %v7067_v5 = vpop.f32.mrf.mxu0  ;;  %v4951_v18 = vadd.f32 %v4809_v19, %v3882_v62  ;;  %v10901_v62 = vrot.slane %v10628_v16, 5  ;;  %v12708_v19 = vor.u32 %v13101_v14, %v12707_v42  ;;  %v7307_v16 = vld [vmem:[#allocation2 + $0x74] sm:$0x1]  ;;  %v9313_v42 = vrot.slane %v9311_v34, 5 }
 0x36c   : > { %v9321_v54 = vrot.slane %v9319_v32, 5  ;;  %v16188_v38 = vadd.f32 %v7067_v5, %v5632_v27  ;;  %v7881_v27 = vpack.c.b16 %v7822_v41, %v7821_v36  ;;  %v9327_v14 = vrot.slane %v9325_v26, 5 }
 0x36d   : > { %v5491_v25 = vpop.f32.mrf.mxu3  ;;  %v11149_v36 = vunpack.c.l.b16 %v10906_v9 }
 0x36e   : > { %17122 = vst [vmem:[#allocation14_spill] sm:$0xff] %v16188_v38  ;;  %v5633_v35 = vadd.f32 %v5491_v25, %v4951_v18  ;;  %v9322_v13 = vor.u32 %v9321_v54, %v9318_v17  ;;  %v10902_v18 = vsel %vm14367_vm11, %v12889_v21, %v10901_v62  ;;  %v9059_v54 = vld [vmem:[#allocation2 + $0x88] sm:$0xf]  ;;  %v7586_v21 = vrot.slane %v7307_v16, 5 }
 0x36f   : > { %v11148_v43 = vunpack.c.l.b16 %v10902_v18  ;;  %v7583_v62 = vsel %vm14367_vm11, %v12603_v60, %v7582_v28  ;;  %v9347_v34 = vshll.u32 %v9059_v54, 16  ;;  %v547_v18 = vld [vmem:[#allocation2 + $0x9c] sm:$0x1] }
 0x370   : > { %v9323_v25 = vrot.slane %v9322_v13, 4  ;;  %v7823_v9 = vunpack.c.l.b16 %v7583_v62  ;;  %v10634_v28 = vld [vmem:[#allocation2 + $0x7c] sm:$0x1] }
 0x371   : > { %v11208_v26 = vpack.c.b16 %v11149_v36, %v11148_v43  ;;  %v306_v43 = vsel %vm13721_vm4, 0, %v305_v52  ;;  %v9058_v36 = vld [vmem:[#allocation2 + $0x84] sm:$0x1] }
 0x372   : > { %v9328_v13 = vsel %vm14377_vm12, %v9323_v25, %v9327_v14  ;;  %v13102_v25 = vld [vmem:[#allocation2 + $0x74] sm:$0xf0]  ;;  %v9335_v14 = vrot.slane %v9333_v48, 5  ;;  %307 = vst [vmem:[#allocation2 + $0x98] sm:$0x1] %v306_v43  ;;  %v9339_v43 = vshll.u32 %v9058_v36, 16 }
 0x373   : > { %v3743_v32 = vpop.f32.mrf.mxu1  ;;  %v7069_v5 = vpop.f32.mrf.mxu0  ;;  %v10085_v16 = vunpack.c.l.b16 %v9328_v13  ;;  %v12712_v13 = vor.u32 %v13102_v25, %v12711_v39 }
 0x374   : > { %11339 = vmatmul.bf16.gmra.mxu0 %v11207_v23  ;;  %v9309_v23 = vrot.slane %v9308_v2, 4  ;;  %v16194_v40 = vadd.f32 %v7069_v5, %v5633_v35  ;;  %v3883_v51 = vadd.f32 %v3743_v32, %v17124_v8  ;;  %v10631_v2 = vld [vmem:[#allocation2 + $0x70] sm:$0xe]  ;;  %v7587_v32 = vsel %vm14367_vm11, %v12604_v4, %v7586_v21  ;;  %v10633_v5 = vld [vmem:[#allocation2 + $0x78] sm:$0xe]  ;;  %v17125_v8 = vld [vmem:[#allocation74_spill] sm:$0xff] }
 0x375   : > { %v548_v4 = vsel %vm13715_vm3, 0, %v547_v18 }
 0x376   : > { %17123 = vst [vmem:[#allocation17_spill] sm:$0xff] %v16194_v40  ;;  %v9314_v35 = vsel %vm14377_vm12, %v9309_v23, %v9313_v42  ;;  %v9332_v23 = vrot.slane %v9330_v49, 4  ;;  %v9060_v49 = vld [vmem:[#allocation2 + $0x8c] sm:$0x1]  ;;  %v7309_v40 = vld [vmem:[#allocation2 + $0x7c] sm:$0x1] }
 0x377   : > { %v5494_v0 = vpop.f32.mrf.mxu3  ;;  %v4812_v17 = vpop.f32.mrf.mxu2  ;;  %v10084_v60 = vunpack.c.l.b16 %v9314_v35  ;;  %v12891_v35 = vrot.slane %v10631_v2, 9  ;;  %549 = vst [vmem:[#allocation2 + $0x9c] sm:$0x1] %v548_v4 }
 0x378   : > { %10278 = vmatmul.bf16.gmra.mxu3 %v10142_v46  ;;  %v4952_v41 = vadd.f32 %v4812_v17, %v3883_v51 }
 0x379   : > { %8700 = vmatmul.bf16.gmra.mxu2 %v12708_v19  ;;  %v9344_v19 = vshrl.u32 %v9059_v54, 16  ;;  %v7824_v54 = vunpack.c.l.b16 %v7587_v32  ;;  %v7308_v32 = vld [vmem:[#allocation2 + $0x78] sm:$0xe] }
 0x37a   : > { %8017 = vmatmul.bf16.gmra.mxu1 %v7881_v27  ;;  %v5634_v46 = vadd.f32 %v5494_v0, %v4952_v41  ;;  %v10632_v27 = vld [vmem:[#allocation2 + $0x74] sm:$0x1]  ;;  %v9349_v41 = vrot.slane %v9347_v34, 5  ;;  %v9336_v34 = vor.u32 %v9335_v14, %v9332_v23  ;;  %v12605_v39 = vrot.slane %v7308_v32, 9 }
 0x37b   : > { %v3745_v57 = vpop.f32.mrf.mxu1  ;;  %v9346_v59 = vrot.slane %v9344_v19, 4  ;;  %v10909_v48 = vrot.slane %v10632_v27, 5  ;;  %v12892_v19 = vrot.slane %v10633_v5, 9  ;;  %v7882_v10 = vpack.c.b16 %v7824_v54, %v7823_v9 }
 0x37c   : > { %v3884_v51 = vadd.f32 %v3745_v57, %v17125_v8  ;;  %v10913_v57 = vrot.slane %v10634_v28, 5  ;;  %v10143_v8 = vpack.c.b16 %v10085_v16, %v10084_v60  ;;  %v7590_v27 = vrot.slane %v7309_v40, 5  ;;  %v17127_v28 = vld [vmem:[#allocation77_spill] sm:$0xff] }
 0x37d   : > { %v9350_v18 = vor.u32 %v9349_v41, %v9346_v59  ;;  %v10910_v2 = vsel %vm14367_vm11, %v12891_v35, %v10909_v48  ;;  %v9337_v23 = vrot.slane %v9336_v34, 4  ;;  %v9341_v9 = vrot.slane %v9339_v43, 5  ;;  %v9061_v59 = vld [vmem:[#allocation2 + $0x90] sm:$0xf]  ;;  %v9063_v41 = vld [vmem:[#allocation2 + $0x98] sm:$0xf] }
 0x37e   : > { %v10914_v60 = vsel %vm14367_vm11, %v12892_v19, %v10913_v57  ;;  %v11150_v4 = vunpack.c.l.b16 %v10910_v2  ;;  %v9361_v48 = vshll.u32 %v9061_v59, 16  ;;  %v10636_v34 = vld [vmem:[#allocation2 + $0x84] sm:$0x1]  ;;  %v10637_v43 = vld [vmem:[#allocation2 + $0x88] sm:$0xe] }
 0x37f   : > { %v7072_v42 = vpop.f32.mrf.mxu0  ;;  %v5496_v0 = vpop.f32.mrf.mxu3  ;;  %v9351_v25 = vrot.slane %v9350_v18, 4  ;;  %v12715_v2 = vld [vmem:[#allocation2 + $0x80] sm:$0xf] }
 0x380   : > { %v4814_v17 = vpop.f32.mrf.mxu2  ;;  %v16210_v21 = vadd.f32 %v7072_v42, %v5634_v46  ;;  %v9353_v46 = vshll.u32 %v9060_v49, 16  ;;  %v7310_v42 = vld [vmem:[#allocation2 + $0x80] sm:$0xe]  ;;  %v9342_v49 = vsel %vm14377_vm12, %v9337_v23, %v9341_v9  ;;  %v9062_v23 = vld [vmem:[#allocation2 + $0x94] sm:$0x1] }
 0x381   : > { %v4953_v62 = vadd.f32 %v4814_v17, %v3884_v51  ;;  %v12606_v36 = vrot.slane %v7310_v42, 9  ;;  %v10086_v42 = vunpack.c.l.b16 %v9342_v49 }
 0x382   : > { %17126 = vst [vmem:[#allocation46_spill] sm:$0xff] %v16210_v21  ;;  %v9355_v14 = vrot.slane %v9353_v46, 5 }
 0x383   : > { %v5635_v52 = vadd.f32 %v5496_v0, %v4953_v62  ;;  %v3748_v38 = vpop.f32.mrf.mxu1  ;;  %v7591_v62 = vsel %vm14367_vm11, %v12605_v39, %v7590_v27 }
 0x384   : > { %11344 = vmatmul.bf16.gmra.mxu0 %v11208_v26  ;;  %v7311_v26 = vld [vmem:[#allocation2 + $0x84] sm:$0x1]  ;;  %v3885_v51 = vadd.f32 %v3748_v38, %v17127_v28  ;;  %v11151_v38 = vunpack.c.l.b16 %v10914_v60  ;;  %v9356_v57 = vsel %vm14377_vm12, %v9351_v25, %v9355_v14  ;;  %v7825_v46 = vunpack.c.l.b16 %v7591_v62  ;;  %v13103_v60 = vld [vmem:[#allocation2 + $0x84] sm:$0xf0]  ;;  %v9064_v62 = vld [vmem:[#allocation2 + $0x9c] sm:$0x1] }
 0x385   : > { %v7594_v40 = vrot.slane %v7311_v26, 5  ;;  %v10638_v26 = vld [vmem:[#allocation2 + $0x8c] sm:$0x1]  ;;  %v12716_v49 = vor.u32 %v13103_v60, %v12715_v2 }
 0x386   : > { %v11209_v18 = vpack.c.b16 %v11151_v38, %v11150_v4  ;;  %v12894_v4 = vrot.slane %v10637_v43, 9  ;;  %v10921_v38 = vrot.slane %v10638_v26, 5 }
 0x387   : > { %v7074_v5 = vpop.f32.mrf.mxu0  ;;  %v7595_v32 = vsel %vm14367_vm11, %v12606_v36, %v7594_v40 }
 0x388   : > { %10283 = vmatmul.bf16.gmra.mxu3 %v10143_v8  ;;  %v4817_v0 = vpop.f32.mrf.mxu2  ;;  %v16217_v17 = vadd.f32 %v7074_v5, %v5635_v52  ;;  %v9372_v52 = vshrl.u32 %v9063_v41, 16  ;;  %v9375_v8 = vshll.u32 %v9063_v41, 16  ;;  %v17129_v5 = vld [vmem:[#allocation80_spill] sm:$0xff]  ;;  %v7826_v14 = vunpack.c.l.b16 %v7595_v32 }
 0x389   : > { %8705 = vmatmul.bf16.gmra.mxu2 %v12712_v13  ;;  %v5499_v16 = vpop.f32.mrf.mxu3  ;;  %v4954_v54 = vadd.f32 %v4817_v0, %v3885_v51  ;;  %v9358_v13 = vshrl.u32 %v9061_v59, 16  ;;  %v9363_v0 = vrot.slane %v9361_v48, 5  ;;  %v10917_v41 = vrot.slane %v10636_v34, 5  ;;  %v7315_v48 = vld [vmem:[#allocation2 + $0x94] sm:$0x1] }
 0x38a   : > { %8022 = vmatmul.bf16.gmra.mxu1 %v7882_v10  ;;  %17128 = vst [vmem:[#allocation18_spill] sm:$0xff] %v16217_v17  ;;  %v10635_v10 = vld [vmem:[#allocation2 + $0x80] sm:$0xe]  ;;  %v9374_v59 = vrot.slane %v9372_v52, 4  ;;  %v7313_v17 = vld [vmem:[#allocation2 + $0x8c] sm:$0x1]  ;;  %v7883_v52 = vpack.c.b16 %v7826_v14, %v7825_v46  ;;  %v10922_v43 = vsel %vm14367_vm11, %v12894_v4, %v10921_v38 }
 0x38b   : > { %v5636_v35 = vadd.f32 %v5499_v16, %v4954_v54  ;;  %v3750_v19 = vpop.f32.mrf.mxu1  ;;  %v12893_v39 = vrot.slane %v10635_v10, 9  ;;  %v10087_v16 = vunpack.c.l.b16 %v9356_v57  ;;  %v9360_v9 = vrot.slane %v9358_v13, 4  ;;  %v7312_v10 = vld [vmem:[#allocation2 + $0x88] sm:$0xe]  ;;  %v7314_v13 = vld [vmem:[#allocation2 + $0x90] sm:$0xe] }
 0x38c   : > { %v3886_v28 = vadd.f32 %v3750_v19, %v17129_v5  ;;  %v9377_v54 = vrot.slane %v9375_v8, 5  ;;  %v9367_v19 = vshll.u32 %v9062_v23, 16  ;;  %v7598_v2 = vrot.slane %v7313_v17, 5  ;;  %v9067_v17 = vld [vmem:[#allocation2 + $0xb8] sm:$0xf] }
 0x38d   : > { %v10144_v57 = vpack.c.b16 %v10087_v16, %v10086_v42  ;;  %v9364_v21 = vor.u32 %v9363_v0, %v9360_v9  ;;  %v10918_v34 = vsel %vm14367_vm11, %v12893_v39, %v10917_v41  ;;  %v12608_v26 = vrot.slane %v7314_v13, 9  ;;  %v9065_v39 = vld [vmem:[#allocation2 + $0xb0] sm:$0xf] }
 0x38e   : > { %v9378_v8 = vor.u32 %v9377_v54, %v9374_v59  ;;  %v9369_v46 = vrot.slane %v9367_v19, 5  ;;  %v11152_v14 = vunpack.c.l.b16 %v10918_v34  ;;  %v11153_v59 = vunpack.c.l.b16 %v10922_v43  ;;  %v10639_v38 = vld [vmem:[#allocation2 + $0x90] sm:$0xe]  ;;  %v10642_v34 = vld [vmem:[#allocation2 + $0x9c] sm:$0x1] }
 0x38f   : > { %v7077_v27 = vpop.f32.mrf.mxu0  ;;  %v9365_v16 = vrot.slane %v9364_v21, 4  ;;  %v12895_v43 = vrot.slane %v10639_v38, 9 }
 0x390   : > { %v4819_v25 = vpop.f32.mrf.mxu2  ;;  %v16228_v36 = vadd.f32 %v7077_v27, %v5636_v35  ;;  %v9381_v35 = vshll.u32 %v9064_v62, 16  ;;  %v7602_v27 = vrot.slane %v7315_v48, 5  ;;  %v9379_v9 = vrot.slane %v9378_v8, 4  ;;  %v10640_v48 = vld [vmem:[#allocation2 + $0x94] sm:$0x1] }
 0x391   : > { %v5501_v51 = vpop.f32.mrf.mxu3  ;;  %v4955_v40 = vadd.f32 %v4819_v25, %v3886_v28  ;;  %v17131_v28 = vld [vmem:[#allocation83_spill] sm:$0xff]  ;;  %v9370_v21 = vsel %vm14377_vm12, %v9365_v16, %v9369_v46  ;;  %v9386_v62 = vshrl.u32 %v9065_v39, 16  ;;  %v11210_v13 = vpack.c.b16 %v11153_v59, %v11152_v14 }
 0x392   : > { %17130 = vst [vmem:[#allocation43_spill] sm:$0xff] %v16228_v36  ;;  %v9383_v0 = vrot.slane %v9381_v35, 5  ;;  %v7603_v41 = vsel %vm14367_vm11, %v12608_v26, %v7602_v27  ;;  %v10088_v8 = vunpack.c.l.b16 %v9370_v21  ;;  %v10641_v35 = vld [vmem:[#allocation2 + $0x98] sm:$0xe]  ;;  %v12719_v27 = vld [vmem:[#allocation2 + $0x90] sm:$0xf] }
 0x393   : > { %v5637_v5 = vadd.f32 %v5501_v51, %v4955_v40 }
 0x394   : > { %11349 = vmatmul.bf16.gmra.mxu0 %v11209_v18  ;;  %v3753_v32 = vpop.f32.mrf.mxu1  ;;  %v12607_v18 = vrot.slane %v7312_v10, 9  ;;  %v9384_v19 = vsel %vm14377_vm12, %v9379_v9, %v9383_v0  ;;  %v9066_v9 = vld [vmem:[#allocation2 + $0xb4] sm:$0x1] }
 0x395   : > { %v3887_v51 = vadd.f32 %v3753_v32, %v17131_v28  ;;  %v10089_v28 = vunpack.c.l.b16 %v9384_v19  ;;  %v9395_v19 = vshll.u32 %v9066_v9, 16 }
 0x396   : > { %v7599_v40 = vsel %vm14367_vm11, %v12607_v18, %v7598_v2  ;;  %v17133_v2 = vld [vmem:[#allocation86_spill] sm:$0xff] }
 0x397   : > { %v7079_v42 = vpop.f32.mrf.mxu0  ;;  %v7827_v32 = vunpack.c.l.b16 %v7599_v40  ;;  %v12896_v40 = vrot.slane %v10641_v35, 9  ;;  %v10145_v38 = vpack.c.b16 %v10089_v28, %v10088_v8 }
 0x398   : > { %10288 = vmatmul.bf16.gmra.mxu3 %v10144_v57  ;;  %v4822_v23 = vpop.f32.mrf.mxu2  ;;  %v16235_v25 = vadd.f32 %v7079_v42, %v5637_v5  ;;  %v9400_v5 = vshrl.u32 %v9067_v17, 16  ;;  %v9403_v57 = vshll.u32 %v9067_v17, 16  ;;  %v13104_v42 = vld [vmem:[#allocation2 + $0x94] sm:$0xf0] }
 0x399   : > { %8710 = vmatmul.bf16.gmra.mxu2 %v12716_v49  ;;  %v5504_v60 = vpop.f32.mrf.mxu3  ;;  %v4956_v54 = vadd.f32 %v4822_v23, %v3887_v51  ;;  %v9389_v49 = vshll.u32 %v9065_v39, 16  ;;  %v9388_v51 = vrot.slane %v9386_v62, 4  ;;  %v10925_v23 = vrot.slane %v10640_v48, 5 }
 0x39a   : > { %8027 = vmatmul.bf16.gmra.mxu1 %v7883_v52  ;;  %17132 = vst [vmem:[#allocation49_spill] sm:$0xff] %v16235_v25  ;;  %v7828_v52 = vunpack.c.l.b16 %v7603_v41  ;;  %v9402_v0 = vrot.slane %v9400_v5, 4  ;;  %v9405_v39 = vrot.slane %v9403_v57, 5  ;;  %v12720_v17 = vor.u32 %v13104_v42, %v12719_v27  ;;  %v7316_v57 = vld [vmem:[#allocation2 + $0xa8] sm:$0xe] }
 0x39b   : > { %v5638_v4 = vadd.f32 %v5504_v60, %v4956_v54  ;;  %v9391_v60 = vrot.slane %v9389_v49, 5  ;;  %v9068_v54 = vld [vmem:[#allocation2 + $0xbc] sm:$0x1]  ;;  %v10929_v41 = vrot.slane %v10642_v34, 5  ;;  %v10926_v49 = vsel %vm14367_vm11, %v12895_v43, %v10925_v23 }
 0x39c   : > { %v3755_v10 = vpop.f32.mrf.mxu1  ;;  %v7884_v62 = vpack.c.b16 %v7828_v52, %v7827_v32  ;;  %v9406_v48 = vor.u32 %v9405_v39, %v9402_v0  ;;  %v11154_v8 = vunpack.c.l.b16 %v10926_v49  ;;  %v9397_v27 = vrot.slane %v9395_v19, 5  ;;  %v9069_v32 = vld [vmem:[#allocation2 + $0xc0] sm:$0xf]  ;;  %v17135_v52 = vld [vmem:[#allocation88_spill] sm:$0xff] }
 0x39d   : > { %v3888_v26 = vadd.f32 %v3755_v10, %v17133_v2  ;;  %v9392_v10 = vor.u32 %v9391_v60, %v9388_v51  ;;  %v9409_v2 = vshll.u32 %v9068_v54, 16  ;;  %v10930_v35 = vsel %vm14367_vm11, %v12896_v40, %v10929_v41  ;;  %v9071_v51 = vld [vmem:[#allocation2 + $0xc8] sm:$0xf] }
 0x39e   : > { %v9407_v43 = vrot.slane %v9406_v48, 4  ;;  %v11155_v39 = vunpack.c.l.b16 %v10930_v35  ;;  %v9417_v40 = vshll.u32 %v9069_v32, 16  ;;  %v9428_v41 = vshrl.u32 %v9071_v51, 16 }
 0x39f   : > { %v7082_v18 = vpop.f32.mrf.mxu0  ;;  %v9393_v34 = vrot.slane %v9392_v10, 4  ;;  %v9411_v28 = vrot.slane %v9409_v2, 5  ;;  %v10643_v2 = vld [vmem:[#allocation2 + $0xb0] sm:$0xe] }
 0x3a0   : > { %v4824_v16 = vpop.f32.mrf.mxu2  ;;  %v16246_v14 = vadd.f32 %v7082_v18, %v5638_v4  ;;  %v7317_v4 = vld [vmem:[#allocation2 + $0xac] sm:$0x1]  ;;  %v7318_v18 = vld [vmem:[#allocation2 + $0xb0] sm:$0xe]  ;;  %v9419_v35 = vrot.slane %v9417_v40, 5 }
 0x3a1   : > { %v5506_v46 = vpop.f32.mrf.mxu3  ;;  %v4957_v59 = vadd.f32 %v4824_v16, %v3888_v26  ;;  %v7319_v26 = vld [vmem:[#allocation2 + $0xb4] sm:$0x1]  ;;  %v7606_v23 = vrot.slane %v7317_v4, 5  ;;  %v12610_v9 = vrot.slane %v7318_v18, 9  ;;  %v9398_v19 = vsel %vm14377_vm12, %v9393_v34, %v9397_v27  ;;  %v12723_v18 = vld [vmem:[#allocation2 + $0xb0] sm:$0xf] }
 0x3a2   : > { %17134 = vst [vmem:[#allocation52_spill] sm:$0xff] %v16246_v14  ;;  %v7610_v0 = vrot.slane %v7319_v26, 5  ;;  %v11211_v4 = vpack.c.b16 %v11155_v39, %v11154_v8  ;;  %v10646_v26 = vld [vmem:[#allocation2 + $0xbc] sm:$0x1]  ;;  %v13105_v34 = vld [vmem:[#allocation2 + $0xb4] sm:$0xf0]  ;;  %v10090_v27 = vunpack.c.l.b16 %v9398_v19 }
 0x3a3   : > { %v5639_v21 = vadd.f32 %v5506_v46, %v4957_v59  ;;  %v12609_v46 = vrot.slane %v7316_v57, 9  ;;  %v10645_v57 = vld [vmem:[#allocation2 + $0xb8] sm:$0xe]  ;;  %v12897_v8 = vrot.slane %v10643_v2, 9  ;;  %v12724_v19 = vor.u32 %v13105_v34, %v12723_v18 }
 0x3a4   : > { %11354 = vmatmul.bf16.gmra.mxu0 %v11210_v13  ;;  %v7611_v48 = vsel %vm14367_vm11, %v12610_v9, %v7610_v0  ;;  %v9072_v9 = vld [vmem:[#allocation2 + $0xcc] sm:$0x1] }
 0x3a5   : > { %v7607_v49 = vsel %vm14367_vm11, %v12609_v46, %v7606_v23  ;;  %v7830_v23 = vunpack.c.l.b16 %v7611_v48  ;;  %v9437_v25 = vshll.u32 %v9072_v9, 16 }
 0x3a6   : > { %v7829_v46 = vunpack.c.l.b16 %v7607_v49 }
 0x3a7   : > { %v3758_v5 = vpop.f32.mrf.mxu1  ;;  %v7084_v13 = vpop.f32.mrf.mxu0  ;;  %v9439_v34 = vrot.slane %v9437_v25, 5 }
 0x3a8   : > { %10293 = vmatmul.bf16.gmra.mxu3 %v10145_v38  ;;  %v3889_v42 = vadd.f32 %v3758_v5, %v17135_v52  ;;  %v16253_v60 = vadd.f32 %v7084_v13, %v5639_v21  ;;  %v9431_v38 = vshll.u32 %v9071_v51, 16  ;;  %v9412_v21 = vsel %vm14377_vm12, %v9407_v43, %v9411_v28  ;;  %v10644_v5 = vld [vmem:[#allocation2 + $0xb4] sm:$0x1]  ;;  %v17137_v51 = vld [vmem:[#allocation89_spill] sm:$0xff] }
 0x3a9   : > { %8715 = vmatmul.bf16.gmra.mxu2 %v12720_v17  ;;  %v9414_v17 = vshrl.u32 %v9069_v32, 16  ;;  %v10091_v52 = vunpack.c.l.b16 %v9412_v21  ;;  %v9430_v43 = vrot.slane %v9428_v41, 4  ;;  %v10933_v39 = vrot.slane %v10644_v5, 5  ;;  %v7320_v5 = vld [vmem:[#allocation2 + $0xb8] sm:$0xe] }
 0x3aa   : > { %8032 = vmatmul.bf16.gmra.mxu1 %v7884_v62  ;;  %17136 = vst [vmem:[#allocation21_spill] sm:$0xff] %v16253_v60  ;;  %v9433_v28 = vrot.slane %v9431_v38, 5  ;;  %v7885_v49 = vpack.c.b16 %v7830_v23, %v7829_v46 }
 0x3ab   : > { %v5509_v54 = vpop.f32.mrf.mxu3  ;;  %v9416_v13 = vrot.slane %v9414_v17, 4  ;;  %v10937_v17 = vrot.slane %v10646_v26, 5  ;;  %v10146_v41 = vpack.c.b16 %v10091_v52, %v10090_v27  ;;  %v7323_v26 = vld [vmem:[#allocation2 + $0xc4] sm:$0x1] }
 0x3ac   : > { %v4827_v16 = vpop.f32.mrf.mxu2  ;;  %v9434_v38 = vor.u32 %v9433_v28, %v9430_v43  ;;  %v9075_v43 = vld [vmem:[#allocation2 + $0xd8] sm:$0xf]  ;;  %v7618_v9 = vrot.slane %v7323_v26, 5 }
 0x3ad   : > { %v4958_v59 = vadd.f32 %v4827_v16, %v3889_v42  ;;  %v9070_v42 = vld [vmem:[#allocation2 + $0xc4] sm:$0x1]  ;;  %v9420_v21 = vor.u32 %v9419_v35, %v9416_v13 }
 0x3ae   : > { %v9423_v14 = vshll.u32 %v9070_v42, 16  ;;  %v12611_v42 = vrot.slane %v7320_v5, 9  ;;  %v13106_v5 = vld [vmem:[#allocation2 + $0xc4] sm:$0xf0] }
 0x3af   : > { %v5640_v10 = vadd.f32 %v5509_v54, %v4958_v59  ;;  %v3760_v62 = vpop.f32.mrf.mxu1  ;;  %v12898_v54 = vrot.slane %v10645_v57, 9  ;;  %v7321_v57 = vld [vmem:[#allocation2 + $0xbc] sm:$0x1]  ;;  %v9421_v18 = vrot.slane %v9420_v21, 4  ;;  %v10648_v21 = vld [vmem:[#allocation2 + $0xc4] sm:$0x1] }
 0x3b0   : > { %v3890_v16 = vadd.f32 %v3760_v62, %v17137_v51  ;;  %v9425_v13 = vrot.slane %v9423_v14, 5  ;;  %v7614_v46 = vrot.slane %v7321_v57, 5 }
 0x3b1   : > { %v7087_v32 = vpop.f32.mrf.mxu0  ;;  %v10938_v2 = vsel %vm14367_vm11, %v12898_v54, %v10937_v17  ;;  %v9456_v17 = vshrl.u32 %v9075_v43, 16 }
 0x3b2   : > { %v16264_v0 = vadd.f32 %v7087_v32, %v5640_v10  ;;  %v10934_v10 = vsel %vm14367_vm11, %v12897_v8, %v10933_v39  ;;  %v9435_v32 = vrot.slane %v9434_v38, 4  ;;  %v11157_v52 = vunpack.c.l.b16 %v10938_v2  ;;  %v10650_v2 = vld [vmem:[#allocation2 + $0xcc] sm:$0x1] }
 0x3b3   : > { %v5511_v60 = vpop.f32.mrf.mxu3  ;;  %v11156_v27 = vunpack.c.l.b16 %v10934_v10  ;;  %v9426_v14 = vsel %vm14377_vm12, %v9421_v18, %v9425_v13  ;;  %v10649_v10 = vld [vmem:[#allocation2 + $0xc8] sm:$0xe]  ;;  %v577_v13 = vld [vmem:[#allocation2 + $0xec] sm:$0x1] }
 0x3b4   : > { %17138 = vst [vmem:[#allocation22_spill] sm:$0xff] %v16264_v0  ;;  %v4829_v59 = vpop.f32.mrf.mxu2  ;;  %11359 = vmatmul.bf16.gmra.mxu0 %v11211_v4  ;;  %v7322_v4 = vld [vmem:[#allocation2 + $0xc0] sm:$0xe]  ;;  %v9440_v54 = vsel %vm14377_vm12, %v9435_v32, %v9439_v34  ;;  %v10092_v57 = vunpack.c.l.b16 %v9426_v14  ;;  %v9074_v34 = vld [vmem:[#allocation2 + $0xd4] sm:$0x1]  ;;  %v10941_v14 = vrot.slane %v10648_v21, 5 }
 0x3b5   : > { %v4959_v40 = vadd.f32 %v4829_v59, %v3890_v16  ;;  %v12612_v23 = vrot.slane %v7322_v4, 9  ;;  %v10093_v4 = vunpack.c.l.b16 %v9440_v54 }
 0x3b7   : > { %v5641_v62 = vadd.f32 %v5511_v60, %v4959_v40  ;;  %v7998_v48 = vpop.f32.mrf.mxu1  ;;  %v9073_v60 = vld [vmem:[#allocation2 + $0xd0] sm:$0xf]  ;;  %v9459_v40 = vshll.u32 %v9075_v43, 16 }
 0x3b8   : > { %10298 = vmatmul.bf16.gmra.mxu3 %v10146_v41  ;;  %v8222_v51 = vadd.f32 %v7998_v48, %v14876_v45  ;;  %v9442_v8 = vshrl.u32 %v9073_v60, 16  ;;  %v9445_v25 = vshll.u32 %v9073_v60, 16  ;;  %v335_v41 = vld [vmem:[#allocation2 + $0xe8] sm:$0x1]  ;;  %v11212_v45 = vpack.c.b16 %v11157_v52, %v11156_v27  ;;  %v12727_v48 = vld [vmem:[#allocation2 + $0xc0] sm:$0xf] }
 0x3b9   : > { %8720 = vmatmul.bf16.gmra.mxu2 %v12724_v19  ;;  %v7089_v35 = vpop.f32.mrf.mxu0  ;;  %v10647_v19 = vld [vmem:[#allocation2 + $0xc0] sm:$0xe]  ;;  %v9458_v60 = vrot.slane %v9456_v17, 4  ;;  %v9461_v27 = vrot.slane %v9459_v40, 5  ;;  %v336_v52 = vsel %vm13721_vm4, 0, %v335_v41  ;;  %v12728_v54 = vor.u32 %v13106_v5, %v12727_v48 }
 0x3ba   : > { %8037 = vmatmul.bf16.gmra.mxu1 %v7885_v49  ;;  %v16270_v28 = vadd.f32 %v7089_v35, %v5641_v62  ;;  %v7615_v62 = vsel %vm14367_vm11, %v12611_v42, %v7614_v46  ;;  %v7619_v49 = vsel %vm14367_vm11, %v12612_v23, %v7618_v9  ;;  %v9444_v26 = vrot.slane %v9442_v8, 4  ;;  %337 = vst [vmem:[#allocation2 + $0xe8] sm:$0x1] %v336_v52  ;;  %v16289_v23 = vld [vmem:[%s16808_s2] ss:$0 sm:$0xff] }
 0x3bb   : > { %v10259_v59 = vpop.f32.mrf.mxu3  ;;  %v9447_v18 = vrot.slane %v9445_v25, 5  ;;  %v7831_v43 = vunpack.c.l.b16 %v7615_v62  ;;  %v578_v46 = vsel %vm13715_vm3, 0, %v577_v13  ;;  %v12900_v8 = vrot.slane %v10649_v10, 9  ;;  %v7324_v17 = vld [vmem:[#allocation2 + $0xc8] sm:$0xe] }
 0x3bc   : > { %17139 = vst [vmem:[#allocation56_spill] sm:$0xff] %v16270_v28  ;;  %v8681_v16 = vpop.f32.mrf.mxu2  ;;  %v10945_v25 = vrot.slane %v10650_v2, 5  ;;  %v7325_v40 = vld [vmem:[#allocation2 + $0xcc] sm:$0x1]  ;;  %v7326_v13 = vld [vmem:[#allocation2 + $0xd0] sm:$0xe]  ;;  %v9462_v28 = vor.u32 %v9461_v27, %v9458_v60 }
 0x3bd   : > { %v8905_v39 = vadd.f32 %v8681_v16, %v8222_v51  ;;  %v7832_v51 = vunpack.c.l.b16 %v7619_v49  ;;  %v9076_v16 = vld [vmem:[#allocation2 + $0xdc] sm:$0x1]  ;;  %579 = vst [vmem:[#allocation2 + $0xec] sm:$0x1] %v578_v46  ;;  %v9448_v41 = vor.u32 %v9447_v18, %v9444_v26  ;;  %v10147_v49 = vpack.c.b16 %v10093_v4, %v10092_v57  ;;  %v7327_v52 = vld [vmem:[#allocation2 + $0xd4] sm:$0x1] }
 0x3be   : > { %v9465_v0 = vshll.u32 %v9076_v16, 16  ;;  %v12613_v48 = vrot.slane %v7324_v17, 9  ;;  %v7622_v2 = vrot.slane %v7325_v40, 5  ;;  %v12614_v5 = vrot.slane %v7326_v13, 9  ;;  %v9077_v27 = vld [vmem:[#allocation2 + $0xe0] sm:$0xf] }
 0x3bf   : > { %v8000_v38 = vpop.f32.mrf.mxu1  ;;  %v10483_v32 = vadd.f32 %v10259_v59, %v8905_v39  ;;  %v12899_v59 = vrot.slane %v10647_v19, 9  ;;  %v7886_v19 = vpack.c.b16 %v7832_v51, %v7831_v43  ;;  %v7626_v26 = vrot.slane %v7327_v52, 5 }
 0x3c0   : > { %v8223_v42 = vadd.f32 %v8000_v38, %v14908_v53  ;;  %v9451_v38 = vshll.u32 %v9074_v34, 16  ;;  %v9449_v18 = vrot.slane %v9448_v41, 4  ;;  %v9467_v34 = vrot.slane %v9465_v0, 5  ;;  %v10651_v0 = vld [vmem:[#allocation2 + $0xd0] sm:$0xe] }
 0x3c1   : > { %v11325_v35 = vpop.f32.mrf.mxu0  ;;  %v10942_v10 = vsel %vm14367_vm11, %v12899_v59, %v10941_v14  ;;  %v7623_v16 = vsel %vm14367_vm11, %v12613_v48, %v7622_v2  ;;  %v9079_v46 = vld [vmem:[#allocation2 + $0xe8] sm:$0xf]  ;;  %v9473_v17 = vshll.u32 %v9077_v27, 16 }
 0x3c2   : > { %v11549_v62 = vadd.f32 %v11325_v35, %v10483_v32  ;;  %v9453_v57 = vrot.slane %v9451_v38, 5  ;;  %v9463_v32 = vrot.slane %v9462_v28, 4  ;;  %v10652_v28 = vld [vmem:[#allocation2 + $0xd4] sm:$0x1]  ;;  %v10654_v38 = vld [vmem:[#allocation2 + $0xdc] sm:$0x1]  ;;  %v7833_v52 = vunpack.c.l.b16 %v7623_v16 }
 0x3c3   : > { %v10261_v39 = vpop.f32.mrf.mxu3 }
 0x3c4   : > { %v8683_v9 = vpop.f32.mrf.mxu2  ;;  %11364 = vmatmul.bf16.gmra.mxu0 %v11212_v45  ;;  %v10946_v45 = vsel %vm14367_vm11, %v12900_v8, %v10945_v25  ;;  %v11745_v4 = vadd.f32 %v16289_v23, %v11549_v62  ;;  %v7627_v8 = vsel %vm14367_vm11, %v12614_v5, %v7626_v26  ;;  %v9487_v62 = vshll.u32 %v9079_v46, 16  ;;  %v9080_v16 = vld [vmem:[#allocation2 + $0xec] sm:$0x1] }
 0x3c5   : > { %v8906_v53 = vadd.f32 %v8683_v9, %v8223_v42  ;;  %v11158_v42 = vunpack.c.l.b16 %v10942_v10  ;;  %v11159_v43 = vunpack.c.l.b16 %v10946_v45  ;;  %v12731_v45 = vld [vmem:[#allocation2 + $0xd0] sm:$0xf]  ;;  %v10949_v5 = vrot.slane %v10652_v28, 5 }
 0x3c6   : > { %v11809_v25 = vmax.f32 %v11745_v4, 0.0  ;;  %v10953_v4 = vrot.slane %v10654_v38, 5  ;;  %v7330_v38 = vld [vmem:[#allocation2 + $0xe0] sm:$0xe] }
 0x3c7   : > { %v10484_v36 = vadd.f32 %v10261_v39, %v8906_v53  ;;  %v8003_v21 = vpop.f32.mrf.mxu1  ;;  %v9468_v53 = vsel %vm14377_vm12, %v9463_v32, %v9467_v34  ;;  %v10653_v39 = vld [vmem:[#allocation2 + $0xd8] sm:$0xe]  ;;  %v9475_v32 = vrot.slane %v9473_v17, 5 }
 0x3c8   : > { %10303 = vmatmul.bf16.gmra.mxu3 %v10147_v49  ;;  %v8224_v59 = vadd.f32 %v8003_v21, %v14920_v58  ;;  %v9484_v58 = vshrl.u32 %v9079_v46, 16  ;;  %v11213_v49 = vpack.c.b16 %v11159_v43, %v11158_v42  ;;  %v12901_v21 = vrot.slane %v10651_v0, 9 }
 0x3c9   : > { %8725 = vmatmul.bf16.gmra.mxu2 %v12728_v54  ;;  %v11327_v35 = vpop.f32.mrf.mxu0  ;;  %v9470_v54 = vshrl.u32 %v9077_v27, 16  ;;  %v10095_v2 = vunpack.c.l.b16 %v9468_v53  ;;  %v9078_v27 = vld [vmem:[#allocation2 + $0xe4] sm:$0x1]  ;;  %v9489_v43 = vrot.slane %v9487_v62, 5 }
 0x3ca   : > { %v11550_v60 = vadd.f32 %v11327_v35, %v10484_v36  ;;  %8042 = vmatmul.bf16.gmra.mxu1 %v7886_v19  ;;  %v9454_v36 = vsel %vm14377_vm12, %v9449_v18, %v9453_v57  ;;  %v7834_v19 = vunpack.c.l.b16 %v7627_v8  ;;  %v13107_v18 = vld [vmem:[#allocation2 + $0xd4] sm:$0xf0]  ;;  %v12902_v57 = vrot.slane %v10653_v39, 9 }
 0x3cb   : > { %v10264_v14 = vpop.f32.mrf.mxu3  ;;  %v10094_v48 = vunpack.c.l.b16 %v9454_v36  ;;  %v9472_v35 = vrot.slane %v9470_v54, 4  ;;  %v9486_v42 = vrot.slane %v9484_v58, 4  ;;  %v12732_v8 = vor.u32 %v13107_v18, %v12731_v45  ;;  %v7331_v58 = vld [vmem:[#allocation2 + $0xe4] sm:$0x1] }
 0x3cc   : > { %v8686_v51 = vpop.f32.mrf.mxu2  ;;  %v11746_v9 = vadd.f32 %v16289_v23, %v11550_v60  ;;  %v10950_v36 = vsel %vm14367_vm11, %v12901_v21, %v10949_v5  ;;  %v10954_v28 = vsel %vm14367_vm11, %v12902_v57, %v10953_v4  ;;  %v9493_v54 = vshll.u32 %v9080_v16, 16  ;;  %v9081_v21 = vld [vmem:[#allocation2 + $0x100] sm:$0xf]  ;;  %v9083_v5 = vld [vmem:[#allocation2 + $0x108] sm:$0xf] }
 0x3cd   : > { %v8907_v41 = vadd.f32 %v8686_v51, %v8224_v59  ;;  %v7887_v59 = vpack.c.b16 %v7834_v19, %v7833_v52  ;;  %v10148_v0 = vpack.c.b16 %v10095_v2, %v10094_v48  ;;  %v9490_v39 = vor.u32 %v9489_v43, %v9486_v42 }
 0x3ce   : > { %v11810_v40 = vmax.f32 %v11746_v9, 0.0  ;;  %v9495_v2 = vrot.slane %v9493_v54, 5  ;;  %v12616_v4 = vrot.slane %v7330_v38, 9  ;;  %v9501_v42 = vshll.u32 %v9081_v21, 16  ;;  %v10658_v54 = vld [vmem:[#allocation2 + $0xec] sm:$0x1] }
 0x3cf   : > { %v8005_v13 = vpop.f32.mrf.mxu1  ;;  %v10485_v34 = vadd.f32 %v10264_v14, %v8907_v41  ;;  %v9476_v14 = vor.u32 %v9475_v32, %v9472_v35  ;;  %v7329_v41 = vld [vmem:[#allocation2 + $0xdc] sm:$0x1]  ;;  %v9491_v48 = vrot.slane %v9490_v39, 4  ;;  %v7634_v35 = vrot.slane %v7331_v58, 5  ;;  %v12735_v39 = vld [vmem:[#allocation2 + $0xe0] sm:$0xf] }
 0x3d0   : > { %v13158_v10 = vpack.c.bf16 %v11810_v40, %v11809_v25  ;;  %v8225_v60 = vadd.f32 %v8005_v13, %v14947_v37  ;;  %v9479_v25 = vshll.u32 %v9078_v27, 16  ;;  %v7328_v40 = vld [vmem:[#allocation2 + $0xd8] sm:$0xe]  ;;  %v11161_v13 = vunpack.c.l.b16 %v10954_v28  ;;  %v10655_v28 = vld [vmem:[#allocation2 + $0xe0] sm:$0xe] }
 0x3d1   : > { %v11330_v26 = vpop.f32.mrf.mxu0  ;;  %v9477_v52 = vrot.slane %v9476_v14, 4  ;;  %v12615_v18 = vrot.slane %v7328_v40, 9  ;;  %v7630_v57 = vrot.slane %v7329_v41, 5  ;;  %v9498_v27 = vshrl.u32 %v9081_v21, 16  ;;  %v10656_v14 = vld [vmem:[#allocation2 + $0xe4] sm:$0x1] }
 0x3d2   : > { %13159 = vst [vmem:[%s16308_s27] sm:$0xff] %v13158_v10   ;;  %v11551_v37 = vadd.f32 %v11330_v26, %v10485_v34  ;;  %v9481_v19 = vrot.slane %v9479_v25, 5  ;;  %v9515_v16 = vshll.u32 %v9083_v5, 16  ;;  %v10657_v25 = vld [vmem:[#allocation2 + $0xe8] sm:$0xe]  ;;  %v9503_v40 = vrot.slane %v9501_v42, 5 }
 0x3d3   : > { %v10266_v9 = vpop.f32.mrf.mxu3  ;;  %v13108_v38 = vld [vmem:[#allocation2 + $0xe4] sm:$0xf0] }
 0x3d4   : > { %v8688_v51 = vpop.f32.mrf.mxu2  ;;  %11369 = vmatmul.bf16.gmra.mxu0 %v11213_v49  ;;  %v11160_v49 = vunpack.c.l.b16 %v10950_v36  ;;  %v11747_v10 = vadd.f32 %v16289_v23, %v11551_v37  ;;  %v9482_v43 = vsel %vm14377_vm12, %v9477_v52, %v9481_v19  ;;  %v9082_v52 = vld [vmem:[#allocation2 + $0x104] sm:$0x1]  ;;  %v9517_v21 = vrot.slane %v9515_v16, 5 }
 0x3d5   : > { %v8908_v46 = vadd.f32 %v8688_v51, %v8225_v60  ;;  %v9512_v51 = vshrl.u32 %v9083_v5, 16  ;;  %v10096_v58 = vunpack.c.l.b16 %v9482_v43  ;;  %v9084_v5 = vld [vmem:[#allocation2 + $0x10c] sm:$0x1]  ;;  %v9507_v43 = vshll.u32 %v9082_v52, 16  ;;  %v7335_v16 = vld [vmem:[#allocation2 + $0x104] sm:$0x1] }
 0x3d7   : > { %v10486_v53 = vadd.f32 %v10266_v9, %v8908_v46  ;;  %v8008_v17 = vpop.f32.mrf.mxu1  ;;  %v11811_v46 = vmax.f32 %v11747_v10, 0.0  ;;  %v9514_v19 = vrot.slane %v9512_v51, 4 }
 0x3d8   : > { %10308 = vmatmul.bf16.gmra.mxu3 %v10148_v0  ;;  %v8226_v34 = vadd.f32 %v8008_v17, %v14983_v29  ;;  %v7631_v0 = vsel %vm14367_vm11, %v12615_v18, %v7630_v57  ;;  %v7635_v29 = vsel %vm14367_vm11, %v12616_v4, %v7634_v35  ;;  %v9500_v17 = vrot.slane %v9498_v27, 4  ;;  %v7333_v27 = vld [vmem:[#allocation2 + $0xfc] sm:$0x1] }
 0x3d9   : > { %8730 = vmatmul.bf16.gmra.mxu2 %v12732_v8  ;;  %v11332_v62 = vpop.f32.mrf.mxu0  ;;  %v9496_v8 = vsel %vm14377_vm12, %v9491_v48, %v9495_v2  ;;  %v7835_v48 = vunpack.c.l.b16 %v7631_v0  ;;  %v7836_v2 = vunpack.c.l.b16 %v7635_v29  ;;  %v12904_v18 = vrot.slane %v10657_v25, 9 }
 0x3da   : > { %v11552_v45 = vadd.f32 %v11332_v62, %v10486_v53  ;;  %8047 = vmatmul.bf16.gmra.mxu1 %v7887_v59  ;;  %v11214_v53 = vpack.c.b16 %v11161_v13, %v11160_v49  ;;  %v10097_v62 = vunpack.c.l.b16 %v9496_v8  ;;  %v12903_v49 = vrot.slane %v10655_v28, 9 }
 0x3db   : > { %v10269_v60 = vpop.f32.mrf.mxu3  ;;  %v10957_v13 = vrot.slane %v10656_v14, 5  ;;  %v10961_v57 = vrot.slane %v10658_v54, 5  ;;  %v9504_v42 = vor.u32 %v9503_v40, %v9500_v17  ;;  %v7888_v8 = vpack.c.b16 %v7836_v2, %v7835_v48  ;;  %v17140_v48 = vld [vmem:[#allocation54_spill] sm:$0xff] }
 0x3dc   : > { %v8691_v26 = vpop.f32.mrf.mxu2  ;;  %v11748_v32 = vadd.f32 %v16289_v23, %v11552_v45  ;;  %v10149_v51 = vpack.c.b16 %v10097_v62, %v10096_v58  ;;  %v7638_v14 = vrot.slane %v7333_v27, 5  ;;  %v9085_v58 = vld [vmem:[#allocation2 + $0x110] sm:$0xf]  ;;  %v9087_v62 = vld [vmem:[#allocation2 + $0x118] sm:$0xf] }
 0x3dd   : > { %v8909_v59 = vadd.f32 %v8691_v26, %v8226_v34  ;;  %v7332_v34 = vld [vmem:[#allocation2 + $0xf8] sm:$0xe]  ;;  %v10958_v0 = vsel %vm14367_vm11, %v12903_v49, %v10957_v13  ;;  %v10962_v29 = vsel %vm14367_vm11, %v12904_v18, %v10961_v57  ;;  %v9526_v18 = vshrl.u32 %v9085_v58, 16 }
 0x3de   : > { %v11812_v9 = vmax.f32 %v11748_v32, 0.0  ;;  %v12736_v32 = vor.u32 %v13108_v38, %v12735_v39  ;;  %v12617_v28 = vrot.slane %v7332_v34, 9  ;;  %v9509_v39 = vrot.slane %v9507_v43, 5  ;;  %v10659_v43 = vld [vmem:[#allocation2 + $0x100] sm:$0xe] }
 0x3df   : > { %v8010_v36 = vpop.f32.mrf.mxu1  ;;  %v10487_v10 = vadd.f32 %v10269_v60, %v8909_v59  ;;  %v7334_v60 = vld [vmem:[#allocation2 + $0x100] sm:$0xe]  ;;  %v11162_v52 = vunpack.c.l.b16 %v10958_v0  ;;  %v9529_v57 = vshll.u32 %v9085_v58, 16  ;;  %v9543_v27 = vshll.u32 %v9087_v62, 16  ;;  %v13109_v0 = vld [vmem:[#allocation2 + $0x104] sm:$0xf0] }
 0x3e0   : > { %v13163_v37 = vpack.c.bf16 %v11812_v9, %v11811_v46  ;;  %v8227_v45 = vadd.f32 %v8010_v36, %v15017_v50  ;;  %v9518_v50 = vor.u32 %v9517_v21, %v9514_v19  ;;  %v9521_v46 = vshll.u32 %v9084_v5, 16  ;;  %v9088_v58 = vld [vmem:[#allocation2 + $0x11c] sm:$0x1] }
 0x3e1   : > { %v11335_v41 = vpop.f32.mrf.mxu0  ;;  %v12618_v25 = vrot.slane %v7334_v60, 9  ;;  %v11163_v19 = vunpack.c.l.b16 %v10962_v29 }
 0x3e2   : > { %13315 = vst [vmem:[%s16308_s27 + $0x8] sm:$0xff] %v13163_v37   ;;  %v11553_v9 = vadd.f32 %v11335_v41, %v10487_v10  ;;  %v7642_v37 = vrot.slane %v7335_v16, 5  ;;  %v9519_v17 = vrot.slane %v9518_v50, 4  ;;  %v9523_v40 = vrot.slane %v9521_v46, 5  ;;  %v10660_v46 = vld [vmem:[#allocation2 + $0x104] sm:$0x1] }
 0x3e3   : > { %v10271_v35 = vpop.f32.mrf.mxu3  ;;  %v7639_v10 = vsel %vm14367_vm11, %v12617_v28, %v7638_v14  ;;  %v11215_v60 = vpack.c.b16 %v11163_v19, %v11162_v52  ;;  %v9528_v14 = vrot.slane %v9526_v18, 4 }
 0x3e4   : > { %v8693_v26 = vpop.f32.mrf.mxu2  ;;  %11374 = vmatmul.bf16.gmra.mxu0 %v11214_v53  ;;  %v9505_v53 = vrot.slane %v9504_v42, 4  ;;  %v11749_v41 = vadd.f32 %v16289_v23, %v11553_v9  ;;  %v9524_v13 = vsel %vm14377_vm12, %v9519_v17, %v9523_v40  ;;  %v7837_v16 = vunpack.c.l.b16 %v7639_v10  ;;  %v10661_v9 = vld [vmem:[#allocation2 + $0x108] sm:$0xe] }
 0x3e5   : > { %v8910_v4 = vadd.f32 %v8693_v26, %v8227_v45  ;;  %v7643_v26 = vsel %vm14367_vm11, %v12618_v25, %v7642_v37  ;;  %v10099_v28 = vunpack.c.l.b16 %v9524_v13  ;;  %v9531_v25 = vrot.slane %v9529_v57, 5 }
 0x3e6   : > { %v9510_v49 = vsel %vm14377_vm12, %v9505_v53, %v9509_v39  ;;  %v7838_v50 = vunpack.c.l.b16 %v7643_v26  ;;  %v9086_v39 = vld [vmem:[#allocation2 + $0x114] sm:$0x1]  ;;  %v9545_v17 = vrot.slane %v9543_v27, 5 }
 0x3e7   : > { %v10488_v59 = vadd.f32 %v10271_v35, %v8910_v4  ;;  %v8013_v36 = vpop.f32.mrf.mxu1  ;;  %v9540_v4 = vshrl.u32 %v9087_v62, 16  ;;  %v11813_v35 = vmax.f32 %v11749_v41, 0.0  ;;  %v10098_v29 = vunpack.c.l.b16 %v9510_v49  ;;  %v7339_v49 = vld [vmem:[#allocation2 + $0x114] sm:$0x1] }
 0x3e8   : > { %10313 = vmatmul.bf16.gmra.mxu3 %v10149_v51  ;;  %v8228_v2 = vadd.f32 %v8013_v36, %v17140_v48  ;;  %v12739_v36 = vld [vmem:[#allocation2 + $0x100] sm:$0xf]  ;;  %v12905_v41 = vrot.slane %v10659_v43, 9  ;;  %v7337_v48 = vld [vmem:[#allocation2 + $0x10c] sm:$0x1]  ;;  %v9535_v13 = vshll.u32 %v9086_v39, 16 }
 0x3e9   : > { %8735 = vmatmul.bf16.gmra.mxu2 %v12736_v32  ;;  %v11337_v54 = vpop.f32.mrf.mxu0  ;;  %v12740_v19 = vor.u32 %v13109_v0, %v12739_v36  ;;  %v10150_v26 = vpack.c.b16 %v10099_v28, %v10098_v29  ;;  %v7646_v27 = vrot.slane %v7337_v48, 5  ;;  %v9091_v29 = vld [vmem:[#allocation2 + $0x128] sm:$0xf] }
 0x3ea   : > { %v11554_v38 = vadd.f32 %v11337_v54, %v10488_v59  ;;  %8052 = vmatmul.bf16.gmra.mxu1 %v7888_v8  ;;  %v10662_v59 = vld [vmem:[#allocation2 + $0x10c] sm:$0x1]  ;;  %v9542_v54 = vrot.slane %v9540_v4, 4 }
 0x3eb   : > { %v10274_v5 = vpop.f32.mrf.mxu3  ;;  %v10969_v10 = vrot.slane %v10662_v59, 5 }
 0x3ec   : > { %v8696_v21 = vpop.f32.mrf.mxu2  ;;  %v11750_v45 = vadd.f32 %v16289_v23, %v11554_v38  ;;  %v10965_v38 = vrot.slane %v10660_v46, 5  ;;  %v9546_v4 = vor.u32 %v9545_v17, %v9542_v54  ;;  %v9537_v46 = vrot.slane %v9535_v13, 5  ;;  %v10666_v13 = vld [vmem:[#allocation2 + $0x11c] sm:$0x1] }
 0x3ed   : > { %v8911_v34 = vadd.f32 %v8696_v21, %v8228_v2  ;;  %v12906_v21 = vrot.slane %v10661_v9, 9  ;;  %v7889_v2 = vpack.c.b16 %v7838_v50, %v7837_v16  ;;  %v9089_v9 = vld [vmem:[#allocation2 + $0x120] sm:$0xf] }
 0x3ee   : > { %v11814_v32 = vmax.f32 %v11750_v45, 0.0  ;;  %v7336_v45 = vld [vmem:[#allocation2 + $0x108] sm:$0xe]  ;;  %v9547_v36 = vrot.slane %v9546_v4, 4 }
 0x3ef   : > { %v8015_v42 = vpop.f32.mrf.mxu1  ;;  %v10489_v37 = vadd.f32 %v10274_v5, %v8911_v34  ;;  %v7338_v5 = vld [vmem:[#allocation2 + $0x110] sm:$0xe]  ;;  %v12619_v34 = vrot.slane %v7336_v45, 9  ;;  %v10970_v43 = vsel %vm14367_vm11, %v12906_v21, %v10969_v10  ;;  %v10664_v45 = vld [vmem:[#allocation2 + $0x114] sm:$0x1] }
 0x3f0   : > { %v13168_v51 = vpack.c.bf16 %v11814_v32, %v11813_v35  ;;  %v8229_v53 = vadd.f32 %v8015_v42, %v15099_v44  ;;  %v9532_v44 = vor.u32 %v9531_v25, %v9528_v14  ;;  %v9549_v35 = vshll.u32 %v9088_v58, 16  ;;  %v10663_v10 = vld [vmem:[#allocation2 + $0x110] sm:$0xe] }
 0x3f1   : > { %v11340_v8 = vpop.f32.mrf.mxu0  ;;  %v10966_v42 = vsel %vm14367_vm11, %v12905_v41, %v10965_v38  ;;  %v11165_v25 = vunpack.c.l.b16 %v10970_v43  ;;  %v9557_v41 = vshll.u32 %v9089_v9, 16 }
 0x3f2   : > { %13316 = vst [vmem:[%s16308_s27 + $0x10] sm:$0xff] %v13168_v51   ;;  %v11555_v18 = vadd.f32 %v11340_v8, %v10489_v37  ;;  %v12620_v51 = vrot.slane %v7338_v5, 9  ;;  %v9533_v50 = vrot.slane %v9532_v44, 4  ;;  %v9551_v0 = vrot.slane %v9549_v35, 5  ;;  %v10665_v44 = vld [vmem:[#allocation2 + $0x118] sm:$0xe] }
 0x3f3   : > { %v10276_v52 = vpop.f32.mrf.mxu3  ;;  %v11164_v14 = vunpack.c.l.b16 %v10966_v42  ;;  %v9090_v35 = vld [vmem:[#allocation2 + $0x124] sm:$0x1] }
 0x3f4   : > { %v8698_v40 = vpop.f32.mrf.mxu2  ;;  %11379 = vmatmul.bf16.gmra.mxu0 %v11215_v60  ;;  %v7650_v60 = vrot.slane %v7339_v49, 5  ;;  %v11751_v59 = vadd.f32 %v16289_v23, %v11555_v18  ;;  %v9538_v58 = vsel %vm14377_vm12, %v9533_v50, %v9537_v46  ;;  %v9552_v21 = vsel %vm14377_vm12, %v9547_v36, %v9551_v0  ;;  %v365_v18 = vld [vmem:[#allocation2 + $0x138] sm:$0x1] }
 0x3f5   : > { %v8912_v62 = vadd.f32 %v8698_v40, %v8229_v53  ;;  %v16354_v53 = vsel %vm14367_vm11, %v12619_v34, %v7646_v27  ;;  %v9554_v40 = vshrl.u32 %v9089_v9, 16  ;;  %v11216_v48 = vpack.c.b16 %v11165_v25, %v11164_v14  ;;  %v607_v27 = vld [vmem:[#allocation2 + $0x13c] sm:$0x1]  ;;  %v9092_v9 = vld [vmem:[#allocation2 + $0x12c] sm:$0x1] }
 0x3f6   : > { %v7651_v17 = vsel %vm14367_vm11, %v12620_v51, %v7650_v60  ;;  %v7839_v5 = vunpack.c.l.b16 %v16354_v53  ;;  %v10100_v4 = vunpack.c.l.b16 %v9538_v58  ;;  %v9559_v34 = vrot.slane %v9557_v41, 5  ;;  %v12743_v51 = vld [vmem:[#allocation2 + $0x110] sm:$0xf]  ;;  %v13110_v60 = vld [vmem:[#allocation2 + $0x114] sm:$0xf0] }
 0x3f7   : > { %v10490_v57 = vadd.f32 %v10276_v52, %v8912_v62  ;;  %v8018_v32 = vpop.f32.mrf.mxu1  ;;  %v9571_v62 = vshll.u32 %v9091_v29, 16  ;;  %v11815_v52 = vmax.f32 %v11751_v59, 0.0  ;;  %v7840_v49 = vunpack.c.l.b16 %v7651_v17  ;;  %v7343_v58 = vld [vmem:[#allocation2 + $0x124] sm:$0x1] }
 0x3f8   : > { %10318 = vmatmul.bf16.gmra.mxu3 %v10150_v26  ;;  %v8230_v28 = vadd.f32 %v8018_v32, %v15103_v11  ;;  %v9568_v11 = vshrl.u32 %v9091_v29, 16  ;;  %v9556_v32 = vrot.slane %v9554_v40, 4  ;;  %v12907_v46 = vrot.slane %v10663_v10, 9 }
 0x3f9   : > { %8740 = vmatmul.bf16.gmra.mxu2 %v12740_v19  ;;  %v11342_v16 = vpop.f32.mrf.mxu0  ;;  %v366_v59 = vsel %vm13721_vm4, 0, %v365_v18  ;;  %v10973_v0 = vrot.slane %v10664_v45, 5  ;;  %v12908_v29 = vrot.slane %v10665_v44, 9  ;;  %v9563_v14 = vshll.u32 %v9090_v35, 16 }
 0x3fa   : > { %v11556_v8 = vadd.f32 %v11342_v16, %v10490_v57  ;;  %8057 = vmatmul.bf16.gmra.mxu1 %v7889_v2  ;;  %v7165_v2 = vadd.f32 %v15080_v61, %v15075_v7  ;;  %v10101_v16 = vunpack.c.l.b16 %v9552_v21  ;;  %v9570_v7 = vrot.slane %v9568_v11, 4  ;;  %367 = vst [vmem:[#allocation2 + $0x138] sm:$0x1] %v366_v59  ;;  %v10667_v59 = vld [vmem:[#allocation2 + $0x120] sm:$0xe] }
 0x3fb   : > { %v10279_v54 = vpop.f32.mrf.mxu3  ;;  %v9573_v61 = vrot.slane %v9571_v62, 5  ;;  %v12744_v53 = vor.u32 %v13110_v60, %v12743_v51  ;;  %v9560_v17 = vor.u32 %v9559_v34, %v9556_v32  ;;  %v9577_v62 = vshll.u32 %v9092_v9, 16  ;;  %v9093_v32 = vld [vmem:[#allocation2 + $0x130] sm:$0xf] }
 0x3fc   : > { %v8701_v37 = vpop.f32.mrf.mxu2  ;;  %v11752_v39 = vadd.f32 %v16289_v23, %v11556_v8  ;;  %v608_v8 = vsel %vm13715_vm3, 0, %v607_v27  ;;  %v10151_v41 = vpack.c.b16 %v10101_v16, %v10100_v4  ;;  %v10974_v10 = vsel %vm14367_vm11, %v12907_v46, %v10973_v0 }
 0x3fd   : > { %v8913_v38 = vadd.f32 %v8701_v37, %v8230_v28  ;;  %v10977_v28 = vrot.slane %v10666_v13, 5  ;;  %609 = vst [vmem:[#allocation2 + $0x13c] sm:$0x1] %v608_v8  ;;  %v9574_v11 = vor.u32 %v9573_v61, %v9570_v7  ;;  %v7658_v44 = vrot.slane %v7343_v58, 5  ;;  %v17142_v7 = vld [vmem:[#allocation23_spill] sm:$0xff] }
 0x3fe   : > { %v11816_v19 = vmax.f32 %v11752_v39, 0.0  ;;  %v7340_v39 = vld [vmem:[#allocation2 + $0x118] sm:$0xe]  ;;  %v9561_v13 = vrot.slane %v9560_v17, 4  ;;  %v9565_v18 = vrot.slane %v9563_v14, 5  ;;  %v11166_v34 = vunpack.c.l.b16 %v10974_v10 }
 0x3ff   : > { %v8020_v26 = vpop.f32.mrf.mxu1  ;;  %v10491_v43 = vadd.f32 %v10279_v54, %v8913_v38  ;;  %v7341_v54 = vld [vmem:[#allocation2 + $0x11c] sm:$0x1]  ;;  %v7342_v38 = vld [vmem:[#allocation2 + $0x120] sm:$0xe]  ;;  %v10978_v45 = vsel %vm14367_vm11, %v12908_v29, %v10977_v28  ;;  %v9575_v35 = vrot.slane %v9574_v11, 4  ;;  %v9582_v28 = vshrl.u32 %v9093_v32, 16 }
 0x400   : > { %v13173_v57 = vpack.c.bf16 %v11816_v19, %v11815_v52  ;;  %v8231_v50 = vadd.f32 %v8020_v26, %v7165_v2  ;;  %v7890_v19 = vpack.c.b16 %v7840_v49, %v7839_v5  ;;  %v7654_v2 = vrot.slane %v7341_v54, 5  ;;  %v10668_v8 = vld [vmem:[#allocation2 + $0x124] sm:$0x1]  ;;  %v10669_v29 = vld [vmem:[#allocation2 + $0x128] sm:$0xe] }
 0x401   : > { %v11345_v42 = vpop.f32.mrf.mxu0  ;;  %v12622_v26 = vrot.slane %v7342_v38, 9  ;;  %v9579_v5 = vrot.slane %v9577_v62, 5  ;;  %v11167_v27 = vunpack.c.l.b16 %v10978_v45  ;;  %v9566_v9 = vsel %vm14377_vm12, %v9561_v13, %v9565_v18  ;;  %v12747_v62 = vld [vmem:[#allocation2 + $0x120] sm:$0xf]  ;;  %v13111_v45 = vld [vmem:[#allocation2 + $0x124] sm:$0xf0] }
 0x402   : > { %13317 = vst [vmem:[%s16308_s27 + $0x18] sm:$0xff] %v13173_v57   ;;  %v11557_v40 = vadd.f32 %v11345_v42, %v10491_v43  ;;  %v17141_v43 = vld [vmem:[#allocation24_spill] sm:$0xff]  ;;  %v9585_v14 = vshll.u32 %v9093_v32, 16  ;;  %v12909_v58 = vrot.slane %v10667_v59, 9 }
 0x403   : > { %v10281_v37 = vpop.f32.mrf.mxu3  ;;  %v7167_v51 = vadd.f32 %v17141_v43, %v15127_v30  ;;  %v7659_v46 = vsel %vm14367_vm11, %v12622_v26, %v7658_v44  ;;  %v9580_v30 = vsel %vm14377_vm12, %v9575_v35, %v9579_v5  ;;  %v11217_v17 = vpack.c.b16 %v11167_v27, %v11166_v34 }
 0x404   : > { %v8703_v36 = vpop.f32.mrf.mxu2  ;;  %11384 = vmatmul.bf16.gmra.mxu0 %v11216_v48  ;;  %v12621_v48 = vrot.slane %v7340_v39, 9  ;;  %v11753_v57 = vadd.f32 %v16289_v23, %v11557_v40  ;;  %v7842_v38 = vunpack.c.l.b16 %v7659_v46  ;;  %v9584_v26 = vrot.slane %v9582_v28, 4 }
 0x405   : > { %v8914_v25 = vadd.f32 %v8703_v36, %v8231_v50  ;;  %v9095_v36 = vld [vmem:[#allocation2 + $0x138] sm:$0xf]  ;;  %v9587_v44 = vrot.slane %v9585_v14, 5 }
 0x406   : > { %v7655_v60 = vsel %vm14367_vm11, %v12621_v48, %v7654_v2  ;;  %v11817_v0 = vmax.f32 %v11753_v57, 0.0  ;;  %v9596_v39 = vshrl.u32 %v9095_v36, 16  ;;  %v9599_v54 = vshll.u32 %v9095_v36, 16  ;;  %v9094_v57 = vld [vmem:[#allocation2 + $0x134] sm:$0x1] }
 0x407   : > { %v10492_v52 = vadd.f32 %v10281_v37, %v8914_v25  ;;  %v8023_v21 = vpop.f32.mrf.mxu1  ;;  %v12910_v48 = vrot.slane %v10669_v29, 9  ;;  %v7345_v36 = vld [vmem:[#allocation2 + $0x12c] sm:$0x1] }
 0x408   : > { %10323 = vmatmul.bf16.gmra.mxu3 %v10151_v41  ;;  %v8232_v61 = vadd.f32 %v8023_v21, %v17142_v7  ;;  %v7841_v41 = vunpack.c.l.b16 %v7655_v60  ;;  %v10981_v21 = vrot.slane %v10668_v8, 5  ;;  %v9601_v35 = vrot.slane %v9599_v54, 5  ;;  %v7344_v8 = vld [vmem:[#allocation2 + $0x128] sm:$0xe] }
 0x409   : > { %8745 = vmatmul.bf16.gmra.mxu2 %v12744_v53  ;;  %v11347_v4 = vpop.f32.mrf.mxu0  ;;  %v10670_v53 = vld [vmem:[#allocation2 + $0x12c] sm:$0x1]  ;;  %v9588_v7 = vor.u32 %v9587_v44, %v9584_v26 }
 0x40a   : > { %v11558_v49 = vadd.f32 %v11347_v4, %v10492_v52  ;;  %8062 = vmatmul.bf16.gmra.mxu1 %v7890_v19  ;;  %v10102_v52 = vunpack.c.l.b16 %v9566_v9  ;;  %v10103_v19 = vunpack.c.l.b16 %v9580_v30  ;;  %v10985_v2 = vrot.slane %v10670_v53, 5  ;;  %v7347_v30 = vld [vmem:[#allocation2 + $0x134] sm:$0x1]  ;;  %v9097_v53 = vld [vmem:[#allocation2 + $0x150] sm:$0xf] }
 0x40b   : > { %v10284_v50 = vpop.f32.mrf.mxu3  ;;  %v9598_v4 = vrot.slane %v9596_v39, 4  ;;  %v7891_v27 = vpack.c.b16 %v7842_v38, %v7841_v41  ;;  %v10982_v60 = vsel %vm14367_vm11, %v12909_v58, %v10981_v21  ;;  %v9099_v41 = vld [vmem:[#allocation2 + $0x158] sm:$0xf]  ;;  %v12623_v58 = vrot.slane %v7344_v8, 9  ;;  %v17143_v21 = vld [vmem:[#allocation33_spill] sm:$0xff] }
 0x40c   : > { %v8706_v42 = vpop.f32.mrf.mxu2  ;;  %v11754_v16 = vadd.f32 %v16289_v23, %v11558_v49  ;;  %v9096_v49 = vld [vmem:[#allocation2 + $0x13c] sm:$0x1]  ;;  %v10152_v43 = vpack.c.b16 %v10103_v19, %v10102_v52  ;;  %v11168_v28 = vunpack.c.l.b16 %v10982_v60  ;;  %v7666_v52 = vrot.slane %v7347_v30, 5  ;;  %v12751_v60 = vld [vmem:[#allocation2 + $0x130] sm:$0xf]  ;;  %v17144_v30 = vld [vmem:[#allocation34_spill] sm:$0xff] }
 0x40d   : > { %v8915_v37 = vadd.f32 %v8706_v42, %v8232_v61  ;;  %v12748_v42 = vor.u32 %v13111_v45, %v12747_v62  ;;  %v9591_v61 = vshll.u32 %v9094_v57, 16  ;;  %v9602_v46 = vor.u32 %v9601_v35, %v9598_v4 }
 0x40e   : > { %v11818_v25 = vmax.f32 %v11754_v16, 0.0  ;;  %v10986_v16 = vsel %vm14367_vm11, %v12910_v48, %v10985_v2  ;;  %v9605_v9 = vshll.u32 %v9096_v49, 16  ;;  %v9610_v48 = vshrl.u32 %v9097_v53, 16 }
 0x40f   : > { %v8025_v40 = vpop.f32.mrf.mxu1  ;;  %v10493_v13 = vadd.f32 %v10284_v50, %v8915_v37  ;;  %v11169_v14 = vunpack.c.l.b16 %v10986_v16  ;;  %v9593_v37 = vrot.slane %v9591_v61, 5  ;;  %v9613_v2 = vshll.u32 %v9097_v53, 16  ;;  %v10674_v16 = vld [vmem:[#allocation2 + $0x13c] sm:$0x1] }
 0x410   : > { %v13178_v11 = vpack.c.bf16 %v11818_v25, %v11817_v0  ;;  %v8233_v18 = vadd.f32 %v8025_v40, %v7167_v51  ;;  %v7346_v0 = vld [vmem:[#allocation2 + $0x130] sm:$0xe]  ;;  %v9589_v25 = vrot.slane %v9588_v7, 4  ;;  %v9607_v40 = vrot.slane %v9605_v9, 5  ;;  %v9100_v53 = vld [vmem:[#allocation2 + $0x15c] sm:$0x1] }
 0x411   : > { %v11350_v10 = vpop.f32.mrf.mxu0  ;;  %v12624_v62 = vrot.slane %v7346_v0, 9  ;;  %v9624_v44 = vshrl.u32 %v9099_v41, 16  ;;  %v9612_v7 = vrot.slane %v9610_v48, 4  ;;  %v9615_v61 = vrot.slane %v9613_v2, 5 }
 0x412   : > { %13318 = vst [vmem:[%s16308_s27 + $0x20] sm:$0xff] %v13178_v11   ;;  %v11559_v51 = vadd.f32 %v11350_v10, %v10493_v13  ;;  %v7662_v11 = vrot.slane %v7345_v36, 5  ;;  %v9594_v26 = vsel %vm14377_vm12, %v9589_v25, %v9593_v37  ;;  %v9627_v13 = vshll.u32 %v9099_v41, 16 }
 0x413   : > { %v10286_v34 = vpop.f32.mrf.mxu3  ;;  %v7667_v49 = vsel %vm14367_vm11, %v12624_v62, %v7666_v52  ;;  %v9626_v8 = vrot.slane %v9624_v44, 4  ;;  %v9616_v62 = vor.u32 %v9615_v61, %v9612_v7  ;;  %v9633_v48 = vshll.u32 %v9100_v53, 16  ;;  %v9101_v7 = vld [vmem:[#allocation2 + $0x160] sm:$0xf]  ;;  %v9103_v61 = vld [vmem:[#allocation2 + $0x168] sm:$0xf] }
 0x414   : > { %v8708_v5 = vpop.f32.mrf.mxu2  ;;  %11389 = vmatmul.bf16.gmra.mxu0 %v11217_v17  ;;  %v11755_v39 = vadd.f32 %v16289_v23, %v11559_v51  ;;  %v9603_v17 = vrot.slane %v9602_v46, 4  ;;  %v10104_v46 = vunpack.c.l.b16 %v9594_v26  ;;  %v9629_v36 = vrot.slane %v9627_v13, 5 }
 0x415   : > { %v8916_v32 = vadd.f32 %v8708_v5, %v8233_v18  ;;  %v7844_v37 = vunpack.c.l.b16 %v7667_v49  ;;  %v9617_v49 = vrot.slane %v9616_v62, 4  ;;  %v9641_v53 = vshll.u32 %v9101_v7, 16 }
 0x416   : > { %v11819_v18 = vmax.f32 %v11755_v39, 0.0  ;;  %v9608_v35 = vsel %vm14377_vm12, %v9603_v17, %v9607_v40  ;;  %v10993_v17 = vrot.slane %v10674_v16, 5 }
 0x417   : > { %v10494_v50 = vadd.f32 %v10286_v34, %v8916_v32  ;;  %v8028_v59 = vpop.f32.mrf.mxu1  ;;  %v10671_v32 = vld [vmem:[#allocation2 + $0x130] sm:$0xe]  ;;  %v10672_v34 = vld [vmem:[#allocation2 + $0x134] sm:$0x1]  ;;  %v10105_v9 = vunpack.c.l.b16 %v9608_v35 }
 0x418   : > { %10328 = vmatmul.bf16.gmra.mxu3 %v10152_v43  ;;  %v8234_v10 = vadd.f32 %v8028_v59, %v17143_v21  ;;  %v11218_v43 = vpack.c.b16 %v11169_v14, %v11168_v28  ;;  %v9098_v59 = vld [vmem:[#allocation2 + $0x154] sm:$0x1]  ;;  %v12911_v28 = vrot.slane %v10671_v32, 9  ;;  %v10989_v14 = vrot.slane %v10672_v34, 5  ;;  %v7350_v21 = vld [vmem:[#allocation2 + $0x150] sm:$0xe] }
 0x419   : > { %8750 = vmatmul.bf16.gmra.mxu2 %v12748_v42  ;;  %v11352_v29 = vpop.f32.mrf.mxu0  ;;  %v9619_v52 = vshll.u32 %v9098_v59, 16 }
 0x41a   : > { %v11560_v54 = vadd.f32 %v11352_v29, %v10494_v50  ;;  %8067 = vmatmul.bf16.gmra.mxu1 %v7891_v27  ;;  %v10673_v27 = vld [vmem:[#allocation2 + $0x138] sm:$0xe] }
 0x41b   : > { %v10289_v45 = vpop.f32.mrf.mxu3  ;;  %v13112_v50 = vld [vmem:[#allocation2 + $0x134] sm:$0xf0]  ;;  %v9621_v32 = vrot.slane %v9619_v52, 5 }
 0x41c   : > { %v8711_v38 = vpop.f32.mrf.mxu2  ;;  %v11756_v19 = vadd.f32 %v16289_v23, %v11560_v54  ;;  %v7663_v23 = vsel %vm14367_vm11, %v12623_v58, %v7662_v11  ;;  %v12912_v54 = vrot.slane %v10673_v27, 9  ;;  %v7348_v58 = vld [vmem:[#allocation2 + $0x148] sm:$0xe]  ;;  %v7349_v11 = vld [vmem:[#allocation2 + $0x14c] sm:$0x1] }
 0x41d   : > { %v8917_v4 = vadd.f32 %v8711_v38, %v8234_v10  ;;  %v7843_v25 = vunpack.c.l.b16 %v7663_v23  ;;  %v12752_v38 = vor.u32 %v13112_v50, %v12751_v60  ;;  %v7351_v10 = vld [vmem:[#allocation2 + $0x154] sm:$0x1]  ;;  %v7670_v35 = vrot.slane %v7349_v11, 5  ;;  %v10675_v11 = vld [vmem:[#allocation2 + $0x150] sm:$0xe] }
 0x41e   : > { %v11820_v57 = vmax.f32 %v11756_v19, 0.0  ;;  %v10153_v19 = vpack.c.b16 %v10105_v9, %v10104_v46  ;;  %v7674_v23 = vrot.slane %v7351_v10, 5  ;;  %v10676_v10 = vld [vmem:[#allocation2 + $0x154] sm:$0x1] }
 0x41f   : > { %v8030_v5 = vpop.f32.mrf.mxu1  ;;  %v10495_v0 = vadd.f32 %v10289_v45, %v8917_v4  ;;  %v9630_v45 = vor.u32 %v9629_v36, %v9626_v8  ;;  %v7892_v44 = vpack.c.b16 %v7844_v37, %v7843_v25  ;;  %v12625_v4 = vrot.slane %v7348_v58, 9  ;;  %v17145_v8 = vld [vmem:[#allocation39_spill] sm:$0xff] }
 0x420   : > { %v13183_v42 = vpack.c.bf16 %v11820_v57, %v11819_v18  ;;  %v8235_v29 = vadd.f32 %v8030_v5, %v17144_v30  ;;  %v10990_v18 = vsel %vm14367_vm11, %v12911_v28, %v10989_v14  ;;  %v10994_v57 = vsel %vm14367_vm11, %v12912_v54, %v10993_v17 }
 0x421   : > { %v11355_v51 = vpop.f32.mrf.mxu0  ;;  %v12626_v5 = vrot.slane %v7350_v21, 9  ;;  %v9631_v27 = vrot.slane %v9630_v45, 4  ;;  %v11171_v50 = vunpack.c.l.b16 %v10994_v57  ;;  %v7671_v9 = vsel %vm14367_vm11, %v12625_v4, %v7670_v35  ;;  %v10677_v45 = vld [vmem:[#allocation2 + $0x158] sm:$0xe] }
 0x422   : > { %13319 = vst [vmem:[%s16308_s27 + $0x28] sm:$0xff] %v13183_v42   ;;  %v11561_v2 = vadd.f32 %v11355_v51, %v10495_v0  ;;  %v9635_v42 = vrot.slane %v9633_v48, 5  ;;  %v11170_v51 = vunpack.c.l.b16 %v10990_v18  ;;  %v9638_v37 = vshrl.u32 %v9101_v7, 16  ;;  %v10678_v48 = vld [vmem:[#allocation2 + $0x15c] sm:$0x1] }
 0x423   : > { %v10291_v41 = vpop.f32.mrf.mxu3  ;;  %v7675_v30 = vsel %vm14367_vm11, %v12626_v5, %v7674_v23  ;;  %v9655_v17 = vshll.u32 %v9103_v61, 16  ;;  %v9643_v4 = vrot.slane %v9641_v53, 5  ;;  %v9102_v23 = vld [vmem:[#allocation2 + $0x164] sm:$0x1] }
 0x424   : > { %v8713_v39 = vpop.f32.mrf.mxu2  ;;  %11394 = vmatmul.bf16.gmra.mxu0 %v11218_v43  ;;  %v16413_v43 = vld [vmem:[%s16808_s2] ss:$0 sm:$0xff]  ;;  %v9636_v25 = vsel %vm14377_vm12, %v9631_v27, %v9635_v42  ;;  %v11219_v52 = vpack.c.b16 %v11171_v50, %v11170_v51  ;;  %v7846_v21 = vunpack.c.l.b16 %v7675_v30  ;;  %v9640_v57 = vrot.slane %v9638_v37, 4 }
 0x425   : > { %v8918_v40 = vadd.f32 %v8713_v39, %v8235_v29  ;;  %v11757_v60 = vadd.f32 %v16413_v43, %v11561_v2  ;;  %v9622_v29 = vsel %vm14377_vm12, %v9617_v49, %v9621_v32  ;;  %v9652_v39 = vshrl.u32 %v9103_v61, 16 }
 0x426   : > { %v10107_v18 = vunpack.c.l.b16 %v9636_v25  ;;  %v9657_v32 = vrot.slane %v9655_v17, 5  ;;  %v12913_v27 = vrot.slane %v10675_v11, 9  ;;  %v10997_v42 = vrot.slane %v10676_v10, 5 }
 0x427   : > { %v10496_v26 = vadd.f32 %v10291_v41, %v8918_v40  ;;  %v8033_v13 = vpop.f32.mrf.mxu1  ;;  %v11821_v28 = vmax.f32 %v11757_v60, 0.0  ;;  %v17146_v40 = vld [vmem:[#allocation40_spill] sm:$0xff]  ;;  %v17147_v41 = vld [vmem:[#allocation31_spill] sm:$0xff]  ;;  %v9654_v49 = vrot.slane %v9652_v39, 4  ;;  %v9104_v60 = vld [vmem:[#allocation2 + $0x16c] sm:$0x1]  ;;  %v9644_v30 = vor.u32 %v9643_v4, %v9640_v57 }
 0x428   : > { %10333 = vmatmul.bf16.gmra.mxu3 %v10153_v19  ;;  %v8236_v36 = vadd.f32 %v8033_v13, %v17145_v8  ;;  %v7845_v19 = vunpack.c.l.b16 %v7671_v9  ;;  %v10106_v13 = vunpack.c.l.b16 %v9622_v29  ;;  %v12914_v51 = vrot.slane %v10677_v45, 9  ;;  %v7353_v9 = vld [vmem:[#allocation2 + $0x15c] sm:$0x1] }
 0x429   : > { %8755 = vmatmul.bf16.gmra.mxu2 %v12752_v38  ;;  %v11357_v34 = vpop.f32.mrf.mxu0  ;;  %v7171_v38 = vadd.f32 %v17147_v41, %v17146_v40  ;;  %v11001_v50 = vrot.slane %v10678_v48, 5  ;;  %v9647_v29 = vshll.u32 %v9102_v23, 16  ;;  %v9658_v53 = vor.u32 %v9657_v32, %v9654_v49  ;;  %v9107_v48 = vld [vmem:[#allocation2 + $0x178] sm:$0xf] }
 0x42a   : > { %v11562_v16 = vadd.f32 %v11357_v34, %v10496_v26  ;;  %8072 = vmatmul.bf16.gmra.mxu1 %v7892_v44  ;;  %v12755_v26 = vld [vmem:[#allocation2 + $0x150] sm:$0xf]  ;;  %v13113_v44 = vld [vmem:[#allocation2 + $0x154] sm:$0xf0]  ;;  %v10154_v8 = vpack.c.b16 %v10107_v18, %v10106_v13  ;;  %v9661_v39 = vshll.u32 %v9104_v60, 16  ;;  %v10998_v17 = vsel %vm14367_vm11, %v12913_v27, %v10997_v42 }
 0x42b   : > { %v10294_v0 = vpop.f32.mrf.mxu3  ;;  %v12756_v61 = vor.u32 %v13113_v44, %v12755_v26  ;;  %v11002_v40 = vsel %vm14367_vm11, %v12914_v51, %v11001_v50  ;;  %v9645_v11 = vrot.slane %v9644_v30, 4  ;;  %v9659_v10 = vrot.slane %v9658_v53, 4  ;;  %v10680_v51 = vld [vmem:[#allocation2 + $0x164] sm:$0x1] }
 0x42c   : > { %v8716_v46 = vpop.f32.mrf.mxu2  ;;  %v11758_v59 = vadd.f32 %v16413_v43, %v11562_v16  ;;  %v9663_v45 = vrot.slane %v9661_v39, 5  ;;  %v11172_v44 = vunpack.c.l.b16 %v10998_v17  ;;  %v11173_v13 = vunpack.c.l.b16 %v11002_v40  ;;  %v637_v39 = vld [vmem:[#allocation2 + $0x18c] sm:$0x1]  ;;  %v13114_v17 = vld [vmem:[#allocation2 + $0x164] sm:$0xf0] }
 0x42d   : > { %v8919_v54 = vadd.f32 %v8716_v46, %v8236_v36  ;;  %v7352_v46 = vld [vmem:[#allocation2 + $0x158] sm:$0xe]  ;;  %v7354_v36 = vld [vmem:[#allocation2 + $0x160] sm:$0xe]  ;;  %v9680_v27 = vshrl.u32 %v9107_v48, 16  ;;  %v9683_v42 = vshll.u32 %v9107_v48, 16 }
 0x42e   : > { %v11822_v14 = vmax.f32 %v11758_v59, 0.0  ;;  %v7893_v59 = vpack.c.b16 %v7846_v21, %v7845_v19  ;;  %v12628_v41 = vrot.slane %v7354_v36, 9  ;;  %v11220_v50 = vpack.c.b16 %v11173_v13, %v11172_v44  ;;  %v10682_v36 = vld [vmem:[#allocation2 + $0x16c] sm:$0x1] }
 0x42f   : > { %v8035_v58 = vpop.f32.mrf.mxu1  ;;  %v10497_v35 = vadd.f32 %v10294_v0, %v8919_v54  ;;  %v7355_v0 = vld [vmem:[#allocation2 + $0x164] sm:$0x1]  ;;  %v7678_v54 = vrot.slane %v7353_v9, 5  ;;  %v11009_v48 = vrot.slane %v10682_v36, 5 }
 0x430   : > { %v13188_v62 = vpack.c.bf16 %v11822_v14, %v11821_v28  ;;  %v8237_v5 = vadd.f32 %v8035_v58, %v7171_v38  ;;  %v12627_v14 = vrot.slane %v7352_v46, 9  ;;  %v7682_v38 = vrot.slane %v7355_v0, 5  ;;  %v395_v0 = vld [vmem:[#allocation2 + $0x188] sm:$0x1] }
 0x431   : > { %v11360_v2 = vpop.f32.mrf.mxu0 }
 0x432   : > { %13320 = vst [vmem:[%s16308_s27 + $0x30] sm:$0xff] %v13188_v62   ;;  %v11563_v25 = vadd.f32 %v11360_v2, %v10497_v35  ;;  %v9649_v62 = vrot.slane %v9647_v29, 5  ;;  %v17148_v2 = vld [vmem:[#allocation32_spill] sm:$0xff]  ;;  %v16437_v57 = vsel %vm14367_vm11, %v12627_v14, %v7678_v54  ;;  %v12759_v54 = vld [vmem:[#allocation2 + $0x160] sm:$0xf] }
 0x433   : > { %v10296_v7 = vpop.f32.mrf.mxu3  ;;  %v7847_v9 = vunpack.c.l.b16 %v16437_v57  ;;  %v12760_v13 = vor.u32 %v13114_v17, %v12759_v54 }
 0x434   : > { %v8718_v34 = vpop.f32.mrf.mxu2  ;;  %11399 = vmatmul.bf16.gmra.mxu0 %v11219_v52  ;;  %v9105_v52 = vld [vmem:[#allocation2 + $0x170] sm:$0xf]  ;;  %v11759_v19 = vadd.f32 %v16413_v43, %v11563_v25  ;;  %v9106_v25 = vld [vmem:[#allocation2 + $0x174] sm:$0x1] }
 0x435   : > { %v8920_v16 = vadd.f32 %v8718_v34, %v8237_v5  ;;  %v7683_v5 = vsel %vm14367_vm11, %v12628_v41, %v7682_v38  ;;  %v9666_v23 = vshrl.u32 %v9105_v52, 16  ;;  %v9669_v49 = vshll.u32 %v9105_v52, 16 }
 0x436   : > { %v9650_v34 = vsel %vm14377_vm12, %v9645_v11, %v9649_v62  ;;  %v11823_v60 = vmax.f32 %v11759_v19, 0.0  ;;  %v9682_v41 = vrot.slane %v9680_v27, 4  ;;  %v9685_v38 = vrot.slane %v9683_v42, 5  ;;  %v9108_v62 = vld [vmem:[#allocation2 + $0x17c] sm:$0x1] }
 0x437   : > { %v10498_v37 = vadd.f32 %v10296_v7, %v8920_v16  ;;  %v8038_v28 = vpop.f32.mrf.mxu1  ;;  %v9664_v7 = vsel %vm14377_vm12, %v9659_v10, %v9663_v45  ;;  %v10108_v29 = vunpack.c.l.b16 %v9650_v34  ;;  %v9671_v53 = vrot.slane %v9669_v49, 5 }
 0x438   : > { %10338 = vmatmul.bf16.gmra.mxu3 %v10154_v8  ;;  %v8238_v26 = vadd.f32 %v8038_v28, %v17148_v2  ;;  %v10681_v8 = vld [vmem:[#allocation2 + $0x168] sm:$0xe]  ;;  %v10109_v40 = vunpack.c.l.b16 %v9664_v7  ;;  %v396_v52 = vsel %vm13721_vm4, 0, %v395_v0  ;;  %v638_v19 = vsel %vm13715_vm3, 0, %v637_v39 }
 0x439   : > { %8760 = vmatmul.bf16.gmra.mxu2 %v12756_v61  ;;  %v11362_v58 = vpop.f32.mrf.mxu0  ;;  %v10679_v61 = vld [vmem:[#allocation2 + $0x160] sm:$0xe]  ;;  %v11005_v10 = vrot.slane %v10680_v51, 5  ;;  %v12916_v45 = vrot.slane %v10681_v8, 9  ;;  %v9675_v2 = vshll.u32 %v9106_v25, 16  ;;  %v9686_v49 = vor.u32 %v9685_v38, %v9682_v41 }
 0x43a   : > { %v11564_v21 = vadd.f32 %v11362_v58, %v10498_v37  ;;  %8077 = vmatmul.bf16.gmra.mxu1 %v7893_v59  ;;  %v7848_v59 = vunpack.c.l.b16 %v7683_v5  ;;  %v9668_v37 = vrot.slane %v9666_v23, 4  ;;  %v12915_v11 = vrot.slane %v10679_v61, 9  ;;  %397 = vst [vmem:[#allocation2 + $0x188] sm:$0x1] %v396_v52  ;;  %v7358_v5 = vld [vmem:[#allocation2 + $0x170] sm:$0xe] }
 0x43b   : > { %v10299_v35 = vpop.f32.mrf.mxu3  ;;  %639 = vst [vmem:[#allocation2 + $0x18c] sm:$0x1] %v638_v19  ;;  %v7359_v23 = vld [vmem:[#allocation2 + $0x174] sm:$0x1]  ;;  %v12630_v51 = vrot.slane %v7358_v5, 9  ;;  %v9677_v8 = vrot.slane %v9675_v2, 5 }
 0x43c   : > { %v8721_v18 = vpop.f32.mrf.mxu2  ;;  %v11760_v4 = vadd.f32 %v16413_v43, %v11564_v21  ;;  %v9672_v57 = vor.u32 %v9671_v53, %v9668_v37  ;;  %v7894_v27 = vpack.c.b16 %v7848_v59, %v7847_v9  ;;  %v10683_v41 = vld [vmem:[#allocation2 + $0x170] sm:$0xe]  ;;  %v10684_v38 = vld [vmem:[#allocation2 + $0x174] sm:$0x1]  ;;  %v10685_v52 = vld [vmem:[#allocation2 + $0x178] sm:$0xe] }
 0x43d   : > { %v8921_v32 = vadd.f32 %v8721_v18, %v8238_v26  ;;  %v7356_v18 = vld [vmem:[#allocation2 + $0x168] sm:$0xe] }
 0x43e   : > { %v11824_v16 = vmax.f32 %v11760_v4, 0.0  ;;  %v12629_v7 = vrot.slane %v7356_v18, 9 }
 0x43f   : > { %v8040_v46 = vpop.f32.mrf.mxu1  ;;  %v10499_v14 = vadd.f32 %v10299_v35, %v8921_v32  ;;  %v10155_v35 = vpack.c.b16 %v10109_v40, %v10108_v29  ;;  %v9689_v32 = vshll.u32 %v9108_v62, 16  ;;  %v9109_v29 = vld [vmem:[#allocation2 + $0x180] sm:$0xf] }
 0x440   : > { %v13193_v30 = vpack.c.bf16 %v11824_v16, %v11823_v60  ;;  %v8239_v58 = vadd.f32 %v8040_v46, %v15340_v33  ;;  %v7357_v33 = vld [vmem:[#allocation2 + $0x16c] sm:$0x1]  ;;  %v11006_v60 = vsel %vm14367_vm11, %v12915_v11, %v11005_v10  ;;  %v11010_v16 = vsel %vm14367_vm11, %v12916_v45, %v11009_v48 }
 0x441   : > { %v11365_v28 = vpop.f32.mrf.mxu0  ;;  %v7686_v61 = vrot.slane %v7357_v33, 5  ;;  %v9673_v46 = vrot.slane %v9672_v57, 4  ;;  %v9691_v9 = vrot.slane %v9689_v32, 5  ;;  %v11174_v25 = vunpack.c.l.b16 %v11006_v60  ;;  %v13115_v32 = vld [vmem:[#allocation2 + $0x174] sm:$0xf0] }
 0x442   : > { %13321 = vst [vmem:[%s16308_s27 + $0x38] sm:$0xff] %v13193_v30   ;;  %v11565_v4 = vadd.f32 %v11365_v28, %v10499_v14  ;;  %v9687_v30 = vrot.slane %v9686_v49, 4  ;;  %v11175_v37 = vunpack.c.l.b16 %v11010_v16  ;;  %v9694_v19 = vshrl.u32 %v9109_v29, 16 }
 0x443   : > { %v10301_v44 = vpop.f32.mrf.mxu3  ;;  %v7687_v39 = vsel %vm14367_vm11, %v12629_v7, %v7686_v61  ;;  %v9678_v40 = vsel %vm14377_vm12, %v9673_v46, %v9677_v8  ;;  %v12917_v33 = vrot.slane %v10683_v41, 9  ;;  %v17149_v7 = vld [vmem:[#allocation35_spill] sm:$0xff]  ;;  %v7360_v41 = vld [vmem:[#allocation2 + $0x178] sm:$0xe] }
 0x444   : > { %v8723_v21 = vpop.f32.mrf.mxu2  ;;  %11404 = vmatmul.bf16.gmra.mxu0 %v11220_v50  ;;  %v7690_v50 = vrot.slane %v7359_v23, 5  ;;  %v11761_v36 = vadd.f32 %v16413_v43, %v11565_v4  ;;  %v9692_v62 = vsel %vm14377_vm12, %v9687_v30, %v9691_v9  ;;  %v12763_v4 = vld [vmem:[#allocation2 + $0x170] sm:$0xf]  ;;  %v11013_v23 = vrot.slane %v10684_v38, 5  ;;  %v7361_v38 = vld [vmem:[#allocation2 + $0x17c] sm:$0x1] }
 0x445   : > { %v8922_v26 = vadd.f32 %v8723_v21, %v8239_v58  ;;  %v9111_v58 = vld [vmem:[#allocation2 + $0x188] sm:$0xf]  ;;  %v9697_v21 = vshll.u32 %v9109_v29, 16  ;;  %v10111_v5 = vunpack.c.l.b16 %v9692_v62 }
 0x446   : > { %v7691_v17 = vsel %vm14367_vm11, %v12630_v51, %v7690_v50  ;;  %v11825_v11 = vmax.f32 %v11761_v36, 0.0  ;;  %v9708_v48 = vshrl.u32 %v9111_v58, 16  ;;  %v9711_v2 = vshll.u32 %v9111_v58, 16  ;;  %v9110_v51 = vld [vmem:[#allocation2 + $0x184] sm:$0x1] }
 0x447   : > { %v10500_v34 = vadd.f32 %v10301_v44, %v8922_v26  ;;  %v8043_v42 = vpop.f32.mrf.mxu1  ;;  %v11221_v26 = vpack.c.b16 %v11175_v37, %v11174_v25  ;;  %v7850_v18 = vunpack.c.l.b16 %v7691_v17  ;;  %v9699_v60 = vrot.slane %v9697_v21, 5  ;;  %v9112_v36 = vld [vmem:[#allocation2 + $0x18c] sm:$0x1]  ;;  %v7362_v58 = vld [vmem:[#allocation2 + $0x180] sm:$0xe] }
 0x448   : > { %10343 = vmatmul.bf16.gmra.mxu3 %v10155_v35  ;;  %v8240_v14 = vadd.f32 %v8043_v42, %v15381_v31  ;;  %v10686_v31 = vld [vmem:[#allocation2 + $0x17c] sm:$0x1]  ;;  %v10110_v35 = vunpack.c.l.b16 %v9678_v40  ;;  %v9696_v42 = vrot.slane %v9694_v19, 4  ;;  %v9710_v50 = vrot.slane %v9708_v48, 4 }
 0x449   : > { %8765 = vmatmul.bf16.gmra.mxu2 %v12760_v13  ;;  %v11367_v0 = vpop.f32.mrf.mxu0  ;;  %v7849_v13 = vunpack.c.l.b16 %v7687_v39  ;;  %v9713_v46 = vrot.slane %v9711_v2, 5  ;;  %v11014_v25 = vsel %vm14367_vm11, %v12917_v33, %v11013_v23  ;;  %v9703_v39 = vshll.u32 %v9110_v51, 16 }
 0x44a   : > { %v11566_v59 = vadd.f32 %v11367_v0, %v10500_v34  ;;  %8082 = vmatmul.bf16.gmra.mxu1 %v7894_v27  ;;  %v12918_v34 = vrot.slane %v10685_v52, 9  ;;  %v11017_v27 = vrot.slane %v10686_v31, 5  ;;  %v10156_v29 = vpack.c.b16 %v10111_v5, %v10110_v35  ;;  %v17150_v5 = vld [vmem:[#allocation13_spill] sm:$0xff] }
 0x44b   : > { %v10304_v54 = vpop.f32.mrf.mxu3  ;;  %v7895_v9 = vpack.c.b16 %v7850_v18, %v7849_v13  ;;  %v9717_v17 = vshll.u32 %v9112_v36, 16  ;;  %v11176_v52 = vunpack.c.l.b16 %v11014_v25  ;;  %v12631_v18 = vrot.slane %v7360_v41, 9  ;;  %v10687_v36 = vld [vmem:[#allocation2 + $0x180] sm:$0xe]  ;;  %v10690_v25 = vld [vmem:[#allocation2 + $0x18c] sm:$0x1] }
 0x44c   : > { %v8726_v53 = vpop.f32.mrf.mxu2  ;;  %v11762_v28 = vadd.f32 %v16413_v43, %v11566_v59  ;;  %v12764_v59 = vor.u32 %v13115_v32, %v12763_v4  ;;  %v11018_v37 = vsel %vm14367_vm11, %v12918_v34, %v11017_v27  ;;  %v7694_v33 = vrot.slane %v7361_v38, 5 }
 0x44d   : > { %v8923_v45 = vadd.f32 %v8726_v53, %v8240_v14  ;;  %v9700_v53 = vor.u32 %v9699_v60, %v9696_v42  ;;  %v11177_v19 = vunpack.c.l.b16 %v11018_v37 }
 0x44e   : > { %v11826_v10 = vmax.f32 %v11762_v28, 0.0 }
 0x44f   : > { %v8045_v44 = vpop.f32.mrf.mxu1  ;;  %v10501_v16 = vadd.f32 %v10304_v54, %v8923_v45  ;;  %v9714_v54 = vor.u32 %v9713_v46, %v9710_v50  ;;  %v9701_v21 = vrot.slane %v9700_v53, 4  ;;  %v9113_v45 = vld [vmem:[#allocation2 + $0x1a0] sm:$0xf]  ;;  %v7695_v46 = vsel %vm14367_vm11, %v12631_v18, %v7694_v33  ;;  %v7365_v18 = vld [vmem:[#allocation2 + $0x19c] sm:$0x1] }
 0x450   : > { %v13198_v57 = vpack.c.bf16 %v11826_v10, %v11825_v11  ;;  %v8241_v61 = vadd.f32 %v8045_v44, %v17149_v7  ;;  %v7363_v11 = vld [vmem:[#allocation2 + $0x184] sm:$0x1]  ;;  %v9705_v10 = vrot.slane %v9703_v39, 5  ;;  %v9115_v44 = vld [vmem:[#allocation2 + $0x1a8] sm:$0xf]  ;;  %v9722_v32 = vshrl.u32 %v9113_v45, 16 }
 0x451   : > { %v11370_v49 = vpop.f32.mrf.mxu0  ;;  %v9715_v2 = vrot.slane %v9714_v54, 4  ;;  %v7698_v4 = vrot.slane %v7363_v11, 5  ;;  %v9725_v34 = vshll.u32 %v9113_v45, 16  ;;  %v9736_v42 = vshrl.u32 %v9115_v44, 16 }
 0x452   : > { %13322 = vst [vmem:[%s16308_s27 + $0x40] sm:$0xff] %v13198_v57   ;;  %v11567_v28 = vadd.f32 %v11370_v49, %v10501_v16  ;;  %v12632_v57 = vrot.slane %v7362_v58, 9  ;;  %v9706_v27 = vsel %vm14377_vm12, %v9701_v21, %v9705_v10  ;;  %v9739_v60 = vshll.u32 %v9115_v44, 16  ;;  %v17151_v58 = vld [vmem:[#allocation15_spill] sm:$0xff]  ;;  %v9116_v10 = vld [vmem:[#allocation2 + $0x1ac] sm:$0x1] }
 0x453   : > { %v10306_v30 = vpop.f32.mrf.mxu3  ;;  %v9724_v37 = vrot.slane %v9722_v32, 4  ;;  %v9727_v53 = vrot.slane %v9725_v34, 5 }
 0x454   : > { %v8728_v8 = vpop.f32.mrf.mxu2  ;;  %11409 = vmatmul.bf16.gmra.mxu0 %v11221_v26  ;;  %v11763_v31 = vadd.f32 %v16413_v43, %v11567_v28  ;;  %v9719_v26 = vrot.slane %v9717_v17, 5  ;;  %v13116_v28 = vld [vmem:[#allocation2 + $0x184] sm:$0xf0]  ;;  %v9114_v17 = vld [vmem:[#allocation2 + $0x1a4] sm:$0x1]  ;;  %v9741_v41 = vrot.slane %v9739_v60, 5 }
 0x455   : > { %v8924_v0 = vadd.f32 %v8728_v8, %v8241_v61  ;;  %v7699_v8 = vsel %vm14367_vm11, %v12632_v57, %v7698_v4  ;;  %v9728_v33 = vor.u32 %v9727_v53, %v9724_v37  ;;  %v9731_v57 = vshll.u32 %v9114_v17, 16 }
 0x456   : > { %v11827_v16 = vmax.f32 %v11763_v31, 0.0  ;;  %v9720_v51 = vsel %vm14377_vm12, %v9715_v2, %v9719_v26  ;;  %v7852_v21 = vunpack.c.l.b16 %v7699_v8 }
 0x457   : > { %v10502_v14 = vadd.f32 %v10306_v30, %v8924_v0  ;;  %v8048_v40 = vpop.f32.mrf.mxu1  ;;  %v10688_v0 = vld [vmem:[#allocation2 + $0x184] sm:$0x1]  ;;  %v10689_v30 = vld [vmem:[#allocation2 + $0x188] sm:$0xe]  ;;  %v10113_v54 = vunpack.c.l.b16 %v9720_v51  ;;  %v9733_v8 = vrot.slane %v9731_v57, 5 }
 0x458   : > { %10348 = vmatmul.bf16.gmra.mxu3 %v10156_v29  ;;  %v8242_v23 = vadd.f32 %v8048_v40, %v17150_v5  ;;  %v12767_v29 = vld [vmem:[#allocation2 + $0x180] sm:$0xf]  ;;  %v9738_v40 = vrot.slane %v9736_v42, 4  ;;  %v12920_v31 = vrot.slane %v10689_v30, 9  ;;  %v7367_v5 = vld [vmem:[#allocation2 + $0x1a4] sm:$0x1] }
 0x459   : > { %8770 = vmatmul.bf16.gmra.mxu2 %v12764_v59  ;;  %v11372_v62 = vpop.f32.mrf.mxu0  ;;  %v11222_v59 = vpack.c.b16 %v11177_v19, %v11176_v52  ;;  %v12919_v52 = vrot.slane %v10687_v36, 9  ;;  %v11021_v19 = vrot.slane %v10688_v0, 5  ;;  %v12768_v44 = vor.u32 %v13116_v28, %v12767_v29  ;;  %v9117_v29 = vld [vmem:[#allocation2 + $0x1b0] sm:$0xf]  ;;  %v10694_v57 = vld [vmem:[#allocation2 + $0x1ac] sm:$0x1] }
 0x45a   : > { %v11568_v48 = vadd.f32 %v11372_v62, %v10502_v14  ;;  %8087 = vmatmul.bf16.gmra.mxu1 %v7895_v9  ;;  %v10112_v14 = vunpack.c.l.b16 %v9706_v27  ;;  %v7851_v62 = vunpack.c.l.b16 %v7695_v46  ;;  %v9729_v46 = vrot.slane %v9728_v33, 4  ;;  %v10693_v33 = vld [vmem:[#allocation2 + $0x1a8] sm:$0xe] }
 0x45b   : > { %v10309_v49 = vpop.f32.mrf.mxu3  ;;  %v11022_v60 = vsel %vm14367_vm11, %v12919_v52, %v11021_v19 }
 0x45c   : > { %v8731_v13 = vpop.f32.mrf.mxu2  ;;  %v11764_v35 = vadd.f32 %v16413_v43, %v11568_v48  ;;  %v11025_v48 = vrot.slane %v10690_v25, 5  ;;  %v10157_v4 = vpack.c.b16 %v10113_v54, %v10112_v14  ;;  %v7896_v27 = vpack.c.b16 %v7852_v21, %v7851_v62  ;;  %v9119_v25 = vld [vmem:[#allocation2 + $0x1b8] sm:$0xf]  ;;  %v17152_v54 = vld [vmem:[#allocation45_spill] sm:$0xff] }
 0x45d   : > { %v8925_v61 = vadd.f32 %v8731_v13, %v8242_v23  ;;  %v7364_v13 = vld [vmem:[#allocation2 + $0x198] sm:$0xe]  ;;  %v9742_v23 = vor.u32 %v9741_v41, %v9738_v40  ;;  %v11178_v37 = vunpack.c.l.b16 %v11022_v60  ;;  %v9753_v62 = vshll.u32 %v9117_v29, 16 }
 0x45e   : > { %v11828_v7 = vmax.f32 %v11764_v35, 0.0  ;;  %v7366_v35 = vld [vmem:[#allocation2 + $0x1a0] sm:$0xe]  ;;  %v9764_v21 = vshrl.u32 %v9119_v25, 16  ;;  %v9767_v19 = vshll.u32 %v9119_v25, 16 }
 0x45f   : > { %v8050_v50 = vpop.f32.mrf.mxu1  ;;  %v10503_v38 = vadd.f32 %v10309_v49, %v8925_v61  ;;  %v9745_v49 = vshll.u32 %v9116_v10, 16  ;;  %v7702_v61 = vrot.slane %v7365_v18, 5  ;;  %v12634_v51 = vrot.slane %v7366_v35, 9  ;;  %v10692_v18 = vld [vmem:[#allocation2 + $0x1a4] sm:$0x1] }
 0x460   : > { %v13203_v9 = vpack.c.bf16 %v11828_v7, %v11827_v16  ;;  %v8243_v11 = vadd.f32 %v8050_v50, %v17151_v58  ;;  %v11026_v16 = vsel %vm14367_vm11, %v12920_v31, %v11025_v48  ;;  %v12633_v7 = vrot.slane %v7364_v13, 9  ;;  %v10691_v48 = vld [vmem:[#allocation2 + $0x1a0] sm:$0xe]  ;;  %v7369_v25 = vld [vmem:[#allocation2 + $0x1ac] sm:$0x1] }
 0x461   : > { %v11375_v39 = vpop.f32.mrf.mxu0  ;;  %v7706_v50 = vrot.slane %v7367_v5, 5  ;;  %v9743_v0 = vrot.slane %v9742_v23, 4  ;;  %v9747_v30 = vrot.slane %v9745_v49, 5  ;;  %v11179_v53 = vunpack.c.l.b16 %v11026_v16  ;;  %v12771_v35 = vld [vmem:[#allocation2 + $0x1a0] sm:$0xf] }
 0x462   : > { %13323 = vst [vmem:[%s16308_s27 + $0x48] sm:$0xff] %v13203_v9   ;;  %v11569_v32 = vadd.f32 %v11375_v39, %v10503_v38  ;;  %v7703_v28 = vsel %vm14367_vm11, %v12633_v7, %v7702_v61  ;;  %v9734_v38 = vsel %vm14377_vm12, %v9729_v46, %v9733_v8  ;;  %v13117_v5 = vld [vmem:[#allocation2 + $0x1a4] sm:$0xf0]  ;;  %v9118_v16 = vld [vmem:[#allocation2 + $0x1b4] sm:$0x1]  ;;  %v9766_v7 = vrot.slane %v9764_v21, 4 }
 0x463   : > { %v10311_v26 = vpop.f32.mrf.mxu3  ;;  %v7707_v41 = vsel %vm14367_vm11, %v12634_v51, %v7706_v50  ;;  %v9748_v58 = vsel %vm14377_vm12, %v9743_v0, %v9747_v30  ;;  %v10114_v23 = vunpack.c.l.b16 %v9734_v38  ;;  %v9769_v61 = vrot.slane %v9767_v19, 5  ;;  %v9120_v8 = vld [vmem:[#allocation2 + $0x1bc] sm:$0x1] }
 0x464   : > { %v8733_v45 = vpop.f32.mrf.mxu2  ;;  %11414 = vmatmul.bf16.gmra.mxu0 %v11222_v59  ;;  %v11765_v9 = vadd.f32 %v16413_v43, %v11569_v32  ;;  %v7854_v13 = vunpack.c.l.b16 %v7707_v41  ;;  %v10115_v49 = vunpack.c.l.b16 %v9748_v58  ;;  %v12921_v50 = vrot.slane %v10691_v48, 9 }
 0x465   : > { %v8926_v2 = vadd.f32 %v8733_v45, %v8243_v11  ;;  %v9750_v11 = vshrl.u32 %v9117_v29, 16  ;;  %v11029_v46 = vrot.slane %v10692_v18, 5  ;;  %v12772_v30 = vor.u32 %v13117_v5, %v12771_v35  ;;  %v7368_v29 = vld [vmem:[#allocation2 + $0x1a8] sm:$0xe] }
 0x466   : > { %v11829_v10 = vmax.f32 %v11765_v9, 0.0  ;;  %v12922_v9 = vrot.slane %v10693_v33, 9  ;;  %v9770_v41 = vor.u32 %v9769_v61, %v9766_v7  ;;  %v9773_v38 = vshll.u32 %v9120_v8, 16  ;;  %v9123_v33 = vld [vmem:[#allocation2 + $0x1c8] sm:$0xf] }
 0x467   : > { %v10504_v34 = vadd.f32 %v10311_v26, %v8926_v2  ;;  %v8053_v42 = vpop.f32.mrf.mxu1  ;;  %v11223_v26 = vpack.c.b16 %v11179_v53, %v11178_v37  ;;  %v9752_v32 = vrot.slane %v9750_v11, 4  ;;  %v10158_v53 = vpack.c.b16 %v10115_v49, %v10114_v23 }
 0x468   : > { %10353 = vmatmul.bf16.gmra.mxu3 %v10157_v4  ;;  %v8244_v17 = vadd.f32 %v8053_v42, %v17152_v54  ;;  %v17153_v42 = vld [vmem:[#allocation16_spill] sm:$0xff]  ;;  %v9759_v54 = vshll.u32 %v9118_v16, 16  ;;  %v12635_v11 = vrot.slane %v7368_v29, 9  ;;  %v11030_v21 = vsel %vm14367_vm11, %v12921_v50, %v11029_v46 }
 0x469   : > { %8775 = vmatmul.bf16.gmra.mxu2 %v12768_v44  ;;  %v11377_v36 = vpop.f32.mrf.mxu0  ;;  %v7853_v44 = vunpack.c.l.b16 %v7703_v28  ;;  %v7371_v28 = vld [vmem:[#allocation2 + $0x1b4] sm:$0x1]  ;;  %v9775_v18 = vrot.slane %v9773_v38, 5  ;;  %v11180_v35 = vunpack.c.l.b16 %v11030_v21  ;;  %v9792_v61 = vshrl.u32 %v9123_v33, 16 }
 0x46a   : > { %v11570_v59 = vadd.f32 %v11377_v36, %v10504_v34  ;;  %8092 = vmatmul.bf16.gmra.mxu1 %v7896_v27  ;;  %v9755_v34 = vrot.slane %v9753_v62, 5  ;;  %v7710_v62 = vrot.slane %v7369_v25, 5  ;;  %v9761_v48 = vrot.slane %v9759_v54, 5  ;;  %v10697_v25 = vld [vmem:[#allocation2 + $0x1b8] sm:$0xe] }
 0x46b   : > { %v10314_v40 = vpop.f32.mrf.mxu3  ;;  %v7897_v37 = vpack.c.b16 %v7854_v13, %v7853_v44  ;;  %v9771_v13 = vrot.slane %v9770_v41, 4  ;;  %v9794_v21 = vrot.slane %v9792_v61, 4 }
 0x46c   : > { %v8736_v39 = vpop.f32.mrf.mxu2  ;;  %v11766_v14 = vadd.f32 %v16413_v43, %v11570_v59  ;;  %v11033_v59 = vrot.slane %v10694_v57, 5  ;;  %v17154_v57 = vld [vmem:[#allocation36_spill] sm:$0xff]  ;;  %v16512_v49 = vsel %vm14367_vm11, %v12635_v11, %v7710_v62 }
 0x46d   : > { %v8927_v52 = vadd.f32 %v8736_v39, %v8244_v17  ;;  %v7370_v39 = vld [vmem:[#allocation2 + $0x1b0] sm:$0xe]  ;;  %v9776_v8 = vsel %vm14377_vm12, %v9771_v13, %v9775_v18  ;;  %v13118_v11 = vld [vmem:[#allocation2 + $0x1b4] sm:$0xf0] }
 0x46e   : > { %v11830_v45 = vmax.f32 %v11766_v14, 0.0  ;;  %v9756_v14 = vor.u32 %v9755_v34, %v9752_v32  ;;  %v10117_v62 = vunpack.c.l.b16 %v9776_v8 }
 0x46f   : > { %v8055_v31 = vpop.f32.mrf.mxu1  ;;  %v10505_v27 = vadd.f32 %v10314_v40, %v8927_v52  ;;  %v7714_v52 = vrot.slane %v7371_v28, 5 }
 0x470   : > { %v13208_v2 = vpack.c.bf16 %v11830_v45, %v11829_v10  ;;  %v8245_v60 = vadd.f32 %v8055_v31, %v17153_v42  ;;  %v11034_v10 = vsel %vm14367_vm11, %v12922_v9, %v11033_v59  ;;  %v12636_v45 = vrot.slane %v7370_v39, 9 }
 0x471   : > { %v11380_v4 = vpop.f32.mrf.mxu0  ;;  %v9757_v31 = vrot.slane %v9756_v14, 4  ;;  %v11181_v5 = vunpack.c.l.b16 %v11034_v10  ;;  %v7855_v59 = vunpack.c.l.b16 %v16512_v49  ;;  %v9122_v14 = vld [vmem:[#allocation2 + $0x1c4] sm:$0x1] }
 0x472   : > { %13324 = vst [vmem:[%s16308_s27 + $0x50] sm:$0xff] %v13208_v2   ;;  %v11571_v17 = vadd.f32 %v11380_v4, %v10505_v27  ;;  %v9121_v2 = vld [vmem:[#allocation2 + $0x1c0] sm:$0xf]  ;;  %v7715_v27 = vsel %vm14367_vm11, %v12636_v45, %v7714_v52  ;;  %v9787_v18 = vshll.u32 %v9122_v14, 16 }
 0x473   : > { %v10316_v0 = vpop.f32.mrf.mxu3  ;;  %v9778_v42 = vshrl.u32 %v9121_v2, 16  ;;  %v9762_v7 = vsel %vm14377_vm12, %v9757_v31, %v9761_v48  ;;  %v7856_v29 = vunpack.c.l.b16 %v7715_v27 }
 0x474   : > { %v8738_v51 = vpop.f32.mrf.mxu2  ;;  %11419 = vmatmul.bf16.gmra.mxu0 %v11223_v26  ;;  %v11767_v26 = vadd.f32 %v16413_v43, %v11571_v17  ;;  %v10116_v28 = vunpack.c.l.b16 %v9762_v7 }
 0x475   : > { %v8928_v36 = vadd.f32 %v8738_v51, %v8245_v60  ;;  %v9781_v60 = vshll.u32 %v9121_v2, 16  ;;  %v9795_v51 = vshll.u32 %v9123_v33, 16  ;;  %v9780_v54 = vrot.slane %v9778_v42, 4 }
 0x476   : > { %v11831_v50 = vmax.f32 %v11767_v26, 0.0  ;;  %v10159_v49 = vpack.c.b16 %v10117_v62, %v10116_v28  ;;  %v10700_v62 = vld [vmem:[#allocation2 + $0x1c4] sm:$0x1] }
 0x477   : > { %v10506_v40 = vadd.f32 %v10316_v0, %v8928_v36  ;;  %v8058_v58 = vpop.f32.mrf.mxu1  ;;  %v10695_v36 = vld [vmem:[#allocation2 + $0x1b0] sm:$0xe]  ;;  %v10696_v0 = vld [vmem:[#allocation2 + $0x1b4] sm:$0x1]  ;;  %v9783_v17 = vrot.slane %v9781_v60, 5  ;;  %v9797_v10 = vrot.slane %v9795_v51, 5 }
 0x478   : > { %10358 = vmatmul.bf16.gmra.mxu3 %v10158_v53  ;;  %v8246_v4 = vadd.f32 %v8058_v58, %v17154_v57  ;;  %v425_v53 = vld [vmem:[#allocation2 + $0x1d8] sm:$0x1]  ;;  %v12775_v58 = vld [vmem:[#allocation2 + $0x1b0] sm:$0xf]  ;;  %v12923_v52 = vrot.slane %v10695_v36, 9  ;;  %v11037_v26 = vrot.slane %v10696_v0, 5 }
 0x479   : > { %8780 = vmatmul.bf16.gmra.mxu2 %v12772_v30  ;;  %v11382_v19 = vpop.f32.mrf.mxu0  ;;  %v11224_v30 = vpack.c.b16 %v11181_v5, %v11180_v35  ;;  %v426_v31 = vsel %vm13721_vm4, 0, %v425_v53  ;;  %v7372_v35 = vld [vmem:[#allocation2 + $0x1b8] sm:$0xe]  ;;  %v9784_v5 = vor.u32 %v9783_v17, %v9780_v54  ;;  %v9798_v27 = vor.u32 %v9797_v10, %v9794_v21  ;;  %v9125_v53 = vld [vmem:[#allocation2 + $0x1d0] sm:$0xf] }
 0x47a   : > { %v11572_v44 = vadd.f32 %v11382_v19, %v10506_v40  ;;  %8097 = vmatmul.bf16.gmra.mxu1 %v7897_v37  ;;  %v10698_v37 = vld [vmem:[#allocation2 + $0x1bc] sm:$0x1]  ;;  %v9124_v19 = vld [vmem:[#allocation2 + $0x1cc] sm:$0x1]  ;;  %427 = vst [vmem:[#allocation2 + $0x1d8] sm:$0x1] %v426_v31  ;;  %v11038_v61 = vsel %vm14367_vm11, %v12923_v52, %v11037_v26 }
 0x47b   : > { %v10319_v34 = vpop.f32.mrf.mxu3  ;;  %v667_v40 = vld [vmem:[#allocation2 + $0x1dc] sm:$0x1]  ;;  %v11041_v13 = vrot.slane %v10698_v37, 5  ;;  %v9801_v42 = vshll.u32 %v9124_v19, 16  ;;  %v9785_v0 = vrot.slane %v9784_v5, 4  ;;  %v9799_v37 = vrot.slane %v9798_v27, 4 }
 0x47c   : > { %v8741_v23 = vpop.f32.mrf.mxu2  ;;  %v11768_v32 = vadd.f32 %v16413_v43, %v11572_v44  ;;  %v668_v48 = vsel %vm13715_vm3, 0, %v667_v40  ;;  %v12924_v44 = vrot.slane %v10697_v25, 9  ;;  %v10701_v52 = vld [vmem:[#allocation2 + $0x1c8] sm:$0xe]  ;;  %v9806_v19 = vshrl.u32 %v9125_v53, 16 }
 0x47d   : > { %v8929_v16 = vadd.f32 %v8741_v23, %v8246_v4  ;;  %v12776_v4 = vor.u32 %v13118_v11, %v12775_v58  ;;  %669 = vst [vmem:[#allocation2 + $0x1dc] sm:$0x1] %v668_v48  ;;  %v10699_v11 = vld [vmem:[#allocation2 + $0x1c0] sm:$0xe]  ;;  %v9809_v31 = vshll.u32 %v9125_v53, 16 }
 0x47e   : > { %v11832_v46 = vmax.f32 %v11768_v32, 0.0  ;;  %v7374_v32 = vld [vmem:[#allocation2 + $0x1c0] sm:$0xe]  ;;  %v11042_v51 = vsel %vm14367_vm11, %v12924_v44, %v11041_v13 }
 0x47f   : > { %v8060_v9 = vpop.f32.mrf.mxu1  ;;  %v10507_v38 = vadd.f32 %v10319_v34, %v8929_v16  ;;  %v7375_v34 = vld [vmem:[#allocation2 + $0x1c4] sm:$0x1]  ;;  %v7898_v16 = vpack.c.b16 %v7856_v29, %v7855_v59  ;;  %v12638_v8 = vrot.slane %v7374_v32, 9  ;;  %v9803_v59 = vrot.slane %v9801_v42, 5  ;;  %v13119_v32 = vld [vmem:[#allocation2 + $0x1c4] sm:$0xf0] }
 0x480   : > { %v13213_v39 = vpack.c.bf16 %v11832_v46, %v11831_v50  ;;  %v8247_v45 = vadd.f32 %v8060_v9, %v15571_v12  ;;  %v7373_v12 = vld [vmem:[#allocation2 + $0x1bc] sm:$0x1]  ;;  %v12637_v50 = vrot.slane %v7372_v35, 9  ;;  %v7722_v36 = vrot.slane %v7375_v34, 5  ;;  %v12779_v35 = vld [vmem:[#allocation2 + $0x1c0] sm:$0xf] }
 0x481   : > { %v11385_v41 = vpop.f32.mrf.mxu0  ;;  %v7718_v46 = vrot.slane %v7373_v12, 5  ;;  %v11183_v28 = vunpack.c.l.b16 %v11042_v51  ;;  %v9127_v21 = vld [vmem:[#allocation2 + $0x1d8] sm:$0xf]  ;;  %v12926_v34 = vrot.slane %v10701_v52, 9  ;;  %v9808_v42 = vrot.slane %v9806_v19, 4 }
 0x482   : > { %13325 = vst [vmem:[%s16308_s27 + $0x58] sm:$0xff] %v13213_v39   ;;  %v11573_v23 = vadd.f32 %v11385_v41, %v10507_v38  ;;  %v11182_v39 = vunpack.c.l.b16 %v11038_v61  ;;  %v7723_v38 = vsel %vm14367_vm11, %v12638_v8, %v7722_v36  ;;  %v9823_v26 = vshll.u32 %v9127_v21, 16  ;;  %v9126_v61 = vld [vmem:[#allocation2 + $0x1d4] sm:$0x1]  ;;  %v16552_v52 = vld [vmem:[%s16808_s2] ss:$0 sm:$0xff] }
 0x483   : > { %v10321_v57 = vpop.f32.mrf.mxu3  ;;  %v7719_v54 = vsel %vm14367_vm11, %v12637_v50, %v7718_v46  ;;  %v9815_v53 = vshll.u32 %v9126_v61, 16 }
 0x484   : > { %v8743_v2 = vpop.f32.mrf.mxu2  ;;  %11424 = vmatmul.bf16.gmra.mxu0 %v11224_v30  ;;  %v9789_v30 = vrot.slane %v9787_v18, 5  ;;  %v11769_v9 = vadd.f32 %v16413_v43, %v11573_v23  ;;  %v11225_v44 = vpack.c.b16 %v11183_v28, %v11182_v39  ;;  %v7857_v18 = vunpack.c.l.b16 %v7719_v54  ;;  %v9128_v8 = vld [vmem:[#allocation2 + $0x1dc] sm:$0x1] }
 0x485   : > { %v8930_v33 = vadd.f32 %v8743_v2, %v8247_v45  ;;  %v9804_v45 = vsel %vm14377_vm12, %v9799_v37, %v9803_v59  ;;  %v9820_v2 = vshrl.u32 %v9127_v21, 16  ;;  %v11045_v23 = vrot.slane %v10700_v62, 5 }
 0x486   : > { %v9790_v58 = vsel %vm14377_vm12, %v9785_v0, %v9789_v30  ;;  %v11833_v10 = vmax.f32 %v11769_v9, 0.0  ;;  %v10119_v5 = vunpack.c.l.b16 %v9804_v45  ;;  %v9825_v50 = vrot.slane %v9823_v26, 5  ;;  %v9129_v45 = vld [vmem:[#allocation2 + $0x1f0] sm:$0xf] }
 0x487   : > { %v10508_v60 = vadd.f32 %v10321_v57, %v8930_v33  ;;  %v8063_v7 = vpop.f32.mrf.mxu1  ;;  %v7858_v33 = vunpack.c.l.b16 %v7723_v38  ;;  %v12925_v57 = vrot.slane %v10699_v11, 9  ;;  %v10118_v12 = vunpack.c.l.b16 %v9790_v58  ;;  %v7379_v38 = vld [vmem:[#allocation2 + $0x1d4] sm:$0x1] }
 0x488   : > { %10363 = vmatmul.bf16.gmra.mxu3 %v10159_v49  ;;  %v8248_v40 = vadd.f32 %v8063_v7, %v15580_v24  ;;  %v10702_v24 = vld [vmem:[#allocation2 + $0x1cc] sm:$0x1]  ;;  %v9822_v51 = vrot.slane %v9820_v2, 4  ;;  %v12780_v9 = vor.u32 %v13119_v32, %v12779_v35 }
 0x489   : > { %8785 = vmatmul.bf16.gmra.mxu2 %v12776_v4  ;;  %v11387_v25 = vpop.f32.mrf.mxu0  ;;  %v11049_v27 = vrot.slane %v10702_v24, 5  ;;  %v7899_v30 = vpack.c.b16 %v7858_v33, %v7857_v18  ;;  %v11046_v37 = vsel %vm14367_vm11, %v12925_v57, %v11045_v23  ;;  %v9131_v24 = vld [vmem:[#allocation2 + $0x1f8] sm:$0xf]  ;;  %v7730_v18 = vrot.slane %v7379_v38, 5  ;;  %v17155_v57 = vld [vmem:[#allocation37_spill] sm:$0xff] }
 0x48a   : > { %v11574_v29 = vadd.f32 %v11387_v25, %v10508_v60  ;;  %8102 = vmatmul.bf16.gmra.mxu1 %v7898_v16  ;;  %v9811_v60 = vrot.slane %v9809_v31, 5  ;;  %v10160_v25 = vpack.c.b16 %v10119_v5, %v10118_v12  ;;  %v9826_v28 = vor.u32 %v9825_v50, %v9822_v51  ;;  %v10703_v51 = vld [vmem:[#allocation2 + $0x1d0] sm:$0xe]  ;;  %v10704_v50 = vld [vmem:[#allocation2 + $0x1d4] sm:$0x1] }
 0x48b   : > { %v10324_v41 = vpop.f32.mrf.mxu3  ;;  %v11050_v59 = vsel %vm14367_vm11, %v12926_v34, %v11049_v27  ;;  %v11184_v11 = vunpack.c.l.b16 %v11046_v37  ;;  %v9834_v12 = vshrl.u32 %v9129_v45, 16  ;;  %v9837_v5 = vshll.u32 %v9129_v45, 16  ;;  %v9132_v38 = vld [vmem:[#allocation2 + $0x1fc] sm:$0x1] }
 0x48c   : > { %v8746_v14 = vpop.f32.mrf.mxu2  ;;  %v11770_v17 = vadd.f32 %v16413_v43, %v11574_v29  ;;  %v9812_v29 = vor.u32 %v9811_v60, %v9808_v42  ;;  %v11185_v62 = vunpack.c.l.b16 %v11050_v59  ;;  %v9851_v32 = vshll.u32 %v9131_v24, 16  ;;  %v13120_v59 = vld [vmem:[#allocation2 + $0x1d4] sm:$0xf0] }
 0x48d   : > { %v8931_v48 = vadd.f32 %v8746_v14, %v8248_v40  ;;  %v9829_v14 = vshll.u32 %v9128_v8, 16  ;;  %v7377_v40 = vld [vmem:[#allocation2 + $0x1cc] sm:$0x1] }
 0x48e   : > { %v11834_v43 = vmax.f32 %v11770_v17, 0.0  ;;  %v7376_v17 = vld [vmem:[#allocation2 + $0x1c8] sm:$0xe]  ;;  %v9813_v21 = vrot.slane %v9812_v29, 4 }
 0x48f   : > { %v8065_v13 = vpop.f32.mrf.mxu1  ;;  %v10509_v16 = vadd.f32 %v10324_v41, %v8931_v48  ;;  %v7378_v41 = vld [vmem:[#allocation2 + $0x1d0] sm:$0xe]  ;;  %v9831_v48 = vrot.slane %v9829_v14, 5  ;;  %v12639_v26 = vrot.slane %v7376_v17, 9 }
 0x490   : > { %v13218_v4 = vpack.c.bf16 %v11834_v43, %v11833_v10  ;;  %v8249_v7 = vadd.f32 %v8065_v13, %v15611_v22  ;;  %v9817_v10 = vrot.slane %v9815_v53, 5  ;;  %v9827_v43 = vrot.slane %v9826_v28, 4 }
 0x491   : > { %v11390_v49 = vpop.f32.mrf.mxu0  ;;  %v12640_v13 = vrot.slane %v7378_v41, 9  ;;  %v9853_v28 = vrot.slane %v9851_v32, 5 }
 0x492   : > { %13326 = vst [vmem:[%s16308_s27 + $0x60] sm:$0xff] %v13218_v4   ;;  %v11575_v22 = vadd.f32 %v11390_v49, %v10509_v16  ;;  %v9818_v23 = vsel %vm14377_vm12, %v9813_v21, %v9817_v10  ;;  %v9848_v49 = vshrl.u32 %v9131_v24, 16  ;;  %v9832_v60 = vsel %vm14377_vm12, %v9827_v43, %v9831_v48  ;;  %v7380_v43 = vld [vmem:[#allocation2 + $0x1e8] sm:$0xe]  ;;  %v7381_v48 = vld [vmem:[#allocation2 + $0x1ec] sm:$0x1] }
 0x493   : > { %v10326_v0 = vpop.f32.mrf.mxu3  ;;  %v7731_v61 = vsel %vm14367_vm11, %v12640_v13, %v7730_v18  ;;  %v10120_v29 = vunpack.c.l.b16 %v9818_v23  ;;  %v10121_v53 = vunpack.c.l.b16 %v9832_v60  ;;  %v7383_v13 = vld [vmem:[#allocation2 + $0x1f4] sm:$0x1]  ;;  %v7734_v32 = vrot.slane %v7381_v48, 5 }
 0x494   : > { %v8748_v46 = vpop.f32.mrf.mxu2  ;;  %11429 = vmatmul.bf16.gmra.mxu0 %v11225_v44  ;;  %v11771_v19 = vadd.f32 %v16552_v52, %v11575_v22  ;;  %v7726_v44 = vrot.slane %v7377_v40, 5  ;;  %v9130_v22 = vld [vmem:[#allocation2 + $0x1f4] sm:$0x1]  ;;  %v7860_v41 = vunpack.c.l.b16 %v7731_v61 }
 0x495   : > { %v8932_v36 = vadd.f32 %v8748_v46, %v8249_v7  ;;  %v10705_v46 = vld [vmem:[#allocation2 + $0x1d8] sm:$0xe] }
 0x496   : > { %v11835_v34 = vmax.f32 %v11771_v19, 0.0  ;;  %v7727_v7 = vsel %vm14367_vm11, %v12639_v26, %v7726_v44  ;;  %v12928_v21 = vrot.slane %v10705_v46, 9  ;;  %v10161_v26 = vpack.c.b16 %v10121_v53, %v10120_v29  ;;  %v7382_v44 = vld [vmem:[#allocation2 + $0x1f0] sm:$0xe]  ;;  %v9133_v46 = vld [vmem:[#allocation2 + $0x200] sm:$0xf] }
 0x497   : > { %v10510_v39 = vadd.f32 %v10326_v0, %v8932_v36  ;;  %v8068_v54 = vpop.f32.mrf.mxu1  ;;  %v11226_v36 = vpack.c.b16 %v11185_v62, %v11184_v11  ;;  %v12783_v0 = vld [vmem:[#allocation2 + $0x1d0] sm:$0xf]  ;;  %v7859_v40 = vunpack.c.l.b16 %v7727_v7  ;;  %v12927_v11 = vrot.slane %v10703_v51, 9 }
 0x498   : > { %10368 = vmatmul.bf16.gmra.mxu3 %v10160_v25  ;;  %v8250_v4 = vadd.f32 %v8068_v54, %v17155_v57  ;;  %v9839_v25 = vrot.slane %v9837_v5, 5  ;;  %v17156_v54 = vld [vmem:[#allocation48_spill] sm:$0xff]  ;;  %v11053_v62 = vrot.slane %v10704_v50, 5 }
 0x499   : > { %8790 = vmatmul.bf16.gmra.mxu2 %v12780_v9  ;;  %v11392_v58 = vpop.f32.mrf.mxu0  ;;  %v9836_v9 = vrot.slane %v9834_v12, 4 }
 0x49a   : > { %v11576_v31 = vadd.f32 %v11392_v58, %v10510_v39  ;;  %8107 = vmatmul.bf16.gmra.mxu1 %v7899_v30  ;;  %v10706_v30 = vld [vmem:[#allocation2 + $0x1dc] sm:$0x1]  ;;  %v9850_v39 = vrot.slane %v9848_v49, 4  ;;  %v11054_v5 = vsel %vm14367_vm11, %v12927_v11, %v11053_v62  ;;  %v12641_v49 = vrot.slane %v7380_v43, 9  ;;  %v10707_v11 = vld [vmem:[#allocation2 + $0x1f0] sm:$0xe] }
 0x49b   : > { %v10329_v35 = vpop.f32.mrf.mxu3  ;;  %v11057_v10 = vrot.slane %v10706_v30, 5  ;;  %v9840_v24 = vor.u32 %v9839_v25, %v9836_v9  ;;  %v10710_v43 = vld [vmem:[#allocation2 + $0x1fc] sm:$0x1] }
 0x49c   : > { %v8751_v2 = vpop.f32.mrf.mxu2  ;;  %v11772_v33 = vadd.f32 %v16552_v52, %v11576_v31  ;;  %v12784_v31 = vor.u32 %v13120_v59, %v12783_v0  ;;  %v9854_v18 = vor.u32 %v9853_v28, %v9850_v39  ;;  %v7735_v9 = vsel %vm14367_vm11, %v12641_v49, %v7734_v32 }
 0x49d   : > { %v8933_v42 = vadd.f32 %v8751_v2, %v8250_v4  ;;  %v9843_v2 = vshll.u32 %v9130_v22, 16  ;;  %v11058_v23 = vsel %vm14367_vm11, %v12928_v21, %v11057_v10  ;;  %v9862_v28 = vshrl.u32 %v9133_v46, 16 }
 0x49e   : > { %v11836_v27 = vmax.f32 %v11772_v33, 0.0  ;;  %v9857_v33 = vshll.u32 %v9132_v38, 16  ;;  %v9855_v7 = vrot.slane %v9854_v18, 4  ;;  %v11187_v0 = vunpack.c.l.b16 %v11058_v23 }
 0x49f   : > { %v8070_v16 = vpop.f32.mrf.mxu1  ;;  %v10511_v14 = vadd.f32 %v10329_v35, %v8933_v42  ;;  %v7900_v35 = vpack.c.b16 %v7860_v41, %v7859_v40  ;;  %v9841_v42 = vrot.slane %v9840_v24, 4  ;;  %v9845_v60 = vrot.slane %v9843_v2, 5  ;;  %v12787_v24 = vld [vmem:[#allocation2 + $0x1f0] sm:$0xf]  ;;  %v13121_v2 = vld [vmem:[#allocation2 + $0x1f4] sm:$0xf0] }
 0x4a0   : > { %v13223_v8 = vpack.c.bf16 %v11836_v27, %v11835_v34  ;;  %v8251_v17 = vadd.f32 %v8070_v16, %v17156_v54  ;;  %v12642_v34 = vrot.slane %v7382_v44, 9  ;;  %v7738_v27 = vrot.slane %v7383_v13, 5 }
 0x4a1   : > { %v11395_v37 = vpop.f32.mrf.mxu0  ;;  %v9859_v61 = vrot.slane %v9857_v33, 5  ;;  %v9846_v22 = vsel %vm14377_vm12, %v9841_v42, %v9845_v60  ;;  %v7861_v10 = vunpack.c.l.b16 %v7735_v9  ;;  %v9864_v13 = vrot.slane %v9862_v28, 4 }
 0x4a2   : > { %13327 = vst [vmem:[%s16308_s27 + $0x68] sm:$0xff] %v13223_v8   ;;  %v11577_v57 = vadd.f32 %v11395_v37, %v10511_v14  ;;  %v9135_v8 = vld [vmem:[#allocation2 + $0x208] sm:$0xf]  ;;  %v17157_v37 = vld [vmem:[#allocation19_spill] sm:$0xff]  ;;  %v7739_v53 = vsel %vm14367_vm11, %v12642_v34, %v7738_v27  ;;  %v9865_v14 = vshll.u32 %v9133_v46, 16  ;;  %v12929_v49 = vrot.slane %v10707_v11, 9 }
 0x4a3   : > { %v10331_v19 = vpop.f32.mrf.mxu3  ;;  %v9860_v39 = vsel %vm14377_vm12, %v9855_v7, %v9859_v61  ;;  %v9876_v54 = vshrl.u32 %v9135_v8, 16  ;;  %v9879_v38 = vshll.u32 %v9135_v8, 16  ;;  %v9136_v34 = vld [vmem:[#allocation2 + $0x20c] sm:$0x1]  ;;  %v12788_v60 = vor.u32 %v13121_v2, %v12787_v24  ;;  %v7384_v61 = vld [vmem:[#allocation2 + $0x1f8] sm:$0xe] }
 0x4a4   : > { %v8753_v58 = vpop.f32.mrf.mxu2  ;;  %11434 = vmatmul.bf16.gmra.mxu0 %v11226_v36  ;;  %v11773_v51 = vadd.f32 %v16552_v52, %v11577_v57  ;;  %v11186_v36 = vunpack.c.l.b16 %v11054_v5  ;;  %v10123_v44 = vunpack.c.l.b16 %v9860_v39  ;;  %v9867_v18 = vrot.slane %v9865_v14, 5  ;;  %v17158_v57 = vld [vmem:[#allocation51_spill] sm:$0xff]  ;;  %v7386_v8 = vld [vmem:[#allocation2 + $0x200] sm:$0xe] }
 0x4a5   : > { %v8934_v45 = vadd.f32 %v8753_v58, %v8251_v17  ;;  %v9881_v5 = vrot.slane %v9879_v38, 5  ;;  %v11065_v7 = vrot.slane %v10710_v43, 5  ;;  %v12644_v14 = vrot.slane %v7386_v8, 9  ;;  %v9137_v38 = vld [vmem:[#allocation2 + $0x210] sm:$0xf] }
 0x4a6   : > { %v11837_v17 = vmax.f32 %v11773_v51, 0.0  ;;  %v11227_v21 = vpack.c.b16 %v11187_v0, %v11186_v36  ;;  %v7385_v51 = vld [vmem:[#allocation2 + $0x1fc] sm:$0x1]  ;;  %v7387_v36 = vld [vmem:[#allocation2 + $0x204] sm:$0x1]  ;;  %v9868_v0 = vor.u32 %v9867_v18, %v9864_v13  ;;  %v9890_v13 = vshrl.u32 %v9137_v38, 16 }
 0x4a7   : > { %v10512_v4 = vadd.f32 %v10331_v19, %v8934_v45  ;;  %v8073_v12 = vpop.f32.mrf.mxu1  ;;  %v7862_v45 = vunpack.c.l.b16 %v7739_v53  ;;  %v10708_v19 = vld [vmem:[#allocation2 + $0x1f4] sm:$0x1]  ;;  %v12643_v53 = vrot.slane %v7384_v61, 9  ;;  %v9893_v18 = vshll.u32 %v9137_v38, 16  ;;  %v455_v61 = vld [vmem:[#allocation2 + $0x228] sm:$0x1] }
 0x4a8   : > { %10373 = vmatmul.bf16.gmra.mxu3 %v10161_v26  ;;  %v8252_v59 = vadd.f32 %v8073_v12, %v17157_v37  ;;  %v10122_v26 = vunpack.c.l.b16 %v9846_v22  ;;  %v9878_v12 = vrot.slane %v9876_v54, 4  ;;  %v11061_v32 = vrot.slane %v10708_v19, 5 }
 0x4a9   : > { %8795 = vmatmul.bf16.gmra.mxu2 %v12784_v31  ;;  %v11397_v16 = vpop.f32.mrf.mxu0  ;;  %v10709_v31 = vld [vmem:[#allocation2 + $0x1f8] sm:$0xe]  ;;  %v7742_v22 = vrot.slane %v7385_v51, 5  ;;  %v7746_v54 = vrot.slane %v7387_v36, 5  ;;  %v9892_v8 = vrot.slane %v9890_v13, 4  ;;  %v9895_v36 = vrot.slane %v9893_v18, 5 }
 0x4aa   : > { %v11578_v50 = vadd.f32 %v11397_v16, %v10512_v4  ;;  %8112 = vmatmul.bf16.gmra.mxu1 %v7900_v35  ;;  %v9134_v35 = vld [vmem:[#allocation2 + $0x204] sm:$0x1]  ;;  %v12930_v16 = vrot.slane %v10709_v31, 9  ;;  %v10162_v46 = vpack.c.b16 %v10123_v44, %v10122_v26  ;;  %v9882_v37 = vor.u32 %v9881_v5, %v9878_v12 }
 0x4ab   : > { %v10334_v29 = vpop.f32.mrf.mxu3  ;;  %v11062_v39 = vsel %vm14367_vm11, %v12929_v49, %v11061_v32  ;;  %v16592_v24 = vsel %vm14367_vm11, %v12643_v53, %v7742_v22  ;;  %v7747_v44 = vsel %vm14367_vm11, %v12644_v14, %v7746_v54  ;;  %v10711_v49 = vld [vmem:[#allocation2 + $0x200] sm:$0xe]  ;;  %v10712_v32 = vld [vmem:[#allocation2 + $0x204] sm:$0x1]  ;;  %v17160_v22 = vld [vmem:[#allocation55_spill] sm:$0xff]  ;;  %v456_v54 = vsel %vm13721_vm4, 0, %v455_v61 }
 0x4ac   : > { %v8756_v30 = vpop.f32.mrf.mxu2  ;;  %v11774_v25 = vadd.f32 %v16552_v52, %v11578_v50  ;;  %v7901_v50 = vpack.c.b16 %v7862_v45, %v7861_v10  ;;  %v11066_v28 = vsel %vm14367_vm11, %v12930_v16, %v11065_v7  ;;  %v9139_v10 = vld [vmem:[#allocation2 + $0x218] sm:$0xf]  ;;  %v11188_v31 = vunpack.c.l.b16 %v11062_v39  ;;  %v10713_v16 = vld [vmem:[#allocation2 + $0x208] sm:$0xe]  ;;  %v10714_v7 = vld [vmem:[#allocation2 + $0x20c] sm:$0x1] }
 0x4ad   : > { %v8935_v41 = vadd.f32 %v8756_v30, %v8252_v59  ;;  %v9871_v30 = vshll.u32 %v9134_v35, 16  ;;  %v9885_v59 = vshll.u32 %v9136_v34, 16  ;;  %v17159_v45 = vld [vmem:[#allocation20_spill] sm:$0xff]  ;;  %v11189_v43 = vunpack.c.l.b16 %v11066_v28  ;;  %457 = vst [vmem:[#allocation2 + $0x228] sm:$0x1] %v456_v54 }
 0x4ae   : > { %v11838_v40 = vmax.f32 %v11774_v25, 0.0  ;;  %v9907_v35 = vshll.u32 %v9139_v10, 16  ;;  %v12931_v28 = vrot.slane %v10711_v49, 9  ;;  %v9140_v14 = vld [vmem:[#allocation2 + $0x21c] sm:$0x1]  ;;  %v12932_v38 = vrot.slane %v10713_v16, 9 }
 0x4af   : > { %v8075_v58 = vpop.f32.mrf.mxu1  ;;  %v10513_v33 = vadd.f32 %v10334_v29, %v8935_v41  ;;  %v9873_v41 = vrot.slane %v9871_v30, 5  ;;  %v11228_v34 = vpack.c.b16 %v11189_v43, %v11188_v31  ;;  %v9896_v31 = vor.u32 %v9895_v36, %v9892_v8  ;;  %v17161_v36 = vld [vmem:[#allocation25_spill] sm:$0xff] }
 0x4b0   : > { %v13228_v62 = vpack.c.bf16 %v11838_v40, %v11837_v17  ;;  %v8253_v4 = vadd.f32 %v8075_v58, %v17158_v57  ;;  %v9869_v40 = vrot.slane %v9868_v0, 4  ;;  %v697_v0 = vld [vmem:[#allocation2 + $0x22c] sm:$0x1]  ;;  %v9909_v53 = vrot.slane %v9907_v35, 5 }
 0x4b1   : > { %v11400_v48 = vpop.f32.mrf.mxu0  ;;  %v9897_v49 = vrot.slane %v9896_v31, 4 }
 0x4b2   : > { %13328 = vst [vmem:[%s16308_s27 + $0x70] sm:$0xff] %v13228_v62   ;;  %v11579_v9 = vadd.f32 %v11400_v48, %v10513_v33  ;;  %v9883_v62 = vrot.slane %v9882_v37, 4  ;;  %v9874_v57 = vsel %vm14377_vm12, %v9869_v40, %v9873_v41  ;;  %v13122_v37 = vld [vmem:[#allocation2 + $0x204] sm:$0xf0]  ;;  %v11069_v41 = vrot.slane %v10712_v32, 5 }
 0x4b3   : > { %v10336_v42 = vpop.f32.mrf.mxu3 }
 0x4b4   : > { %v8758_v23 = vpop.f32.mrf.mxu2  ;;  %11439 = vmatmul.bf16.gmra.mxu0 %v11227_v21  ;;  %v11775_v58 = vadd.f32 %v16552_v52, %v11579_v9  ;;  %v9887_v21 = vrot.slane %v9885_v59, 5 }
 0x4b5   : > { %v8936_v27 = vadd.f32 %v8758_v23, %v8253_v4  ;;  %v9904_v4 = vshrl.u32 %v9139_v10, 16 }
 0x4b6   : > { %v11839_v12 = vmax.f32 %v11775_v58, 0.0  ;;  %v9888_v23 = vsel %vm14377_vm12, %v9883_v62, %v9887_v21  ;;  %v11073_v58 = vrot.slane %v10714_v7, 5  ;;  %v9141_v7 = vld [vmem:[#allocation2 + $0x220] sm:$0xf] }
 0x4b7   : > { %v10514_v25 = vadd.f32 %v10336_v42, %v8936_v27  ;;  %v8078_v29 = vpop.f32.mrf.mxu1  ;;  %v7863_v42 = vunpack.c.l.b16 %v16592_v24  ;;  %v10125_v59 = vunpack.c.l.b16 %v9888_v23  ;;  %v7390_v24 = vld [vmem:[#allocation2 + $0x210] sm:$0xe] }
 0x4b8   : > { %10378 = vmatmul.bf16.gmra.mxu3 %v10162_v46  ;;  %v8254_v19 = vadd.f32 %v8078_v29, %v17159_v45  ;;  %v9138_v46 = vld [vmem:[#allocation2 + $0x214] sm:$0x1]  ;;  %v9906_v29 = vrot.slane %v9904_v4, 4  ;;  %v7388_v45 = vld [vmem:[#allocation2 + $0x208] sm:$0xe]  ;;  %v11074_v4 = vsel %vm14367_vm11, %v12932_v38, %v11073_v58 }
 0x4b9   : > { %8800 = vmatmul.bf16.gmra.mxu2 %v12788_v60  ;;  %v11402_v17 = vpop.f32.mrf.mxu0  ;;  %v7864_v60 = vunpack.c.l.b16 %v7747_v44  ;;  %v9913_v44 = vshll.u32 %v9140_v14, 16  ;;  %v12645_v35 = vrot.slane %v7388_v45, 9  ;;  %v9921_v14 = vshll.u32 %v9141_v7, 16 }
 0x4ba   : > { %v11580_v11 = vadd.f32 %v11402_v17, %v10514_v25  ;;  %8117 = vmatmul.bf16.gmra.mxu1 %v7901_v50  ;;  %v10124_v50 = vunpack.c.l.b16 %v9874_v57  ;;  %v12791_v25 = vld [vmem:[#allocation2 + $0x200] sm:$0xf]  ;;  %v698_v17 = vsel %vm13715_vm3, 0, %v697_v0  ;;  %v11070_v57 = vsel %vm14367_vm11, %v12931_v28, %v11069_v41 }
 0x4bb   : > { %v10339_v26 = vpop.f32.mrf.mxu3  ;;  %v12792_v10 = vor.u32 %v13122_v37, %v12791_v25  ;;  %699 = vst [vmem:[#allocation2 + $0x22c] sm:$0x1] %v698_v17  ;;  %v7902_v18 = vpack.c.b16 %v7864_v60, %v7863_v42  ;;  %v9915_v42 = vrot.slane %v9913_v44, 5  ;;  %v11190_v61 = vunpack.c.l.b16 %v11070_v57  ;;  %v10715_v37 = vld [vmem:[#allocation2 + $0x210] sm:$0xe]  ;;  %v17162_v57 = vld [vmem:[#allocation26_spill] sm:$0xff] }
 0x4bc   : > { %v8761_v48 = vpop.f32.mrf.mxu2  ;;  %v11776_v2 = vadd.f32 %v16552_v52, %v11580_v11  ;;  %v9899_v11 = vshll.u32 %v9138_v46, 16  ;;  %v9918_v28 = vshrl.u32 %v9141_v7, 16 }
 0x4bd   : > { %v8937_v33 = vadd.f32 %v8761_v48, %v8254_v19  ;;  %v7389_v19 = vld [vmem:[#allocation2 + $0x20c] sm:$0x1]  ;;  %v10163_v48 = vpack.c.b16 %v10125_v59, %v10124_v50  ;;  %v10716_v59 = vld [vmem:[#allocation2 + $0x214] sm:$0x1] }
 0x4be   : > { %v11840_v5 = vmax.f32 %v11776_v2, 0.0  ;;  %v7391_v2 = vld [vmem:[#allocation2 + $0x214] sm:$0x1]  ;;  %v9901_v32 = vrot.slane %v9899_v11, 5 }
 0x4bf   : > { %v8080_v27 = vpop.f32.mrf.mxu1  ;;  %v10515_v9 = vadd.f32 %v10339_v26, %v8937_v33  ;;  %v9910_v26 = vor.u32 %v9909_v53, %v9906_v29  ;;  %v7754_v23 = vrot.slane %v7391_v2, 5  ;;  %v9143_v29 = vld [vmem:[#allocation2 + $0x228] sm:$0xf]  ;;  %v13123_v2 = vld [vmem:[#allocation2 + $0x214] sm:$0xf0] }
 0x4c0   : > { %v13233_v51 = vpack.c.bf16 %v11840_v5, %v11839_v12  ;;  %v8255_v39 = vadd.f32 %v8080_v27, %v17160_v22  ;;  %v7750_v12 = vrot.slane %v7389_v19, 5  ;;  %v12646_v5 = vrot.slane %v7390_v24, 9  ;;  %v12795_v19 = vld [vmem:[#allocation2 + $0x210] sm:$0xf] }
 0x4c1   : > { %v11405_v30 = vpop.f32.mrf.mxu0  ;;  %v9911_v16 = vrot.slane %v9910_v26, 4  ;;  %v9902_v25 = vsel %vm14377_vm12, %v9897_v49, %v9901_v32  ;;  %v9932_v41 = vshrl.u32 %v9143_v29, 16  ;;  %v9935_v38 = vshll.u32 %v9143_v29, 16 }
 0x4c2   : > { %13329 = vst [vmem:[%s16308_s27 + $0x78] sm:$0xff] %v13233_v51   ;;  %v11581_v43 = vadd.f32 %v11405_v30, %v10515_v9  ;;  %v11191_v51 = vunpack.c.l.b16 %v11074_v4  ;;  %v7751_v46 = vsel %vm14367_vm11, %v12645_v35, %v7750_v12  ;;  %v7755_v9 = vsel %vm14367_vm11, %v12646_v5, %v7754_v23  ;;  %v9142_v35 = vld [vmem:[#allocation2 + $0x224] sm:$0x1]  ;;  %v9144_v49 = vld [vmem:[#allocation2 + $0x22c] sm:$0x1] }
 0x4c3   : > { %v10341_v21 = vpop.f32.mrf.mxu3  ;;  %v9916_v22 = vsel %vm14377_vm12, %v9911_v16, %v9915_v42  ;;  %v10126_v31 = vunpack.c.l.b16 %v9902_v25  ;;  %v9934_v12 = vrot.slane %v9932_v41, 4  ;;  %v9937_v5 = vrot.slane %v9935_v38, 5  ;;  %v7394_v25 = vld [vmem:[#allocation2 + $0x220] sm:$0xe]  ;;  %v9147_v41 = vld [vmem:[#allocation2 + $0x248] sm:$0xf] }
 0x4c4   : > { %v8763_v40 = vpop.f32.mrf.mxu2  ;;  %11444 = vmatmul.bf16.gmra.mxu0 %v11228_v34  ;;  %v11777_v34 = vadd.f32 %v16552_v52, %v11581_v43  ;;  %v11229_v58 = vpack.c.b16 %v11191_v51, %v11190_v61  ;;  %v10127_v43 = vunpack.c.l.b16 %v9916_v22  ;;  %v12796_v16 = vor.u32 %v13123_v2, %v12795_v19 }
 0x4c5   : > { %v8938_v62 = vadd.f32 %v8763_v40, %v8255_v39  ;;  %v10717_v39 = vld [vmem:[#allocation2 + $0x218] sm:$0xe]  ;;  %v10718_v40 = vld [vmem:[#allocation2 + $0x21c] sm:$0x1]  ;;  %v9927_v51 = vshll.u32 %v9142_v35, 16  ;;  %v9960_v2 = vshrl.u32 %v9147_v41, 16 }
 0x4c6   : > { %v11841_v53 = vmax.f32 %v11777_v34, 0.0  ;;  %v12934_v26 = vrot.slane %v10717_v39, 9  ;;  %v11081_v44 = vrot.slane %v10718_v40, 5  ;;  %v10164_v42 = vpack.c.b16 %v10127_v43, %v10126_v31 }
 0x4c7   : > { %v10516_v13 = vadd.f32 %v10341_v21, %v8938_v62  ;;  %v8083_v33 = vpop.f32.mrf.mxu1  ;;  %v7865_v62 = vunpack.c.l.b16 %v7751_v46  ;;  %v7866_v21 = vunpack.c.l.b16 %v7755_v9  ;;  %v7393_v9 = vld [vmem:[#allocation2 + $0x21c] sm:$0x1]  ;;  %v9929_v39 = vrot.slane %v9927_v51, 5 }
 0x4c8   : > { %10383 = vmatmul.bf16.gmra.mxu3 %v10163_v48  ;;  %v8256_v0 = vadd.f32 %v8083_v33, %v17161_v36  ;;  %v11077_v48 = vrot.slane %v10716_v59, 5  ;;  %v11082_v7 = vsel %vm14367_vm11, %v12934_v26, %v11081_v44  ;;  %v9941_v36 = vshll.u32 %v9144_v49, 16  ;;  %v10719_v49 = vld [vmem:[#allocation2 + $0x220] sm:$0xe] }
 0x4c9   : > { %8805 = vmatmul.bf16.gmra.mxu2 %v12792_v10  ;;  %v11407_v27 = vpop.f32.mrf.mxu0  ;;  %v12933_v10 = vrot.slane %v10715_v37, 9  ;;  %v7395_v37 = vld [vmem:[#allocation2 + $0x224] sm:$0x1]  ;;  %v9963_v26 = vshll.u32 %v9147_v41, 16  ;;  %v7396_v41 = vld [vmem:[#allocation2 + $0x238] sm:$0xe] }
 0x4ca   : > { %v11582_v60 = vadd.f32 %v11407_v27, %v10516_v13  ;;  %8122 = vmatmul.bf16.gmra.mxu1 %v7902_v18  ;;  %v9920_v13 = vrot.slane %v9918_v28, 4  ;;  %v9923_v18 = vrot.slane %v9921_v14, 5  ;;  %v7903_v27 = vpack.c.b16 %v7866_v21, %v7865_v62  ;;  %v9145_v28 = vld [vmem:[#allocation2 + $0x240] sm:$0xf] }
 0x4cb   : > { %v10344_v30 = vpop.f32.mrf.mxu3  ;;  %v9943_v40 = vrot.slane %v9941_v36, 5  ;;  %v12648_v62 = vrot.slane %v7394_v25, 9  ;;  %v7762_v21 = vrot.slane %v7395_v37, 5  ;;  %v9946_v43 = vshrl.u32 %v9145_v28, 16  ;;  %v9146_v36 = vld [vmem:[#allocation2 + $0x244] sm:$0x1] }
 0x4cc   : > { %v8766_v50 = vpop.f32.mrf.mxu2  ;;  %v11778_v8 = vadd.f32 %v16552_v52, %v11582_v60  ;;  %v11078_v60 = vsel %vm14367_vm11, %v12933_v10, %v11077_v48  ;;  %v9924_v61 = vor.u32 %v9923_v18, %v9920_v13  ;;  %v9949_v48 = vshll.u32 %v9145_v28, 16 }
 0x4cd   : > { %v8939_v17 = vadd.f32 %v8766_v50, %v8256_v0  ;;  %v11192_v29 = vunpack.c.l.b16 %v11078_v60  ;;  %v10722_v60 = vld [vmem:[#allocation2 + $0x22c] sm:$0x1]  ;;  %v12935_v28 = vrot.slane %v10719_v49, 9 }
 0x4ce   : > { %v11842_v54 = vmax.f32 %v11778_v8, 0.0  ;;  %v9938_v8 = vor.u32 %v9937_v5, %v9934_v12  ;;  %v9925_v22 = vrot.slane %v9924_v61, 4  ;;  %v9951_v61 = vrot.slane %v9949_v48, 5 }
 0x4cf   : > { %v8085_v11 = vpop.f32.mrf.mxu1  ;;  %v10517_v33 = vadd.f32 %v10344_v30, %v8939_v17  ;;  %v7392_v30 = vld [vmem:[#allocation2 + $0x218] sm:$0xe] }
 0x4d0   : > { %v13238_v45 = vpack.c.bf16 %v11842_v54, %v11841_v53  ;;  %v8257_v4 = vadd.f32 %v8085_v11, %v17162_v57  ;;  %v11193_v53 = vunpack.c.l.b16 %v11082_v7  ;;  %v9939_v17 = vrot.slane %v9938_v8, 4  ;;  %v17164_v57 = vld [vmem:[#allocation60_spill] sm:$0xff] }
 0x4d1   : > { %v11410_v24 = vpop.f32.mrf.mxu0  ;;  %v7758_v11 = vrot.slane %v7393_v9, 5  ;;  %v9948_v7 = vrot.slane %v9946_v43, 4 }
 0x4d2   : > { %13330 = vst [vmem:[%s16308_s27 + $0x80] sm:$0xff] %v13238_v45   ;;  %v11583_v50 = vadd.f32 %v11410_v24, %v10517_v33  ;;  %v17163_v45 = vld [vmem:[#allocation41_spill] sm:$0xff]  ;;  %v9930_v24 = vsel %vm14377_vm12, %v9925_v22, %v9929_v39  ;;  %v9944_v33 = vsel %vm14377_vm12, %v9939_v17, %v9943_v40  ;;  %v9148_v22 = vld [vmem:[#allocation2 + $0x24c] sm:$0x1] }
 0x4d3   : > { %v10346_v34 = vpop.f32.mrf.mxu3  ;;  %v10129_v8 = vunpack.c.l.b16 %v9944_v33 }
 0x4d4   : > { %v8768_v23 = vpop.f32.mrf.mxu2  ;;  %11449 = vmatmul.bf16.gmra.mxu0 %v11229_v58  ;;  %v11779_v14 = vadd.f32 %v16552_v52, %v11583_v50  ;;  %v12647_v58 = vrot.slane %v7392_v30, 9  ;;  %v13124_v50 = vld [vmem:[#allocation2 + $0x224] sm:$0xf0]  ;;  %v9965_v30 = vrot.slane %v9963_v26, 5 }
 0x4d5   : > { %v8940_v32 = vadd.f32 %v8768_v23, %v8257_v4  ;;  %v17165_v4 = vld [vmem:[#allocation63_spill] sm:$0xff]  ;;  %v7763_v23 = vsel %vm14367_vm11, %v12648_v62, %v7762_v21  ;;  %v7398_v21 = vld [vmem:[#allocation2 + $0x240] sm:$0xe] }
 0x4d6   : > { %v11843_v44 = vmax.f32 %v11779_v14, 0.0  ;;  %v7193_v35 = vadd.f32 %v17165_v4, %v17164_v57  ;;  %v7759_v5 = vsel %vm14367_vm11, %v12647_v58, %v7758_v11  ;;  %v11089_v14 = vrot.slane %v10722_v60, 5 }
 0x4d7   : > { %v10518_v46 = vadd.f32 %v10346_v34, %v8940_v32  ;;  %v8088_v0 = vpop.f32.mrf.mxu1  ;;  %v10720_v32 = vld [vmem:[#allocation2 + $0x224] sm:$0x1]  ;;  %v10721_v34 = vld [vmem:[#allocation2 + $0x228] sm:$0xe]  ;;  %v7867_v37 = vunpack.c.l.b16 %v7759_v5  ;;  %v9952_v58 = vor.u32 %v9951_v61, %v9948_v7  ;;  %v9955_v11 = vshll.u32 %v9146_v36, 16 }
 0x4d8   : > { %10388 = vmatmul.bf16.gmra.mxu3 %v10164_v42  ;;  %v8258_v19 = vadd.f32 %v8088_v0, %v17163_v45  ;;  %v12799_v42 = vld [vmem:[#allocation2 + $0x220] sm:$0xf]  ;;  %v9962_v0 = vrot.slane %v9960_v2, 4  ;;  %v17166_v61 = vld [vmem:[#allocation66_spill] sm:$0xff] }
 0x4d9   : > { %8810 = vmatmul.bf16.gmra.mxu2 %v12796_v16  ;;  %v11412_v59 = vpop.f32.mrf.mxu0  ;;  %v11230_v16 = vpack.c.b16 %v11193_v53, %v11192_v29  ;;  %v11085_v29 = vrot.slane %v10720_v32, 5  ;;  %v12936_v53 = vrot.slane %v10721_v34, 9  ;;  %v12800_v40 = vor.u32 %v13124_v50, %v12799_v42  ;;  %v9149_v32 = vld [vmem:[#allocation2 + $0x250] sm:$0xf]  ;;  %v9151_v34 = vld [vmem:[#allocation2 + $0x258] sm:$0xf] }
 0x4da   : > { %v11584_v54 = vadd.f32 %v11412_v59, %v10518_v46  ;;  %8127 = vmatmul.bf16.gmra.mxu1 %v7903_v27  ;;  %v10128_v46 = vunpack.c.l.b16 %v9930_v24  ;;  %v7868_v59 = vunpack.c.l.b16 %v7763_v23  ;;  %v9966_v45 = vor.u32 %v9965_v30, %v9962_v0  ;;  %v10723_v36 = vld [vmem:[#allocation2 + $0x240] sm:$0xe]  ;;  %v10724_v0 = vld [vmem:[#allocation2 + $0x244] sm:$0x1] }
 0x4db   : > { %v10349_v31 = vpop.f32.mrf.mxu3  ;;  %v11086_v2 = vsel %vm14367_vm11, %v12935_v28, %v11085_v29  ;;  %v11090_v26 = vsel %vm14367_vm11, %v12936_v53, %v11089_v14  ;;  %v9953_v57 = vrot.slane %v9952_v58, 4  ;;  %v9957_v4 = vrot.slane %v9955_v11, 5  ;;  %v10726_v29 = vld [vmem:[#allocation2 + $0x24c] sm:$0x1]  ;;  %v12803_v58 = vld [vmem:[#allocation2 + $0x240] sm:$0xf] }
 0x4dc   : > { %v8771_v38 = vpop.f32.mrf.mxu2  ;;  %v11780_v10 = vadd.f32 %v16552_v52, %v11584_v54  ;;  %v10165_v62 = vpack.c.b16 %v10129_v8, %v10128_v46  ;;  %v7904_v48 = vpack.c.b16 %v7868_v59, %v7867_v37  ;;  %v9977_v37 = vshll.u32 %v9149_v32, 16 }
 0x4dd   : > { %v8941_v18 = vadd.f32 %v8771_v38, %v8258_v19  ;;  %v7397_v38 = vld [vmem:[#allocation2 + $0x23c] sm:$0x1]  ;;  %v9969_v19 = vshll.u32 %v9148_v22, 16  ;;  %v9958_v8 = vsel %vm14377_vm12, %v9953_v57, %v9957_v4  ;;  %v9988_v59 = vshrl.u32 %v9151_v34, 16 }
 0x4de   : > { %v11844_v13 = vmax.f32 %v11780_v10, 0.0  ;;  %v7399_v10 = vld [vmem:[#allocation2 + $0x244] sm:$0x1]  ;;  %v9991_v53 = vshll.u32 %v9151_v34, 16  ;;  %v10130_v11 = vunpack.c.l.b16 %v9958_v8 }
 0x4df   : > { %v8090_v12 = vpop.f32.mrf.mxu1  ;;  %v10519_v9 = vadd.f32 %v10349_v31, %v8941_v18  ;;  %v12650_v18 = vrot.slane %v7398_v21, 9  ;;  %v7770_v33 = vrot.slane %v7399_v10, 5  ;;  %v9971_v5 = vrot.slane %v9969_v19, 5 }
 0x4e0   : > { %v13243_v27 = vpack.c.bf16 %v11844_v13, %v11843_v44  ;;  %v8259_v25 = vadd.f32 %v8090_v12, %v7193_v35  ;;  %v12649_v44 = vrot.slane %v7396_v41, 9  ;;  %v7766_v13 = vrot.slane %v7397_v38, 5 }
 0x4e1   : > { %v11415_v51 = vpop.f32.mrf.mxu0  ;;  %v9967_v12 = vrot.slane %v9966_v45, 4  ;;  %v7771_v46 = vsel %vm14367_vm11, %v12650_v18, %v7770_v33  ;;  %v12937_v41 = vrot.slane %v10723_v36, 9  ;;  %v13125_v45 = vld [vmem:[#allocation2 + $0x244] sm:$0xf0]  ;;  %v9152_v33 = vld [vmem:[#allocation2 + $0x25c] sm:$0x1] }
 0x4e2   : > { %13331 = vst [vmem:[%s16308_s27 + $0x88] sm:$0xff] %v13243_v27   ;;  %v11585_v31 = vadd.f32 %v11415_v51, %v10519_v9  ;;  %v11194_v27 = vunpack.c.l.b16 %v11086_v2  ;;  %v7767_v60 = vsel %vm14367_vm11, %v12649_v44, %v7766_v13  ;;  %v10725_v9 = vld [vmem:[#allocation2 + $0x248] sm:$0xe]  ;;  %v9990_v44 = vrot.slane %v9988_v59, 4 }
 0x4e3   : > { %v10351_v17 = vpop.f32.mrf.mxu3  ;;  %v9972_v30 = vsel %vm14377_vm12, %v9967_v12, %v9971_v5  ;;  %v12938_v21 = vrot.slane %v10725_v9, 9  ;;  %v9993_v13 = vrot.slane %v9991_v53, 5  ;;  %v12804_v12 = vor.u32 %v13125_v45, %v12803_v58  ;;  %v9153_v9 = vld [vmem:[#allocation2 + $0x260] sm:$0xf] }
 0x4e4   : > { %v8773_v39 = vpop.f32.mrf.mxu2  ;;  %11454 = vmatmul.bf16.gmra.mxu0 %v11230_v16  ;;  %v11781_v23 = vadd.f32 %v16552_v52, %v11585_v31  ;;  %v11195_v16 = vunpack.c.l.b16 %v11090_v26  ;;  %v10131_v19 = vunpack.c.l.b16 %v9972_v30  ;;  %v11097_v31 = vrot.slane %v10726_v29, 5  ;;  %v9150_v26 = vld [vmem:[#allocation2 + $0x254] sm:$0x1] }
 0x4e5   : > { %v8942_v54 = vadd.f32 %v8773_v39, %v8259_v25  ;;  %v9974_v25 = vshrl.u32 %v9149_v32, 16  ;;  %v9983_v34 = vshll.u32 %v9150_v26, 16  ;;  %v10005_v58 = vshll.u32 %v9153_v9, 16 }
 0x4e6   : > { %v11845_v22 = vmax.f32 %v11781_v23, 0.0  ;;  %v11231_v14 = vpack.c.b16 %v11195_v16, %v11194_v27  ;;  %v10166_v23 = vpack.c.b16 %v10131_v19, %v10130_v11  ;;  %v9994_v16 = vor.u32 %v9993_v13, %v9990_v44  ;;  %v12807_v44 = vld [vmem:[#allocation2 + $0x250] sm:$0xf]  ;;  %v13126_v13 = vld [vmem:[#allocation2 + $0x254] sm:$0xf0] }
 0x4e7   : > { %v10520_v43 = vadd.f32 %v10351_v17, %v8942_v54  ;;  %v8093_v24 = vpop.f32.mrf.mxu1  ;;  %v7869_v17 = vunpack.c.l.b16 %v7767_v60  ;;  %v9985_v30 = vrot.slane %v9983_v34, 5 }
 0x4e8   : > { %10393 = vmatmul.bf16.gmra.mxu3 %v10165_v62  ;;  %v8260_v51 = vadd.f32 %v8093_v24, %v17166_v61  ;;  %v11093_v62 = vrot.slane %v10724_v0, 5  ;;  %v7401_v61 = vld [vmem:[#allocation2 + $0x24c] sm:$0x1]  ;;  %v9995_v59 = vrot.slane %v9994_v16, 4  ;;  %v9154_v16 = vld [vmem:[#allocation2 + $0x264] sm:$0x1] }
 0x4e9   : > { %8815 = vmatmul.bf16.gmra.mxu2 %v12800_v40  ;;  %v11417_v35 = vpop.f32.mrf.mxu0  ;;  %v7870_v40 = vunpack.c.l.b16 %v7771_v46  ;;  %v7774_v53 = vrot.slane %v7401_v61, 5 }
 0x4ea   : > { %v11586_v49 = vadd.f32 %v11417_v35, %v10520_v43  ;;  %8132 = vmatmul.bf16.gmra.mxu1 %v7904_v48  ;;  %v9976_v43 = vrot.slane %v9974_v25, 4  ;;  %v9979_v48 = vrot.slane %v9977_v37, 5  ;;  %v11094_v5 = vsel %vm14367_vm11, %v12937_v41, %v11093_v62 }
 0x4eb   : > { %v10354_v50 = vpop.f32.mrf.mxu3  ;;  %v7905_v35 = vpack.c.b16 %v7870_v40, %v7869_v17  ;;  %v11196_v8 = vunpack.c.l.b16 %v11094_v5  ;;  %v10730_v5 = vld [vmem:[#allocation2 + $0x25c] sm:$0x1] }
 0x4ec   : > { %v8776_v42 = vpop.f32.mrf.mxu2  ;;  %v11782_v7 = vadd.f32 %v16552_v52, %v11586_v49  ;;  %v11098_v49 = vsel %vm14367_vm11, %v12938_v21, %v11097_v31  ;;  %v9980_v32 = vor.u32 %v9979_v48, %v9976_v43  ;;  %v10727_v48 = vld [vmem:[#allocation2 + $0x250] sm:$0xe] }
 0x4ed   : > { %v8943_v28 = vadd.f32 %v8776_v42, %v8260_v51  ;;  %v9997_v42 = vshll.u32 %v9152_v33, 16  ;;  %v7402_v51 = vld [vmem:[#allocation2 + $0x250] sm:$0xe]  ;;  %v11197_v36 = vunpack.c.l.b16 %v11098_v49  ;;  %v10007_v33 = vrot.slane %v10005_v58, 5  ;;  %v485_v58 = vld [vmem:[#allocation2 + $0x278] sm:$0x1] }
 0x4ee   : > { %v11846_v39 = vmax.f32 %v11782_v7, 0.0  ;;  %v7400_v7 = vld [vmem:[#allocation2 + $0x248] sm:$0xe]  ;;  %v9981_v0 = vrot.slane %v9980_v32, 4  ;;  %v12939_v61 = vrot.slane %v10727_v48, 9  ;;  %v17167_v48 = vld [vmem:[#allocation69_spill] sm:$0xff] }
 0x4ef   : > { %v8095_v54 = vpop.f32.mrf.mxu1  ;;  %v10521_v24 = vadd.f32 %v10354_v50, %v8943_v28  ;;  %v7403_v50 = vld [vmem:[#allocation2 + $0x254] sm:$0x1]  ;;  %v12651_v29 = vrot.slane %v7400_v7, 9  ;;  %v11232_v26 = vpack.c.b16 %v11197_v36, %v11196_v8  ;;  %v12808_v7 = vor.u32 %v13126_v13, %v12807_v44 }
 0x4f0   : > { %v13248_v38 = vpack.c.bf16 %v11846_v39, %v11845_v22  ;;  %v8261_v2 = vadd.f32 %v8095_v54, %v15949_v6  ;;  %v9999_v22 = vrot.slane %v9997_v42, 5  ;;  %v9155_v39 = vld [vmem:[#allocation2 + $0x268] sm:$0xf]  ;;  %v7778_v54 = vrot.slane %v7403_v50, 5  ;;  %v9156_v42 = vld [vmem:[#allocation2 + $0x26c] sm:$0x1] }
 0x4f1   : > { %v11420_v10 = vpop.f32.mrf.mxu0  ;;  %v9986_v11 = vsel %vm14377_vm12, %v9981_v0, %v9985_v30  ;;  %v10016_v62 = vshrl.u32 %v9155_v39, 16  ;;  %v10019_v21 = vshll.u32 %v9155_v39, 16  ;;  %v11105_v36 = vrot.slane %v10730_v5, 5 }
 0x4f2   : > { %13332 = vst [vmem:[%s16308_s27 + $0x90] sm:$0xff] %v13248_v38   ;;  %v11587_v6 = vadd.f32 %v11420_v10, %v10521_v24  ;;  %v10002_v38 = vshrl.u32 %v9153_v9, 16  ;;  %v10000_v31 = vsel %vm14377_vm12, %v9995_v59, %v9999_v22  ;;  %v10728_v24 = vld [vmem:[#allocation2 + $0x254] sm:$0x1]  ;;  %v7404_v9 = vld [vmem:[#allocation2 + $0x258] sm:$0xe] }
 0x4f3   : > { %v10356_v4 = vpop.f32.mrf.mxu3  ;;  %v10021_v49 = vrot.slane %v10019_v21, 5 }
 0x4f4   : > { %v8778_v18 = vpop.f32.mrf.mxu2  ;;  %11459 = vmatmul.bf16.gmra.mxu0 %v11231_v14  ;;  %v11783_v25 = vadd.f32 %v16552_v52, %v11587_v6  ;;  %v12652_v14 = vrot.slane %v7402_v51, 9  ;;  %v11101_v51 = vrot.slane %v10728_v24, 5 }
 0x4f5   : > { %v8944_v57 = vadd.f32 %v8778_v18, %v8261_v2  ;;  %v10004_v18 = vrot.slane %v10002_v38, 4 }
 0x4f6   : > { %v11847_v10 = vmax.f32 %v11783_v25, 0.0  ;;  %v7405_v25 = vld [vmem:[#allocation2 + $0x25c] sm:$0x1] }
 0x4f7   : > { %v10522_v27 = vadd.f32 %v10356_v4, %v8944_v57  ;;  %v8098_v60 = vpop.f32.mrf.mxu1  ;;  %v10132_v4 = vunpack.c.l.b16 %v9986_v11  ;;  %v10008_v0 = vor.u32 %v10007_v33, %v10004_v18  ;;  %v727_v33 = vld [vmem:[#allocation2 + $0x27c] sm:$0x1] }
 0x4f8   : > { %10398 = vmatmul.bf16.gmra.mxu3 %v10166_v23  ;;  %v8262_v40 = vadd.f32 %v8098_v60, %v15951_v63  ;;  %v7779_v63 = vsel %vm14367_vm11, %v12652_v14, %v7778_v54  ;;  %v10018_v23 = vrot.slane %v10016_v62, 4  ;;  %v7406_v14 = vld [vmem:[#allocation2 + $0x260] sm:$0xe]  ;;  %v7407_v54 = vld [vmem:[#allocation2 + $0x264] sm:$0x1]  ;;  %v728_v5 = vsel %vm13715_vm3, 0, %v727_v33 }
 0x4f9   : > { %8820 = vmatmul.bf16.gmra.mxu2 %v12804_v12  ;;  %v11422_v46 = vpop.f32.mrf.mxu0  ;;  %v10729_v12 = vld [vmem:[#allocation2 + $0x258] sm:$0xe]  ;;  %v10009_v38 = vrot.slane %v10008_v0, 4  ;;  %729 = vst [vmem:[#allocation2 + $0x27c] sm:$0x1] %v728_v5 }
 0x4fa   : > { %v11588_v37 = vadd.f32 %v11422_v46, %v10522_v27  ;;  %8137 = vmatmul.bf16.gmra.mxu1 %v7905_v35  ;;  %v10133_v35 = vunpack.c.l.b16 %v10000_v31  ;;  %v7872_v27 = vunpack.c.l.b16 %v7779_v63  ;;  %v12940_v8 = vrot.slane %v10729_v12, 9  ;;  %v10731_v12 = vld [vmem:[#allocation2 + $0x260] sm:$0xe] }
 0x4fb   : > { %v10359_v41 = vpop.f32.mrf.mxu3  ;;  %v10022_v59 = vor.u32 %v10021_v49, %v10018_v23  ;;  %v7786_v63 = vrot.slane %v7407_v54, 5  ;;  %v12941_v0 = vrot.slane %v10731_v12, 9 }
 0x4fc   : > { %v8781_v28 = vpop.f32.mrf.mxu2  ;;  %v11784_v17 = vadd.f32 %v16552_v52, %v11588_v37  ;;  %v7775_v52 = vsel %vm14367_vm11, %v12651_v29, %v7774_v53  ;;  %v10167_v30 = vpack.c.b16 %v10133_v35, %v10132_v4  ;;  %v10011_v37 = vshll.u32 %v9154_v16, 16  ;;  %v10733_v16 = vld [vmem:[#allocation2 + $0x268] sm:$0xe] }
 0x4fd   : > { %v8945_v19 = vadd.f32 %v8781_v28, %v8262_v40  ;;  %v7871_v6 = vunpack.c.l.b16 %v7775_v52  ;;  %v11102_v53 = vsel %vm14367_vm11, %v12939_v61, %v11101_v51  ;;  %v12653_v40 = vrot.slane %v7404_v9, 9  ;;  %v12811_v61 = vld [vmem:[#allocation2 + $0x260] sm:$0xf]  ;;  %v9157_v9 = vld [vmem:[#allocation2 + $0x270] sm:$0xf] }
 0x4fe   : > { %v11848_v45 = vmax.f32 %v11784_v17, 0.0  ;;  %v11106_v17 = vsel %vm14367_vm11, %v12940_v8, %v11105_v36  ;;  %v10013_v62 = vrot.slane %v10011_v37, 5  ;;  %v10023_v21 = vrot.slane %v10022_v59, 4  ;;  %v13127_v36 = vld [vmem:[#allocation2 + $0x264] sm:$0xf0] }
 0x4ff   : > { %v8100_v43 = vpop.f32.mrf.mxu1  ;;  %v10523_v32 = vadd.f32 %v10359_v41, %v8945_v19  ;;  %v7906_v28 = vpack.c.b16 %v7872_v27, %v7871_v6  ;;  %v7782_v41 = vrot.slane %v7405_v25, 5  ;;  %v16686_v19 = vld [vmem:[%s16808_s2] ss:$0 sm:$0xff]  ;;  %v12654_v52 = vrot.slane %v7406_v14, 9  ;;  %v17168_v25 = vld [vmem:[#allocation30_spill] sm:$0xff] }
 0x500   : > { %v13253_v2 = vpack.c.bf16 %v11848_v45, %v11847_v10  ;;  %v8263_v34 = vadd.f32 %v8100_v43, %v16009_v56  ;;  %v10025_v56 = vshll.u32 %v9156_v42, 16  ;;  %v486_v45 = vsel %vm13721_vm4, 0, %v485_v58  ;;  %v10734_v42 = vld [vmem:[#allocation2 + $0x26c] sm:$0x1] }
 0x501   : > { %v11425_v57 = vpop.f32.mrf.mxu0  ;;  %487 = vst [vmem:[#allocation2 + $0x278] sm:$0x1] %v486_v45  ;;  %v7783_v18 = vsel %vm14367_vm11, %v12653_v40, %v7782_v41  ;;  %v10014_v4 = vsel %vm14377_vm12, %v10009_v38, %v10013_v62  ;;  %v12942_v59 = vrot.slane %v10733_v16, 9  ;;  %v9158_v41 = vld [vmem:[#allocation2 + $0x274] sm:$0x1] }
 0x502   : > { %13333 = vst [vmem:[%s16308_s27 + $0x98] sm:$0xff] %v13253_v2   ;;  %v11589_v22 = vadd.f32 %v11425_v57, %v10523_v32  ;;  %v10027_v10 = vrot.slane %v10025_v56, 5  ;;  %v11198_v2 = vunpack.c.l.b16 %v11102_v53  ;;  %v7787_v32 = vsel %vm14367_vm11, %v12654_v52, %v7786_v63  ;;  %v9160_v38 = vld [vmem:[#allocation2 + $0x27c] sm:$0x1]  ;;  %v7408_v45 = vld [vmem:[#allocation2 + $0x268] sm:$0xe] }
 0x503   : > { %v10361_v46 = vpop.f32.mrf.mxu3  ;;  %v10134_v51 = vunpack.c.l.b16 %v10014_v4  ;;  %v7874_v8 = vunpack.c.l.b16 %v7787_v32  ;;  %v11113_v56 = vrot.slane %v10734_v42, 5  ;;  %v12812_v53 = vor.u32 %v13127_v36, %v12811_v61  ;;  %v17169_v42 = vld [vmem:[#allocation42_spill] sm:$0xff] }
 0x504   : > { %v8783_v60 = vpop.f32.mrf.mxu2  ;;  %11464 = vmatmul.bf16.gmra.mxu0 %v11232_v26  ;;  %v11785_v31 = vadd.f32 %v16686_v19, %v11589_v22  ;;  %v11199_v26 = vunpack.c.l.b16 %v11106_v17  ;;  %v10028_v35 = vsel %vm14377_vm12, %v10023_v21, %v10027_v10  ;;  %v10030_v22 = vshrl.u32 %v9157_v9, 16 }
 0x505   : > { %v8946_v50 = vadd.f32 %v8783_v60, %v8263_v34  ;;  %v10732_v34 = vld [vmem:[#allocation2 + $0x264] sm:$0x1]  ;;  %v11114_v10 = vsel %vm14367_vm11, %v12942_v59, %v11113_v56  ;;  %v10039_v63 = vshll.u32 %v9158_v41, 16  ;;  %v12655_v12 = vrot.slane %v7408_v45, 9  ;;  %v12815_v59 = vld [vmem:[#allocation2 + $0x270] sm:$0xf] }
 0x506   : > { %v11849_v23 = vmax.f32 %v11785_v31, 0.0  ;;  %v11233_v6 = vpack.c.b16 %v11199_v26, %v11198_v2  ;;  %v10032_v58 = vrot.slane %v10030_v22, 4  ;;  %v7410_v2 = vld [vmem:[#allocation2 + $0x270] sm:$0xe]  ;;  %v7411_v26 = vld [vmem:[#allocation2 + $0x274] sm:$0x1]  ;;  %v11201_v33 = vunpack.c.l.b16 %v11114_v10 }
 0x507   : > { %v10524_v39 = vadd.f32 %v10361_v46, %v8946_v50  ;;  %v8103_v29 = vpop.f32.mrf.mxu1  ;;  %v10135_v50 = vunpack.c.l.b16 %v10028_v35  ;;  %v10041_v5 = vrot.slane %v10039_v63, 5 }
 0x508   : > { %10403 = vmatmul.bf16.gmra.mxu3 %v10167_v30  ;;  %v8264_v24 = vadd.f32 %v8103_v29, %v17167_v48  ;;  %v11109_v30 = vrot.slane %v10732_v34, 5  ;;  %v9159_v54 = vld [vmem:[#allocation2 + $0x278] sm:$0xf]  ;;  %v12656_v34 = vrot.slane %v7410_v2, 9 }
 0x509   : > { %8825 = vmatmul.bf16.gmra.mxu2 %v12808_v7  ;;  %v11427_v11 = vpop.f32.mrf.mxu0  ;;  %v7873_v7 = vunpack.c.l.b16 %v7783_v18  ;;  %v10168_v14 = vpack.c.b16 %v10135_v50, %v10134_v51  ;;  %v10044_v48 = vshrl.u32 %v9159_v54, 16 }
 0x50a   : > { %v11590_v43 = vadd.f32 %v11427_v11, %v10524_v39  ;;  %8142 = vmatmul.bf16.gmra.mxu1 %v7906_v28  ;;  %v11110_v40 = vsel %vm14367_vm11, %v12941_v0, %v11109_v30  ;;  %v10033_v11 = vshll.u32 %v9157_v9, 16 }
 0x50b   : > { %v10364_v13 = vpop.f32.mrf.mxu3  ;;  %v7907_v21 = vpack.c.b16 %v7874_v8, %v7873_v7  ;;  %v10046_v4 = vrot.slane %v10044_v48, 4 }
 0x50c   : > { %v8786_v44 = vpop.f32.mrf.mxu2  ;;  %v11786_v3 = vadd.f32 %v16686_v19, %v11590_v43  ;;  %v7409_v43 = vld [vmem:[#allocation2 + $0x26c] sm:$0x1]  ;;  %v10035_v52 = vrot.slane %v10033_v11, 5  ;;  %v10738_v11 = vld [vmem:[#allocation2 + $0x27c] sm:$0x1] }
 0x50d   : > { %v8947_v57 = vadd.f32 %v8786_v44, %v8264_v24  ;;  %v11200_v24 = vunpack.c.l.b16 %v11110_v40  ;;  %v10047_v44 = vshll.u32 %v9159_v54, 16  ;;  %v7790_v32 = vrot.slane %v7409_v43, 5 }
 0x50e   : > { %v11850_v49 = vmax.f32 %v11786_v3, 0.0  ;;  %v10053_v3 = vshll.u32 %v9160_v38, 16  ;;  %v11121_v63 = vrot.slane %v10738_v11, 5 }
 0x50f   : > { %v8105_v27 = vpop.f32.mrf.mxu1  ;;  %v10525_v1 = vadd.f32 %v10364_v13, %v8947_v57  ;;  %v10036_v57 = vor.u32 %v10035_v52, %v10032_v58  ;;  %v7791_v30 = vsel %vm14367_vm11, %v12655_v12, %v7790_v32  ;;  %v10737_v58 = vld [vmem:[#allocation2 + $0x278] sm:$0xe] }
 0x510   : > { %v13258_v60 = vpack.c.bf16 %v11850_v49, %v11849_v23  ;;  %v8265_v37 = vadd.f32 %v8105_v27, %v17168_v25  ;;  %v10049_v23 = vrot.slane %v10047_v44, 5  ;;  %v10055_v51 = vrot.slane %v10053_v3, 5 }
 0x511   : > { %v11430_v46 = vpop.f32.mrf.mxu0  ;;  %v10037_v27 = vrot.slane %v10036_v57, 4  ;;  %v7875_v41 = vunpack.c.l.b16 %v7791_v30  ;;  %v12944_v52 = vrot.slane %v10737_v58, 9 }
 0x512   : > { %13334 = vst [vmem:[%s16308_s27 + $0xa0] sm:$0xff] %v13258_v60   ;;  %v11591_v17 = vadd.f32 %v11430_v46, %v10525_v1  ;;  %v10050_v61 = vor.u32 %v10049_v23, %v10046_v4 }
 0x513   : > { %v10366_v29 = vpop.f32.mrf.mxu3  ;;  %v10042_v8 = vsel %vm14377_vm12, %v10037_v27, %v10041_v5 }
 0x514   : > { %v8788_v39 = vpop.f32.mrf.mxu2  ;;  %11469 = vmatmul.bf16.gmra.mxu0 %v11233_v6  ;;  %v11787_v13 = vadd.f32 %v16686_v19, %v11591_v17  ;;  %v7794_v6 = vrot.slane %v7411_v26, 5  ;;  %v10051_v36 = vrot.slane %v10050_v61, 4  ;;  %v17170_v17 = vld [vmem:[#allocation72_spill] sm:$0xff] }
 0x515   : > { %v8948_v28 = vadd.f32 %v8788_v39, %v8265_v37  ;;  %v11234_v37 = vpack.c.b16 %v11201_v33, %v11200_v24  ;;  %v13128_v39 = vld [vmem:[#allocation2 + $0x274] sm:$0xf0] }
 0x516   : > { %v11851_v50 = vmax.f32 %v11787_v13, 0.0  ;;  %v7795_v9 = vsel %vm14367_vm11, %v12656_v34, %v7794_v6  ;;  %v10056_v56 = vsel %vm14377_vm12, %v10051_v36, %v10055_v51  ;;  %v12816_v47 = vor.u32 %v13128_v39, %v12815_v59 }
 0x517   : > { %v10526_v62 = vadd.f32 %v10366_v29, %v8948_v28  ;;  %v8108_v31 = vpop.f32.mrf.mxu1  ;;  %v10136_v28 = vunpack.c.l.b16 %v10042_v8  ;;  %v10137_v29 = vunpack.c.l.b16 %v10056_v56  ;;  %v7876_v38 = vunpack.c.l.b16 %v7795_v9  ;;  %v17171_v9 = vld [vmem:[#allocation75_spill] sm:$0xff] }
 0x518   : > { %10408 = vmatmul.bf16.gmra.mxu3 %v10168_v14  ;;  %v8266_v60 = vadd.f32 %v8108_v31, %v17169_v42  ;;  %v10736_v14 = vld [vmem:[#allocation2 + $0x274] sm:$0x1]  ;;  %v11122_v13 = vsel %vm14367_vm11, %v12944_v52, %v11121_v63 }
 0x519   : > { %8830 = vmatmul.bf16.gmra.mxu2 %v12812_v53  ;;  %v11432_v18 = vpop.f32.mrf.mxu0  ;;  %v10735_v53 = vld [vmem:[#allocation2 + $0x270] sm:$0xe]  ;;  %v10169_v31 = vpack.c.b16 %v10137_v29, %v10136_v28  ;;  %v11117_v43 = vrot.slane %v10736_v14, 5  ;;  %v7908_v2 = vpack.c.b16 %v7876_v38, %v7875_v41  ;;  %v11203_v5 = vunpack.c.l.b16 %v11122_v13 }
 0x51a   : > { %v11592_v35 = vadd.f32 %v11432_v18, %v10526_v62  ;;  %8147 = vmatmul.bf16.gmra.mxu1 %v7907_v21  ;;  %v12943_v45 = vrot.slane %v10735_v53, 9  ;;  %v17172_v53 = vld [vmem:[#allocation78_spill] sm:$0xff] }
 0x51b   : > { %v10369_v7 = vpop.f32.mrf.mxu3 }
 0x51c   : > { %v8791_v49 = vpop.f32.mrf.mxu2  ;;  %v11788_v16 = vadd.f32 %v16686_v19, %v11592_v35  ;;  %v11118_v3 = vsel %vm14367_vm11, %v12943_v45, %v11117_v43  ;;  %v17173_v45 = vld [vmem:[#allocation81_spill] sm:$0xff] }
 0x51d   : > { %v8949_v1 = vadd.f32 %v8791_v49, %v8266_v60  ;;  %v11202_v12 = vunpack.c.l.b16 %v11118_v3  ;;  %v17174_v3 = vld [vmem:[#allocation84_spill] sm:$0xff] }
 0x51e   : > { %v11852_v46 = vmax.f32 %v11788_v16, 0.0 }
 0x51f   : > { %v8110_v0 = vpop.f32.mrf.mxu1  ;;  %v10527_v54 = vadd.f32 %v10369_v7, %v8949_v1  ;;  %v11235_v20 = vpack.c.b16 %v11203_v5, %v11202_v12 }
 0x520   : > { %v13263_v25 = vpack.c.bf16 %v11852_v46, %v11851_v50  ;;  %v8267_v40 = vadd.f32 %v8110_v0, %v17170_v17 }
 0x521   : > { %v11435_v22 = vpop.f32.mrf.mxu0 }
 0x522   : > { %13335 = vst [vmem:[%s16308_s27 + $0xa8] sm:$0xff] %v13263_v25   ;;  %v11593_v48 = vadd.f32 %v11435_v22, %v10527_v54 }
 0x523   : > { %v10371_v10 = vpop.f32.mrf.mxu3 }
 0x524   : > { %v8793_v62 = vpop.f32.mrf.mxu2  ;;  %11474 = vmatmul.bf16.gmra.mxu0 %v11234_v37  ;;  %v11789_v18 = vadd.f32 %v16686_v19, %v11593_v48 }
 0x525   : > { %v8950_v21 = vadd.f32 %v8793_v62, %v8267_v40 }
 0x526   : > { %v11853_v49 = vmax.f32 %v11789_v18, 0.0 }
 0x527   : > { %v10528_v24 = vadd.f32 %v10371_v10, %v8950_v21  ;;  %v8113_v26 = vpop.f32.mrf.mxu1 }
 0x528   : > { %10413 = vmatmul.bf16.gmra.mxu3 %v10169_v31  ;;  %v8268_v35 = vadd.f32 %v8113_v26, %v16127_v55 }
 0x529   : > { %8835 = vmatmul.bf16.gmra.mxu2 %v12816_v47  ;;  %v11437_v44 = vpop.f32.mrf.mxu0 }
 0x52a   : > { %v11594_v33 = vadd.f32 %v11437_v44, %v10528_v24  ;;  %8152 = vmatmul.bf16.gmra.mxu1 %v7908_v2 }
 0x52b   : > { %v10374_v23 = vpop.f32.mrf.mxu3 }
 0x52c   : > { %v8796_v57 = vpop.f32.mrf.mxu2  ;;  %v11790_v4 = vadd.f32 %v16686_v19, %v11594_v33 }
 0x52d   : > { %v8951_v34 = vadd.f32 %v8796_v57, %v8268_v35 }
 0x52e   : > { %v11854_v32 = vmax.f32 %v11790_v4, 0.0 }
 0x52f   : > { %v8115_v6 = vpop.f32.mrf.mxu1  ;;  %v10529_v42 = vadd.f32 %v10374_v23, %v8951_v34 }
 0x530   : > { %v13268_v27 = vpack.c.bf16 %v11854_v32, %v11853_v49  ;;  %v8269_v60 = vadd.f32 %v8115_v6, %v16131_v15  ;;  %v17175_v6 = vld [vmem:[#allocation38_spill] sm:$0xff] }
 0x531   : > { %v11440_v16 = vpop.f32.mrf.mxu0 }
 0x532   : > { %13336 = vst [vmem:[%s16308_s27 + $0xb0] sm:$0xff] %v13268_v27   ;;  %v11595_v50 = vadd.f32 %v11440_v16, %v10529_v42 }
 0x533   : > { %v10376_v51 = vpop.f32.mrf.mxu3 }
 0x534   : > { %v8798_v7 = vpop.f32.mrf.mxu2  ;;  %11479 = vmatmul.bf16.gmra.mxu0 %v11235_v20  ;;  %v11791_v8 = vadd.f32 %v16686_v19, %v11595_v50 }
 0x535   : > { %v8952_v61 = vadd.f32 %v8798_v7, %v8269_v60 }
 0x536   : > { %v11855_v59 = vmax.f32 %v11791_v8, 0.0 }
 0x537   : > { %v10530_v55 = vadd.f32 %v10376_v51, %v8952_v61  ;;  %v8118_v46 = vpop.f32.mrf.mxu1 }
 0x538   : > { %v8270_v25 = vadd.f32 %v8118_v46, %v17171_v9 }
 0x539   : > { %v11442_v1 = vpop.f32.mrf.mxu0 }
 0x53a   : > { %v11596_v36 = vadd.f32 %v11442_v1, %v10530_v55  ;;  %v17176_v55 = vld [vmem:[#allocation87_spill] sm:$0xff] }
 0x53b   : > { %v10379_v37 = vpop.f32.mrf.mxu3 }
 0x53c   : > { %v8801_v0 = vpop.f32.mrf.mxu2  ;;  %v11792_v30 = vadd.f32 %v16686_v19, %v11596_v36 }
 0x53d   : > { %v8953_v56 = vadd.f32 %v8801_v0, %v8270_v25 }
 0x53e   : > { %v11856_v15 = vmax.f32 %v11792_v30, 0.0 }
 0x53f   : > { %v8120_v22 = vpop.f32.mrf.mxu1  ;;  %v10531_v29 = vadd.f32 %v10379_v37, %v8953_v56 }
 0x540   : > { %v13273_v39 = vpack.c.bf16 %v11856_v15, %v11855_v59  ;;  %v8271_v14 = vadd.f32 %v8120_v22, %v17172_v53  ;;  %v17177_v22 = vld [vmem:[#allocation14_spill] sm:$0xff] }
 0x541   : > { %v11445_v28 = vpop.f32.mrf.mxu0 }
 0x542   : > { %13337 = vst [vmem:[%s16308_s27 + $0xb8] sm:$0xff] %v13273_v39   ;;  %v11597_v41 = vadd.f32 %v11445_v28, %v10531_v29 }
 0x543   : > { %v10381_v40 = vpop.f32.mrf.mxu3 }
 0x544   : > { %v8803_v54 = vpop.f32.mrf.mxu2  ;;  %v11793_v62 = vadd.f32 %v16686_v19, %v11597_v41 }
 0x545   : > { %v8954_v17 = vadd.f32 %v8803_v54, %v8271_v14 }
 0x546   : > { %v11857_v52 = vmax.f32 %v11793_v62, 0.0 }
 0x547   : > { %v10532_v38 = vadd.f32 %v10381_v40, %v8954_v17  ;;  %v8123_v58 = vpop.f32.mrf.mxu1 }
 0x548   : > { %v8272_v31 = vadd.f32 %v8123_v58, %v17173_v45 }
 0x549   : > { %v11447_v11 = vpop.f32.mrf.mxu0 }
 0x54a   : > { %v11598_v21 = vadd.f32 %v11447_v11, %v10532_v38  ;;  %v17178_v38 = vld [vmem:[#allocation17_spill] sm:$0xff] }
 0x54b   : > { %v10384_v43 = vpop.f32.mrf.mxu3 }
 0x54c   : > { %v8806_v10 = vpop.f32.mrf.mxu2  ;;  %v11794_v47 = vadd.f32 %v16686_v19, %v11598_v21 }
 0x54d   : > { %v8955_v48 = vadd.f32 %v8806_v10, %v8272_v31 }
 0x54e   : > { %v11858_v63 = vmax.f32 %v11794_v47, 0.0 }
 0x54f   : > { %v8125_v24 = vpop.f32.mrf.mxu1  ;;  %v10533_v44 = vadd.f32 %v10384_v43, %v8955_v48 }
 0x550   : > { %v13278_v2 = vpack.c.bf16 %v11858_v63, %v11857_v52  ;;  %v8273_v13 = vadd.f32 %v8125_v24, %v17174_v3  ;;  %v17179_v24 = vld [vmem:[#allocation46_spill] sm:$0xff] }
 0x551   : > { %v11450_v26 = vpop.f32.mrf.mxu0 }
 0x552   : > { %13338 = vst [vmem:[%s16308_s27 + $0xc0] sm:$0xff] %v13278_v2   ;;  %v11599_v4 = vadd.f32 %v11450_v26, %v10533_v44 }
 0x553   : > { %v10386_v57 = vpop.f32.mrf.mxu3 }
 0x554   : > { %v8808_v18 = vpop.f32.mrf.mxu2  ;;  %v11795_v23 = vadd.f32 %v16686_v19, %v11599_v4 }
 0x555   : > { %v8956_v33 = vadd.f32 %v8808_v18, %v8273_v13 }
 0x556   : > { %v11859_v16 = vmax.f32 %v11795_v23, 0.0 }
 0x557   : > { %v10534_v35 = vadd.f32 %v10386_v57, %v8956_v33  ;;  %v8128_v12 = vpop.f32.mrf.mxu1 }
 0x558   : > { %v8274_v27 = vadd.f32 %v8128_v12, %v17175_v6 }
 0x559   : > { %v11452_v5 = vpop.f32.mrf.mxu0 }
 0x55a   : > { %v11600_v49 = vadd.f32 %v11452_v5, %v10534_v35  ;;  %v17180_v35 = vld [vmem:[#allocation18_spill] sm:$0xff] }
 0x55b   : > { %v10389_v20 = vpop.f32.mrf.mxu3 }
 0x55c   : > { %v8811_v32 = vpop.f32.mrf.mxu2  ;;  %v11796_v34 = vadd.f32 %v16686_v19, %v11600_v49 }
 0x55d   : > { %v8957_v60 = vadd.f32 %v8811_v32, %v8274_v27 }
 0x55e   : > { %v11860_v42 = vmax.f32 %v11796_v34, 0.0 }
 0x55f   : > { %v8130_v7 = vpop.f32.mrf.mxu1  ;;  %v10535_v50 = vadd.f32 %v10389_v20, %v8957_v60 }
 0x560   : > { %v13283_v61 = vpack.c.bf16 %v11860_v42, %v11859_v16  ;;  %v8275_v46 = vadd.f32 %v8130_v7, %v17176_v55  ;;  %v17181_v7 = vld [vmem:[#allocation43_spill] sm:$0xff] }
 0x561   : > { %v11455_v51 = vpop.f32.mrf.mxu0 }
 0x562   : > { %13339 = vst [vmem:[%s16308_s27 + $0xc8] sm:$0xff] %v13283_v61   ;;  %v11601_v0 = vadd.f32 %v11455_v51, %v10535_v50 }
 0x563   : > { %v10391_v36 = vpop.f32.mrf.mxu3 }
 0x564   : > { %v8813_v1 = vpop.f32.mrf.mxu2  ;;  %v11797_v37 = vadd.f32 %v16686_v19, %v11601_v0 }
 0x565   : > { %v8958_v8 = vadd.f32 %v8813_v1, %v8275_v46 }
 0x566   : > { %v11861_v29 = vmax.f32 %v11797_v37, 0.0 }
 0x567   : > { %v10536_v30 = vadd.f32 %v10391_v36, %v8958_v8  ;;  %v8133_v9 = vpop.f32.mrf.mxu1 }
 0x568   : > { %v8276_v39 = vadd.f32 %v8133_v9, %v17177_v22 }
 0x569   : > { %v11457_v25 = vpop.f32.mrf.mxu0 }
 0x56a   : > { %v11602_v59 = vadd.f32 %v11457_v25, %v10536_v30  ;;  %v17182_v30 = vld [vmem:[#allocation49_spill] sm:$0xff] }
 0x56b   : > { %v10394_v28 = vpop.f32.mrf.mxu3 }
 0x56c   : > { %v8816_v15 = vpop.f32.mrf.mxu2  ;;  %v11798_v56 = vadd.f32 %v16686_v19, %v11602_v59 }
 0x56d   : > { %v8959_v14 = vadd.f32 %v8816_v15, %v8276_v39 }
 0x56e   : > { %v11862_v53 = vmax.f32 %v11798_v56, 0.0 }
 0x56f   : > { %v8135_v54 = vpop.f32.mrf.mxu1  ;;  %v10537_v41 = vadd.f32 %v10394_v28, %v8959_v14 }
 0x570   : > { %v13288_v17 = vpack.c.bf16 %v11862_v53, %v11861_v29  ;;  %v8277_v58 = vadd.f32 %v8135_v54, %v17178_v38  ;;  %v17183_v54 = vld [vmem:[#allocation52_spill] sm:$0xff] }
 0x571   : > { %v11460_v40 = vpop.f32.mrf.mxu0 }
 0x572   : > { %13340 = vst [vmem:[%s16308_s27 + $0xd0] sm:$0xff] %v13288_v17   ;;  %v11603_v10 = vadd.f32 %v11460_v40, %v10537_v41 }
 0x573   : > { %v10396_v21 = vpop.f32.mrf.mxu3 }
 0x574   : > { %v8818_v11 = vpop.f32.mrf.mxu2  ;;  %v11799_v43 = vadd.f32 %v16686_v19, %v11603_v10 }
 0x575   : > { %v8960_v62 = vadd.f32 %v8818_v11, %v8277_v58 }
 0x576   : > { %v11863_v44 = vmax.f32 %v11799_v43, 0.0 }
 0x577   : > { %v10538_v47 = vadd.f32 %v10396_v21, %v8960_v62  ;;  %v8138_v45 = vpop.f32.mrf.mxu1 }
 0x578   : > { %v8278_v2 = vadd.f32 %v8138_v45, %v17179_v24 }
 0x579   : > { %v11462_v31 = vpop.f32.mrf.mxu0 }
 0x57a   : > { %v11604_v52 = vadd.f32 %v11462_v31, %v10538_v47  ;;  %v17184_v47 = vld [vmem:[#allocation21_spill] sm:$0xff] }
 0x57b   : > { %v10399_v26 = vpop.f32.mrf.mxu3 }
 0x57c   : > { %v8821_v63 = vpop.f32.mrf.mxu2  ;;  %v11800_v48 = vadd.f32 %v16686_v19, %v11604_v52 }
 0x57d   : > { %v8961_v13 = vadd.f32 %v8821_v63, %v8278_v2 }
 0x57e   : > { %v11864_v3 = vmax.f32 %v11800_v48, 0.0 }
 0x57f   : > { %v8140_v18 = vpop.f32.mrf.mxu1  ;;  %v10539_v4 = vadd.f32 %v10399_v26, %v8961_v13 }
 0x580   : > { %v13293_v33 = vpack.c.bf16 %v11864_v3, %v11863_v44  ;;  %v8279_v12 = vadd.f32 %v8140_v18, %v17180_v35  ;;  %v17185_v18 = vld [vmem:[#allocation22_spill] sm:$0xff] }
 0x581   : > { %v11465_v57 = vpop.f32.mrf.mxu0 }
 0x582   : > { %13341 = vst [vmem:[%s16308_s27 + $0xd8] sm:$0xff] %v13293_v33   ;;  %v11605_v32 = vadd.f32 %v11465_v57, %v10539_v4 }
 0x583   : > { %v10401_v49 = vpop.f32.mrf.mxu3 }
 0x584   : > { %v8823_v5 = vpop.f32.mrf.mxu2  ;;  %v11801_v20 = vadd.f32 %v16686_v19, %v11605_v32 }
 0x585   : > { %v8962_v23 = vadd.f32 %v8823_v5, %v8279_v12 }
 0x586   : > { %v11865_v50 = vmax.f32 %v11801_v20, 0.0 }
 0x587   : > { %v10540_v34 = vadd.f32 %v10401_v49, %v8962_v23  ;;  %v8143_v6 = vpop.f32.mrf.mxu1 }
 0x588   : > { %v8280_v61 = vadd.f32 %v8143_v6, %v17181_v7 }
 0x589   : > { %v11467_v27 = vpop.f32.mrf.mxu0 }
 0x58a   : > { %v11606_v16 = vadd.f32 %v11467_v27, %v10540_v34  ;;  %v17186_v34 = vld [vmem:[#allocation56_spill] sm:$0xff] }
 0x58b   : > { %v10404_v51 = vpop.f32.mrf.mxu3 }
 0x58c   : > { %v8826_v42 = vpop.f32.mrf.mxu2  ;;  %v11802_v60 = vadd.f32 %v16686_v19, %v11606_v16 }
 0x58d   : > { %v8963_v46 = vadd.f32 %v8826_v42, %v8280_v61 }
 0x58e   : > { %v11866_v55 = vmax.f32 %v11802_v60, 0.0 }
 0x58f   : > { %v8145_v1 = vpop.f32.mrf.mxu1  ;;  %v10541_v0 = vadd.f32 %v10404_v51, %v8963_v46 }
 0x590   : > { %v13298_v8 = vpack.c.bf16 %v11866_v55, %v11865_v50  ;;  %v8281_v9 = vadd.f32 %v8145_v1, %v17182_v30 }
 0x591   : > { %v11470_v36 = vpop.f32.mrf.mxu0 }
 0x592   : > { %13342 = vst [vmem:[%s16308_s27 + $0xe0] sm:$0xff] %v13298_v8   ;;  %v11607_v15 = vadd.f32 %v11470_v36, %v10541_v0 }
 0x593   : > { %v10406_v59 = vpop.f32.mrf.mxu3 }
 0x594   : > { %v8828_v25 = vpop.f32.mrf.mxu2  ;;  %v11803_v28 = vadd.f32 %v16686_v19, %v11607_v15 }
 0x595   : > { %v8964_v37 = vadd.f32 %v8828_v25, %v8281_v9 }
 0x596   : > { %v11867_v41 = vmax.f32 %v11803_v28, 0.0 }
 0x597   : > { %v10542_v56 = vadd.f32 %v10406_v59, %v8964_v37  ;;  %v8148_v22 = vpop.f32.mrf.mxu1 }
 0x598   : > { %v8282_v17 = vadd.f32 %v8148_v22, %v17183_v54 }
 0x599   : > { %v11472_v39 = vpop.f32.mrf.mxu0 }
 0x59a   : > { %v11608_v29 = vadd.f32 %v11472_v39, %v10542_v56 }
 0x59b   : > { %v10409_v40 = vpop.f32.mrf.mxu3 }
 0x59c   : > { %v8831_v53 = vpop.f32.mrf.mxu2  ;;  %v11804_v14 = vadd.f32 %v16686_v19, %v11608_v29 }
 0x59d   : > { %v8965_v58 = vadd.f32 %v8831_v53, %v8282_v17 }
 0x59e   : > { %v11868_v38 = vmax.f32 %v11804_v14, 0.0 }
 0x59f   : > { %v8150_v11 = vpop.f32.mrf.mxu1  ;;  %v10543_v10 = vadd.f32 %v10409_v40, %v8965_v58 }
 0x5a0   : > { %v13303_v62 = vpack.c.bf16 %v11868_v38, %v11867_v41  ;;  %v8283_v45 = vadd.f32 %v8150_v11, %v17184_v47 }
 0x5a1   : > { %v11475_v21 = vpop.f32.mrf.mxu0 }
 0x5a2   : > { %13343 = vst [vmem:[%s16308_s27 + $0xe8] sm:$0xff] %v13303_v62   ;;  %v11609_v63 = vadd.f32 %v11475_v21, %v10543_v10 }
 0x5a3   : > { %v10411_v52 = vpop.f32.mrf.mxu3 }
 0x5a4   : > { %v8833_v31 = vpop.f32.mrf.mxu2  ;;  %v11805_v26 = vadd.f32 %v16686_v19, %v11609_v63 }
 0x5a5   : > { %v8966_v43 = vadd.f32 %v8833_v31, %v8283_v45 }
 0x5a6   : > { %v11869_v4 = vmax.f32 %v11805_v26, 0.0 }
 0x5a7   : > { %v10544_v48 = vadd.f32 %v10411_v52, %v8966_v43  ;;  %v8153_v24 = vpop.f32.mrf.mxu1 }
 0x5a8   : > { %v8284_v33 = vadd.f32 %v8153_v24, %v17185_v18 }
 0x5a9   : > { %v11477_v2 = vpop.f32.mrf.mxu0 }
 0x5aa   : > { %v11610_v44 = vadd.f32 %v11477_v2, %v10544_v48 }
 0x5ab   : > { %v10414_v57 = vpop.f32.mrf.mxu3 }
 0x5ac   : > { %v8836_v3 = vpop.f32.mrf.mxu2  ;;  %v11806_v13 = vadd.f32 %v16686_v19, %v11610_v44 }
 0x5ad   : > { %v8967_v12 = vadd.f32 %v8836_v3, %v8284_v33 }
 0x5ae   : > { %v11870_v35 = vmax.f32 %v11806_v13, 0.0 }
 0x5af   : > { %v8155_v5 = vpop.f32.mrf.mxu1  ;;  %v10545_v32 = vadd.f32 %v10414_v57, %v8967_v12 }
 0x5b0   : > { %v13308_v23 = vpack.c.bf16 %v11870_v35, %v11869_v4  ;;  %v8285_v6 = vadd.f32 %v8155_v5, %v17186_v34 }
 0x5b1   : > { %v11480_v49 = vpop.f32.mrf.mxu0 }
 0x5b2   : > { %13344 = vst [vmem:[%s16308_s27 + $0xf0] sm:$0xff] %v13308_v23   ;;  %v11611_v42 = vadd.f32 %v11480_v49, %v10545_v32 }
 0x5b3   : > { %v10416_v16 = vpop.f32.mrf.mxu3 }
 0x5b4   : > { %v8838_v27 = vpop.f32.mrf.mxu2  ;;  %v11807_v61 = vadd.f32 %v16686_v19, %v11611_v42 }
 0x5b5   : > { %v8968_v20 = vadd.f32 %v8838_v27, %v8285_v6 }
 0x5b6   : > { %v11871_v55 = vmax.f32 %v11807_v61, 0.0 }
 0x5b7   : > { %v10546_v60 = vadd.f32 %v10416_v16, %v8968_v20 }
 0x5b9   : > { %v11482_v7 = vpop.f32.mrf.mxu0 }
 0x5ba   : > { %v11612_v51 = vadd.f32 %v11482_v7, %v10546_v60 }
 0x5bc   : > { %v11808_v50 = vadd.f32 %v16686_v19, %v11612_v51 }
 0x5be   : > { %v11872_v46 = vmax.f32 %v11808_v50, 0.0 }
 0x5c0   : > { %v13313_v1 = vpack.c.bf16 %v11872_v46, %v11871_v55 }
 0x5c2   : > { %13345 = vst [vmem:[%s16308_s27 + $0xf8] sm:$0xff] %v13313_v1  }
 0x5c3   : > { %13523 = shalt.err (!%p13520_p10)
}
 0x5c4   : > { %s13572_s6 = smov 64   ;;  %s13573_s27 = smov 4  }
 0x5c5   : > { %13376 = dma.vmem_to_hbm [thread:$0]  (%p13663_p3), %s12016_s10, 4096, %s12018_s11, %s12002_s16, %s13572_s6, %s13572_s6, %s13573_s27  }
 0x5c6 PF: > { %s12032_s22 = sand.u32 1, %s13554_s12   ;;  %p17187_p12 = scmp.ge.s32.totalorder %s13566_s15, 2 }
 0x5c7   : > { %s12033_s24 = scalar_lea.sflag [#allocation6], %s12032_s22 }
 0x5c8   : > { %p13387_p13 = pnand %p17187_p12, %p13629_p6 }
 0x5ca   : > { %p13388_p0 = pneg %p13387_p13 }
 0x5cc   : > { %13549 = dma.done.wait (%p13388_p0), %s12033_s24, 4096  }
 0x5cd   : > { %13551 = vsyncadd (%p13388_p0), %s12033_s24, 4294963200  ;;  %p17_p5 = scmp.ge.s32.totalorder %s13647_s26, 4   ;;  %s17188_s12 = smov %s13558_s13 }
 0x5ce   : > { %s17189_s13 = smov %s13562_s14  ;;  %s17190_s14 = smov %s13659_s4 }
 0x5cf   : > { %s17191_s15 = smov %s13647_s26  ;;  %19 = sbr.rel (!%p17_p5) target bundleno = 6 (0x6), region = 92 }
 0x5d4   :  { %12039 = vsyncpa [#allocation5], 1 }
 0x5d5   :  { %12041 = vsyncpa [#allocation5 + $0x1], 1 }
 0x5d6   :  { %12042 = vsyncpa [#allocation8], 1 }
 0x5d7   :  { %12043 = vsyncpa [#allocation6], 1 }
 0x5d8   :  { %12045 = vsyncpa [#allocation6 + $0x1], 1 }

</bundles_post_ra>
